<compile_context>
chip_gen: v5e
topology: v5e:2x2
jax: 0.10.0
libtpu: 0.0.40
codegen_flags: <defaults>
</compile_context>

<pallas_src>
import functools
import math

import jax
import jax.numpy as jnp
from jax.experimental import pallas as pl
from jax.experimental.pallas import tpu as pltpu

VGG19_CFG = [64, 64, 'M', 128, 128, 'M', 256, 256, 256, 256, 'M',
             512, 512, 512, 512, 'M', 512, 512, 512, 512, 'M']
TRUNCATE = 35          # vgg19_bn(pretrained=True).features[:35]
BN_EPS = 1e-5          # nn.BatchNorm2d default eps

STYLE_OUTPUT_LAYERS = {5: 'relu_1_2', 12: 'relu_2_2', 22: 'relu_3_3', 35: 'relu_4_3'}
CONTENT_OUTPUT_LAYERS = {22: 'relu_3_3'}


def build_stages():
    """Expand the VGG cfg into stages carrying torchvision module indices."""
    stages = []
    idx = 0
    cin = 3
    for v in VGG19_CFG:
        if idx >= TRUNCATE:
            break
        if v == 'M':
            stages.append(('pool', idx))
            idx += 1
        else:
            # (kind, cin, cout, conv_idx, bn_idx, relu_idx)
            stages.append(('conv', cin, v, idx, idx + 1, idx + 2))
            idx += 3
            cin = v
    return stages


STAGES = build_stages()


# --------------------------------------------------------------------------
# Tiling / VMEM helpers
# --------------------------------------------------------------------------
@functools.lru_cache(maxsize=None)
def _vmem_limit_bytes():
    """Scoped-VMEM request sized per chip generation (v7x has only 64 MiB)."""
    try:
        cap = pltpu.get_tpu_info().vmem_capacity_bytes
    except Exception:
        cap = 64 * 1024 * 1024
    return max(32 * 1024 * 1024, min(96 * 1024 * 1024, int(cap * 0.65)))


def _pick_tile_m(m, target=512):
    """Largest divisor of m that is <= target, preferring multiples of 8."""
    if m <= target:
        return m
    for d in range(target, 7, -1):
        if m % d == 0 and d % 8 == 0:
            return d
    for d in range(target, 0, -1):
        if m % d == 0:
            return d
    return m


def _largest_divisor_leq(n, target):
    target = min(n, target)
    for d in range(target, 0, -1):
        if n % d == 0:
            return d
    return n


# --------------------------------------------------------------------------
# Pallas kernels
# --------------------------------------------------------------------------
def _matmul_bn_act_kernel(x_ref, w_ref, scale_ref, shift_ref, o_ref, *, apply_relu):
    """Fused (im2col-conv as bf16 MXU matmul) + folded BatchNorm (+ ReLU)."""
    acc = jnp.dot(x_ref[...], w_ref[...], preferred_element_type=jnp.float32)
    y = acc * scale_ref[...] + shift_ref[...]
    if apply_relu:
        y = jnp.maximum(y, 0.0)
    o_ref[...] = y.astype(o_ref.dtype)


def _maxpool2x2_kernel(x_ref, o_ref):
    """x_ref: (4, n, th, wo, c) -- the four 2x2 window taps, pre-de-interleaved.

    Three full-block VPU maxes, lane-dense store.
    """
    o_ref[...] = jnp.maximum(jnp.maximum(x_ref[0], x_ref[1]),
                             jnp.maximum(x_ref[2], x_ref[3]))


# --------------------------------------------------------------------------
# Wrappers (glue: padding / im2col / transposes stay in plain JAX)
# --------------------------------------------------------------------------
def _im2col_3x3(x):
    """x: (N, H, W, C) bf16 -> (N*H*W, 9*C), 3x3 window, pad=1, (ky,kx,cin) order."""
    n, h, w, c = x.shape
    xp = jnp.pad(x, ((0, 0), (1, 1), (1, 1), (0, 0)))
    cols = [xp[:, ky:ky + h, kx:kx + w, :] for ky in range(3) for kx in range(3)]
    patches = jnp.stack(cols, axis=3)          # (N, H, W, 9, C)
    return patches.reshape(n * h * w, 9 * c)


def conv3x3_bn_relu(x, w_flat, scale, shift, *, apply_relu):
    """x: (N,H,W,Cin) NHWC bf16.  w_flat: (9*Cin, Cout) bf16.  scale/shift: (1, Cout) f32."""
    n, h, w_sp, cin = x.shape
    cout = w_flat.shape[1]
    m = n * h * w_sp
    k = 9 * cin
    cols = _im2col_3x3(x)                       # (m, k) bf16

    tile_n = 256 if cout >= 256 else cout       # 256-wide to match v6e/v7x MXU
    tile_m = _pick_tile_m(m, 512)
    # Grid: cout tiles OUTER, m tiles INNER -> weight block index constant along
    # the inner axis, so the (k, tile_n) weight block stays resident in VMEM.
    grid = (cout // tile_n, m // tile_m)

    out = pl.pallas_call(
        functools.partial(_matmul_bn_act_kernel, apply_relu=apply_relu),
        out_shape=jax.ShapeDtypeStruct((m, cout), jnp.bfloat16),
        grid=grid,
        in_specs=[
            pl.BlockSpec((tile_m, k), lambda j, i: (i, 0)),
            pl.BlockSpec((k, tile_n), lambda j, i: (0, j)),
            pl.BlockSpec((1, tile_n), lambda j, i: (0, j)),
            pl.BlockSpec((1, tile_n), lambda j, i: (0, j)),
        ],
        out_specs=pl.BlockSpec((tile_m, tile_n), lambda j, i: (i, j)),
        compiler_params=pltpu.CompilerParams(
            dimension_semantics=("parallel", "parallel"),
            vmem_limit_bytes=_vmem_limit_bytes()),
    )(cols, w_flat, scale, shift)
    return out.reshape(n, h, w_sp, cout)


def maxpool2x2(x):
    """MaxPool2d(kernel_size=2, stride=2) on NHWC (H, W even for VGG shapes)."""
    n, h, w, c = x.shape
    assert h % 2 == 0 and w % 2 == 0, "maxpool2x2 expects even spatial dims"
    ho, wo = h // 2, w // 2
    # De-interleave the four 2x2 window taps outside the kernel (cheap XLA
    # transpose); the kernel then needs no strided sublane loads or reshapes.
    xw = x.reshape(n, ho, 2, wo, 2, c)
    xw = jnp.transpose(xw, (2, 4, 0, 1, 3, 5)).reshape(4, n, ho, wo, c)

    th = _largest_divisor_leq(ho, 8)            # row tile -> pipelined grid
    grid = (ho // th,)
    return pl.pallas_call(
        _maxpool2x2_kernel,
        out_shape=jax.ShapeDtypeStruct((n, ho, wo, c), x.dtype),
        grid=grid,
        in_specs=[pl.BlockSpec((4, n, th, wo, c), lambda i: (0, 0, i, 0, 0))],
        out_specs=pl.BlockSpec((n, th, wo, c), lambda i: (0, i, 0, 0)),
        compiler_params=pltpu.CompilerParams(
            dimension_semantics=("parallel",)),
    )(xw)


# --------------------------------------------------------------------------
# Parameters (deterministic synthetic init; conv bias + eval-mode BN folded)
# --------------------------------------------------------------------------
def init_params(seed=0):
    key = jax.random.PRNGKey(seed)
    params = {}
    for stage in STAGES:
        if stage[0] != 'conv':
            continue
        _, cin, cout, conv_idx, _, _ = stage
        key, kw, kb, kg, kbeta, km, kv = jax.random.split(key, 7)
        fan_in = 9 * cin
        w = jax.random.normal(kw, (3, 3, cin, cout), jnp.float32) * math.sqrt(2.0 / fan_in)
        conv_b = 0.01 * jax.random.normal(kb, (cout,), jnp.float32)
        gamma = 1.0 + 0.1 * jax.random.normal(kg, (cout,), jnp.float32)
        beta = 0.1 * jax.random.normal(kbeta, (cout,), jnp.float32)
        running_mean = 0.1 * jax.random.normal(km, (cout,), jnp.float32)
        running_var = 1.0 + 0.1 * jax.random.uniform(kv, (cout,), jnp.float32)
        # Fold eval-mode BatchNorm (running stats) and the conv bias into
        # per-channel f32 scale/shift applied after the bf16 matmul in-kernel.
        scale = gamma / jnp.sqrt(running_var + BN_EPS)
        shift = beta + (conv_b - running_mean) * scale
        params[conv_idx] = (
            w.reshape(9 * cin, cout).astype(jnp.bfloat16),  # (ky,kx,cin) order matches im2col
            scale.reshape(1, cout).astype(jnp.float32),
            shift.reshape(1, cout).astype(jnp.float32),
        )
    return params


# --------------------------------------------------------------------------
# FeatureExtractor.forward equivalent
# --------------------------------------------------------------------------
@functools.partial(jax.jit, static_argnames=("target",))
def feature_extractor_forward(params, inp_nchw, target='style'):
    assert target in ['style', 'content']
    output_layer = CONTENT_OUTPUT_LAYERS if target == 'content' else STYLE_OUTPUT_LAYERS
    needed = {i for i in output_layer if i < TRUNCATE}   # idx 35 is unreachable in [:35]
    last_needed = max(needed)

    x = jnp.transpose(inp_nchw, (0, 2, 3, 1)).astype(jnp.bfloat16)  # NCHW -> NHWC, bf16
    output = {}
    for stage in STAGES:
        if stage[0] == 'pool':
            x = maxpool2x2(x)          # pool indices are never tap points
        else:
            _, cin, cout, conv_idx, bn_idx, relu_idx = stage
            w_flat, scale, shift = params[conv_idx]
            apply_relu = relu_idx < TRUNCATE
            x = conv3x3_bn_relu(x, w_flat, scale, shift, apply_relu=apply_relu)
            if apply_relu and relu_idx in needed:
                output[output_layer[relu_idx]] = (
                    jnp.transpose(x, (0, 3, 1, 2)).astype(jnp.float32))  # -> NCHW f32
            if relu_idx >= last_needed:
                # Remaining modules (conv23..bn34, pool26) are never tapped in the
                # reference either -- their results are dead, so skip the compute.
                break
    return output


if __name__ == "__main__":
    params = init_params(0)
    x = jax.random.normal(jax.random.PRNGKey(0), (2, 3, 16, 16), jnp.float32)  # NCHW

    style_feats = feature_extractor_forward(params, x, target='style')
    jax.block_until_ready(style_feats)
    assert set(style_feats.keys()) == {'relu_1_2', 'relu_2_2', 'relu_3_3'}
    assert style_feats['relu_1_2'].shape == (2, 64, 16, 16)
    assert style_feats['relu_2_2'].shape == (2, 128, 8, 8)
    assert style_feats['relu_3_3'].shape == (2, 256, 4, 4)

    content_feats = feature_extractor_forward(params, x, target='content')
    jax.block_until_ready(content_feats)
    assert set(content_feats.keys()) == {'relu_3_3'}
    assert content_feats['relu_3_3'].shape == (2, 256, 4, 4)

    print("KERNEL_OK")
</pallas_src>

<mosaic_0001>
module attributes {stable_mosaic.version = 11 : i64} {
  func.func @_matmul_bn_act_kernel(%arg0: i32, %arg1: i32, %arg2: memref<512x27xbf16, #tpu.memory_space<vmem>>, %arg3: memref<27x64xbf16, #tpu.memory_space<vmem>>, %arg4: memref<1x64xf32, #tpu.memory_space<vmem>>, %arg5: memref<1x64xf32, #tpu.memory_space<vmem>>, %arg6: memref<512x64xbf16, #tpu.memory_space<vmem>>) attributes {dimension_semantics = [#tpu.dimension_semantics<parallel>, #tpu.dimension_semantics<parallel>], iteration_bounds = array<i64: 1, 1>, scalar_prefetch = 0 : i64, scratch_operands = 0 : i64, tpu.core_type = #tpu.core_type<tc>, window_params = [{transform_indices = @transform_0, window_bounds = array<i64: 512, 27>}, {transform_indices = @transform_1, window_bounds = array<i64: 27, 64>}, {transform_indices = @transform_2, window_bounds = array<i64: 1, 64>}, {transform_indices = @transform_3, window_bounds = array<i64: 1, 64>}, {transform_indices = @transform_4, window_bounds = array<i64: 512, 64>}]} {
    %c0 = arith.constant 0 : index
    %c0_0 = arith.constant 0 : index
    %0 = vector.load %arg2[%c0, %c0_0] : memref<512x27xbf16, #tpu.memory_space<vmem>>, vector<512x27xbf16>
    %c0_1 = arith.constant 0 : index
    %c0_2 = arith.constant 0 : index
    %1 = vector.load %arg3[%c0_1, %c0_2] : memref<27x64xbf16, #tpu.memory_space<vmem>>, vector<27x64xbf16>
    %cst = arith.constant dense<0.000000e+00> : vector<512x64xf32>
    %2 = tpu.matmul %0, %1, %cst {dimension_numbers = #tpu.dot_dimension_numbers<[1], [0], [0], [1], [0, 0, 1, 1], [], []>} : vector<512x27xbf16>, vector<27x64xbf16>, vector<512x64xf32> -> vector<512x64xf32>
    %c0_3 = arith.constant 0 : index
    %c0_4 = arith.constant 0 : index
    %3 = vector.load %arg4[%c0_3, %c0_4] : memref<1x64xf32, #tpu.memory_space<vmem>>, vector<1x64xf32>
    %4 = vector.broadcast %3 : vector<1x64xf32> to vector<512x64xf32>
    %5 = arith.mulf %2, %4 : vector<512x64xf32>
    %c0_5 = arith.constant 0 : index
    %c0_6 = arith.constant 0 : index
    %6 = vector.load %arg5[%c0_5, %c0_6] : memref<1x64xf32, #tpu.memory_space<vmem>>, vector<1x64xf32>
    %7 = vector.broadcast %6 : vector<1x64xf32> to vector<512x64xf32>
    %8 = arith.addf %5, %7 : vector<512x64xf32>
    %cst_7 = arith.constant 0.000000e+00 : f32
    %9 = vector.broadcast %cst_7 : f32 to vector<512x64xf32>
    %10 = arith.maximumf %8, %9 : vector<512x64xf32>
    %11 = arith.truncf %10 : vector<512x64xf32> to vector<512x64xbf16>
    %c0_8 = arith.constant 0 : index
    %c0_9 = arith.constant 0 : index
    %12 = vector.load %arg6[%c0_8, %c0_9] : memref<512x64xbf16, #tpu.memory_space<vmem>>, vector<512x64xbf16>
    tpu.vector_store %arg6[%c0_8, %c0_9], %11 {strides = array<i32>} : memref<512x64xbf16, #tpu.memory_space<vmem>>, vector<512x64xbf16>,
    return
  }
  func.func @transform_0(%arg0: i32, %arg1: i32) -> (i32, i32) {
    %c0_i32 = arith.constant 0 : i32
    %c0_i32_0 = arith.constant 0 : i32
    return %arg1, %c0_i32 : i32, i32
  }
  func.func @transform_1(%arg0: i32, %arg1: i32) -> (i32, i32) {
    %c0_i32 = arith.constant 0 : i32
    %c0_i32_0 = arith.constant 0 : i32
    return %c0_i32, %arg0 : i32, i32
  }
  func.func @transform_2(%arg0: i32, %arg1: i32) -> (i32, i32) {
    %c0_i32 = arith.constant 0 : i32
    %c0_i32_0 = arith.constant 0 : i32
    return %c0_i32, %arg0 : i32, i32
  }
  func.func @transform_3(%arg0: i32, %arg1: i32) -> (i32, i32) {
    %c0_i32 = arith.constant 0 : i32
    %c0_i32_0 = arith.constant 0 : i32
    return %c0_i32, %arg0 : i32, i32
  }
  func.func @transform_4(%arg0: i32, %arg1: i32) -> (i32, i32) {
    %c0_i32 = arith.constant 0 : i32
    return %arg1, %arg0 : i32, i32
  }
}

module attributes {stable_mosaic.version = 11 : i64} {
  func.func @_matmul_bn_act_kernel(%arg0: i32, %arg1: i32, %arg2: memref<512x576xbf16, #tpu.memory_space<vmem>>, %arg3: memref<576x64xbf16, #tpu.memory_space<vmem>>, %arg4: memref<1x64xf32, #tpu.memory_space<vmem>>, %arg5: memref<1x64xf32, #tpu.memory_space<vmem>>, %arg6: memref<512x64xbf16, #tpu.memory_space<vmem>>) attributes {dimension_semantics = [#tpu.dimension_semantics<parallel>, #tpu.dimension_semantics<parallel>], iteration_bounds = array<i64: 1, 1>, scalar_prefetch = 0 : i64, scratch_operands = 0 : i64, tpu.core_type = #tpu.core_type<tc>, window_params = [{transform_indices = @transform_0, window_bounds = array<i64: 512, 576>}, {transform_indices = @transform_1, window_bounds = array<i64: 576, 64>}, {transform_indices = @transform_2, window_bounds = array<i64: 1, 64>}, {transform_indices = @transform_3, window_bounds = array<i64: 1, 64>}, {transform_indices = @transform_4, window_bounds = array<i64: 512, 64>}]} {
    %c0 = arith.constant 0 : index
    %c0_0 = arith.constant 0 : index
    %0 = vector.load %arg2[%c0, %c0_0] : memref<512x576xbf16, #tpu.memory_space<vmem>>, vector<512x576xbf16>
    %c0_1 = arith.constant 0 : index
    %c0_2 = arith.constant 0 : index
    %1 = vector.load %arg3[%c0_1, %c0_2] : memref<576x64xbf16, #tpu.memory_space<vmem>>, vector<576x64xbf16>
    %cst = arith.constant dense<0.000000e+00> : vector<512x64xf32>
    %2 = tpu.matmul %0, %1, %cst {dimension_numbers = #tpu.dot_dimension_numbers<[1], [0], [0], [1], [0, 0, 1, 1], [], []>} : vector<512x576xbf16>, vector<576x64xbf16>, vector<512x64xf32> -> vector<512x64xf32>
    %c0_3 = arith.constant 0 : index
    %c0_4 = arith.constant 0 : index
    %3 = vector.load %arg4[%c0_3, %c0_4] : memref<1x64xf32, #tpu.memory_space<vmem>>, vector<1x64xf32>
    %4 = vector.broadcast %3 : vector<1x64xf32> to vector<512x64xf32>
    %5 = arith.mulf %2, %4 : vector<512x64xf32>
    %c0_5 = arith.constant 0 : index
    %c0_6 = arith.constant 0 : index
    %6 = vector.load %arg5[%c0_5, %c0_6] : memref<1x64xf32, #tpu.memory_space<vmem>>, vector<1x64xf32>
    %7 = vector.broadcast %6 : vector<1x64xf32> to vector<512x64xf32>
    %8 = arith.addf %5, %7 : vector<512x64xf32>
    %cst_7 = arith.constant 0.000000e+00 : f32
    %9 = vector.broadcast %cst_7 : f32 to vector<512x64xf32>
    %10 = arith.maximumf %8, %9 : vector<512x64xf32>
    %11 = arith.truncf %10 : vector<512x64xf32> to vector<512x64xbf16>
    %c0_8 = arith.constant 0 : index
    %c0_9 = arith.constant 0 : index
    %12 = vector.load %arg6[%c0_8, %c0_9] : memref<512x64xbf16, #tpu.memory_space<vmem>>, vector<512x64xbf16>
    tpu.vector_store %arg6[%c0_8, %c0_9], %11 {strides = array<i32>} : memref<512x64xbf16, #tpu.memory_space<vmem>>, vector<512x64xbf16>,
    return
  }
  func.func @transform_0(%arg0: i32, %arg1: i32) -> (i32, i32) {
    %c0_i32 = arith.constant 0 : i32
    %c0_i32_0 = arith.constant 0 : i32
    return %arg1, %c0_i32 : i32, i32
  }
  func.func @transform_1(%arg0: i32, %arg1: i32) -> (i32, i32) {
    %c0_i32 = arith.constant 0 : i32
    %c0_i32_0 = arith.constant 0 : i32
    return %c0_i32, %arg0 : i32, i32
  }
  func.func @transform_2(%arg0: i32, %arg1: i32) -> (i32, i32) {
    %c0_i32 = arith.constant 0 : i32
    %c0_i32_0 = arith.constant 0 : i32
    return %c0_i32, %arg0 : i32, i32
  }
  func.func @transform_3(%arg0: i32, %arg1: i32) -> (i32, i32) {
    %c0_i32 = arith.constant 0 : i32
    %c0_i32_0 = arith.constant 0 : i32
    return %c0_i32, %arg0 : i32, i32
  }
  func.func @transform_4(%arg0: i32, %arg1: i32) -> (i32, i32) {
    %c0_i32 = arith.constant 0 : i32
    return %arg1, %arg0 : i32, i32
  }
}

module attributes {stable_mosaic.version = 11 : i64} {
  func.func @_maxpool2x2_kernel(%arg0: i32, %arg1: memref<4x2x8x8x64xbf16, #tpu.memory_space<vmem>>, %arg2: memref<2x8x8x64xbf16, #tpu.memory_space<vmem>>) attributes {dimension_semantics = [#tpu.dimension_semantics<parallel>], iteration_bounds = array<i64: 1>, scalar_prefetch = 0 : i64, scratch_operands = 0 : i64, tpu.core_type = #tpu.core_type<tc>, window_params = [{transform_indices = @transform_0, window_bounds = array<i64: 4, 2, 8, 8, 64>}, {transform_indices = @transform_1, window_bounds = array<i64: 2, 8, 8, 64>}]} {
    %c0 = arith.constant 0 : index
    %c0_0 = arith.constant 0 : index
    %c0_1 = arith.constant 0 : index
    %c0_2 = arith.constant 0 : index
    %c0_3 = arith.constant 0 : index
    %0 = vector.load %arg1[%c0, %c0_0, %c0_1, %c0_2, %c0_3] : memref<4x2x8x8x64xbf16, #tpu.memory_space<vmem>>, vector<1x2x8x8x64xbf16>
    %1 = vector.shape_cast %0 : vector<1x2x8x8x64xbf16> to vector<2x8x8x64xbf16>
    %c1 = arith.constant 1 : index
    %c0_4 = arith.constant 0 : index
    %c0_5 = arith.constant 0 : index
    %c0_6 = arith.constant 0 : index
    %c0_7 = arith.constant 0 : index
    %2 = vector.load %arg1[%c1, %c0_4, %c0_5, %c0_6, %c0_7] : memref<4x2x8x8x64xbf16, #tpu.memory_space<vmem>>, vector<1x2x8x8x64xbf16>
    %3 = vector.shape_cast %2 : vector<1x2x8x8x64xbf16> to vector<2x8x8x64xbf16>
    %4 = arith.maximumf %1, %3 : vector<2x8x8x64xbf16>
    %c2 = arith.constant 2 : index
    %c0_8 = arith.constant 0 : index
    %c0_9 = arith.constant 0 : index
    %c0_10 = arith.constant 0 : index
    %c0_11 = arith.constant 0 : index
    %5 = vector.load %arg1[%c2, %c0_8, %c0_9, %c0_10, %c0_11] : memref<4x2x8x8x64xbf16, #tpu.memory_space<vmem>>, vector<1x2x8x8x64xbf16>
    %6 = vector.shape_cast %5 : vector<1x2x8x8x64xbf16> to vector<2x8x8x64xbf16>
    %c3 = arith.constant 3 : index
    %c0_12 = arith.constant 0 : index
    %c0_13 = arith.constant 0 : index
    %c0_14 = arith.constant 0 : index
    %c0_15 = arith.constant 0 : index
    %7 = vector.load %arg1[%c3, %c0_12, %c0_13, %c0_14, %c0_15] : memref<4x2x8x8x64xbf16, #tpu.memory_space<vmem>>, vector<1x2x8x8x64xbf16>
    %8 = vector.shape_cast %7 : vector<1x2x8x8x64xbf16> to vector<2x8x8x64xbf16>
    %9 = arith.maximumf %6, %8 : vector<2x8x8x64xbf16>
    %10 = arith.maximumf %4, %9 : vector<2x8x8x64xbf16>
    %c0_16 = arith.constant 0 : index
    %c0_17 = arith.constant 0 : index
    %c0_18 = arith.constant 0 : index
    %c0_19 = arith.constant 0 : index
    %11 = vector.load %arg2[%c0_16, %c0_17, %c0_18, %c0_19] : memref<2x8x8x64xbf16, #tpu.memory_space<vmem>>, vector<2x8x8x64xbf16>
    tpu.vector_store %arg2[%c0_16, %c0_17, %c0_18, %c0_19], %10 {strides = array<i32>} : memref<2x8x8x64xbf16, #tpu.memory_space<vmem>>, vector<2x8x8x64xbf16>,
    return
  }
  func.func @transform_0(%arg0: i32) -> (i32, i32, i32, i32, i32) {
    %c0_i32 = arith.constant 0 : i32
    %c0_i32_0 = arith.constant 0 : i32
    %c0_i32_1 = arith.constant 0 : i32
    %c0_i32_2 = arith.constant 0 : i32
    %c0_i32_3 = arith.constant 0 : i32
    return %c0_i32, %c0_i32_0, %arg0, %c0_i32_1, %c0_i32_2 : i32, i32, i32, i32, i32
  }
  func.func @transform_1(%arg0: i32) -> (i32, i32, i32, i32) {
    %c0_i32 = arith.constant 0 : i32
    %c0_i32_0 = arith.constant 0 : i32
    %c0_i32_1 = arith.constant 0 : i32
    %c0_i32_2 = arith.constant 0 : i32
    return %c0_i32, %arg0, %c0_i32_0, %c0_i32_1 : i32, i32, i32, i32
  }
}

module attributes {stable_mosaic.version = 11 : i64} {
  func.func @_matmul_bn_act_kernel(%arg0: i32, %arg1: i32, %arg2: memref<128x576xbf16, #tpu.memory_space<vmem>>, %arg3: memref<576x128xbf16, #tpu.memory_space<vmem>>, %arg4: memref<1x128xf32, #tpu.memory_space<vmem>>, %arg5: memref<1x128xf32, #tpu.memory_space<vmem>>, %arg6: memref<128x128xbf16, #tpu.memory_space<vmem>>) attributes {dimension_semantics = [#tpu.dimension_semantics<parallel>, #tpu.dimension_semantics<parallel>], iteration_bounds = array<i64: 1, 1>, scalar_prefetch = 0 : i64, scratch_operands = 0 : i64, tpu.core_type = #tpu.core_type<tc>, window_params = [{transform_indices = @transform_0, window_bounds = array<i64: 128, 576>}, {transform_indices = @transform_1, window_bounds = array<i64: 576, 128>}, {transform_indices = @transform_2, window_bounds = array<i64: 1, 128>}, {transform_indices = @transform_3, window_bounds = array<i64: 1, 128>}, {transform_indices = @transform_4, window_bounds = array<i64: 128, 128>}]} {
    %c0 = arith.constant 0 : index
    %c0_0 = arith.constant 0 : index
    %0 = vector.load %arg2[%c0, %c0_0] : memref<128x576xbf16, #tpu.memory_space<vmem>>, vector<128x576xbf16>
    %c0_1 = arith.constant 0 : index
    %c0_2 = arith.constant 0 : index
    %1 = vector.load %arg3[%c0_1, %c0_2] : memref<576x128xbf16, #tpu.memory_space<vmem>>, vector<576x128xbf16>
    %cst = arith.constant dense<0.000000e+00> : vector<128x128xf32>
    %2 = tpu.matmul %0, %1, %cst {dimension_numbers = #tpu.dot_dimension_numbers<[1], [0], [0], [1], [0, 0, 1, 1], [], []>} : vector<128x576xbf16>, vector<576x128xbf16>, vector<128x128xf32> -> vector<128x128xf32>
    %c0_3 = arith.constant 0 : index
    %c0_4 = arith.constant 0 : index
    %3 = vector.load %arg4[%c0_3, %c0_4] : memref<1x128xf32, #tpu.memory_space<vmem>>, vector<1x128xf32>
    %4 = vector.broadcast %3 : vector<1x128xf32> to vector<128x128xf32>
    %5 = arith.mulf %2, %4 : vector<128x128xf32>
    %c0_5 = arith.constant 0 : index
    %c0_6 = arith.constant 0 : index
    %6 = vector.load %arg5[%c0_5, %c0_6] : memref<1x128xf32, #tpu.memory_space<vmem>>, vector<1x128xf32>
    %7 = vector.broadcast %6 : vector<1x128xf32> to vector<128x128xf32>
    %8 = arith.addf %5, %7 : vector<128x128xf32>
    %cst_7 = arith.constant 0.000000e+00 : f32
    %9 = vector.broadcast %cst_7 : f32 to vector<128x128xf32>
    %10 = arith.maximumf %8, %9 : vector<128x128xf32>
    %11 = arith.truncf %10 : vector<128x128xf32> to vector<128x128xbf16>
    %c0_8 = arith.constant 0 : index
    %c0_9 = arith.constant 0 : index
    %12 = vector.load %arg6[%c0_8, %c0_9] : memref<128x128xbf16, #tpu.memory_space<vmem>>, vector<128x128xbf16>
    tpu.vector_store %arg6[%c0_8, %c0_9], %11 {strides = array<i32>} : memref<128x128xbf16, #tpu.memory_space<vmem>>, vector<128x128xbf16>,
    return
  }
  func.func @transform_0(%arg0: i32, %arg1: i32) -> (i32, i32) {
    %c0_i32 = arith.constant 0 : i32
    %c0_i32_0 = arith.constant 0 : i32
    return %arg1, %c0_i32 : i32, i32
  }
  func.func @transform_1(%arg0: i32, %arg1: i32) -> (i32, i32) {
    %c0_i32 = arith.constant 0 : i32
    %c0_i32_0 = arith.constant 0 : i32
    return %c0_i32, %arg0 : i32, i32
  }
  func.func @transform_2(%arg0: i32, %arg1: i32) -> (i32, i32) {
    %c0_i32 = arith.constant 0 : i32
    %c0_i32_0 = arith.constant 0 : i32
    return %c0_i32, %arg0 : i32, i32
  }
  func.func @transform_3(%arg0: i32, %arg1: i32) -> (i32, i32) {
    %c0_i32 = arith.constant 0 : i32
    %c0_i32_0 = arith.constant 0 : i32
    return %c0_i32, %arg0 : i32, i32
  }
  func.func @transform_4(%arg0: i32, %arg1: i32) -> (i32, i32) {
    %c0_i32 = arith.constant 0 : i32
    return %arg1, %arg0 : i32, i32
  }
}

module attributes {stable_mosaic.version = 11 : i64} {
  func.func @_matmul_bn_act_kernel(%arg0: i32, %arg1: i32, %arg2: memref<128x1152xbf16, #tpu.memory_space<vmem>>, %arg3: memref<1152x128xbf16, #tpu.memory_space<vmem>>, %arg4: memref<1x128xf32, #tpu.memory_space<vmem>>, %arg5: memref<1x128xf32, #tpu.memory_space<vmem>>, %arg6: memref<128x128xbf16, #tpu.memory_space<vmem>>) attributes {dimension_semantics = [#tpu.dimension_semantics<parallel>, #tpu.dimension_semantics<parallel>], iteration_bounds = array<i64: 1, 1>, scalar_prefetch = 0 : i64, scratch_operands = 0 : i64, tpu.core_type = #tpu.core_type<tc>, window_params = [{transform_indices = @transform_0, window_bounds = array<i64: 128, 1152>}, {transform_indices = @transform_1, window_bounds = array<i64: 1152, 128>}, {transform_indices = @transform_2, window_bounds = array<i64: 1, 128>}, {transform_indices = @transform_3, window_bounds = array<i64: 1, 128>}, {transform_indices = @transform_4, window_bounds = array<i64: 128, 128>}]} {
    %c0 = arith.constant 0 : index
    %c0_0 = arith.constant 0 : index
    %0 = vector.load %arg2[%c0, %c0_0] : memref<128x1152xbf16, #tpu.memory_space<vmem>>, vector<128x1152xbf16>
    %c0_1 = arith.constant 0 : index
    %c0_2 = arith.constant 0 : index
    %1 = vector.load %arg3[%c0_1, %c0_2] : memref<1152x128xbf16, #tpu.memory_space<vmem>>, vector<1152x128xbf16>
    %cst = arith.constant dense<0.000000e+00> : vector<128x128xf32>
    %2 = tpu.matmul %0, %1, %cst {dimension_numbers = #tpu.dot_dimension_numbers<[1], [0], [0], [1], [0, 0, 1, 1], [], []>} : vector<128x1152xbf16>, vector<1152x128xbf16>, vector<128x128xf32> -> vector<128x128xf32>
    %c0_3 = arith.constant 0 : index
    %c0_4 = arith.constant 0 : index
    %3 = vector.load %arg4[%c0_3, %c0_4] : memref<1x128xf32, #tpu.memory_space<vmem>>, vector<1x128xf32>
    %4 = vector.broadcast %3 : vector<1x128xf32> to vector<128x128xf32>
    %5 = arith.mulf %2, %4 : vector<128x128xf32>
    %c0_5 = arith.constant 0 : index
    %c0_6 = arith.constant 0 : index
    %6 = vector.load %arg5[%c0_5, %c0_6] : memref<1x128xf32, #tpu.memory_space<vmem>>, vector<1x128xf32>
    %7 = vector.broadcast %6 : vector<1x128xf32> to vector<128x128xf32>
    %8 = arith.addf %5, %7 : vector<128x128xf32>
    %cst_7 = arith.constant 0.000000e+00 : f32
    %9 = vector.broadcast %cst_7 : f32 to vector<128x128xf32>
    %10 = arith.maximumf %8, %9 : vector<128x128xf32>
    %11 = arith.truncf %10 : vector<128x128xf32> to vector<128x128xbf16>
    %c0_8 = arith.constant 0 : index
    %c0_9 = arith.constant 0 : index
    %12 = vector.load %arg6[%c0_8, %c0_9] : memref<128x128xbf16, #tpu.memory_space<vmem>>, vector<128x128xbf16>
    tpu.vector_store %arg6[%c0_8, %c0_9], %11 {strides = array<i32>} : memref<128x128xbf16, #tpu.memory_space<vmem>>, vector<128x128xbf16>,
    return
  }
  func.func @transform_0(%arg0: i32, %arg1: i32) -> (i32, i32) {
    %c0_i32 = arith.constant 0 : i32
    %c0_i32_0 = arith.constant 0 : i32
    return %arg1, %c0_i32 : i32, i32
  }
  func.func @transform_1(%arg0: i32, %arg1: i32) -> (i32, i32) {
    %c0_i32 = arith.constant 0 : i32
    %c0_i32_0 = arith.constant 0 : i32
    return %c0_i32, %arg0 : i32, i32
  }
  func.func @transform_2(%arg0: i32, %arg1: i32) -> (i32, i32) {
    %c0_i32 = arith.constant 0 : i32
    %c0_i32_0 = arith.constant 0 : i32
    return %c0_i32, %arg0 : i32, i32
  }
  func.func @transform_3(%arg0: i32, %arg1: i32) -> (i32, i32) {
    %c0_i32 = arith.constant 0 : i32
    %c0_i32_0 = arith.constant 0 : i32
    return %c0_i32, %arg0 : i32, i32
  }
  func.func @transform_4(%arg0: i32, %arg1: i32) -> (i32, i32) {
    %c0_i32 = arith.constant 0 : i32
    return %arg1, %arg0 : i32, i32
  }
}

module attributes {stable_mosaic.version = 11 : i64} {
  func.func @_maxpool2x2_kernel(%arg0: i32, %arg1: memref<4x2x4x4x128xbf16, #tpu.memory_space<vmem>>, %arg2: memref<2x4x4x128xbf16, #tpu.memory_space<vmem>>) attributes {dimension_semantics = [#tpu.dimension_semantics<parallel>], iteration_bounds = array<i64: 1>, scalar_prefetch = 0 : i64, scratch_operands = 0 : i64, tpu.core_type = #tpu.core_type<tc>, window_params = [{transform_indices = @transform_0, window_bounds = array<i64: 4, 2, 4, 4, 128>}, {transform_indices = @transform_1, window_bounds = array<i64: 2, 4, 4, 128>}]} {
    %c0 = arith.constant 0 : index
    %c0_0 = arith.constant 0 : index
    %c0_1 = arith.constant 0 : index
    %c0_2 = arith.constant 0 : index
    %c0_3 = arith.constant 0 : index
    %0 = vector.load %arg1[%c0, %c0_0, %c0_1, %c0_2, %c0_3] : memref<4x2x4x4x128xbf16, #tpu.memory_space<vmem>>, vector<1x2x4x4x128xbf16>
    %1 = vector.shape_cast %0 : vector<1x2x4x4x128xbf16> to vector<2x4x4x128xbf16>
    %c1 = arith.constant 1 : index
    %c0_4 = arith.constant 0 : index
    %c0_5 = arith.constant 0 : index
    %c0_6 = arith.constant 0 : index
    %c0_7 = arith.constant 0 : index
    %2 = vector.load %arg1[%c1, %c0_4, %c0_5, %c0_6, %c0_7] : memref<4x2x4x4x128xbf16, #tpu.memory_space<vmem>>, vector<1x2x4x4x128xbf16>
    %3 = vector.shape_cast %2 : vector<1x2x4x4x128xbf16> to vector<2x4x4x128xbf16>
    %4 = arith.maximumf %1, %3 : vector<2x4x4x128xbf16>
    %c2 = arith.constant 2 : index
    %c0_8 = arith.constant 0 : index
    %c0_9 = arith.constant 0 : index
    %c0_10 = arith.constant 0 : index
    %c0_11 = arith.constant 0 : index
    %5 = vector.load %arg1[%c2, %c0_8, %c0_9, %c0_10, %c0_11] : memref<4x2x4x4x128xbf16, #tpu.memory_space<vmem>>, vector<1x2x4x4x128xbf16>
    %6 = vector.shape_cast %5 : vector<1x2x4x4x128xbf16> to vector<2x4x4x128xbf16>
    %c3 = arith.constant 3 : index
    %c0_12 = arith.constant 0 : index
    %c0_13 = arith.constant 0 : index
    %c0_14 = arith.constant 0 : index
    %c0_15 = arith.constant 0 : index
    %7 = vector.load %arg1[%c3, %c0_12, %c0_13, %c0_14, %c0_15] : memref<4x2x4x4x128xbf16, #tpu.memory_space<vmem>>, vector<1x2x4x4x128xbf16>
    %8 = vector.shape_cast %7 : vector<1x2x4x4x128xbf16> to vector<2x4x4x128xbf16>
    %9 = arith.maximumf %6, %8 : vector<2x4x4x128xbf16>
    %10 = arith.maximumf %4, %9 : vector<2x4x4x128xbf16>
    %c0_16 = arith.constant 0 : index
    %c0_17 = arith.constant 0 : index
    %c0_18 = arith.constant 0 : index
    %c0_19 = arith.constant 0 : index
    %11 = vector.load %arg2[%c0_16, %c0_17, %c0_18, %c0_19] : memref<2x4x4x128xbf16, #tpu.memory_space<vmem>>, vector<2x4x4x128xbf16>
    tpu.vector_store %arg2[%c0_16, %c0_17, %c0_18, %c0_19], %10 {strides = array<i32>} : memref<2x4x4x128xbf16, #tpu.memory_space<vmem>>, vector<2x4x4x128xbf16>,
    return
  }
  func.func @transform_0(%arg0: i32) -> (i32, i32, i32, i32, i32) {
    %c0_i32 = arith.constant 0 : i32
    %c0_i32_0 = arith.constant 0 : i32
    %c0_i32_1 = arith.constant 0 : i32
    %c0_i32_2 = arith.constant 0 : i32
    %c0_i32_3 = arith.constant 0 : i32
    return %c0_i32, %c0_i32_0, %arg0, %c0_i32_1, %c0_i32_2 : i32, i32, i32, i32, i32
  }
  func.func @transform_1(%arg0: i32) -> (i32, i32, i32, i32) {
    %c0_i32 = arith.constant 0 : i32
    %c0_i32_0 = arith.constant 0 : i32
    %c0_i32_1 = arith.constant 0 : i32
    %c0_i32_2 = arith.constant 0 : i32
    return %c0_i32, %arg0, %c0_i32_0, %c0_i32_1 : i32, i32, i32, i32
  }
}

module attributes {stable_mosaic.version = 11 : i64} {
  func.func @_matmul_bn_act_kernel(%arg0: i32, %arg1: i32, %arg2: memref<32x1152xbf16, #tpu.memory_space<vmem>>, %arg3: memref<1152x256xbf16, #tpu.memory_space<vmem>>, %arg4: memref<1x256xf32, #tpu.memory_space<vmem>>, %arg5: memref<1x256xf32, #tpu.memory_space<vmem>>, %arg6: memref<32x256xbf16, #tpu.memory_space<vmem>>) attributes {dimension_semantics = [#tpu.dimension_semantics<parallel>, #tpu.dimension_semantics<parallel>], iteration_bounds = array<i64: 1, 1>, scalar_prefetch = 0 : i64, scratch_operands = 0 : i64, tpu.core_type = #tpu.core_type<tc>, window_params = [{transform_indices = @transform_0, window_bounds = array<i64: 32, 1152>}, {transform_indices = @transform_1, window_bounds = array<i64: 1152, 256>}, {transform_indices = @transform_2, window_bounds = array<i64: 1, 256>}, {transform_indices = @transform_3, window_bounds = array<i64: 1, 256>}, {transform_indices = @transform_4, window_bounds = array<i64: 32, 256>}]} {
    %c0 = arith.constant 0 : index
    %c0_0 = arith.constant 0 : index
    %0 = vector.load %arg2[%c0, %c0_0] : memref<32x1152xbf16, #tpu.memory_space<vmem>>, vector<32x1152xbf16>
    %c0_1 = arith.constant 0 : index
    %c0_2 = arith.constant 0 : index
    %1 = vector.load %arg3[%c0_1, %c0_2] : memref<1152x256xbf16, #tpu.memory_space<vmem>>, vector<1152x256xbf16>
    %cst = arith.constant dense<0.000000e+00> : vector<32x256xf32>
    %2 = tpu.matmul %0, %1, %cst {dimension_numbers = #tpu.dot_dimension_numbers<[1], [0], [0], [1], [0, 0, 1, 1], [], []>} : vector<32x1152xbf16>, vector<1152x256xbf16>, vector<32x256xf32> -> vector<32x256xf32>
    %c0_3 = arith.constant 0 : index
    %c0_4 = arith.constant 0 : index
    %3 = vector.load %arg4[%c0_3, %c0_4] : memref<1x256xf32, #tpu.memory_space<vmem>>, vector<1x256xf32>
    %4 = vector.broadcast %3 : vector<1x256xf32> to vector<32x256xf32>
    %5 = arith.mulf %2, %4 : vector<32x256xf32>
    %c0_5 = arith.constant 0 : index
    %c0_6 = arith.constant 0 : index
    %6 = vector.load %arg5[%c0_5, %c0_6] : memref<1x256xf32, #tpu.memory_space<vmem>>, vector<1x256xf32>
    %7 = vector.broadcast %6 : vector<1x256xf32> to vector<32x256xf32>
    %8 = arith.addf %5, %7 : vector<32x256xf32>
    %cst_7 = arith.constant 0.000000e+00 : f32
    %9 = vector.broadcast %cst_7 : f32 to vector<32x256xf32>
    %10 = arith.maximumf %8, %9 : vector<32x256xf32>
    %11 = arith.truncf %10 : vector<32x256xf32> to vector<32x256xbf16>
    %c0_8 = arith.constant 0 : index
    %c0_9 = arith.constant 0 : index
    %12 = vector.load %arg6[%c0_8, %c0_9] : memref<32x256xbf16, #tpu.memory_space<vmem>>, vector<32x256xbf16>
    tpu.vector_store %arg6[%c0_8, %c0_9], %11 {strides = array<i32>} : memref<32x256xbf16, #tpu.memory_space<vmem>>, vector<32x256xbf16>,
    return
  }
  func.func @transform_0(%arg0: i32, %arg1: i32) -> (i32, i32) {
    %c0_i32 = arith.constant 0 : i32
    %c0_i32_0 = arith.constant 0 : i32
    return %arg1, %c0_i32 : i32, i32
  }
  func.func @transform_1(%arg0: i32, %arg1: i32) -> (i32, i32) {
    %c0_i32 = arith.constant 0 : i32
    %c0_i32_0 = arith.constant 0 : i32
    return %c0_i32, %arg0 : i32, i32
  }
  func.func @transform_2(%arg0: i32, %arg1: i32) -> (i32, i32) {
    %c0_i32 = arith.constant 0 : i32
    %c0_i32_0 = arith.constant 0 : i32
    return %c0_i32, %arg0 : i32, i32
  }
  func.func @transform_3(%arg0: i32, %arg1: i32) -> (i32, i32) {
    %c0_i32 = arith.constant 0 : i32
    %c0_i32_0 = arith.constant 0 : i32
    return %c0_i32, %arg0 : i32, i32
  }
  func.func @transform_4(%arg0: i32, %arg1: i32) -> (i32, i32) {
    %c0_i32 = arith.constant 0 : i32
    return %arg1, %arg0 : i32, i32
  }
}

module attributes {stable_mosaic.version = 11 : i64} {
  func.func @_matmul_bn_act_kernel(%arg0: i32, %arg1: i32, %arg2: memref<32x2304xbf16, #tpu.memory_space<vmem>>, %arg3: memref<2304x256xbf16, #tpu.memory_space<vmem>>, %arg4: memref<1x256xf32, #tpu.memory_space<vmem>>, %arg5: memref<1x256xf32, #tpu.memory_space<vmem>>, %arg6: memref<32x256xbf16, #tpu.memory_space<vmem>>) attributes {dimension_semantics = [#tpu.dimension_semantics<parallel>, #tpu.dimension_semantics<parallel>], iteration_bounds = array<i64: 1, 1>, scalar_prefetch = 0 : i64, scratch_operands = 0 : i64, tpu.core_type = #tpu.core_type<tc>, window_params = [{transform_indices = @transform_0, window_bounds = array<i64: 32, 2304>}, {transform_indices = @transform_1, window_bounds = array<i64: 2304, 256>}, {transform_indices = @transform_2, window_bounds = array<i64: 1, 256>}, {transform_indices = @transform_3, window_bounds = array<i64: 1, 256>}, {transform_indices = @transform_4, window_bounds = array<i64: 32, 256>}]} {
    %c0 = arith.constant 0 : index
    %c0_0 = arith.constant 0 : index
    %0 = vector.load %arg2[%c0, %c0_0] : memref<32x2304xbf16, #tpu.memory_space<vmem>>, vector<32x2304xbf16>
    %c0_1 = arith.constant 0 : index
    %c0_2 = arith.constant 0 : index
    %1 = vector.load %arg3[%c0_1, %c0_2] : memref<2304x256xbf16, #tpu.memory_space<vmem>>, vector<2304x256xbf16>
    %cst = arith.constant dense<0.000000e+00> : vector<32x256xf32>
    %2 = tpu.matmul %0, %1, %cst {dimension_numbers = #tpu.dot_dimension_numbers<[1], [0], [0], [1], [0, 0, 1, 1], [], []>} : vector<32x2304xbf16>, vector<2304x256xbf16>, vector<32x256xf32> -> vector<32x256xf32>
    %c0_3 = arith.constant 0 : index
    %c0_4 = arith.constant 0 : index
    %3 = vector.load %arg4[%c0_3, %c0_4] : memref<1x256xf32, #tpu.memory_space<vmem>>, vector<1x256xf32>
    %4 = vector.broadcast %3 : vector<1x256xf32> to vector<32x256xf32>
    %5 = arith.mulf %2, %4 : vector<32x256xf32>
    %c0_5 = arith.constant 0 : index
    %c0_6 = arith.constant 0 : index
    %6 = vector.load %arg5[%c0_5, %c0_6] : memref<1x256xf32, #tpu.memory_space<vmem>>, vector<1x256xf32>
    %7 = vector.broadcast %6 : vector<1x256xf32> to vector<32x256xf32>
    %8 = arith.addf %5, %7 : vector<32x256xf32>
    %cst_7 = arith.constant 0.000000e+00 : f32
    %9 = vector.broadcast %cst_7 : f32 to vector<32x256xf32>
    %10 = arith.maximumf %8, %9 : vector<32x256xf32>
    %11 = arith.truncf %10 : vector<32x256xf32> to vector<32x256xbf16>
    %c0_8 = arith.constant 0 : index
    %c0_9 = arith.constant 0 : index
    %12 = vector.load %arg6[%c0_8, %c0_9] : memref<32x256xbf16, #tpu.memory_space<vmem>>, vector<32x256xbf16>
    tpu.vector_store %arg6[%c0_8, %c0_9], %11 {strides = array<i32>} : memref<32x256xbf16, #tpu.memory_space<vmem>>, vector<32x256xbf16>,
    return
  }
  func.func @transform_0(%arg0: i32, %arg1: i32) -> (i32, i32) {
    %c0_i32 = arith.constant 0 : i32
    %c0_i32_0 = arith.constant 0 : i32
    return %arg1, %c0_i32 : i32, i32
  }
  func.func @transform_1(%arg0: i32, %arg1: i32) -> (i32, i32) {
    %c0_i32 = arith.constant 0 : i32
    %c0_i32_0 = arith.constant 0 : i32
    return %c0_i32, %arg0 : i32, i32
  }
  func.func @transform_2(%arg0: i32, %arg1: i32) -> (i32, i32) {
    %c0_i32 = arith.constant 0 : i32
    %c0_i32_0 = arith.constant 0 : i32
    return %c0_i32, %arg0 : i32, i32
  }
  func.func @transform_3(%arg0: i32, %arg1: i32) -> (i32, i32) {
    %c0_i32 = arith.constant 0 : i32
    %c0_i32_0 = arith.constant 0 : i32
    return %c0_i32, %arg0 : i32, i32
  }
  func.func @transform_4(%arg0: i32, %arg1: i32) -> (i32, i32) {
    %c0_i32 = arith.constant 0 : i32
    return %arg1, %arg0 : i32, i32
  }
}

</mosaic_0001>

<bundles_post_ra>
// kernel: feature_extractor_forward.9
= control target key start
LH: loop header
LB: loop body
LE: loop exit
PB: predicated region body
PF: predicated region fallthrough
CT: control target
= control target key end

     0   :  { %vm354_vm0 = vcmask 1044480   ;;  %vm355_vm1 = vcmask 1045504   ;;  %v1074_v2 = vmov 65535   ;;  %vm257_vm2 = vcmask 220160   ;;  %s1631_s1 = inlined_call_operand.vmem [shape: bf16[27,64], index: 1, kind: input, shape index: {}]   ;;  %s1632_s2 = inlined_call_operand.vmem [shape: f32[1,64], index: 2, kind: input, shape index: {}]   ;;  %s1633_s3 = inlined_call_operand.vmem [shape: f32[1,64], index: 3, kind: input, shape index: {}]   ;;  %s1634_s0 = inlined_call_operand.vmem [shape: bf16[512,27], index: 0, kind: input, shape index: {}]   ;;  %s1635_s4 = inlined_call_operand.vmem [shape: bf16[512,64], index: 4, kind: output, shape index: {}]  }
   0x1   :  { %v997_v0 = vld [vmem:[%s1631_s1 + $0x8] sm:$0xf]  ;;  %v1064_v1 = vld [vmem:[%s1631_s1 + $0x8] sm:$0x30]  ;;  %v356_v3 = vsel %vm354_vm0, 4294967295, %v1074_v2  ;;  %v1063_v7 = vld [vmem:[%s1631_s1] sm:$0xff] }
   0x2   :  { %v998_v4 = vor.u32 %v1064_v1, %v997_v0  ;;  %v357_v5 = vsel %vm355_vm1, %v356_v3, 0  ;;  %v1031_v8 = vld [vmem:[%s1634_s0] sm:$0xff]  ;;  %v1032_v12 = vld [vmem:[%s1634_s0 + $0x8] sm:$0xff]  ;;  %v1033_v16 = vld [vmem:[%s1634_s0 + $0x10] sm:$0xff]  ;;  %vm794_vm3 = vcmask 519168  }
   0x3   :  { %v1039_v9 = vld [vmem:[%s1634_s0 + $0x40] sm:$0xff]  ;;  %v1040_v13 = vld [vmem:[%s1634_s0 + $0x48] sm:$0xff]  ;;  %v1041_v17 = vld [vmem:[%s1634_s0 + $0x50] sm:$0xff] }
   0x4   :  { %v359_v6 = vand.u32 %v998_v4, %v357_v5  ;;  %v1047_v10 = vld [vmem:[%s1634_s0 + $0x80] sm:$0xff]  ;;  %v1048_v14 = vld [vmem:[%s1634_s0 + $0x88] sm:$0xff]  ;;  %v1049_v18 = vld [vmem:[%s1634_s0 + $0x90] sm:$0xff] }
   0x5   :  { %v1055_v11 = vld [vmem:[%s1634_s0 + $0xc0] sm:$0xff]  ;;  %v1056_v15 = vld [vmem:[%s1634_s0 + $0xc8] sm:$0xff]  ;;  %v1057_v19 = vld [vmem:[%s1634_s0 + $0xd0] sm:$0xff] }
   0x6   :  { %367 = vmatpush.bf16.msra.mxu0 %v359_v6  ;;  %1065 = vmatpush.bf16.msra.mxu1 %v359_v6  ;;  %v1034_v20 = vld [vmem:[%s1634_s0 + $0x18] sm:$0xff]  ;;  %v1035_v24 = vld [vmem:[%s1634_s0 + $0x20] sm:$0xff]  ;;  %v1036_v28 = vld [vmem:[%s1634_s0 + $0x28] sm:$0xff] }
   0x7   :  { %1066 = vmatpush.bf16.msra.mxu2 %v359_v6  ;;  %1067 = vmatpush.bf16.msra.mxu3 %v359_v6  ;;  %v1042_v21 = vld [vmem:[%s1634_s0 + $0x58] sm:$0xff]  ;;  %v1043_v25 = vld [vmem:[%s1634_s0 + $0x60] sm:$0xff]  ;;  %v1044_v29 = vld [vmem:[%s1634_s0 + $0x68] sm:$0xff] }
   0x8   :  { %v1050_v22 = vld [vmem:[%s1634_s0 + $0x98] sm:$0xff]  ;;  %v1051_v26 = vld [vmem:[%s1634_s0 + $0xa0] sm:$0xff]  ;;  %v1052_v30 = vld [vmem:[%s1634_s0 + $0xa8] sm:$0xff] }
   0x9   :  { %v1058_v23 = vld [vmem:[%s1634_s0 + $0xd8] sm:$0xff]  ;;  %v1059_v27 = vld [vmem:[%s1634_s0 + $0xe0] sm:$0xff]  ;;  %v1060_v31 = vld [vmem:[%s1634_s0 + $0xe8] sm:$0xff] }
   0xa   :  { %368 = vmatpush.bf16.msra.mxu0 %v1063_v7  ;;  %1068 = vmatpush.bf16.msra.mxu1 %v1063_v7  ;;  %v1037_v32 = vld [vmem:[%s1634_s0 + $0x30] sm:$0xff]  ;;  %v1038_v36 = vld [vmem:[%s1634_s0 + $0x38] sm:$0xff]  ;;  %v1240_v40 = vld [vmem:[%s1632_s2] ss:$0 sm:$0xff] }
   0xb   :  { %1069 = vmatpush.bf16.msra.mxu2 %v1063_v7  ;;  %1070 = vmatpush.bf16.msra.mxu3 %v1063_v7  ;;  %v1045_v33 = vld [vmem:[%s1634_s0 + $0x70] sm:$0xff]  ;;  %v1046_v37 = vld [vmem:[%s1634_s0 + $0x78] sm:$0xff]  ;;  %v1245_v41 = vld [vmem:[%s1633_s3] ss:$0 sm:$0xff] }
   0xc   :  { %v1053_v34 = vld [vmem:[%s1634_s0 + $0xb0] sm:$0xff]  ;;  %v1054_v38 = vld [vmem:[%s1634_s0 + $0xb8] sm:$0xff] }
   0xd   :  { %999 = vmatmul.msk.bf16.vlgmr.msra.gmra.mxu0 %vm257_vm2, %v1031_v8  ;;  %1007 = vmatmul.msk.bf16.vlgmr.msra.gmra.mxu1 %vm257_vm2, %v1039_v9  ;;  %v1061_v35 = vld [vmem:[%s1634_s0 + $0xf0] sm:$0xff]  ;;  %v1062_v39 = vld [vmem:[%s1634_s0 + $0xf8] sm:$0xff] }
   0xe   :  { %1015 = vmatmul.msk.bf16.vlgmr.msra.gmra.mxu2 %vm257_vm2, %v1047_v10  ;;  %1023 = vmatmul.msk.bf16.vlgmr.msra.gmra.mxu3 %vm257_vm2, %v1055_v11 }
  0x1d   :  { %1000 = vmatmul.msk.bf16.gmra.mxu0 %vm257_vm2, %v1032_v12  ;;  %1008 = vmatmul.msk.bf16.gmra.mxu1 %vm257_vm2, %v1040_v13 }
  0x1e   :  { %1016 = vmatmul.msk.bf16.gmra.mxu2 %vm257_vm2, %v1048_v14  ;;  %1024 = vmatmul.msk.bf16.gmra.mxu3 %vm257_vm2, %v1056_v15 }
  0x2d   :  { %1001 = vmatmul.msk.bf16.gmra.mxu0 %vm257_vm2, %v1033_v16  ;;  %1009 = vmatmul.msk.bf16.gmra.mxu1 %vm257_vm2, %v1041_v17 }
  0x2e   :  { %1017 = vmatmul.msk.bf16.gmra.mxu2 %vm257_vm2, %v1049_v18  ;;  %1025 = vmatmul.msk.bf16.gmra.mxu3 %vm257_vm2, %v1057_v19 }
  0x3d   :  { %1002 = vmatmul.msk.bf16.gmra.mxu0 %vm257_vm2, %v1034_v20  ;;  %1010 = vmatmul.msk.bf16.gmra.mxu1 %vm257_vm2, %v1042_v21 }
  0x3e   :  { %1018 = vmatmul.msk.bf16.gmra.mxu2 %vm257_vm2, %v1050_v22  ;;  %1026 = vmatmul.msk.bf16.gmra.mxu3 %vm257_vm2, %v1058_v23 }
  0x4d   :  { %1003 = vmatmul.msk.bf16.gmra.mxu0 %vm257_vm2, %v1035_v24  ;;  %1011 = vmatmul.msk.bf16.gmra.mxu1 %vm257_vm2, %v1043_v25 }
  0x4e   :  { %1019 = vmatmul.msk.bf16.gmra.mxu2 %vm257_vm2, %v1051_v26  ;;  %1027 = vmatmul.msk.bf16.gmra.mxu3 %vm257_vm2, %v1059_v27 }
  0x5d   :  { %1004 = vmatmul.msk.bf16.gmra.mxu0 %vm257_vm2, %v1036_v28  ;;  %1012 = vmatmul.msk.bf16.gmra.mxu1 %vm257_vm2, %v1044_v29 }
  0x5e   :  { %1020 = vmatmul.msk.bf16.gmra.mxu2 %vm257_vm2, %v1052_v30  ;;  %1028 = vmatmul.msk.bf16.gmra.mxu3 %vm257_vm2, %v1060_v31 }
  0x6d   :  { %1005 = vmatmul.msk.bf16.gmra.mxu0 %vm257_vm2, %v1037_v32  ;;  %1013 = vmatmul.msk.bf16.gmra.mxu1 %vm257_vm2, %v1045_v33 }
  0x6e   :  { %1021 = vmatmul.msk.bf16.gmra.mxu2 %vm257_vm2, %v1053_v34  ;;  %1029 = vmatmul.msk.bf16.gmra.mxu3 %vm257_vm2, %v1061_v35 }
  0x7d   :  { %1006 = vmatmul.msk.bf16.gmra.mxu0 %vm257_vm2, %v1038_v36  ;;  %1014 = vmatmul.msk.bf16.gmra.mxu1 %vm257_vm2, %v1046_v37 }
  0x7e   :  { %1022 = vmatmul.msk.bf16.gmra.mxu2 %vm257_vm2, %v1054_v38  ;;  %1030 = vmatmul.msk.bf16.gmra.mxu3 %vm257_vm2, %v1062_v39 }
  0x8a   :  { %v370_v42 = vpop.f32.mrf.mxu0  ;;  %v410_v43 = vpop.f32.mrf.mxu1 }
  0x8b   :  { %v534_v44 = vmul.f32 %v1240_v40, %v370_v42  ;;  %v550_v45 = vmul.f32 %v1240_v40, %v410_v43 }
  0x8d   :  { %v602_v46 = vadd.f32 %v1245_v41, %v534_v44  ;;  %v618_v47 = vadd.f32 %v1245_v41, %v550_v45 }
  0x8f   :  { %v666_v48 = vmax.f32 %v602_v46, 0.0  ;;  %v682_v49 = vmax.f32 %v618_v47, 0.0 }
  0x91   :  { %v730_v50 = vpack.c.bf16 %v666_v48, %v666_v48  ;;  %v746_v51 = vpack.c.bf16 %v682_v49, %v682_v49  ;;  %v450_v52 = vpop.f32.mrf.mxu2  ;;  %v490_v53 = vpop.f32.mrf.mxu3 }
  0x92   :  { %v566_v54 = vmul.f32 %v1240_v40, %v450_v52  ;;  %v582_v55 = vmul.f32 %v1240_v40, %v490_v53  ;;  %v372_v56 = vpop.f32.mrf.mxu0  ;;  %v412_v57 = vpop.f32.mrf.mxu1 }
  0x93   :  { %795 = vst.msk [vmem:[%s1635_s4] sm:$0xf] %vm794_vm3, %v730_v50  ;;  %v535_v58 = vmul.f32 %v1240_v40, %v372_v56  ;;  %v551_v59 = vmul.f32 %v1240_v40, %v412_v57 }
  0x94   :  { %811 = vst.msk [vmem:[%s1635_s4 + $0x40] sm:$0xf] %vm794_vm3, %v746_v51  ;;  %v634_v60 = vadd.f32 %v1245_v41, %v566_v54  ;;  %v650_v61 = vadd.f32 %v1245_v41, %v582_v55 }
  0x95   :  { %v603_v62 = vadd.f32 %v1245_v41, %v535_v58  ;;  %v619_v63 = vadd.f32 %v1245_v41, %v551_v59 }
  0x96   :  { %v698_v0 = vmax.f32 %v634_v60, 0.0  ;;  %v714_v1 = vmax.f32 %v650_v61, 0.0 }
  0x97   :  { %v667_v2 = vmax.f32 %v603_v62, 0.0  ;;  %v683_v3 = vmax.f32 %v619_v63, 0.0 }
  0x98   :  { %v762_v4 = vpack.c.bf16 %v698_v0, %v698_v0  ;;  %v778_v5 = vpack.c.bf16 %v714_v1, %v714_v1 }
  0x99   :  { %v731_v6 = vpack.c.bf16 %v667_v2, %v667_v2  ;;  %v747_v7 = vpack.c.bf16 %v683_v3, %v683_v3  ;;  %v452_v8 = vpop.f32.mrf.mxu2  ;;  %v492_v9 = vpop.f32.mrf.mxu3 }
  0x9a   :  { %827 = vst.msk [vmem:[%s1635_s4 + $0x80] sm:$0xf] %vm794_vm3, %v762_v4  ;;  %v567_v10 = vmul.f32 %v1240_v40, %v452_v8  ;;  %v583_v11 = vmul.f32 %v1240_v40, %v492_v9  ;;  %v375_v12 = vpop.f32.mrf.mxu0  ;;  %v415_v13 = vpop.f32.mrf.mxu1 }
  0x9b   :  { %843 = vst.msk [vmem:[%s1635_s4 + $0xc0] sm:$0xf] %vm794_vm3, %v778_v5  ;;  %v536_v14 = vmul.f32 %v1240_v40, %v375_v12  ;;  %v552_v15 = vmul.f32 %v1240_v40, %v415_v13 }
  0x9c   :  { %796 = vst.msk [vmem:[%s1635_s4 + $0x4] sm:$0xf] %vm794_vm3, %v731_v6  ;;  %v635_v16 = vadd.f32 %v1245_v41, %v567_v10  ;;  %v651_v17 = vadd.f32 %v1245_v41, %v583_v11 }
  0x9d   :  { %812 = vst.msk [vmem:[%s1635_s4 + $0x44] sm:$0xf] %vm794_vm3, %v747_v7  ;;  %v604_v18 = vadd.f32 %v1245_v41, %v536_v14  ;;  %v620_v19 = vadd.f32 %v1245_v41, %v552_v15 }
  0x9e   :  { %v699_v20 = vmax.f32 %v635_v16, 0.0  ;;  %v715_v21 = vmax.f32 %v651_v17, 0.0 }
  0x9f   :  { %v668_v22 = vmax.f32 %v604_v18, 0.0  ;;  %v684_v23 = vmax.f32 %v620_v19, 0.0 }
  0xa0   :  { %v763_v24 = vpack.c.bf16 %v699_v20, %v699_v20  ;;  %v779_v25 = vpack.c.bf16 %v715_v21, %v715_v21 }
  0xa1   :  { %v732_v26 = vpack.c.bf16 %v668_v22, %v668_v22  ;;  %v748_v27 = vpack.c.bf16 %v684_v23, %v684_v23  ;;  %v455_v28 = vpop.f32.mrf.mxu2  ;;  %v495_v29 = vpop.f32.mrf.mxu3 }
  0xa2   :  { %828 = vst.msk [vmem:[%s1635_s4 + $0x84] sm:$0xf] %vm794_vm3, %v763_v24  ;;  %v568_v30 = vmul.f32 %v1240_v40, %v455_v28  ;;  %v584_v31 = vmul.f32 %v1240_v40, %v495_v29  ;;  %v377_v32 = vpop.f32.mrf.mxu0  ;;  %v417_v33 = vpop.f32.mrf.mxu1 }
  0xa3   :  { %844 = vst.msk [vmem:[%s1635_s4 + $0xc4] sm:$0xf] %vm794_vm3, %v779_v25  ;;  %v537_v34 = vmul.f32 %v1240_v40, %v377_v32  ;;  %v553_v35 = vmul.f32 %v1240_v40, %v417_v33 }
  0xa4   :  { %797 = vst.msk [vmem:[%s1635_s4 + $0x8] sm:$0xf] %vm794_vm3, %v732_v26  ;;  %v636_v36 = vadd.f32 %v1245_v41, %v568_v30  ;;  %v652_v37 = vadd.f32 %v1245_v41, %v584_v31 }
  0xa5   :  { %813 = vst.msk [vmem:[%s1635_s4 + $0x48] sm:$0xf] %vm794_vm3, %v748_v27  ;;  %v605_v38 = vadd.f32 %v1245_v41, %v537_v34  ;;  %v621_v39 = vadd.f32 %v1245_v41, %v553_v35 }
  0xa6   :  { %v700_v42 = vmax.f32 %v636_v36, 0.0  ;;  %v716_v43 = vmax.f32 %v652_v37, 0.0 }
  0xa7   :  { %v669_v44 = vmax.f32 %v605_v38, 0.0  ;;  %v685_v45 = vmax.f32 %v621_v39, 0.0 }
  0xa8   :  { %v764_v46 = vpack.c.bf16 %v700_v42, %v700_v42  ;;  %v780_v47 = vpack.c.bf16 %v716_v43, %v716_v43 }
  0xa9   :  { %v733_v48 = vpack.c.bf16 %v669_v44, %v669_v44  ;;  %v749_v49 = vpack.c.bf16 %v685_v45, %v685_v45  ;;  %v457_v50 = vpop.f32.mrf.mxu2  ;;  %v497_v51 = vpop.f32.mrf.mxu3 }
  0xaa   :  { %829 = vst.msk [vmem:[%s1635_s4 + $0x88] sm:$0xf] %vm794_vm3, %v764_v46  ;;  %v569_v52 = vmul.f32 %v1240_v40, %v457_v50  ;;  %v585_v53 = vmul.f32 %v1240_v40, %v497_v51  ;;  %v380_v54 = vpop.f32.mrf.mxu0  ;;  %v420_v55 = vpop.f32.mrf.mxu1 }
  0xab   :  { %845 = vst.msk [vmem:[%s1635_s4 + $0xc8] sm:$0xf] %vm794_vm3, %v780_v47  ;;  %v538_v56 = vmul.f32 %v1240_v40, %v380_v54  ;;  %v554_v57 = vmul.f32 %v1240_v40, %v420_v55 }
  0xac   :  { %798 = vst.msk [vmem:[%s1635_s4 + $0xc] sm:$0xf] %vm794_vm3, %v733_v48  ;;  %v637_v58 = vadd.f32 %v1245_v41, %v569_v52  ;;  %v653_v59 = vadd.f32 %v1245_v41, %v585_v53 }
  0xad   :  { %814 = vst.msk [vmem:[%s1635_s4 + $0x4c] sm:$0xf] %vm794_vm3, %v749_v49  ;;  %v606_v60 = vadd.f32 %v1245_v41, %v538_v56  ;;  %v622_v61 = vadd.f32 %v1245_v41, %v554_v57 }
  0xae   :  { %v701_v62 = vmax.f32 %v637_v58, 0.0  ;;  %v717_v63 = vmax.f32 %v653_v59, 0.0 }
  0xaf   :  { %v670_v0 = vmax.f32 %v606_v60, 0.0  ;;  %v686_v1 = vmax.f32 %v622_v61, 0.0 }
  0xb0   :  { %v765_v2 = vpack.c.bf16 %v701_v62, %v701_v62  ;;  %v781_v3 = vpack.c.bf16 %v717_v63, %v717_v63 }
  0xb1   :  { %v734_v4 = vpack.c.bf16 %v670_v0, %v670_v0  ;;  %v750_v5 = vpack.c.bf16 %v686_v1, %v686_v1  ;;  %v460_v6 = vpop.f32.mrf.mxu2  ;;  %v500_v7 = vpop.f32.mrf.mxu3 }
  0xb2   :  { %830 = vst.msk [vmem:[%s1635_s4 + $0x8c] sm:$0xf] %vm794_vm3, %v765_v2  ;;  %v570_v8 = vmul.f32 %v1240_v40, %v460_v6  ;;  %v586_v9 = vmul.f32 %v1240_v40, %v500_v7  ;;  %v382_v10 = vpop.f32.mrf.mxu0  ;;  %v422_v11 = vpop.f32.mrf.mxu1 }
  0xb3   :  { %846 = vst.msk [vmem:[%s1635_s4 + $0xcc] sm:$0xf] %vm794_vm3, %v781_v3  ;;  %v539_v12 = vmul.f32 %v1240_v40, %v382_v10  ;;  %v555_v13 = vmul.f32 %v1240_v40, %v422_v11 }
  0xb4   :  { %799 = vst.msk [vmem:[%s1635_s4 + $0x10] sm:$0xf] %vm794_vm3, %v734_v4  ;;  %v638_v14 = vadd.f32 %v1245_v41, %v570_v8  ;;  %v654_v15 = vadd.f32 %v1245_v41, %v586_v9 }
  0xb5   :  { %815 = vst.msk [vmem:[%s1635_s4 + $0x50] sm:$0xf] %vm794_vm3, %v750_v5  ;;  %v607_v16 = vadd.f32 %v1245_v41, %v539_v12  ;;  %v623_v17 = vadd.f32 %v1245_v41, %v555_v13 }
  0xb6   :  { %v702_v18 = vmax.f32 %v638_v14, 0.0  ;;  %v718_v19 = vmax.f32 %v654_v15, 0.0 }
  0xb7   :  { %v671_v20 = vmax.f32 %v607_v16, 0.0  ;;  %v687_v21 = vmax.f32 %v623_v17, 0.0 }
  0xb8   :  { %v766_v22 = vpack.c.bf16 %v702_v18, %v702_v18  ;;  %v782_v23 = vpack.c.bf16 %v718_v19, %v718_v19 }
  0xb9   :  { %v735_v24 = vpack.c.bf16 %v671_v20, %v671_v20  ;;  %v751_v25 = vpack.c.bf16 %v687_v21, %v687_v21  ;;  %v462_v26 = vpop.f32.mrf.mxu2  ;;  %v502_v27 = vpop.f32.mrf.mxu3 }
  0xba   :  { %831 = vst.msk [vmem:[%s1635_s4 + $0x90] sm:$0xf] %vm794_vm3, %v766_v22  ;;  %v571_v28 = vmul.f32 %v1240_v40, %v462_v26  ;;  %v587_v29 = vmul.f32 %v1240_v40, %v502_v27  ;;  %v385_v30 = vpop.f32.mrf.mxu0  ;;  %v425_v31 = vpop.f32.mrf.mxu1 }
  0xbb   :  { %847 = vst.msk [vmem:[%s1635_s4 + $0xd0] sm:$0xf] %vm794_vm3, %v782_v23  ;;  %v540_v32 = vmul.f32 %v1240_v40, %v385_v30  ;;  %v556_v33 = vmul.f32 %v1240_v40, %v425_v31 }
  0xbc   :  { %800 = vst.msk [vmem:[%s1635_s4 + $0x14] sm:$0xf] %vm794_vm3, %v735_v24  ;;  %v639_v34 = vadd.f32 %v1245_v41, %v571_v28  ;;  %v655_v35 = vadd.f32 %v1245_v41, %v587_v29 }
  0xbd   :  { %816 = vst.msk [vmem:[%s1635_s4 + $0x54] sm:$0xf] %vm794_vm3, %v751_v25  ;;  %v608_v36 = vadd.f32 %v1245_v41, %v540_v32  ;;  %v624_v37 = vadd.f32 %v1245_v41, %v556_v33 }
  0xbe   :  { %v703_v38 = vmax.f32 %v639_v34, 0.0  ;;  %v719_v39 = vmax.f32 %v655_v35, 0.0 }
  0xbf   :  { %v672_v42 = vmax.f32 %v608_v36, 0.0  ;;  %v688_v43 = vmax.f32 %v624_v37, 0.0 }
  0xc0   :  { %v767_v44 = vpack.c.bf16 %v703_v38, %v703_v38  ;;  %v783_v45 = vpack.c.bf16 %v719_v39, %v719_v39 }
  0xc1   :  { %v736_v46 = vpack.c.bf16 %v672_v42, %v672_v42  ;;  %v752_v47 = vpack.c.bf16 %v688_v43, %v688_v43  ;;  %v465_v48 = vpop.f32.mrf.mxu2  ;;  %v505_v49 = vpop.f32.mrf.mxu3 }
  0xc2   :  { %832 = vst.msk [vmem:[%s1635_s4 + $0x94] sm:$0xf] %vm794_vm3, %v767_v44  ;;  %v572_v50 = vmul.f32 %v1240_v40, %v465_v48  ;;  %v588_v51 = vmul.f32 %v1240_v40, %v505_v49  ;;  %v387_v52 = vpop.f32.mrf.mxu0  ;;  %v427_v53 = vpop.f32.mrf.mxu1 }
  0xc3   :  { %848 = vst.msk [vmem:[%s1635_s4 + $0xd4] sm:$0xf] %vm794_vm3, %v783_v45  ;;  %v541_v54 = vmul.f32 %v1240_v40, %v387_v52  ;;  %v557_v55 = vmul.f32 %v1240_v40, %v427_v53 }
  0xc4   :  { %801 = vst.msk [vmem:[%s1635_s4 + $0x18] sm:$0xf] %vm794_vm3, %v736_v46  ;;  %v640_v56 = vadd.f32 %v1245_v41, %v572_v50  ;;  %v656_v57 = vadd.f32 %v1245_v41, %v588_v51 }
  0xc5   :  { %817 = vst.msk [vmem:[%s1635_s4 + $0x58] sm:$0xf] %vm794_vm3, %v752_v47  ;;  %v609_v58 = vadd.f32 %v1245_v41, %v541_v54  ;;  %v625_v59 = vadd.f32 %v1245_v41, %v557_v55 }
  0xc6   :  { %v704_v60 = vmax.f32 %v640_v56, 0.0  ;;  %v720_v61 = vmax.f32 %v656_v57, 0.0 }
  0xc7   :  { %v673_v62 = vmax.f32 %v609_v58, 0.0  ;;  %v689_v63 = vmax.f32 %v625_v59, 0.0 }
  0xc8   :  { %v768_v0 = vpack.c.bf16 %v704_v60, %v704_v60  ;;  %v784_v1 = vpack.c.bf16 %v720_v61, %v720_v61 }
  0xc9   :  { %v737_v2 = vpack.c.bf16 %v673_v62, %v673_v62  ;;  %v753_v3 = vpack.c.bf16 %v689_v63, %v689_v63  ;;  %v467_v4 = vpop.f32.mrf.mxu2  ;;  %v507_v5 = vpop.f32.mrf.mxu3 }
  0xca   :  { %833 = vst.msk [vmem:[%s1635_s4 + $0x98] sm:$0xf] %vm794_vm3, %v768_v0  ;;  %v573_v6 = vmul.f32 %v1240_v40, %v467_v4  ;;  %v589_v7 = vmul.f32 %v1240_v40, %v507_v5  ;;  %v390_v8 = vpop.f32.mrf.mxu0  ;;  %v430_v9 = vpop.f32.mrf.mxu1 }
  0xcb   :  { %849 = vst.msk [vmem:[%s1635_s4 + $0xd8] sm:$0xf] %vm794_vm3, %v784_v1  ;;  %v542_v10 = vmul.f32 %v1240_v40, %v390_v8  ;;  %v558_v11 = vmul.f32 %v1240_v40, %v430_v9 }
  0xcc   :  { %802 = vst.msk [vmem:[%s1635_s4 + $0x1c] sm:$0xf] %vm794_vm3, %v737_v2  ;;  %v641_v12 = vadd.f32 %v1245_v41, %v573_v6  ;;  %v657_v13 = vadd.f32 %v1245_v41, %v589_v7 }
  0xcd   :  { %818 = vst.msk [vmem:[%s1635_s4 + $0x5c] sm:$0xf] %vm794_vm3, %v753_v3  ;;  %v610_v14 = vadd.f32 %v1245_v41, %v542_v10  ;;  %v626_v15 = vadd.f32 %v1245_v41, %v558_v11 }
  0xce   :  { %v705_v16 = vmax.f32 %v641_v12, 0.0  ;;  %v721_v17 = vmax.f32 %v657_v13, 0.0 }
  0xcf   :  { %v674_v18 = vmax.f32 %v610_v14, 0.0  ;;  %v690_v19 = vmax.f32 %v626_v15, 0.0 }
  0xd0   :  { %v769_v20 = vpack.c.bf16 %v705_v16, %v705_v16  ;;  %v785_v21 = vpack.c.bf16 %v721_v17, %v721_v17 }
  0xd1   :  { %v738_v22 = vpack.c.bf16 %v674_v18, %v674_v18  ;;  %v754_v23 = vpack.c.bf16 %v690_v19, %v690_v19  ;;  %v470_v24 = vpop.f32.mrf.mxu2  ;;  %v510_v25 = vpop.f32.mrf.mxu3 }
  0xd2   :  { %834 = vst.msk [vmem:[%s1635_s4 + $0x9c] sm:$0xf] %vm794_vm3, %v769_v20  ;;  %v574_v26 = vmul.f32 %v1240_v40, %v470_v24  ;;  %v590_v27 = vmul.f32 %v1240_v40, %v510_v25  ;;  %v392_v28 = vpop.f32.mrf.mxu0  ;;  %v432_v29 = vpop.f32.mrf.mxu1 }
  0xd3   :  { %850 = vst.msk [vmem:[%s1635_s4 + $0xdc] sm:$0xf] %vm794_vm3, %v785_v21  ;;  %v543_v30 = vmul.f32 %v1240_v40, %v392_v28  ;;  %v559_v31 = vmul.f32 %v1240_v40, %v432_v29 }
  0xd4   :  { %803 = vst.msk [vmem:[%s1635_s4 + $0x20] sm:$0xf] %vm794_vm3, %v738_v22  ;;  %v642_v32 = vadd.f32 %v1245_v41, %v574_v26  ;;  %v658_v33 = vadd.f32 %v1245_v41, %v590_v27 }
  0xd5   :  { %819 = vst.msk [vmem:[%s1635_s4 + $0x60] sm:$0xf] %vm794_vm3, %v754_v23  ;;  %v611_v34 = vadd.f32 %v1245_v41, %v543_v30  ;;  %v627_v35 = vadd.f32 %v1245_v41, %v559_v31 }
  0xd6   :  { %v706_v36 = vmax.f32 %v642_v32, 0.0  ;;  %v722_v37 = vmax.f32 %v658_v33, 0.0 }
  0xd7   :  { %v675_v38 = vmax.f32 %v611_v34, 0.0  ;;  %v691_v39 = vmax.f32 %v627_v35, 0.0 }
  0xd8   :  { %v770_v42 = vpack.c.bf16 %v706_v36, %v706_v36  ;;  %v786_v43 = vpack.c.bf16 %v722_v37, %v722_v37 }
  0xd9   :  { %v739_v44 = vpack.c.bf16 %v675_v38, %v675_v38  ;;  %v755_v45 = vpack.c.bf16 %v691_v39, %v691_v39  ;;  %v472_v46 = vpop.f32.mrf.mxu2  ;;  %v512_v47 = vpop.f32.mrf.mxu3 }
  0xda   :  { %835 = vst.msk [vmem:[%s1635_s4 + $0xa0] sm:$0xf] %vm794_vm3, %v770_v42  ;;  %v575_v48 = vmul.f32 %v1240_v40, %v472_v46  ;;  %v591_v49 = vmul.f32 %v1240_v40, %v512_v47  ;;  %v395_v50 = vpop.f32.mrf.mxu0  ;;  %v435_v51 = vpop.f32.mrf.mxu1 }
  0xdb   :  { %851 = vst.msk [vmem:[%s1635_s4 + $0xe0] sm:$0xf] %vm794_vm3, %v786_v43  ;;  %v544_v52 = vmul.f32 %v1240_v40, %v395_v50  ;;  %v560_v53 = vmul.f32 %v1240_v40, %v435_v51 }
  0xdc   :  { %804 = vst.msk [vmem:[%s1635_s4 + $0x24] sm:$0xf] %vm794_vm3, %v739_v44  ;;  %v643_v54 = vadd.f32 %v1245_v41, %v575_v48  ;;  %v659_v55 = vadd.f32 %v1245_v41, %v591_v49 }
  0xdd   :  { %820 = vst.msk [vmem:[%s1635_s4 + $0x64] sm:$0xf] %vm794_vm3, %v755_v45  ;;  %v612_v56 = vadd.f32 %v1245_v41, %v544_v52  ;;  %v628_v57 = vadd.f32 %v1245_v41, %v560_v53 }
  0xde   :  { %v707_v58 = vmax.f32 %v643_v54, 0.0  ;;  %v723_v59 = vmax.f32 %v659_v55, 0.0 }
  0xdf   :  { %v676_v60 = vmax.f32 %v612_v56, 0.0  ;;  %v692_v61 = vmax.f32 %v628_v57, 0.0 }
  0xe0   :  { %v771_v62 = vpack.c.bf16 %v707_v58, %v707_v58  ;;  %v787_v63 = vpack.c.bf16 %v723_v59, %v723_v59 }
  0xe1   :  { %v740_v0 = vpack.c.bf16 %v676_v60, %v676_v60  ;;  %v756_v1 = vpack.c.bf16 %v692_v61, %v692_v61  ;;  %v475_v2 = vpop.f32.mrf.mxu2  ;;  %v515_v3 = vpop.f32.mrf.mxu3 }
  0xe2   :  { %836 = vst.msk [vmem:[%s1635_s4 + $0xa4] sm:$0xf] %vm794_vm3, %v771_v62  ;;  %v576_v4 = vmul.f32 %v1240_v40, %v475_v2  ;;  %v592_v5 = vmul.f32 %v1240_v40, %v515_v3  ;;  %v397_v6 = vpop.f32.mrf.mxu0  ;;  %v437_v7 = vpop.f32.mrf.mxu1 }
  0xe3   :  { %852 = vst.msk [vmem:[%s1635_s4 + $0xe4] sm:$0xf] %vm794_vm3, %v787_v63  ;;  %v545_v8 = vmul.f32 %v1240_v40, %v397_v6  ;;  %v561_v9 = vmul.f32 %v1240_v40, %v437_v7 }
  0xe4   :  { %805 = vst.msk [vmem:[%s1635_s4 + $0x28] sm:$0xf] %vm794_vm3, %v740_v0  ;;  %v644_v10 = vadd.f32 %v1245_v41, %v576_v4  ;;  %v660_v11 = vadd.f32 %v1245_v41, %v592_v5 }
  0xe5   :  { %821 = vst.msk [vmem:[%s1635_s4 + $0x68] sm:$0xf] %vm794_vm3, %v756_v1  ;;  %v613_v12 = vadd.f32 %v1245_v41, %v545_v8  ;;  %v629_v13 = vadd.f32 %v1245_v41, %v561_v9 }
  0xe6   :  { %v708_v14 = vmax.f32 %v644_v10, 0.0  ;;  %v724_v15 = vmax.f32 %v660_v11, 0.0 }
  0xe7   :  { %v677_v16 = vmax.f32 %v613_v12, 0.0  ;;  %v693_v17 = vmax.f32 %v629_v13, 0.0 }
  0xe8   :  { %v772_v18 = vpack.c.bf16 %v708_v14, %v708_v14  ;;  %v788_v19 = vpack.c.bf16 %v724_v15, %v724_v15 }
  0xe9   :  { %v741_v20 = vpack.c.bf16 %v677_v16, %v677_v16  ;;  %v757_v21 = vpack.c.bf16 %v693_v17, %v693_v17  ;;  %v477_v22 = vpop.f32.mrf.mxu2  ;;  %v517_v23 = vpop.f32.mrf.mxu3 }
  0xea   :  { %837 = vst.msk [vmem:[%s1635_s4 + $0xa8] sm:$0xf] %vm794_vm3, %v772_v18  ;;  %v577_v24 = vmul.f32 %v1240_v40, %v477_v22  ;;  %v593_v25 = vmul.f32 %v1240_v40, %v517_v23  ;;  %v400_v26 = vpop.f32.mrf.mxu0  ;;  %v440_v27 = vpop.f32.mrf.mxu1 }
  0xeb   :  { %853 = vst.msk [vmem:[%s1635_s4 + $0xe8] sm:$0xf] %vm794_vm3, %v788_v19  ;;  %v546_v28 = vmul.f32 %v1240_v40, %v400_v26  ;;  %v562_v29 = vmul.f32 %v1240_v40, %v440_v27 }
  0xec   :  { %806 = vst.msk [vmem:[%s1635_s4 + $0x2c] sm:$0xf] %vm794_vm3, %v741_v20  ;;  %v645_v30 = vadd.f32 %v1245_v41, %v577_v24  ;;  %v661_v31 = vadd.f32 %v1245_v41, %v593_v25 }
  0xed   :  { %822 = vst.msk [vmem:[%s1635_s4 + $0x6c] sm:$0xf] %vm794_vm3, %v757_v21  ;;  %v614_v32 = vadd.f32 %v1245_v41, %v546_v28  ;;  %v630_v33 = vadd.f32 %v1245_v41, %v562_v29 }
  0xee   :  { %v709_v34 = vmax.f32 %v645_v30, 0.0  ;;  %v725_v35 = vmax.f32 %v661_v31, 0.0 }
  0xef   :  { %v678_v36 = vmax.f32 %v614_v32, 0.0  ;;  %v694_v37 = vmax.f32 %v630_v33, 0.0 }
  0xf0   :  { %v773_v38 = vpack.c.bf16 %v709_v34, %v709_v34  ;;  %v789_v39 = vpack.c.bf16 %v725_v35, %v725_v35 }
  0xf1   :  { %v742_v42 = vpack.c.bf16 %v678_v36, %v678_v36  ;;  %v758_v43 = vpack.c.bf16 %v694_v37, %v694_v37  ;;  %v480_v44 = vpop.f32.mrf.mxu2  ;;  %v520_v45 = vpop.f32.mrf.mxu3 }
  0xf2   :  { %838 = vst.msk [vmem:[%s1635_s4 + $0xac] sm:$0xf] %vm794_vm3, %v773_v38  ;;  %v578_v46 = vmul.f32 %v1240_v40, %v480_v44  ;;  %v594_v47 = vmul.f32 %v1240_v40, %v520_v45  ;;  %v402_v48 = vpop.f32.mrf.mxu0  ;;  %v442_v49 = vpop.f32.mrf.mxu1 }
  0xf3   :  { %854 = vst.msk [vmem:[%s1635_s4 + $0xec] sm:$0xf] %vm794_vm3, %v789_v39  ;;  %v547_v50 = vmul.f32 %v1240_v40, %v402_v48  ;;  %v563_v51 = vmul.f32 %v1240_v40, %v442_v49 }
  0xf4   :  { %807 = vst.msk [vmem:[%s1635_s4 + $0x30] sm:$0xf] %vm794_vm3, %v742_v42  ;;  %v646_v52 = vadd.f32 %v1245_v41, %v578_v46  ;;  %v662_v53 = vadd.f32 %v1245_v41, %v594_v47 }
  0xf5   :  { %823 = vst.msk [vmem:[%s1635_s4 + $0x70] sm:$0xf] %vm794_vm3, %v758_v43  ;;  %v615_v54 = vadd.f32 %v1245_v41, %v547_v50  ;;  %v631_v55 = vadd.f32 %v1245_v41, %v563_v51 }
  0xf6   :  { %v710_v56 = vmax.f32 %v646_v52, 0.0  ;;  %v726_v57 = vmax.f32 %v662_v53, 0.0 }
  0xf7   :  { %v679_v58 = vmax.f32 %v615_v54, 0.0  ;;  %v695_v59 = vmax.f32 %v631_v55, 0.0 }
  0xf8   :  { %v774_v60 = vpack.c.bf16 %v710_v56, %v710_v56  ;;  %v790_v61 = vpack.c.bf16 %v726_v57, %v726_v57 }
  0xf9   :  { %v743_v62 = vpack.c.bf16 %v679_v58, %v679_v58  ;;  %v759_v63 = vpack.c.bf16 %v695_v59, %v695_v59  ;;  %v482_v0 = vpop.f32.mrf.mxu2  ;;  %v522_v1 = vpop.f32.mrf.mxu3 }
  0xfa   :  { %839 = vst.msk [vmem:[%s1635_s4 + $0xb0] sm:$0xf] %vm794_vm3, %v774_v60  ;;  %v579_v2 = vmul.f32 %v1240_v40, %v482_v0  ;;  %v595_v3 = vmul.f32 %v1240_v40, %v522_v1  ;;  %v405_v4 = vpop.f32.mrf.mxu0  ;;  %v445_v5 = vpop.f32.mrf.mxu1 }
  0xfb   :  { %855 = vst.msk [vmem:[%s1635_s4 + $0xf0] sm:$0xf] %vm794_vm3, %v790_v61  ;;  %v548_v6 = vmul.f32 %v1240_v40, %v405_v4  ;;  %v564_v7 = vmul.f32 %v1240_v40, %v445_v5 }
  0xfc   :  { %808 = vst.msk [vmem:[%s1635_s4 + $0x34] sm:$0xf] %vm794_vm3, %v743_v62  ;;  %v647_v8 = vadd.f32 %v1245_v41, %v579_v2  ;;  %v663_v9 = vadd.f32 %v1245_v41, %v595_v3 }
  0xfd   :  { %824 = vst.msk [vmem:[%s1635_s4 + $0x74] sm:$0xf] %vm794_vm3, %v759_v63  ;;  %v616_v10 = vadd.f32 %v1245_v41, %v548_v6  ;;  %v632_v11 = vadd.f32 %v1245_v41, %v564_v7 }
  0xfe   :  { %v711_v12 = vmax.f32 %v647_v8, 0.0  ;;  %v727_v13 = vmax.f32 %v663_v9, 0.0 }
  0xff   :  { %v680_v14 = vmax.f32 %v616_v10, 0.0  ;;  %v696_v15 = vmax.f32 %v632_v11, 0.0 }
 0x100   :  { %v775_v16 = vpack.c.bf16 %v711_v12, %v711_v12  ;;  %v791_v17 = vpack.c.bf16 %v727_v13, %v727_v13 }
 0x101   :  { %v744_v18 = vpack.c.bf16 %v680_v14, %v680_v14  ;;  %v760_v19 = vpack.c.bf16 %v696_v15, %v696_v15  ;;  %v485_v20 = vpop.f32.mrf.mxu2  ;;  %v525_v21 = vpop.f32.mrf.mxu3 }
 0x102   :  { %840 = vst.msk [vmem:[%s1635_s4 + $0xb4] sm:$0xf] %vm794_vm3, %v775_v16  ;;  %v580_v22 = vmul.f32 %v1240_v40, %v485_v20  ;;  %v596_v23 = vmul.f32 %v1240_v40, %v525_v21  ;;  %v407_v24 = vpop.f32.mrf.mxu0  ;;  %v447_v25 = vpop.f32.mrf.mxu1 }
 0x103   :  { %856 = vst.msk [vmem:[%s1635_s4 + $0xf4] sm:$0xf] %vm794_vm3, %v791_v17  ;;  %v549_v26 = vmul.f32 %v1240_v40, %v407_v24  ;;  %v565_v27 = vmul.f32 %v1240_v40, %v447_v25 }
 0x104   :  { %809 = vst.msk [vmem:[%s1635_s4 + $0x38] sm:$0xf] %vm794_vm3, %v744_v18  ;;  %v648_v28 = vadd.f32 %v1245_v41, %v580_v22  ;;  %v664_v29 = vadd.f32 %v1245_v41, %v596_v23 }
 0x105   :  { %825 = vst.msk [vmem:[%s1635_s4 + $0x78] sm:$0xf] %vm794_vm3, %v760_v19  ;;  %v617_v30 = vadd.f32 %v1245_v41, %v549_v26  ;;  %v633_v31 = vadd.f32 %v1245_v41, %v565_v27 }
 0x106   :  { %v712_v32 = vmax.f32 %v648_v28, 0.0  ;;  %v728_v33 = vmax.f32 %v664_v29, 0.0 }
 0x107   :  { %v681_v34 = vmax.f32 %v617_v30, 0.0  ;;  %v697_v35 = vmax.f32 %v633_v31, 0.0 }
 0x108   :  { %v776_v36 = vpack.c.bf16 %v712_v32, %v712_v32  ;;  %v792_v37 = vpack.c.bf16 %v728_v33, %v728_v33 }
 0x109   :  { %v745_v38 = vpack.c.bf16 %v681_v34, %v681_v34  ;;  %v761_v39 = vpack.c.bf16 %v697_v35, %v697_v35  ;;  %v487_v42 = vpop.f32.mrf.mxu2  ;;  %v527_v43 = vpop.f32.mrf.mxu3 }
 0x10a   :  { %841 = vst.msk [vmem:[%s1635_s4 + $0xb8] sm:$0xf] %vm794_vm3, %v776_v36  ;;  %v581_v44 = vmul.f32 %v1240_v40, %v487_v42  ;;  %v597_v45 = vmul.f32 %v1240_v40, %v527_v43 }
 0x10b   :  { %857 = vst.msk [vmem:[%s1635_s4 + $0xf8] sm:$0xf] %vm794_vm3, %v792_v37 }
 0x10c   :  { %810 = vst.msk [vmem:[%s1635_s4 + $0x3c] sm:$0xf] %vm794_vm3, %v745_v38  ;;  %v649_v46 = vadd.f32 %v1245_v41, %v581_v44  ;;  %v665_v47 = vadd.f32 %v1245_v41, %v597_v45 }
 0x10d   :  { %826 = vst.msk [vmem:[%s1635_s4 + $0x7c] sm:$0xf] %vm794_vm3, %v761_v39 }
 0x10e   :  { %v713_v40 = vmax.f32 %v649_v46, 0.0  ;;  %v729_v48 = vmax.f32 %v665_v47, 0.0 }
 0x110   :  { %v777_v49 = vpack.c.bf16 %v713_v40, %v713_v40  ;;  %v793_v50 = vpack.c.bf16 %v729_v48, %v729_v48 }
 0x112   :  { %842 = vst.msk [vmem:[%s1635_s4 + $0xbc] sm:$0xf] %vm794_vm3, %v777_v49 }
 0x113   :  { %858 = vst.msk [vmem:[%s1635_s4 + $0xfc] sm:$0xf] %vm794_vm3, %v793_v50 }

// kernel: feature_extractor_forward.11
= control target key start
LH: loop header
LB: loop body
LE: loop exit
PB: predicated region body
PF: predicated region fallthrough
CT: control target
= control target key end

     0   :  { %vm267_vm0 = vcmask 519168   ;;  %s665_s0 = inlined_call_operand.vmem [shape: bf16[4,2,8,8,64], index: 0, kind: input, shape index: {}]   ;;  %s666_s1 = inlined_call_operand.vmem [shape: bf16[2,8,8,64], index: 1, kind: output, shape index: {}]  }
   0x1   :  { %v337_v0 = vld [vmem:[%s665_s0] sm:$0xff]   ;;  %v464_v8 = vld [vmem:[%s665_s0 + $0x8] sm:$0xff]   ;;  %v465_v24 = vld [vmem:[%s665_s0 + $0x10] sm:$0xff]  }
   0x2   :  { %v471_v1 = vld [vmem:[%s665_s0 + $0x40] sm:$0xff]   ;;  %v338_v3 = vunpack.c.l.bf16 %v337_v0  ;;  %v339_v7 = vunpack.c.h.bf16 %v337_v0  ;;  %v472_v9 = vld [vmem:[%s665_s0 + $0x48] sm:$0xff]   ;;  %v342_v17 = vunpack.c.l.bf16 %v464_v8  ;;  %v473_v25 = vld [vmem:[%s665_s0 + $0x50] sm:$0xff]   ;;  %v343_v28 = vunpack.c.h.bf16 %v464_v8 }
   0x3   :  { %v479_v2 = vld [vmem:[%s665_s0 + $0x80] sm:$0xff]   ;;  %v370_v4 = vunpack.c.l.bf16 %v471_v1  ;;  %v371_v11 = vunpack.c.h.bf16 %v471_v1  ;;  %v480_v14 = vld [vmem:[%s665_s0 + $0x88] sm:$0xff]   ;;  %v374_v18 = vunpack.c.l.bf16 %v472_v9  ;;  %v481_v26 = vld [vmem:[%s665_s0 + $0x90] sm:$0xff]   ;;  %v375_v29 = vunpack.c.h.bf16 %v472_v9 }
   0x4   :  { %v402_v5 = vunpack.c.l.bf16 %v479_v2  ;;  %v487_v6 = vld [vmem:[%s665_s0 + $0xc0] sm:$0xff]   ;;  %v403_v12 = vunpack.c.h.bf16 %v479_v2  ;;  %v488_v15 = vld [vmem:[%s665_s0 + $0xc8] sm:$0xff]   ;;  %v406_v19 = vunpack.c.l.bf16 %v480_v14  ;;  %v407_v30 = vunpack.c.h.bf16 %v480_v14  ;;  %v489_v35 = vld [vmem:[%s665_s0 + $0xd0] sm:$0xff]  }
   0x5   :  { %v434_v10 = vunpack.c.l.bf16 %v487_v6  ;;  %v435_v13 = vunpack.c.h.bf16 %v487_v6  ;;  %v73_v16 = vmax.f32 %v338_v3, %v370_v4  ;;  %v74_v21 = vmax.f32 %v339_v7, %v371_v11  ;;  %v466_v44 = vld [vmem:[%s665_s0 + $0x18] sm:$0xff]   ;;  %v467_v0 = vld [vmem:[%s665_s0 + $0x20] sm:$0xff]  }
   0x6   :  { %v438_v23 = vunpack.c.l.bf16 %v488_v15  ;;  %v75_v27 = vmax.f32 %v342_v17, %v374_v18  ;;  %v439_v34 = vunpack.c.h.bf16 %v488_v15  ;;  %v76_v36 = vmax.f32 %v343_v28, %v375_v29  ;;  %v474_v45 = vld [vmem:[%s665_s0 + $0x58] sm:$0xff]   ;;  %v475_v1 = vld [vmem:[%s665_s0 + $0x60] sm:$0xff]  }
   0x7   :  { %v171_v20 = vmax.f32 %v402_v5, %v434_v10  ;;  %v172_v22 = vmax.f32 %v403_v12, %v435_v13  ;;  %v346_v37 = vunpack.c.l.bf16 %v465_v24  ;;  %v378_v38 = vunpack.c.l.bf16 %v473_v25  ;;  %v482_v50 = vld [vmem:[%s665_s0 + $0x98] sm:$0xff]   ;;  %v483_v6 = vld [vmem:[%s665_s0 + $0xa0] sm:$0xff]  }
   0x8   :  { %v173_v33 = vmax.f32 %v406_v19, %v438_v23  ;;  %v410_v39 = vunpack.c.l.bf16 %v481_v26  ;;  %v174_v43 = vmax.f32 %v407_v30, %v439_v34  ;;  %v442_v47 = vunpack.c.l.bf16 %v489_v35  ;;  %v490_v51 = vld [vmem:[%s665_s0 + $0xd8] sm:$0xff]   ;;  %v491_v11 = vld [vmem:[%s665_s0 + $0xe0] sm:$0xff]  }
   0x9   :  { %v235_v31 = vmax.f32 %v73_v16, %v171_v20  ;;  %v236_v32 = vmax.f32 %v74_v21, %v172_v22  ;;  %v77_v46 = vmax.f32 %v346_v37, %v378_v38  ;;  %v347_v48 = vunpack.c.h.bf16 %v465_v24  ;;  %v468_v20 = vld [vmem:[%s665_s0 + $0x28] sm:$0xff]  }
   0xa   :  { %v237_v42 = vmax.f32 %v75_v27, %v173_v33  ;;  %v379_v49 = vunpack.c.h.bf16 %v473_v25  ;;  %v238_v53 = vmax.f32 %v76_v36, %v174_v43  ;;  %v411_v54 = vunpack.c.h.bf16 %v481_v26  ;;  %v476_v21 = vld [vmem:[%s665_s0 + $0x68] sm:$0xff]  }
   0xb   :  { %v251_v40 = vpack.c.bf16 %v235_v31, %v235_v31  ;;  %v252_v41 = vpack.c.bf16 %v236_v32, %v236_v32  ;;  %v443_v55 = vunpack.c.h.bf16 %v489_v35  ;;  %v175_v56 = vmax.f32 %v410_v39, %v442_v47  ;;  %v484_v26 = vld [vmem:[%s665_s0 + $0xa8] sm:$0xff]  }
   0xc   :  { %v253_v52 = vpack.c.bf16 %v237_v42, %v237_v42  ;;  %v78_v57 = vmax.f32 %v347_v48, %v379_v49  ;;  %v350_v58 = vunpack.c.l.bf16 %v466_v44  ;;  %v382_v59 = vunpack.c.l.bf16 %v474_v45  ;;  %v492_v27 = vld [vmem:[%s665_s0 + $0xe8] sm:$0xff]  }
   0xd   :  { %268 = vst.msk [vmem:[%s666_s1] sm:$0xf] %vm267_vm0, %v251_v40  ;;  %v254_v60 = vpack.c.bf16 %v238_v53, %v238_v53  ;;  %v176_v61 = vmax.f32 %v411_v54, %v443_v55  ;;  %v414_v62 = vunpack.c.l.bf16 %v482_v50  ;;  %v446_v63 = vunpack.c.l.bf16 %v490_v51  ;;  %v469_v40 = vld [vmem:[%s665_s0 + $0x30] sm:$0xff]  }
   0xe   :  { %269 = vst.msk [vmem:[%s666_s1 + $0x4] sm:$0xf] %vm267_vm0, %v252_v41  ;;  %v239_v2 = vmax.f32 %v77_v46, %v175_v56  ;;  %v79_v3 = vmax.f32 %v350_v58, %v382_v59  ;;  %v351_v4 = vunpack.c.h.bf16 %v466_v44  ;;  %v383_v5 = vunpack.c.h.bf16 %v474_v45  ;;  %v477_v41 = vld [vmem:[%s665_s0 + $0x70] sm:$0xff]  }
   0xf   :  { %270 = vst.msk [vmem:[%s666_s1 + $0x8] sm:$0xf] %vm267_vm0, %v253_v52  ;;  %v240_v7 = vmax.f32 %v78_v57, %v176_v61  ;;  %v177_v8 = vmax.f32 %v414_v62, %v446_v63  ;;  %v415_v9 = vunpack.c.h.bf16 %v482_v50  ;;  %v447_v10 = vunpack.c.h.bf16 %v490_v51  ;;  %v485_v46 = vld [vmem:[%s665_s0 + $0xb0] sm:$0xff]   ;;  %v478_v61 = vld [vmem:[%s665_s0 + $0x78] sm:$0xff]  }
  0x10   :  { %271 = vst.msk [vmem:[%s666_s1 + $0xc] sm:$0xf] %vm267_vm0, %v254_v60  ;;  %v255_v12 = vpack.c.bf16 %v239_v2, %v239_v2  ;;  %v80_v13 = vmax.f32 %v351_v4, %v383_v5  ;;  %v354_v14 = vunpack.c.l.bf16 %v467_v0  ;;  %v386_v15 = vunpack.c.l.bf16 %v475_v1  ;;  %v493_v51 = vld [vmem:[%s665_s0 + $0xf0] sm:$0xff]   ;;  %v470_v60 = vld [vmem:[%s665_s0 + $0x38] sm:$0xff]  }
  0x11   :  { %v256_v16 = vpack.c.bf16 %v240_v7, %v240_v7  ;;  %v241_v17 = vmax.f32 %v79_v3, %v177_v8  ;;  %v178_v18 = vmax.f32 %v415_v9, %v447_v10  ;;  %v418_v19 = vunpack.c.l.bf16 %v483_v6  ;;  %v486_v2 = vld [vmem:[%s665_s0 + $0xb8] sm:$0xff]  }
  0x12   :  { %272 = vst.msk [vmem:[%s666_s1 + $0x10] sm:$0xf] %vm267_vm0, %v255_v12  ;;  %v81_v22 = vmax.f32 %v354_v14, %v386_v15  ;;  %v450_v23 = vunpack.c.l.bf16 %v491_v11  ;;  %v355_v24 = vunpack.c.h.bf16 %v467_v0  ;;  %v387_v25 = vunpack.c.h.bf16 %v475_v1  ;;  %v494_v3 = vld [vmem:[%s665_s0 + $0xf8] sm:$0xff]  }
  0x13   :  { %273 = vst.msk [vmem:[%s666_s1 + $0x14] sm:$0xf] %vm267_vm0, %v256_v16  ;;  %v257_v28 = vpack.c.bf16 %v241_v17, %v241_v17  ;;  %v242_v29 = vmax.f32 %v80_v13, %v178_v18  ;;  %v419_v30 = vunpack.c.h.bf16 %v483_v6  ;;  %v451_v31 = vunpack.c.h.bf16 %v491_v11 }
  0x14   :  { %v179_v32 = vmax.f32 %v418_v19, %v450_v23  ;;  %v82_v33 = vmax.f32 %v355_v24, %v387_v25  ;;  %v358_v34 = vunpack.c.l.bf16 %v468_v20  ;;  %v390_v35 = vunpack.c.l.bf16 %v476_v21 }
  0x15   :  { %274 = vst.msk [vmem:[%s666_s1 + $0x18] sm:$0xf] %vm267_vm0, %v257_v28  ;;  %v258_v36 = vpack.c.bf16 %v242_v29, %v242_v29  ;;  %v180_v37 = vmax.f32 %v419_v30, %v451_v31  ;;  %v422_v38 = vunpack.c.l.bf16 %v484_v26  ;;  %v454_v39 = vunpack.c.l.bf16 %v492_v27 }
  0x16   :  { %v243_v42 = vmax.f32 %v81_v22, %v179_v32  ;;  %v83_v43 = vmax.f32 %v358_v34, %v390_v35  ;;  %v359_v44 = vunpack.c.h.bf16 %v468_v20  ;;  %v391_v45 = vunpack.c.h.bf16 %v476_v21 }
  0x17   :  { %275 = vst.msk [vmem:[%s666_s1 + $0x1c] sm:$0xf] %vm267_vm0, %v258_v36  ;;  %v244_v47 = vmax.f32 %v82_v33, %v180_v37  ;;  %v181_v48 = vmax.f32 %v422_v38, %v454_v39  ;;  %v423_v49 = vunpack.c.h.bf16 %v484_v26  ;;  %v455_v50 = vunpack.c.h.bf16 %v492_v27 }
  0x18   :  { %v259_v52 = vpack.c.bf16 %v243_v42, %v243_v42  ;;  %v84_v53 = vmax.f32 %v359_v44, %v391_v45  ;;  %v362_v54 = vunpack.c.l.bf16 %v469_v40  ;;  %v394_v55 = vunpack.c.l.bf16 %v477_v41 }
  0x19   :  { %v260_v56 = vpack.c.bf16 %v244_v47, %v244_v47  ;;  %v245_v57 = vmax.f32 %v83_v43, %v181_v48  ;;  %v182_v58 = vmax.f32 %v423_v49, %v455_v50  ;;  %v426_v59 = vunpack.c.l.bf16 %v485_v46 }
  0x1a   :  { %276 = vst.msk [vmem:[%s666_s1 + $0x20] sm:$0xf] %vm267_vm0, %v259_v52  ;;  %v85_v62 = vmax.f32 %v362_v54, %v394_v55  ;;  %v458_v63 = vunpack.c.l.bf16 %v493_v51  ;;  %v363_v0 = vunpack.c.h.bf16 %v469_v40  ;;  %v395_v1 = vunpack.c.h.bf16 %v477_v41 }
  0x1b   :  { %277 = vst.msk [vmem:[%s666_s1 + $0x24] sm:$0xf] %vm267_vm0, %v260_v56  ;;  %v261_v4 = vpack.c.bf16 %v245_v57, %v245_v57  ;;  %v246_v5 = vmax.f32 %v84_v53, %v182_v58  ;;  %v427_v6 = vunpack.c.h.bf16 %v485_v46  ;;  %v459_v7 = vunpack.c.h.bf16 %v493_v51 }
  0x1c   :  { %v183_v8 = vmax.f32 %v426_v59, %v458_v63  ;;  %v86_v9 = vmax.f32 %v363_v0, %v395_v1  ;;  %v366_v10 = vunpack.c.l.bf16 %v470_v60  ;;  %v398_v11 = vunpack.c.l.bf16 %v478_v61 }
  0x1d   :  { %278 = vst.msk [vmem:[%s666_s1 + $0x28] sm:$0xf] %vm267_vm0, %v261_v4  ;;  %v262_v12 = vpack.c.bf16 %v246_v5, %v246_v5  ;;  %v184_v13 = vmax.f32 %v427_v6, %v459_v7  ;;  %v430_v14 = vunpack.c.l.bf16 %v486_v2  ;;  %v462_v15 = vunpack.c.l.bf16 %v494_v3 }
  0x1e   :  { %v247_v16 = vmax.f32 %v85_v62, %v183_v8  ;;  %v87_v17 = vmax.f32 %v366_v10, %v398_v11  ;;  %v367_v18 = vunpack.c.h.bf16 %v470_v60  ;;  %v399_v19 = vunpack.c.h.bf16 %v478_v61 }
  0x1f   :  { %279 = vst.msk [vmem:[%s666_s1 + $0x2c] sm:$0xf] %vm267_vm0, %v262_v12  ;;  %v248_v20 = vmax.f32 %v86_v9, %v184_v13  ;;  %v185_v21 = vmax.f32 %v430_v14, %v462_v15  ;;  %v431_v22 = vunpack.c.h.bf16 %v486_v2  ;;  %v463_v23 = vunpack.c.h.bf16 %v494_v3 }
  0x20   :  { %v263_v24 = vpack.c.bf16 %v247_v16, %v247_v16  ;;  %v88_v25 = vmax.f32 %v367_v18, %v399_v19 }
  0x21   :  { %v264_v26 = vpack.c.bf16 %v248_v20, %v248_v20  ;;  %v249_v27 = vmax.f32 %v87_v17, %v185_v21  ;;  %v186_v28 = vmax.f32 %v431_v22, %v463_v23 }
  0x22   :  { %280 = vst.msk [vmem:[%s666_s1 + $0x30] sm:$0xf] %vm267_vm0, %v263_v24 }
  0x23   :  { %281 = vst.msk [vmem:[%s666_s1 + $0x34] sm:$0xf] %vm267_vm0, %v264_v26  ;;  %v265_v29 = vpack.c.bf16 %v249_v27, %v249_v27  ;;  %v250_v30 = vmax.f32 %v88_v25, %v186_v28 }
  0x25   :  { %282 = vst.msk [vmem:[%s666_s1 + $0x38] sm:$0xf] %vm267_vm0, %v265_v29  ;;  %v266_v31 = vpack.c.bf16 %v250_v30, %v250_v30 }
  0x27   :  { %283 = vst.msk [vmem:[%s666_s1 + $0x3c] sm:$0xf] %vm267_vm0, %v266_v31 }

// kernel: feature_extractor_forward.10
= control target key start
LH: loop header
LB: loop body
LE: loop exit
PB: predicated region body
PF: predicated region fallthrough
CT: control target
= control target key end

     0   :  { %vm1298_vm0 = vcmask 523264   ;;  %vm2504_vm1 = vcmask 519168   ;;  %s5346_s1 = inlined_call_operand.vmem [shape: bf16[576,64], index: 1, kind: input, shape index: {}]   ;;  %s5347_s0 = inlined_call_operand.vmem [shape: bf16[512,576], index: 0, kind: input, shape index: {}]   ;;  %s5348_s2 = inlined_call_operand.vmem [shape: f32[1,64], index: 2, kind: input, shape index: {}]   ;;  %s5349_s3 = inlined_call_operand.vmem [shape: f32[1,64], index: 3, kind: input, shape index: {}]   ;;  %s5350_s4 = inlined_call_operand.vmem [shape: bf16[512,64], index: 4, kind: output, shape index: {}]  }
   0x1   :  { %v3556_v0 = vld [vmem:[%s5346_s1 + $0x38] sm:$0xff]  ;;  %v3555_v1 = vld [vmem:[%s5346_s1 + $0x30] sm:$0xff]  ;;  %v3554_v2 = vld [vmem:[%s5346_s1 + $0x28] sm:$0xff] }
   0x2   :  { %3585 = vmatpush.bf16.msra.mxu1 %v3556_v0  ;;  %3586 = vmatpush.bf16.msra.mxu2 %v3556_v0  ;;  %v3553_v3 = vld [vmem:[%s5346_s1 + $0x20] sm:$0xff]  ;;  %v3552_v4 = vld [vmem:[%s5346_s1 + $0x18] sm:$0xff]  ;;  %v3551_v5 = vld [vmem:[%s5346_s1 + $0x10] sm:$0xff] }
   0x3   :  { %3587 = vmatpush.bf16.msra.mxu3 %v3556_v0  ;;  %1395 = vmatpush.bf16.msra.mxu0 %v3556_v0  ;;  %v3550_v6 = vld [vmem:[%s5346_s1 + $0x8] sm:$0xff]  ;;  %v3549_v7 = vld [vmem:[%s5346_s1] sm:$0xff]  ;;  %v3431_v9 = vld [vmem:[%s5347_s0 + $0x150] sm:$0xf0] }
   0x4   :  { %v2735_v8 = vld [vmem:[%s5347_s0 + $0x140] sm:$0xf]  ;;  %v3471_v11 = vld [vmem:[%s5347_s0 + $0x290] sm:$0xf0]  ;;  %v3572_v16 = vld [vmem:[%s5346_s1 + $0xb8] sm:$0xff] }
   0x5   :  { %v2895_v10 = vld [vmem:[%s5347_s0 + $0x280] sm:$0xf]  ;;  %v3511_v13 = vld [vmem:[%s5347_s0 + $0x3d0] sm:$0xf0]  ;;  %v3580_v17 = vld [vmem:[%s5346_s1 + $0xf8] sm:$0xff]  ;;  %v2736_v18 = vor.u32 %v3431_v9, %v2735_v8 }
   0x6   :  { %3588 = vmatpush.bf16.msra.mxu1 %v3555_v1  ;;  %3589 = vmatpush.bf16.msra.mxu2 %v3555_v1  ;;  %v3055_v12 = vld [vmem:[%s5347_s0 + $0x3c0] sm:$0xf]  ;;  %v3391_v15 = vld [vmem:[%s5347_s0 + $0x10] sm:$0xf0]  ;;  %v2896_v19 = vor.u32 %v3471_v11, %v2895_v10  ;;  %v3564_v22 = vld [vmem:[%s5346_s1 + $0x78] sm:$0xff] }
   0x7   :  { %3590 = vmatpush.bf16.msra.mxu3 %v3555_v1  ;;  %1396 = vmatpush.bf16.msra.mxu0 %v3555_v1  ;;  %v2575_v14 = vld [vmem:[%s5347_s0] sm:$0xf]  ;;  %v3056_v20 = vor.u32 %v3511_v13, %v3055_v12  ;;  %v3584_v23 = vld [vmem:[%s5346_s1 + $0x118] sm:$0xff]  ;;  %v3571_v24 = vld [vmem:[%s5346_s1 + $0xb0] sm:$0xff] }
   0x8   :  { %v2576_v21 = vor.u32 %v3391_v15, %v2575_v14  ;;  %v3579_v25 = vld [vmem:[%s5346_s1 + $0xf0] sm:$0xff]  ;;  %v3570_v28 = vld [vmem:[%s5346_s1 + $0xa8] sm:$0xff]  ;;  %v3436_v32 = vld [vmem:[%s5347_s0 + $0x178] sm:$0xf0] }
   0x9   :  { %v3563_v26 = vld [vmem:[%s5346_s1 + $0x70] sm:$0xff]  ;;  %v3578_v29 = vld [vmem:[%s5346_s1 + $0xe8] sm:$0xff]  ;;  %v3476_v34 = vld [vmem:[%s5347_s0 + $0x2b8] sm:$0xf0] }
   0xa   :  { %3591 = vmatpush.bf16.msra.mxu1 %v3554_v2  ;;  %3592 = vmatpush.bf16.msra.mxu2 %v3554_v2  ;;  %v3583_v27 = vld [vmem:[%s5346_s1 + $0x110] sm:$0xff]  ;;  %v3562_v30 = vld [vmem:[%s5346_s1 + $0x68] sm:$0xff]  ;;  %v3516_v36 = vld [vmem:[%s5347_s0 + $0x3f8] sm:$0xf0] }
   0xb   :  { %3593 = vmatpush.bf16.msra.mxu3 %v3554_v2  ;;  %1397 = vmatpush.bf16.msra.mxu0 %v3554_v2  ;;  %v2755_v31 = vld [vmem:[%s5347_s0 + $0x168] sm:$0xf]  ;;  %v3396_v38 = vld [vmem:[%s5347_s0 + $0x38] sm:$0xf0]  ;;  %v3569_v43 = vld [vmem:[%s5346_s1 + $0xa0] sm:$0xff] }
   0xc   :  { %v2915_v33 = vld [vmem:[%s5347_s0 + $0x2a8] sm:$0xf]  ;;  %v2756_v39 = vor.u32 %v3436_v32, %v2755_v31  ;;  %v3577_v44 = vld [vmem:[%s5346_s1 + $0xe0] sm:$0xff]  ;;  %v2775_v46 = vld [vmem:[%s5347_s0 + $0x190] sm:$0xf] }
   0xd   :  { %v3075_v35 = vld [vmem:[%s5347_s0 + $0x3e8] sm:$0xf]  ;;  %v2916_v40 = vor.u32 %v3476_v34, %v2915_v33  ;;  %v3561_v45 = vld [vmem:[%s5346_s1 + $0x60] sm:$0xff]  ;;  %v2935_v48 = vld [vmem:[%s5347_s0 + $0x2d0] sm:$0xf] }
   0xe   :  { %3594 = vmatpush.bf16.msra.mxu1 %v3553_v3  ;;  %3595 = vmatpush.bf16.msra.mxu2 %v3553_v3  ;;  %v2595_v37 = vld [vmem:[%s5347_s0 + $0x28] sm:$0xf]  ;;  %v3076_v41 = vor.u32 %v3516_v36, %v3075_v35  ;;  %v3441_v47 = vld [vmem:[%s5347_s0 + $0x1a0] sm:$0xf0]  ;;  %v3095_v50 = vld [vmem:[%s5347_s0 + $0x410] sm:$0xf] }
   0xf   :  { %3596 = vmatpush.bf16.msra.mxu3 %v3553_v3  ;;  %1398 = vmatpush.bf16.msra.mxu0 %v3553_v3  ;;  %v2596_v42 = vor.u32 %v3396_v38, %v2595_v37  ;;  %v3481_v49 = vld [vmem:[%s5347_s0 + $0x2e0] sm:$0xf0]  ;;  %v2615_v52 = vld [vmem:[%s5347_s0 + $0x50] sm:$0xf]  ;;  %v2776_v54 = vor.u32 %v3441_v47, %v2775_v46  ;;  %v3568_v58 = vld [vmem:[%s5346_s1 + $0x98] sm:$0xff] }
  0x10   :  { %v3521_v51 = vld [vmem:[%s5347_s0 + $0x420] sm:$0xf0]  ;;  %v2936_v55 = vor.u32 %v3481_v49, %v2935_v48  ;;  %v3576_v59 = vld [vmem:[%s5346_s1 + $0xd8] sm:$0xff]  ;;  %v3582_v61 = vld [vmem:[%s5346_s1 + $0x108] sm:$0xff] }
  0x11   :  { %v3401_v53 = vld [vmem:[%s5347_s0 + $0x60] sm:$0xf0]  ;;  %v3096_v56 = vor.u32 %v3521_v51, %v3095_v50  ;;  %v3560_v60 = vld [vmem:[%s5346_s1 + $0x58] sm:$0xff]  ;;  %v3446_v63 = vld [vmem:[%s5347_s0 + $0x1c8] sm:$0xf0] }
  0x12   :  { %3597 = vmatpush.bf16.msra.mxu1 %v3552_v4  ;;  %3598 = vmatpush.bf16.msra.mxu2 %v3552_v4  ;;  %v2616_v57 = vor.u32 %v3401_v53, %v2615_v52  ;;  %v2795_v62 = vld [vmem:[%s5347_s0 + $0x1b8] sm:$0xf]  ;;  %v3486_v1 = vld [vmem:[%s5347_s0 + $0x308] sm:$0xf0]  ;;  %v3567_v10 = vld [vmem:[%s5346_s1 + $0x90] sm:$0xff] }
  0x13   :  { %3599 = vmatpush.bf16.msra.mxu3 %v3552_v4  ;;  %1399 = vmatpush.bf16.msra.mxu0 %v3552_v4  ;;  %v2955_v0 = vld [vmem:[%s5347_s0 + $0x2f8] sm:$0xf]  ;;  %v3526_v3 = vld [vmem:[%s5347_s0 + $0x448] sm:$0xf0]  ;;  %v3575_v11 = vld [vmem:[%s5346_s1 + $0xd0] sm:$0xff] }
  0x14   :  { %v3115_v2 = vld [vmem:[%s5347_s0 + $0x438] sm:$0xf]  ;;  %v3559_v12 = vld [vmem:[%s5346_s1 + $0x50] sm:$0xff]  ;;  %v2815_v13 = vld [vmem:[%s5347_s0 + $0x1e0] sm:$0xf] }
  0x15   :  { %v2635_v4 = vld [vmem:[%s5347_s0 + $0x78] sm:$0xf]  ;;  %v3116_v8 = vor.u32 %v3526_v3, %v3115_v2  ;;  %v3451_v14 = vld [vmem:[%s5347_s0 + $0x1f0] sm:$0xf0]  ;;  %v2975_v15 = vld [vmem:[%s5347_s0 + $0x320] sm:$0xf] }
  0x16   :  { %3600 = vmatpush.bf16.msra.mxu1 %v3551_v5  ;;  %3601 = vmatpush.bf16.msra.mxu2 %v3551_v5  ;;  %v2995_v31 = vld [vmem:[%s5347_s0 + $0x348] sm:$0xf]  ;;  %v3496_v32 = vld [vmem:[%s5347_s0 + $0x358] sm:$0xf0]  ;;  %v3015_v46 = vld [vmem:[%s5347_s0 + $0x370] sm:$0xf] }
  0x17   :  { %3602 = vmatpush.bf16.msra.mxu3 %v3551_v5  ;;  %1400 = vmatpush.bf16.msra.mxu0 %v3551_v5  ;;  %v3406_v5 = vld [vmem:[%s5347_s0 + $0x88] sm:$0xf0]  ;;  %v3155_v33 = vld [vmem:[%s5347_s0 + $0x488] sm:$0xf]  ;;  %v3536_v34 = vld [vmem:[%s5347_s0 + $0x498] sm:$0xf0]  ;;  %v2996_v38 = vor.u32 %v3496_v32, %v2995_v31 }
  0x18   :  { %v2636_v9 = vor.u32 %v3406_v5, %v2635_v4  ;;  %v2675_v35 = vld [vmem:[%s5347_s0 + $0xc8] sm:$0xf]  ;;  %v3416_v36 = vld [vmem:[%s5347_s0 + $0xd8] sm:$0xf0]  ;;  %v3501_v47 = vld [vmem:[%s5347_s0 + $0x380] sm:$0xf0] }
  0x19   :  { %v3175_v48 = vld [vmem:[%s5347_s0 + $0x4b0] sm:$0xf]  ;;  %v3541_v49 = vld [vmem:[%s5347_s0 + $0x4c0] sm:$0xf0]  ;;  %v3016_v53 = vor.u32 %v3501_v47, %v3015_v46  ;;  %v2577_v5 = vld [vmem:[%s5347_s0 + $0x14] sm:$0xf0] }
  0x1a   :  { %3603 = vmatpush.bf16.msra.mxu1 %v3550_v6  ;;  %3604 = vmatpush.bf16.msra.mxu2 %v3550_v6  ;;  %v2695_v50 = vld [vmem:[%s5347_s0 + $0xf0] sm:$0xf]  ;;  %v3421_v51 = vld [vmem:[%s5347_s0 + $0x100] sm:$0xf0]  ;;  %v3400_v46 = vld [vmem:[%s5347_s0 + $0x5c] sm:$0xf] }
  0x1b   :  { %3605 = vmatpush.bf16.msra.mxu3 %v3550_v6  ;;  %1401 = vmatpush.bf16.msra.mxu0 %v3550_v6  ;;  %v2796_v6 = vor.u32 %v3446_v63, %v2795_v62  ;;  %v2715_v62 = vld [vmem:[%s5347_s0 + $0x118] sm:$0xf]  ;;  %v3426_v63 = vld [vmem:[%s5347_s0 + $0x128] sm:$0xf0]  ;;  %v3389_v4 = vld [vmem:[%s5347_s0 + $0x4] sm:$0xf] }
  0x1c   :  { %v2716_v3 = vor.u32 %v3426_v63, %v2715_v62  ;;  %v2625_v47 = vld [vmem:[%s5347_s0 + $0x6c] sm:$0xf0]  ;;  %v3404_v62 = vld [vmem:[%s5347_s0 + $0x7c] sm:$0xf] }
  0x1d   :  { %v2637_v63 = vld [vmem:[%s5347_s0 + $0x8c] sm:$0xf0] }
  0x1e   :  { %3606 = vmatpush.bf16.msra.mxu1 %v3549_v7  ;;  %3607 = vmatpush.bf16.msra.mxu2 %v3549_v7 }
  0x1f   :  { %3608 = vmatpush.bf16.msra.mxu3 %v3549_v7  ;;  %1402 = vmatpush.bf16.msra.mxu0 %v3549_v7  ;;  %v2956_v7 = vor.u32 %v3486_v1, %v2955_v0 }
  0x21   :  { %1443 = vmatmul.bf16.vlgmr.msra.gmra.mxu1 %v2736_v18  ;;  %1483 = vmatmul.bf16.vlgmr.msra.gmra.mxu2 %v2896_v19  ;;  %v3531_v18 = vld [vmem:[%s5347_s0 + $0x470] sm:$0xf0]  ;;  %v2655_v19 = vld [vmem:[%s5347_s0 + $0xa0] sm:$0xf] }
  0x22   :  { %1733 = vmatpush.bf16.msrb.mxu2 %v3572_v16  ;;  %1523 = vmatmul.bf16.vlgmr.msra.gmra.mxu3 %v3056_v20  ;;  %v3491_v16 = vld [vmem:[%s5347_s0 + $0x330] sm:$0xf0] }
  0x23   :  { %1902 = vmatpush.bf16.msrb.mxu3 %v3580_v17  ;;  %1403 = vmatmul.bf16.vlgmr.msra.gmra.mxu0 %v2576_v21  ;;  %v3135_v17 = vld [vmem:[%s5347_s0 + $0x460] sm:$0xf]  ;;  %v3411_v20 = vld [vmem:[%s5347_s0 + $0xb0] sm:$0xf0]  ;;  %v2816_v21 = vor.u32 %v3451_v14, %v2815_v13 }
  0x24   :  { %1564 = vmatpush.bf16.msrb.mxu1 %v3564_v22  ;;  %2075 = vmatpush.bf16.msrb.mxu0 %v3584_v23  ;;  %v2976_v22 = vor.u32 %v3491_v16, %v2975_v15  ;;  %v3136_v23 = vor.u32 %v3531_v18, %v3135_v17 }
  0x26   :  { %1734 = vmatpush.bf16.msrb.mxu2 %v3571_v24  ;;  %v2656_v24 = vor.u32 %v3411_v20, %v2655_v19 }
  0x27   :  { %1903 = vmatpush.bf16.msrb.mxu3 %v3579_v25  ;;  %v3566_v25 = vld [vmem:[%s5346_s1 + $0x88] sm:$0xff] }
  0x28   :  { %1565 = vmatpush.bf16.msrb.mxu1 %v3563_v26  ;;  %2076 = vmatpush.bf16.msrb.mxu0 %v3583_v27  ;;  %v3574_v26 = vld [vmem:[%s5346_s1 + $0xc8] sm:$0xff] }
  0x29   :  { %v3558_v27 = vld [vmem:[%s5346_s1 + $0x48] sm:$0xff] }
  0x2a   :  { %1735 = vmatpush.bf16.msrb.mxu2 %v3570_v28  ;;  %v3581_v28 = vld [vmem:[%s5346_s1 + $0x100] sm:$0xff] }
  0x2b   :  { %1904 = vmatpush.bf16.msrb.mxu3 %v3578_v29  ;;  %v2835_v29 = vld [vmem:[%s5347_s0 + $0x208] sm:$0xf] }
  0x2c   :  { %1566 = vmatpush.bf16.msrb.mxu1 %v3562_v30  ;;  %2077 = vmatpush.bf16.msrb.mxu0 %v3582_v61  ;;  %v3456_v30 = vld [vmem:[%s5347_s0 + $0x218] sm:$0xf0]  ;;  %v3546_v61 = vld [vmem:[%s5347_s0 + $0x4e8] sm:$0xf0] }
  0x2d   :  { %v2836_v37 = vor.u32 %v3456_v30, %v2835_v29  ;;  %v3398_v29 = vld [vmem:[%s5347_s0 + $0x48] sm:$0xf0] }
  0x2e   :  { %1736 = vmatpush.bf16.msrb.mxu2 %v3569_v43  ;;  %v3557_v43 = vld [vmem:[%s5346_s1 + $0x40] sm:$0xff] }
  0x2f   :  { %1905 = vmatpush.bf16.msrb.mxu3 %v3577_v44  ;;  %v2855_v44 = vld [vmem:[%s5347_s0 + $0x230] sm:$0xf] }
  0x30   :  { %1567 = vmatpush.bf16.msrb.mxu1 %v3561_v45  ;;  %2078 = vmatpush.bf16.msrb.mxu0 %v3581_v28  ;;  %v3461_v45 = vld [vmem:[%s5347_s0 + $0x240] sm:$0xf0]  ;;  %v2611_v28 = vld [vmem:[%s5347_s0 + $0x38] sm:$0xf] }
  0x31   :  { %1448 = vmatmul.bf16.gmra.mxu1 %v2756_v39  ;;  %1488 = vmatmul.bf16.gmra.mxu2 %v2916_v40  ;;  %v3156_v39 = vor.u32 %v3536_v34, %v3155_v33  ;;  %v2676_v40 = vor.u32 %v3416_v36, %v2675_v35  ;;  %v2856_v52 = vor.u32 %v3461_v45, %v2855_v44  ;;  %v2623_v44 = vld [vmem:[%s5347_s0 + $0x58] sm:$0xf]  ;;  %v3402_v45 = vld [vmem:[%s5347_s0 + $0x68] sm:$0xf0] }
  0x32   :  { %1528 = vmatmul.bf16.gmra.mxu3 %v3076_v41  ;;  %1737 = vmatpush.bf16.msrb.mxu2 %v3568_v58  ;;  %v3565_v41 = vld [vmem:[%s5346_s1 + $0x80] sm:$0xff]  ;;  %v3035_v58 = vld [vmem:[%s5347_s0 + $0x398] sm:$0xf]  ;;  %v2612_v36 = vor.u32 %v3398_v29, %v2611_v28  ;;  %v3410_v28 = vld [vmem:[%s5347_s0 + $0xac] sm:$0xf] }
  0x33   :  { %1408 = vmatmul.bf16.gmra.mxu0 %v2596_v42  ;;  %1906 = vmatpush.bf16.msrb.mxu3 %v3576_v59  ;;  %v3573_v42 = vld [vmem:[%s5346_s1 + $0xc0] sm:$0xff]  ;;  %v3506_v59 = vld [vmem:[%s5347_s0 + $0x3a8] sm:$0xf0] }
  0x34   :  { %1568 = vmatpush.bf16.msrb.mxu1 %v3560_v60  ;;  %v3195_v60 = vld [vmem:[%s5347_s0 + $0x4d8] sm:$0xf]  ;;  %v3036_v1 = vor.u32 %v3506_v59, %v3035_v58  ;;  %v2665_v29 = vld [vmem:[%s5347_s0 + $0xbc] sm:$0xf0] }
  0x35   :  { %v3196_v2 = vor.u32 %v3546_v61, %v3195_v60 }
  0x36   :  { %1738 = vmatpush.bf16.msrb.mxu2 %v3567_v10  ;;  %v2591_v10 = vld [vmem:[%s5347_s0 + $0x10] sm:$0xf] }
  0x37   :  { %1907 = vmatpush.bf16.msrb.mxu3 %v3575_v11  ;;  %v3393_v11 = vld [vmem:[%s5347_s0 + $0x20] sm:$0xf0] }
  0x38   :  { %1569 = vmatpush.bf16.msrb.mxu1 %v3559_v12  ;;  %v2580_v12 = vor.u32 %v3389_v4, %v2577_v5  ;;  %v2592_v16 = vor.u32 %v3393_v11, %v2591_v10  ;;  %v2651_v4 = vld [vmem:[%s5347_s0 + $0x88] sm:$0xf]  ;;  %v3408_v5 = vld [vmem:[%s5347_s0 + $0x98] sm:$0xf0] }
  0x3a   :  { %1739 = vmatpush.bf16.msrb.mxu2 %v3566_v25  ;;  %v3397_v25 = vld [vmem:[%s5347_s0 + $0x40] sm:$0xf0] }
  0x3b   :  { %1908 = vmatpush.bf16.msrb.mxu3 %v3574_v26  ;;  %v3395_v26 = vld [vmem:[%s5347_s0 + $0x34] sm:$0xf] }
  0x3c   :  { %1570 = vmatpush.bf16.msrb.mxu1 %v3558_v27  ;;  %v2605_v27 = vld [vmem:[%s5347_s0 + $0x44] sm:$0xf0] }
  0x3d   :  { %v2608_v35 = vor.u32 %v3395_v26, %v2605_v27  ;;  %v2663_v26 = vld [vmem:[%s5347_s0 + $0xa8] sm:$0xf]  ;;  %v3412_v27 = vld [vmem:[%s5347_s0 + $0xb8] sm:$0xf0] }
  0x3e   :  { %1740 = vmatpush.bf16.msrb.mxu2 %v3565_v41 }
  0x3f   :  { %1909 = vmatpush.bf16.msrb.mxu3 %v3573_v42  ;;  %v3399_v42 = vld [vmem:[%s5347_s0 + $0x54] sm:$0xf] }
  0x40   :  { %1571 = vmatpush.bf16.msrb.mxu1 %v3557_v43  ;;  %v2617_v43 = vld [vmem:[%s5347_s0 + $0x64] sm:$0xf0] }
  0x41   :  { %1453 = vmatmul.bf16.gmra.mxu1 %v2776_v54  ;;  %1493 = vmatmul.bf16.gmra.mxu2 %v2936_v55  ;;  %v3176_v54 = vor.u32 %v3541_v49, %v3175_v48  ;;  %v2696_v55 = vor.u32 %v3421_v51, %v2695_v50  ;;  %v2631_v48 = vld [vmem:[%s5347_s0 + $0x60] sm:$0xf]  ;;  %v3403_v49 = vld [vmem:[%s5347_s0 + $0x70] sm:$0xf0] }
  0x42   :  { %1533 = vmatmul.bf16.gmra.mxu3 %v3096_v56  ;;  %v2875_v56 = vld [vmem:[%s5347_s0 + $0x258] sm:$0xf] }
  0x43   :  { %1413 = vmatmul.bf16.gmra.mxu0 %v2616_v57  ;;  %v3466_v57 = vld [vmem:[%s5347_s0 + $0x268] sm:$0xf0] }
  0x44   :  { %v2876_v0 = vor.u32 %v3466_v57, %v2875_v56  ;;  %v2632_v56 = vor.u32 %v3403_v49, %v2631_v48 }
  0x51   :  { %1458 = vmatmul.bf16.gmra.mxu1 %v2796_v6  ;;  %1498 = vmatmul.bf16.gmra.mxu2 %v2956_v7  ;;  %v2583_v6 = vld [vmem:[%s5347_s0 + $0x8] sm:$0xf]  ;;  %v3392_v7 = vld [vmem:[%s5347_s0 + $0x18] sm:$0xf0] }
  0x52   :  { %1538 = vmatmul.bf16.gmra.mxu3 %v3116_v8  ;;  %v3390_v8 = vld [vmem:[%s5347_s0 + $0xc] sm:$0xf]  ;;  %v2584_v13 = vor.u32 %v3392_v7, %v2583_v6 }
  0x53   :  { %1418 = vmatmul.bf16.gmra.mxu0 %v2636_v9  ;;  %v2585_v9 = vld [vmem:[%s5347_s0 + $0x1c] sm:$0xf0] }
  0x54   :  { %v2588_v15 = vor.u32 %v3390_v8, %v2585_v9  ;;  %v2640_v8 = vor.u32 %v3404_v62, %v2637_v63  ;;  %v2683_v62 = vld [vmem:[%s5347_s0 + $0xd0] sm:$0xf]  ;;  %v3417_v63 = vld [vmem:[%s5347_s0 + $0xe0] sm:$0xf0] }
  0x61   :  { %1463 = vmatmul.bf16.gmra.mxu1 %v2816_v21  ;;  %1503 = vmatmul.bf16.gmra.mxu2 %v2976_v22  ;;  %v3394_v22 = vld [vmem:[%s5347_s0 + $0x2c] sm:$0xf] }
  0x62   :  { %1543 = vmatmul.bf16.gmra.mxu3 %v3136_v23  ;;  %v2597_v23 = vld [vmem:[%s5347_s0 + $0x3c] sm:$0xf0] }
  0x63   :  { %1423 = vmatmul.bf16.gmra.mxu0 %v2656_v24  ;;  %v2603_v24 = vld [vmem:[%s5347_s0 + $0x30] sm:$0xf]  ;;  %v2600_v32 = vor.u32 %v3394_v22, %v2597_v23 }
  0x64   :  { %v2604_v33 = vor.u32 %v3397_v25, %v2603_v24  ;;  %v3409_v24 = vld [vmem:[%s5347_s0 + $0xa4] sm:$0xf]  ;;  %v2657_v25 = vld [vmem:[%s5347_s0 + $0xb4] sm:$0xf0] }
  0x71   :  { %1468 = vmatmul.bf16.gmra.mxu1 %v2836_v37  ;;  %1508 = vmatmul.bf16.gmra.mxu2 %v2996_v38 }
  0x72   :  { %1548 = vmatmul.bf16.gmra.mxu3 %v3156_v39 }
  0x73   :  { %1428 = vmatmul.bf16.gmra.mxu0 %v2676_v40 }
  0x81   :  { %1473 = vmatmul.bf16.gmra.mxu1 %v2856_v52  ;;  %1513 = vmatmul.bf16.gmra.mxu2 %v3016_v53  ;;  %v2620_v52 = vor.u32 %v3399_v42, %v2617_v43  ;;  %v2624_v53 = vor.u32 %v3402_v45, %v2623_v44  ;;  %v2660_v42 = vor.u32 %v3409_v24, %v2657_v25 }
  0x82   :  { %1553 = vmatmul.bf16.gmra.mxu3 %v3176_v54  ;;  %v2664_v43 = vor.u32 %v3412_v27, %v2663_v26  ;;  %v2668_v45 = vor.u32 %v3410_v28, %v2665_v29 }
  0x83   :  { %1433 = vmatmul.bf16.gmra.mxu0 %v2696_v55  ;;  %v2628_v55 = vor.u32 %v3400_v46, %v2625_v47 }
  0x91   :  { %1478 = vmatmul.bf16.gmra.mxu1 %v2876_v0  ;;  %1518 = vmatmul.bf16.gmra.mxu2 %v3036_v1  ;;  %v2643_v0 = vld [vmem:[%s5347_s0 + $0x80] sm:$0xf]  ;;  %v3407_v1 = vld [vmem:[%s5347_s0 + $0x90] sm:$0xf0] }
  0x92   :  { %1558 = vmatmul.bf16.gmra.mxu3 %v3196_v2  ;;  %v3405_v2 = vld [vmem:[%s5347_s0 + $0x84] sm:$0xf]  ;;  %v2644_v9 = vor.u32 %v3407_v1, %v2643_v0  ;;  %v3415_v0 = vld [vmem:[%s5347_s0 + $0xd4] sm:$0xf]  ;;  %v2685_v1 = vld [vmem:[%s5347_s0 + $0xe4] sm:$0xf0] }
  0x93   :  { %1438 = vmatmul.bf16.gmra.mxu0 %v2716_v3  ;;  %v2645_v3 = vld [vmem:[%s5347_s0 + $0x94] sm:$0xf0] }
  0x94   :  { %v2648_v11 = vor.u32 %v3405_v2, %v2645_v3  ;;  %v2691_v2 = vld [vmem:[%s5347_s0 + $0xd8] sm:$0xf]  ;;  %v3418_v3 = vld [vmem:[%s5347_s0 + $0xe8] sm:$0xf0] }
  0x95   :  { %v2692_v24 = vor.u32 %v3418_v3, %v2691_v2 }
  0x9e   :  { %v3964_v14 = vpop.f32.mrf.mxu1 }
  0xa0   :  { %v3966_v17 = vpop.f32.mrf.mxu0 }
  0xa1   :  { %1572 = vmatmul.bf16.vlgmr.msrb.gmra.mxu1 %v2580_v12  ;;  %1741 = vmatmul.bf16.vlgmr.msrb.gmra.mxu2 %v2584_v13  ;;  %v2652_v12 = vor.u32 %v3408_v5, %v2651_v4 }
  0xa2   :  { %1910 = vmatmul.bf16.vlgmr.msrb.gmra.mxu3 %v2588_v15 }
  0xa3   :  { %3357 = vmatmul.msk.bf16.vlgmr.msrb.gmra.mxu0 %vm1298_vm0, %v2592_v16 }
  0xa4   :  { %v3969_v18 = vpop.f32.mrf.mxu2 }
  0xa5   :  { %v3971_v19 = vpop.f32.mrf.mxu3 }
  0xa6   :  { %5351 = vst [vmem:[#allocation2_spill] sm:$0xff] %v3971_v19  ;;  %v3973_v20 = vpop.f32.mrf.mxu1 }
  0xa8   :  { %v3975_v21 = vpop.f32.mrf.mxu0 }
  0xac   :  { %v4001_v30 = vpop.f32.mrf.mxu2 }
  0xad   :  { %v4003_v31 = vpop.f32.mrf.mxu3 }
  0xae   :  { %5352 = vst [vmem:[#allocation3_spill] sm:$0xff] %v4003_v31  ;;  %v4005_v34 = vpop.f32.mrf.mxu1 }
  0xb0   :  { %v4007_v37 = vpop.f32.mrf.mxu0 }
  0xb1   :  { %1577 = vmatmul.bf16.gmra.mxu1 %v2600_v32  ;;  %1746 = vmatmul.bf16.gmra.mxu2 %v2604_v33  ;;  %v2671_v32 = vld [vmem:[%s5347_s0 + $0xb0] sm:$0xf]  ;;  %v3413_v33 = vld [vmem:[%s5347_s0 + $0xc0] sm:$0xf0] }
  0xb2   :  { %1915 = vmatmul.bf16.gmra.mxu3 %v2608_v35  ;;  %v2672_v46 = vor.u32 %v3413_v33, %v2671_v32  ;;  %v3419_v32 = vld [vmem:[%s5347_s0 + $0xf4] sm:$0xf]  ;;  %v2697_v33 = vld [vmem:[%s5347_s0 + $0x104] sm:$0xf0] }
  0xb3   :  { %3358 = vmatmul.msk.bf16.gmra.mxu0 %vm1298_vm0, %v2612_v36 }
  0xb4   :  { %v4010_v38 = vpop.f32.mrf.mxu2 }
  0xb5   :  { %v4012_v39 = vpop.f32.mrf.mxu3 }
  0xb6   :  { %5353 = vst [vmem:[#allocation4_spill] sm:$0xff] %v4012_v39  ;;  %v4014_v40 = vpop.f32.mrf.mxu1 }
  0xb8   :  { %v4016_v41 = vpop.f32.mrf.mxu0 }
  0xbc   :  { %v4042_v50 = vpop.f32.mrf.mxu2 }
  0xbd   :  { %v4044_v51 = vpop.f32.mrf.mxu3 }
  0xbe   :  { %5354 = vst [vmem:[#allocation5_spill] sm:$0xff] %v4044_v51  ;;  %v4046_v54 = vpop.f32.mrf.mxu1 }
  0xc0   :  { %v4048_v57 = vpop.f32.mrf.mxu0 }
  0xc1   :  { %1582 = vmatmul.bf16.gmra.mxu1 %v2620_v52  ;;  %1751 = vmatmul.bf16.gmra.mxu2 %v2624_v53 }
  0xc2   :  { %1920 = vmatmul.bf16.gmra.mxu3 %v2628_v55  ;;  %v3414_v55 = vld [vmem:[%s5347_s0 + $0xcc] sm:$0xf] }
  0xc3   :  { %3359 = vmatmul.msk.bf16.gmra.mxu0 %vm1298_vm0, %v2632_v56  ;;  %v2677_v56 = vld [vmem:[%s5347_s0 + $0xdc] sm:$0xf0] }
  0xc4   :  { %v4051_v58 = vpop.f32.mrf.mxu2 }
  0xc5   :  { %v4053_v59 = vpop.f32.mrf.mxu3 }
  0xc6   :  { %5355 = vst [vmem:[#allocation6_spill] sm:$0xff] %v4053_v59  ;;  %v4055_v60 = vpop.f32.mrf.mxu1 }
  0xc8   :  { %v4057_v61 = vpop.f32.mrf.mxu0 }
  0xcc   :  { %v4083_v6 = vpop.f32.mrf.mxu2 }
  0xcd   :  { %v4085_v7 = vpop.f32.mrf.mxu3 }
  0xce   :  { %5356 = vst [vmem:[#allocation7_spill] sm:$0xff] %v4085_v7  ;;  %v4087_v10 = vpop.f32.mrf.mxu1 }
  0xd0   :  { %v4089_v13 = vpop.f32.mrf.mxu0 }
  0xd1   :  { %1587 = vmatmul.bf16.gmra.mxu1 %v2640_v8  ;;  %1756 = vmatmul.bf16.gmra.mxu2 %v2644_v9  ;;  %v2680_v8 = vor.u32 %v3414_v55, %v2677_v56  ;;  %v2684_v9 = vor.u32 %v3417_v63, %v2683_v62  ;;  %v2711_v55 = vld [vmem:[%s5347_s0 + $0x100] sm:$0xf]  ;;  %v3423_v56 = vld [vmem:[%s5347_s0 + $0x110] sm:$0xf0] }
  0xd2   :  { %1925 = vmatmul.bf16.gmra.mxu3 %v2648_v11 }
  0xd3   :  { %3360 = vmatmul.msk.bf16.gmra.mxu0 %vm1298_vm0, %v2652_v12  ;;  %v2688_v12 = vor.u32 %v3415_v0, %v2685_v1  ;;  %v2700_v0 = vor.u32 %v3419_v32, %v2697_v33  ;;  %v3424_v32 = vld [vmem:[%s5347_s0 + $0x11c] sm:$0xf]  ;;  %v2717_v33 = vld [vmem:[%s5347_s0 + $0x12c] sm:$0xf0] }
  0xd4   :  { %v4092_v15 = vpop.f32.mrf.mxu2 }
  0xd5   :  { %v4094_v16 = vpop.f32.mrf.mxu3 }
  0xd6   :  { %5357 = vst [vmem:[#allocation8_spill] sm:$0xff] %v4094_v16  ;;  %v4096_v22 = vpop.f32.mrf.mxu1 }
  0xd8   :  { %v4098_v23 = vpop.f32.mrf.mxu0 }
  0xdc   :  { %v4124_v35 = vpop.f32.mrf.mxu2 }
  0xdd   :  { %5358 = vst [vmem:[#allocation9_spill] sm:$0xff] %v4124_v35  ;;  %v4126_v36 = vpop.f32.mrf.mxu3 }
  0xde   :  { %5359 = vst [vmem:[#allocation10_spill] sm:$0xff] %v4126_v36  ;;  %v4128_v44 = vpop.f32.mrf.mxu1 }
  0xe0   :  { %v4130_v47 = vpop.f32.mrf.mxu0 }
  0xe1   :  { %1592 = vmatmul.bf16.gmra.mxu1 %v2660_v42  ;;  %1761 = vmatmul.bf16.gmra.mxu2 %v2664_v43  ;;  %v2703_v42 = vld [vmem:[%s5347_s0 + $0xf8] sm:$0xf]  ;;  %v3422_v43 = vld [vmem:[%s5347_s0 + $0x108] sm:$0xf0] }
  0xe2   :  { %1930 = vmatmul.bf16.gmra.mxu3 %v2668_v45  ;;  %v3420_v45 = vld [vmem:[%s5347_s0 + $0xfc] sm:$0xf]  ;;  %v2704_v1 = vor.u32 %v3422_v43, %v2703_v42  ;;  %v2723_v42 = vld [vmem:[%s5347_s0 + $0x120] sm:$0xf]  ;;  %v3427_v43 = vld [vmem:[%s5347_s0 + $0x130] sm:$0xf0] }
  0xe3   :  { %3361 = vmatmul.msk.bf16.gmra.mxu0 %vm1298_vm0, %v2672_v46  ;;  %v2705_v46 = vld [vmem:[%s5347_s0 + $0x10c] sm:$0xf0] }
  0xe4   :  { %v4133_v48 = vpop.f32.mrf.mxu2  ;;  %v2708_v3 = vor.u32 %v3420_v45, %v2705_v46  ;;  %v3425_v45 = vld [vmem:[%s5347_s0 + $0x124] sm:$0xf]  ;;  %v2725_v46 = vld [vmem:[%s5347_s0 + $0x134] sm:$0xf0] }
  0xe5   :  { %5360 = vst [vmem:[#allocation11_spill] sm:$0xff] %v4133_v48  ;;  %v4135_v49 = vpop.f32.mrf.mxu3 }
  0xe6   :  { %5361 = vst [vmem:[#allocation12_spill] sm:$0xff] %v4135_v49  ;;  %v4137_v52 = vpop.f32.mrf.mxu1 }
  0xe8   :  { %v4139_v53 = vpop.f32.mrf.mxu0 }
  0xec   :  { %v4165_v4 = vpop.f32.mrf.mxu2 }
  0xed   :  { %5362 = vst [vmem:[#allocation13_spill] sm:$0xff] %v4165_v4  ;;  %v4167_v5 = vpop.f32.mrf.mxu3 }
  0xee   :  { %5363 = vst [vmem:[#allocation14_spill] sm:$0xff] %v4167_v5  ;;  %v4169_v11 = vpop.f32.mrf.mxu1  ;;  %v2728_v5 = vor.u32 %v3425_v45, %v2725_v46  ;;  %v2751_v45 = vld [vmem:[%s5347_s0 + $0x150] sm:$0xf]  ;;  %v3433_v46 = vld [vmem:[%s5347_s0 + $0x160] sm:$0xf0] }
  0xef   :  { %v2752_v39 = vor.u32 %v3433_v46, %v2751_v45 }
  0xf0   :  { %v4171_v25 = vpop.f32.mrf.mxu0 }
  0xf1   :  { %1597 = vmatmul.bf16.gmra.mxu1 %v2680_v8  ;;  %1766 = vmatmul.bf16.gmra.mxu2 %v2684_v9  ;;  %v2712_v8 = vor.u32 %v3423_v56, %v2711_v55  ;;  %v2731_v55 = vld [vmem:[%s5347_s0 + $0x128] sm:$0xf]  ;;  %v3428_v56 = vld [vmem:[%s5347_s0 + $0x138] sm:$0xf0] }
  0xf2   :  { %1935 = vmatmul.bf16.gmra.mxu3 %v2688_v12  ;;  %v2732_v49 = vor.u32 %v3428_v56, %v2731_v55 }
  0xf3   :  { %3362 = vmatmul.msk.bf16.gmra.mxu0 %vm1298_vm0, %v2692_v24 }
  0xf4   :  { %v4174_v26 = vpop.f32.mrf.mxu2 }
  0xf5   :  { %5364 = vst [vmem:[#allocation15_spill] sm:$0xff] %v4174_v26  ;;  %v4176_v27 = vpop.f32.mrf.mxu3 }
  0xf6   :  { %5365 = vst [vmem:[#allocation16_spill] sm:$0xff] %v4176_v27  ;;  %v4178_v28 = vpop.f32.mrf.mxu1 }
  0xf8   :  { %v4180_v29 = vpop.f32.mrf.mxu0 }
  0xfc   :  { %v4206_v62 = vpop.f32.mrf.mxu2 }
  0xfd   :  { %5366 = vst [vmem:[#allocation17_spill] sm:$0xff] %v4206_v62  ;;  %v4208_v63 = vpop.f32.mrf.mxu3 }
  0xfe   :  { %5367 = vst [vmem:[#allocation18_spill] sm:$0xff] %v4208_v63  ;;  %v4210_v2 = vpop.f32.mrf.mxu1 }
 0x100   :  { %v4212_v9 = vpop.f32.mrf.mxu0 }
 0x101   :  { %1602 = vmatmul.bf16.gmra.mxu1 %v2700_v0  ;;  %1771 = vmatmul.bf16.gmra.mxu2 %v2704_v1 }
 0x102   :  { %1940 = vmatmul.bf16.gmra.mxu3 %v2708_v3  ;;  %v2720_v3 = vor.u32 %v3424_v32, %v2717_v33  ;;  %v3429_v32 = vld [vmem:[%s5347_s0 + $0x144] sm:$0xf]  ;;  %v2737_v33 = vld [vmem:[%s5347_s0 + $0x154] sm:$0xf0] }
 0x103   :  { %3363 = vmatmul.msk.bf16.gmra.mxu0 %vm1298_vm0, %v2712_v8  ;;  %v2724_v8 = vor.u32 %v3427_v43, %v2723_v42  ;;  %v3430_v42 = vld [vmem:[%s5347_s0 + $0x14c] sm:$0xf]  ;;  %v2745_v43 = vld [vmem:[%s5347_s0 + $0x15c] sm:$0xf0] }
 0x104   :  { %v4215_v12 = vpop.f32.mrf.mxu2  ;;  %v2748_v51 = vor.u32 %v3430_v42, %v2745_v43  ;;  %v3438_v42 = vld [vmem:[%s5347_s0 + $0x188] sm:$0xf0] }
 0x105   :  { %5368 = vst [vmem:[#allocation19_spill] sm:$0xff] %v4215_v12  ;;  %v4217_v24 = vpop.f32.mrf.mxu3 }
 0x106   :  { %5369 = vst [vmem:[#allocation20_spill] sm:$0xff] %v4217_v24  ;;  %v4219_v27 = vpop.f32.mrf.mxu1 }
 0x108   :  { %v4221_v63 = vpop.f32.mrf.mxu0 }
 0x10c   :  { %v4247_v0 = vpop.f32.mrf.mxu2 }
 0x10d   :  { %5370 = vst [vmem:[#allocation21_spill] sm:$0xff] %v4247_v0  ;;  %v4249_v1 = vpop.f32.mrf.mxu3 }
 0x10e   :  { %5371 = vst [vmem:[#allocation22_spill] sm:$0xff] %v4249_v1  ;;  %v4251_v24 = vpop.f32.mrf.mxu1 }
 0x110   :  { %v4253_v36 = vpop.f32.mrf.mxu0 }
 0x111   :  { %1607 = vmatmul.bf16.gmra.mxu1 %v2720_v3  ;;  %1776 = vmatmul.bf16.gmra.mxu2 %v2724_v8  ;;  %v2740_v3 = vor.u32 %v3429_v32, %v2737_v33  ;;  %v4297_v32 = vld [vmem:[%s5348_s2] ss:$0 sm:$0xff] }
 0x112   :  { %1945 = vmatmul.bf16.gmra.mxu3 %v2728_v5  ;;  %v3432_v5 = vld [vmem:[%s5347_s0 + $0x158] sm:$0xf0] }
 0x113   :  { %3364 = vmatmul.msk.bf16.gmra.mxu0 %vm1298_vm0, %v2732_v49  ;;  %v2743_v49 = vld [vmem:[%s5347_s0 + $0x148] sm:$0xf] }
 0x114   :  { %v4256_v16 = vpop.f32.mrf.mxu2  ;;  %v2744_v8 = vor.u32 %v3432_v5, %v2743_v49  ;;  %v2771_v5 = vld [vmem:[%s5347_s0 + $0x178] sm:$0xf] }
 0x115   :  { %5372 = vst [vmem:[#allocation23_spill] sm:$0xff] %v4256_v16  ;;  %v4258_v7 = vpop.f32.mrf.mxu3 }
 0x116   :  { %5373 = vst [vmem:[#allocation24_spill] sm:$0xff] %v4258_v7  ;;  %v4260_v59 = vpop.f32.mrf.mxu1 }
 0x118   :  { %v4262_v1 = vpop.f32.mrf.mxu0 }
 0x11c   :  { %v4288_v55 = vpop.f32.mrf.mxu2 }
 0x11d   :  { %5374 = vst [vmem:[#allocation25_spill] sm:$0xff] %v4288_v55  ;;  %v4290_v56 = vpop.f32.mrf.mxu3 }
 0x11e   :  { %5375 = vst [vmem:[#allocation26_spill] sm:$0xff] %v4290_v56  ;;  %v1573_v7 = vpop.f32.mrf.mxu1 }
 0x11f   :  { %v1574_v19 = vadd.f32 %v1573_v7, %v3966_v17  ;;  %v3434_v17 = vld [vmem:[%s5347_s0 + $0x16c] sm:$0xf]  ;;  %v3435_v7 = vld [vmem:[%s5347_s0 + $0x174] sm:$0xf] }
 0x120   :  { %v2080_v31 = vpop.f32.mrf.mxu0 }
 0x121   :  { %1612 = vmatmul.bf16.gmra.mxu1 %v2740_v3  ;;  %1781 = vmatmul.bf16.gmra.mxu2 %v2744_v8 }
 0x122   :  { %1950 = vmatmul.bf16.gmra.mxu3 %v2748_v51  ;;  %v4302_v51 = vld [vmem:[%s5349_s3] ss:$0 sm:$0xff] }
 0x123   :  { %3365 = vmatmul.msk.bf16.gmra.mxu0 %vm1298_vm0, %v2752_v39  ;;  %v2763_v39 = vld [vmem:[%s5347_s0 + $0x170] sm:$0xf] }
 0x124   :  { %v1742_v16 = vpop.f32.mrf.mxu2 }
 0x125   :  { %v1743_v0 = vadd.f32 %v1742_v16, %v1574_v19  ;;  %v1911_v12 = vpop.f32.mrf.mxu3  ;;  %v2757_v19 = vld [vmem:[%s5347_s0 + $0x17c] sm:$0xf0] }
 0x126   :  { %v1575_v62 = vpop.f32.mrf.mxu1  ;;  %v2760_v3 = vor.u32 %v3434_v17, %v2757_v19 }
 0x127   :  { %v1912_v55 = vadd.f32 %v1911_v12, %v1743_v0  ;;  %v1576_v12 = vadd.f32 %v1575_v62, %v3975_v21  ;;  %v2765_v0 = vld [vmem:[%s5347_s0 + $0x184] sm:$0xf0] }
 0x128   :  { %v2082_v33 = vpop.f32.mrf.mxu0  ;;  %v2768_v62 = vor.u32 %v3435_v7, %v2765_v0 }
 0x129   :  { %v2081_v49 = vadd.f32 %v2080_v31, %v1912_v55  ;;  %v3437_v31 = vld [vmem:[%s5347_s0 + $0x180] sm:$0xf0] }
 0x12a   :  { %v2764_v8 = vor.u32 %v3437_v31, %v2763_v39 }
 0x12b   :  { %v2244_v16 = vmul.f32 %v4297_v32, %v2081_v49  ;;  %v2772_v49 = vor.u32 %v3438_v42, %v2771_v5  ;;  %v3439_v42 = vld [vmem:[%s5347_s0 + $0x194] sm:$0xf] }
 0x12c   :  { %v1744_v43 = vpop.f32.mrf.mxu2 }
 0x12d   :  { %v2312_v45 = vadd.f32 %v4302_v51, %v2244_v16  ;;  %v1745_v46 = vadd.f32 %v1744_v43, %v1576_v12  ;;  %v1913_v55 = vpop.f32.mrf.mxu3  ;;  %v2785_v43 = vld [vmem:[%s5347_s0 + $0x1ac] sm:$0xf0] }
 0x12e   :  { %v1578_v21 = vpop.f32.mrf.mxu1 }
 0x12f   :  { %v2376_v56 = vmax.f32 %v2312_v45, 0.0  ;;  %v1914_v26 = vadd.f32 %v1913_v55, %v1745_v46  ;;  %v1579_v19 = vadd.f32 %v1578_v21, %v4007_v37  ;;  %v2783_v37 = vld [vmem:[%s5347_s0 + $0x198] sm:$0xf]  ;;  %v2791_v55 = vld [vmem:[%s5347_s0 + $0x1a0] sm:$0xf] }
 0x130   :  { %v2085_v4 = vpop.f32.mrf.mxu0 }
 0x131   :  { %v2440_v48 = vpack.c.bf16 %v2376_v56, %v2376_v56  ;;  %v2083_v35 = vadd.f32 %v2082_v33, %v1914_v26  ;;  %1617 = vmatmul.bf16.gmra.mxu1 %v2760_v3  ;;  %1786 = vmatmul.bf16.gmra.mxu2 %v2764_v8  ;;  %v3443_v3 = vld [vmem:[%s5347_s0 + $0x1b0] sm:$0xf0] }
 0x132   :  { %1955 = vmatmul.bf16.gmra.mxu3 %v2768_v62 }
 0x133   :  { %3366 = vmatmul.msk.bf16.gmra.mxu0 %vm1298_vm0, %v2772_v49  ;;  %2505 = vst.msk [vmem:[%s5350_s4] sm:$0xf] %vm2504_vm1, %v2440_v48  ;;  %v2245_v17 = vmul.f32 %v4297_v32, %v2083_v35  ;;  %v2777_v35 = vld [vmem:[%s5347_s0 + $0x1a4] sm:$0xf0]  ;;  %v3442_v48 = vld [vmem:[%s5347_s0 + $0x1a8] sm:$0xf0] }
 0x134   :  { %v1747_v39 = vpop.f32.mrf.mxu2 }
 0x135   :  { %v2313_v31 = vadd.f32 %v4302_v51, %v2245_v17  ;;  %v1748_v7 = vadd.f32 %v1747_v39, %v1579_v19  ;;  %v1916_v56 = vpop.f32.mrf.mxu3  ;;  %v2780_v17 = vor.u32 %v3439_v42, %v2777_v35  ;;  %v2784_v19 = vor.u32 %v3442_v48, %v2783_v37 }
 0x136   :  { %v1580_v26 = vpop.f32.mrf.mxu1 }
 0x137   :  { %v2377_v33 = vmax.f32 %v2313_v31, 0.0  ;;  %v1917_v16 = vadd.f32 %v1916_v56, %v1748_v7  ;;  %v1581_v46 = vadd.f32 %v1580_v26, %v4016_v41  ;;  %v2792_v7 = vor.u32 %v3443_v3, %v2791_v55  ;;  %v3444_v3 = vld [vmem:[%s5347_s0 + $0x1bc] sm:$0xf] }
 0x138   :  { %v2087_v12 = vpop.f32.mrf.mxu0 }
 0x139   :  { %v2441_v0 = vpack.c.bf16 %v2377_v33, %v2377_v33  ;;  %v2086_v5 = vadd.f32 %v2085_v4, %v1917_v16  ;;  %v3440_v4 = vld [vmem:[%s5347_s0 + $0x19c] sm:$0xf] }
 0x13a   :  { %v2788_v31 = vor.u32 %v3440_v4, %v2785_v43 }
 0x13b   :  { %2506 = vst.msk [vmem:[%s5350_s4 + $0x4] sm:$0xf] %vm2504_vm1, %v2441_v0  ;;  %v2246_v45 = vmul.f32 %v4297_v32, %v2086_v5 }
 0x13c   :  { %v1749_v8 = vpop.f32.mrf.mxu2 }
 0x13d   :  { %v2314_v21 = vadd.f32 %v4302_v51, %v2246_v45  ;;  %v1750_v62 = vadd.f32 %v1749_v8, %v1581_v46  ;;  %v1918_v49 = vpop.f32.mrf.mxu3  ;;  %v2797_v8 = vld [vmem:[%s5347_s0 + $0x1cc] sm:$0xf0] }
 0x13e   :  { %v1583_v39 = vpop.f32.mrf.mxu1 }
 0x13f   :  { %v2378_v56 = vmax.f32 %v2314_v21, 0.0  ;;  %v1919_v41 = vadd.f32 %v1918_v49, %v1750_v62  ;;  %v1584_v5 = vadd.f32 %v1583_v39, %v4048_v57  ;;  %v2803_v57 = vld [vmem:[%s5347_s0 + $0x1c0] sm:$0xf]  ;;  %v3447_v21 = vld [vmem:[%s5347_s0 + $0x1d0] sm:$0xf0] }
 0x140   :  { %v2090_v26 = vpop.f32.mrf.mxu0  ;;  %v3445_v62 = vld [vmem:[%s5347_s0 + $0x1c4] sm:$0xf]  ;;  %v2805_v49 = vld [vmem:[%s5347_s0 + $0x1d4] sm:$0xf0]  ;;  %v2811_v39 = vld [vmem:[%s5347_s0 + $0x1c8] sm:$0xf] }
 0x141   :  { %v2442_v33 = vpack.c.bf16 %v2378_v56, %v2378_v56  ;;  %v2088_v16 = vadd.f32 %v2087_v12, %v1919_v41  ;;  %1622 = vmatmul.bf16.gmra.mxu1 %v2780_v17  ;;  %1791 = vmatmul.bf16.gmra.mxu2 %v2784_v19 }
 0x142   :  { %1960 = vmatmul.bf16.gmra.mxu3 %v2788_v31  ;;  %v3448_v31 = vld [vmem:[%s5347_s0 + $0x1d8] sm:$0xf0] }
 0x143   :  { %3367 = vmatmul.msk.bf16.gmra.mxu0 %vm1298_vm0, %v2792_v7  ;;  %2507 = vst.msk [vmem:[%s5350_s4 + $0x8] sm:$0xf] %vm2504_vm1, %v2442_v33  ;;  %v2247_v0 = vmul.f32 %v4297_v32, %v2088_v16  ;;  %v2800_v33 = vor.u32 %v3444_v3, %v2797_v8  ;;  %v2804_v16 = vor.u32 %v3447_v21, %v2803_v57 }
 0x144   :  { %v1752_v42 = vpop.f32.mrf.mxu2 }
 0x145   :  { %v2315_v35 = vadd.f32 %v4302_v51, %v2247_v0  ;;  %v1753_v37 = vadd.f32 %v1752_v42, %v1584_v5  ;;  %v1921_v48 = vpop.f32.mrf.mxu3  ;;  %v2808_v5 = vor.u32 %v3445_v62, %v2805_v49  ;;  %v2812_v42 = vor.u32 %v3448_v31, %v2811_v39  ;;  %v2817_v39 = vld [vmem:[%s5347_s0 + $0x1f4] sm:$0xf0]  ;;  %v3452_v31 = vld [vmem:[%s5347_s0 + $0x1f8] sm:$0xf0] }
 0x146   :  { %v1585_v12 = vpop.f32.mrf.mxu1 }
 0x147   :  { %v2379_v4 = vmax.f32 %v2315_v35, 0.0  ;;  %v1922_v43 = vadd.f32 %v1921_v48, %v1753_v37  ;;  %v1586_v19 = vadd.f32 %v1585_v12, %v4057_v61 }
 0x148   :  { %v2092_v45 = vpop.f32.mrf.mxu0 }
 0x149   :  { %v2443_v46 = vpack.c.bf16 %v2379_v4, %v2379_v4  ;;  %v2091_v55 = vadd.f32 %v2090_v26, %v1922_v43 }
 0x14b   :  { %2508 = vst.msk [vmem:[%s5350_s4 + $0xc] sm:$0xf] %vm2504_vm1, %v2443_v46  ;;  %v2248_v17 = vmul.f32 %v4297_v32, %v2091_v55 }
 0x14c   :  { %v1754_v7 = vpop.f32.mrf.mxu2 }
 0x14d   :  { %v2316_v56 = vadd.f32 %v4302_v51, %v2248_v17  ;;  %v1755_v41 = vadd.f32 %v1754_v7, %v1586_v19  ;;  %v1923_v26 = vpop.f32.mrf.mxu3  ;;  %v3449_v19 = vld [vmem:[%s5347_s0 + $0x1e4] sm:$0xf]  ;;  %v3450_v7 = vld [vmem:[%s5347_s0 + $0x1ec] sm:$0xf] }
 0x14e   :  { %v1588_v0 = vpop.f32.mrf.mxu1 }
 0x14f   :  { %v2380_v35 = vmax.f32 %v2316_v56, 0.0  ;;  %v1924_v61 = vadd.f32 %v1923_v26, %v1755_v41  ;;  %v1589_v43 = vadd.f32 %v1588_v0, %v4089_v13  ;;  %v2823_v13 = vld [vmem:[%s5347_s0 + $0x1e8] sm:$0xf]  ;;  %v2825_v56 = vld [vmem:[%s5347_s0 + $0x1fc] sm:$0xf0] }
 0x150   :  { %v2095_v37 = vpop.f32.mrf.mxu0 }
 0x151   :  { %v2444_v48 = vpack.c.bf16 %v2380_v35, %v2380_v35  ;;  %v2093_v12 = vadd.f32 %v2092_v45, %v1924_v61  ;;  %1627 = vmatmul.bf16.gmra.mxu1 %v2800_v33  ;;  %1796 = vmatmul.bf16.gmra.mxu2 %v2804_v16  ;;  %v2831_v33 = vld [vmem:[%s5347_s0 + $0x1f0] sm:$0xf]  ;;  %v3453_v16 = vld [vmem:[%s5347_s0 + $0x200] sm:$0xf0]  ;;  %v2820_v61 = vor.u32 %v3449_v19, %v2817_v39 }
 0x152   :  { %1965 = vmatmul.bf16.gmra.mxu3 %v2808_v5 }
 0x153   :  { %3368 = vmatmul.msk.bf16.gmra.mxu0 %vm1298_vm0, %v2812_v42  ;;  %2509 = vst.msk [vmem:[%s5350_s4 + $0x10] sm:$0xf] %vm2504_vm1, %v2444_v48  ;;  %v2249_v4 = vmul.f32 %v4297_v32, %v2093_v12  ;;  %v2828_v12 = vor.u32 %v3450_v7, %v2825_v56  ;;  %v3454_v56 = vld [vmem:[%s5347_s0 + $0x20c] sm:$0xf] }
 0x154   :  { %v1757_v46 = vpop.f32.mrf.mxu2 }
 0x155   :  { %v2317_v55 = vadd.f32 %v4302_v51, %v2249_v4  ;;  %v1758_v3 = vadd.f32 %v1757_v46, %v1589_v43  ;;  %v1926_v8 = vpop.f32.mrf.mxu3  ;;  %v2832_v4 = vor.u32 %v3453_v16, %v2831_v33  ;;  %v3455_v33 = vld [vmem:[%s5347_s0 + $0x214] sm:$0xf]  ;;  %v2845_v16 = vld [vmem:[%s5347_s0 + $0x224] sm:$0xf0] }
 0x156   :  { %v1590_v45 = vpop.f32.mrf.mxu1 }
 0x157   :  { %v2381_v57 = vmax.f32 %v2317_v55, 0.0  ;;  %v1927_v21 = vadd.f32 %v1926_v8, %v1758_v3  ;;  %v1591_v26 = vadd.f32 %v1590_v45, %v4098_v23 }
 0x158   :  { %v2097_v62 = vpop.f32.mrf.mxu0 }
 0x159   :  { %v2445_v49 = vpack.c.bf16 %v2381_v57, %v2381_v57  ;;  %v2096_v17 = vadd.f32 %v2095_v37, %v1927_v21  ;;  %v2824_v37 = vor.u32 %v3452_v31, %v2823_v13 }
 0x15b   :  { %2510 = vst.msk [vmem:[%s5350_s4 + $0x14] sm:$0xf] %vm2504_vm1, %v2445_v49  ;;  %v2250_v41 = vmul.f32 %v4297_v32, %v2096_v17 }
 0x15c   :  { %v1759_v0 = vpop.f32.mrf.mxu2 }
 0x15d   :  { %v2318_v5 = vadd.f32 %v4302_v51, %v2250_v41  ;;  %v1760_v42 = vadd.f32 %v1759_v0, %v1591_v26  ;;  %v1928_v35 = vpop.f32.mrf.mxu3  ;;  %v2837_v41 = vld [vmem:[%s5347_s0 + $0x21c] sm:$0xf0]  ;;  %v3457_v26 = vld [vmem:[%s5347_s0 + $0x220] sm:$0xf0] }
 0x15e   :  { %v1593_v48 = vpop.f32.mrf.mxu1 }
 0x15f   :  { %v2382_v43 = vmax.f32 %v2318_v5, 0.0  ;;  %v1929_v23 = vadd.f32 %v1928_v35, %v1760_v42  ;;  %v1594_v45 = vadd.f32 %v1593_v48, %v4130_v47  ;;  %v2843_v47 = vld [vmem:[%s5347_s0 + $0x210] sm:$0xf]  ;;  %v2851_v42 = vld [vmem:[%s5347_s0 + $0x218] sm:$0xf] }
 0x160   :  { %v2100_v46 = vpop.f32.mrf.mxu0  ;;  %v3458_v35 = vld [vmem:[%s5347_s0 + $0x228] sm:$0xf0] }
 0x161   :  { %v2446_v55 = vpack.c.bf16 %v2382_v43, %v2382_v43  ;;  %v2098_v3 = vadd.f32 %v2097_v62, %v1929_v23  ;;  %1632 = vmatmul.bf16.gmra.mxu1 %v2820_v61  ;;  %1801 = vmatmul.bf16.gmra.mxu2 %v2824_v37  ;;  %v2844_v43 = vor.u32 %v3457_v26, %v2843_v47  ;;  %v3459_v26 = vld [vmem:[%s5347_s0 + $0x234] sm:$0xf] }
 0x162   :  { %1970 = vmatmul.bf16.gmra.mxu3 %v2828_v12 }
 0x163   :  { %3369 = vmatmul.msk.bf16.gmra.mxu0 %vm1298_vm0, %v2832_v4  ;;  %2511 = vst.msk [vmem:[%s5350_s4 + $0x18] sm:$0xf] %vm2504_vm1, %v2446_v55  ;;  %v2251_v8 = vmul.f32 %v4297_v32, %v2098_v3  ;;  %v2840_v4 = vor.u32 %v3454_v56, %v2837_v41  ;;  %v2852_v55 = vor.u32 %v3458_v35, %v2851_v42 }
 0x164   :  { %v1762_v57 = vpop.f32.mrf.mxu2 }
 0x165   :  { %v2319_v21 = vadd.f32 %v4302_v51, %v2251_v8  ;;  %v1763_v49 = vadd.f32 %v1762_v57, %v1594_v45  ;;  %v1931_v17 = vpop.f32.mrf.mxu3 }
 0x166   :  { %v1595_v62 = vpop.f32.mrf.mxu1 }
 0x167   :  { %v2383_v19 = vmax.f32 %v2319_v21, 0.0  ;;  %v1932_v39 = vadd.f32 %v1931_v17, %v1763_v49  ;;  %v1596_v5 = vadd.f32 %v1595_v62, %v4139_v53 }
 0x168   :  { %v2102_v13 = vpop.f32.mrf.mxu0 }
 0x169   :  { %v2447_v31 = vpack.c.bf16 %v2383_v19, %v2383_v19  ;;  %v2101_v7 = vadd.f32 %v2100_v46, %v1932_v39  ;;  %v2848_v46 = vor.u32 %v3455_v33, %v2845_v16  ;;  %v2857_v33 = vld [vmem:[%s5347_s0 + $0x244] sm:$0xf0]  ;;  %v3462_v16 = vld [vmem:[%s5347_s0 + $0x248] sm:$0xf0] }
 0x16b   :  { %2512 = vst.msk [vmem:[%s5350_s4 + $0x1c] sm:$0xf] %vm2504_vm1, %v2447_v31  ;;  %v2252_v0 = vmul.f32 %v4297_v32, %v2101_v7 }
 0x16c   :  { %v1764_v61 = vpop.f32.mrf.mxu2 }
 0x16d   :  { %v2320_v37 = vadd.f32 %v4302_v51, %v2252_v0  ;;  %v1765_v48 = vadd.f32 %v1764_v61, %v1596_v5  ;;  %v1933_v12 = vpop.f32.mrf.mxu3  ;;  %v3460_v0 = vld [vmem:[%s5347_s0 + $0x23c] sm:$0xf]  ;;  %v2865_v5 = vld [vmem:[%s5347_s0 + $0x24c] sm:$0xf0]  ;;  %v2871_v61 = vld [vmem:[%s5347_s0 + $0x240] sm:$0xf] }
 0x16e   :  { %v1598_v23 = vpop.f32.mrf.mxu1 }
 0x16f   :  { %v2384_v3 = vmax.f32 %v2320_v37, 0.0  ;;  %v1934_v53 = vadd.f32 %v1933_v12, %v1765_v48  ;;  %v1599_v49 = vadd.f32 %v1598_v23, %v4171_v25  ;;  %v2863_v25 = vld [vmem:[%s5347_s0 + $0x238] sm:$0xf]  ;;  %v3463_v37 = vld [vmem:[%s5347_s0 + $0x250] sm:$0xf0]  ;;  %v2860_v23 = vor.u32 %v3459_v26, %v2857_v33 }
 0x170   :  { %v2105_v8 = vpop.f32.mrf.mxu0  ;;  %v3464_v33 = vld [vmem:[%s5347_s0 + $0x25c] sm:$0xf] }
 0x171   :  { %v2448_v45 = vpack.c.bf16 %v2384_v3, %v2384_v3  ;;  %v2103_v57 = vadd.f32 %v2102_v13, %v1934_v53  ;;  %1637 = vmatmul.bf16.gmra.mxu1 %v2840_v4  ;;  %1806 = vmatmul.bf16.gmra.mxu2 %v2844_v43  ;;  %v2868_v3 = vor.u32 %v3460_v0, %v2865_v5  ;;  %v3465_v0 = vld [vmem:[%s5347_s0 + $0x264] sm:$0xf]  ;;  %v2885_v5 = vld [vmem:[%s5347_s0 + $0x274] sm:$0xf0] }
 0x172   :  { %1975 = vmatmul.bf16.gmra.mxu3 %v2848_v46  ;;  %v2864_v46 = vor.u32 %v3462_v16, %v2863_v25  ;;  %v2872_v53 = vor.u32 %v3463_v37, %v2871_v61  ;;  %v2877_v25 = vld [vmem:[%s5347_s0 + $0x26c] sm:$0xf0]  ;;  %v3467_v16 = vld [vmem:[%s5347_s0 + $0x270] sm:$0xf0]  ;;  %v2891_v61 = vld [vmem:[%s5347_s0 + $0x268] sm:$0xf] }
 0x173   :  { %3370 = vmatmul.msk.bf16.gmra.mxu0 %vm1298_vm0, %v2852_v55  ;;  %2513 = vst.msk [vmem:[%s5350_s4 + $0x20] sm:$0xf] %vm2504_vm1, %v2448_v45  ;;  %v2253_v21 = vmul.f32 %v4297_v32, %v2103_v57  ;;  %v3468_v37 = vld [vmem:[%s5347_s0 + $0x278] sm:$0xf0] }
 0x174   :  { %v1767_v17 = vpop.f32.mrf.mxu2 }
 0x175   :  { %v2321_v62 = vadd.f32 %v4302_v51, %v2253_v21  ;;  %v1768_v19 = vadd.f32 %v1767_v17, %v1599_v49  ;;  %v1936_v39 = vpop.f32.mrf.mxu3 }
 0x176   :  { %v1600_v13 = vpop.f32.mrf.mxu1 }
 0x177   :  { %v2385_v31 = vmax.f32 %v2321_v62, 0.0  ;;  %v1937_v7 = vadd.f32 %v1936_v39, %v1768_v19  ;;  %v1601_v35 = vadd.f32 %v1600_v13, %v4180_v29 }
 0x178   :  { %v2107_v56 = vpop.f32.mrf.mxu0 }
 0x179   :  { %v2449_v41 = vpack.c.bf16 %v2385_v31, %v2385_v31  ;;  %v2106_v47 = vadd.f32 %v2105_v8, %v1937_v7 }
 0x17b   :  { %2514 = vst.msk [vmem:[%s5350_s4 + $0x24] sm:$0xf] %vm2504_vm1, %v2449_v41  ;;  %v2254_v42 = vmul.f32 %v4297_v32, %v2106_v47 }
 0x17c   :  { %v1769_v48 = vpop.f32.mrf.mxu2 }
 0x17d   :  { %v2322_v12 = vadd.f32 %v4302_v51, %v2254_v42  ;;  %v1770_v4 = vadd.f32 %v1769_v48, %v1601_v35  ;;  %v1938_v43 = vpop.f32.mrf.mxu3 }
 0x17e   :  { %v1603_v55 = vpop.f32.mrf.mxu1 }
 0x17f   :  { %v2386_v8 = vmax.f32 %v2322_v12, 0.0  ;;  %v1939_v29 = vadd.f32 %v1938_v43, %v1770_v4  ;;  %v1604_v17 = vadd.f32 %v1603_v55, %v4212_v9  ;;  %v2883_v9 = vld [vmem:[%s5347_s0 + $0x260] sm:$0xf] }
 0x180   :  { %v2110_v45 = vpop.f32.mrf.mxu0 }
 0x181   :  { %v2450_v57 = vpack.c.bf16 %v2386_v8, %v2386_v8  ;;  %v2108_v21 = vadd.f32 %v2107_v56, %v1939_v29  ;;  %1642 = vmatmul.bf16.gmra.mxu1 %v2860_v23  ;;  %1811 = vmatmul.bf16.gmra.mxu2 %v2864_v46  ;;  %v2880_v23 = vor.u32 %v3464_v33, %v2877_v25  ;;  %v2897_v33 = vld [vmem:[%s5347_s0 + $0x294] sm:$0xf0]  ;;  %v3472_v25 = vld [vmem:[%s5347_s0 + $0x298] sm:$0xf0] }
 0x182   :  { %1980 = vmatmul.bf16.gmra.mxu3 %v2868_v3  ;;  %v2884_v46 = vor.u32 %v3467_v16, %v2883_v9  ;;  %v2888_v3 = vor.u32 %v3465_v0, %v2885_v5  ;;  %v3470_v9 = vld [vmem:[%s5347_s0 + $0x28c] sm:$0xf]  ;;  %v2905_v16 = vld [vmem:[%s5347_s0 + $0x29c] sm:$0xf0] }
 0x183   :  { %3371 = vmatmul.msk.bf16.gmra.mxu0 %vm1298_vm0, %v2872_v53  ;;  %2515 = vst.msk [vmem:[%s5350_s4 + $0x28] sm:$0xf] %vm2504_vm1, %v2450_v57  ;;  %v2255_v49 = vmul.f32 %v4297_v32, %v2108_v21  ;;  %v2892_v53 = vor.u32 %v3468_v37, %v2891_v61 }
 0x184   :  { %v1772_v62 = vpop.f32.mrf.mxu2 }
 0x185   :  { %v2323_v19 = vadd.f32 %v4302_v51, %v2255_v49  ;;  %v1773_v39 = vadd.f32 %v1772_v62, %v1604_v17  ;;  %v1941_v13 = vpop.f32.mrf.mxu3 }
 0x186   :  { %v1605_v31 = vpop.f32.mrf.mxu1 }
 0x187   :  { %v2387_v7 = vmax.f32 %v2323_v19, 0.0  ;;  %v1942_v56 = vadd.f32 %v1941_v13, %v1773_v39  ;;  %v1606_v35 = vadd.f32 %v1605_v31, %v4221_v63 }
 0x188   :  { %v2112_v41 = vpop.f32.mrf.mxu0 }
 0x189   :  { %v2451_v47 = vpack.c.bf16 %v2387_v7, %v2387_v7  ;;  %v2111_v26 = vadd.f32 %v2110_v45, %v1942_v56 }
 0x18b   :  { %2516 = vst.msk [vmem:[%s5350_s4 + $0x2c] sm:$0xf] %vm2504_vm1, %v2451_v47  ;;  %v2256_v42 = vmul.f32 %v4297_v32, %v2111_v26  ;;  %v3469_v26 = vld [vmem:[%s5347_s0 + $0x284] sm:$0xf] }
 0x18c   :  { %v1774_v48 = vpop.f32.mrf.mxu2 }
 0x18d   :  { %v2324_v12 = vadd.f32 %v4302_v51, %v2256_v42  ;;  %v1775_v4 = vadd.f32 %v1774_v48, %v1606_v35  ;;  %v1943_v43 = vpop.f32.mrf.mxu3  ;;  %v2911_v42 = vld [vmem:[%s5347_s0 + $0x290] sm:$0xf]  ;;  %v3473_v35 = vld [vmem:[%s5347_s0 + $0x2a0] sm:$0xf0] }
 0x18e   :  { %v1608_v55 = vpop.f32.mrf.mxu1 }
 0x18f   :  { %v2388_v8 = vmax.f32 %v2324_v12, 0.0  ;;  %v1944_v63 = vadd.f32 %v1943_v43, %v1775_v4  ;;  %v1609_v49 = vadd.f32 %v1608_v55, %v4253_v36  ;;  %v2903_v36 = vld [vmem:[%s5347_s0 + $0x288] sm:$0xf]  ;;  %v2900_v4 = vor.u32 %v3469_v26, %v2897_v33  ;;  %v3475_v26 = vld [vmem:[%s5347_s0 + $0x2b4] sm:$0xf] }
 0x190   :  { %v2115_v29 = vpop.f32.mrf.mxu0  ;;  %v2904_v43 = vor.u32 %v3472_v25, %v2903_v36  ;;  %v2912_v55 = vor.u32 %v3473_v35, %v2911_v42  ;;  %v2925_v33 = vld [vmem:[%s5347_s0 + $0x2c4] sm:$0xf0] }
 0x191   :  { %v2452_v45 = vpack.c.bf16 %v2388_v8, %v2388_v8  ;;  %v2113_v57 = vadd.f32 %v2112_v41, %v1944_v63  ;;  %1647 = vmatmul.bf16.gmra.mxu1 %v2880_v23  ;;  %1816 = vmatmul.bf16.gmra.mxu2 %v2884_v46  ;;  %v2908_v46 = vor.u32 %v3470_v9, %v2905_v16  ;;  %v2931_v9 = vld [vmem:[%s5347_s0 + $0x2b8] sm:$0xf]  ;;  %v3478_v16 = vld [vmem:[%s5347_s0 + $0x2c8] sm:$0xf0] }
 0x192   :  { %1985 = vmatmul.bf16.gmra.mxu3 %v2888_v3 }
 0x193   :  { %3372 = vmatmul.msk.bf16.gmra.mxu0 %vm1298_vm0, %v2892_v53  ;;  %2517 = vst.msk [vmem:[%s5350_s4 + $0x30] sm:$0xf] %vm2504_vm1, %v2452_v45  ;;  %v2257_v21 = vmul.f32 %v4297_v32, %v2113_v57 }
 0x194   :  { %v1777_v17 = vpop.f32.mrf.mxu2 }
 0x195   :  { %v2325_v62 = vadd.f32 %v4302_v51, %v2257_v21  ;;  %v1778_v19 = vadd.f32 %v1777_v17, %v1609_v49  ;;  %v1946_v39 = vpop.f32.mrf.mxu3 }
 0x196   :  { %v1610_v13 = vpop.f32.mrf.mxu1 }
 0x197   :  { %v2389_v31 = vmax.f32 %v2325_v62, 0.0  ;;  %v1947_v7 = vadd.f32 %v1946_v39, %v1778_v19  ;;  %v1611_v5 = vadd.f32 %v1610_v13, %v4262_v1 }
 0x198   :  { %v2117_v56 = vpop.f32.mrf.mxu0 }
 0x199   :  { %v2453_v41 = vpack.c.bf16 %v2389_v31, %v2389_v31  ;;  %v2116_v47 = vadd.f32 %v2115_v29, %v1947_v7 }
 0x19b   :  { %2518 = vst.msk [vmem:[%s5350_s4 + $0x34] sm:$0xf] %vm2504_vm1, %v2453_v41  ;;  %v2258_v0 = vmul.f32 %v4297_v32, %v2116_v47  ;;  %v2917_v41 = vld [vmem:[%s5347_s0 + $0x2bc] sm:$0xf0]  ;;  %v3477_v47 = vld [vmem:[%s5347_s0 + $0x2c0] sm:$0xf0] }
 0x19c   :  { %v1779_v61 = vpop.f32.mrf.mxu2 }
 0x19d   :  { %v2326_v37 = vadd.f32 %v4302_v51, %v2258_v0  ;;  %v1780_v48 = vadd.f32 %v1779_v61, %v1611_v5  ;;  %v1948_v12 = vpop.f32.mrf.mxu3 }
 0x19e   :  { %v1613_v23 = vpop.f32.mrf.mxu1 }
 0x19f   :  { %v2390_v3 = vmax.f32 %v2326_v37, 0.0  ;;  %v1949_v1 = vadd.f32 %v1948_v12, %v1780_v48  ;;  %v1614_v45 = vadd.f32 %v1613_v23, %v3964_v14  ;;  %v2923_v14 = vld [vmem:[%s5347_s0 + $0x2b0] sm:$0xf]  ;;  %v2928_v12 = vor.u32 %v3475_v26, %v2925_v33 }
 0x1a0   :  { %v2120_v53 = vpop.f32.mrf.mxu0  ;;  %v2924_v37 = vor.u32 %v3477_v47, %v2923_v14  ;;  %v2951_v14 = vld [vmem:[%s5347_s0 + $0x2e0] sm:$0xf]  ;;  %v3483_v47 = vld [vmem:[%s5347_s0 + $0x2f0] sm:$0xf0] }
 0x1a1   :  { %v2454_v8 = vpack.c.bf16 %v2390_v3, %v2390_v3  ;;  %v2118_v63 = vadd.f32 %v2117_v56, %v1949_v1  ;;  %1652 = vmatmul.bf16.gmra.mxu1 %v2900_v4  ;;  %1821 = vmatmul.bf16.gmra.mxu2 %v2904_v43  ;;  %v3474_v56 = vld [vmem:[%s5347_s0 + $0x2ac] sm:$0xf]  ;;  %v2932_v4 = vor.u32 %v3478_v16, %v2931_v9 }
 0x1a2   :  { %1990 = vmatmul.bf16.gmra.mxu3 %v2908_v46  ;;  %v2920_v61 = vor.u32 %v3474_v56, %v2917_v41 }
 0x1a3   :  { %3373 = vmatmul.msk.bf16.gmra.mxu0 %vm1298_vm0, %v2912_v55  ;;  %2519 = vst.msk [vmem:[%s5350_s4 + $0x38] sm:$0xf] %vm2504_vm1, %v2454_v8  ;;  %v2259_v29 = vmul.f32 %v4297_v32, %v2118_v63 }
 0x1a4   :  { %v1782_v57 = vpop.f32.mrf.mxu2 }
 0x1a5   :  { %v2327_v21 = vadd.f32 %v4302_v51, %v2259_v29  ;;  %v1783_v49 = vadd.f32 %v1782_v57, %v1614_v45  ;;  %v1951_v17 = vpop.f32.mrf.mxu3 }
 0x1a6   :  { %v1615_v62 = vpop.f32.mrf.mxu1 }
 0x1a7   :  { %v2391_v19 = vmax.f32 %v2327_v21, 0.0  ;;  %v1952_v39 = vadd.f32 %v1951_v17, %v1783_v49  ;;  %v1616_v25 = vadd.f32 %v1615_v62, %v3973_v20 }
 0x1a8   :  { %v2122_v13 = vpop.f32.mrf.mxu0 }
 0x1a9   :  { %v2455_v31 = vpack.c.bf16 %v2391_v19, %v2391_v19  ;;  %v2121_v7 = vadd.f32 %v2120_v53, %v1952_v39  ;;  %v3479_v19 = vld [vmem:[%s5347_s0 + $0x2d4] sm:$0xf]  ;;  %v2937_v39 = vld [vmem:[%s5347_s0 + $0x2e4] sm:$0xf0] }
 0x1aa   :  { %v2940_v9 = vor.u32 %v3479_v19, %v2937_v39  ;;  %v2971_v19 = vld [vmem:[%s5347_s0 + $0x308] sm:$0xf]  ;;  %v3488_v39 = vld [vmem:[%s5347_s0 + $0x318] sm:$0xf0] }
 0x1ab   :  { %2520 = vst.msk [vmem:[%s5350_s4 + $0x3c] sm:$0xf] %vm2504_vm1, %v2455_v31  ;;  %v2260_v36 = vmul.f32 %v4297_v32, %v2121_v7  ;;  %v3480_v31 = vld [vmem:[%s5347_s0 + $0x2dc] sm:$0xf]  ;;  %v2945_v7 = vld [vmem:[%s5347_s0 + $0x2ec] sm:$0xf0] }
 0x1ac   :  { %v1784_v0 = vpop.f32.mrf.mxu2 }
 0x1ad   :  { %v2328_v5 = vadd.f32 %v4302_v51, %v2260_v36  ;;  %v1785_v42 = vadd.f32 %v1784_v0, %v1616_v25  ;;  %v1953_v35 = vpop.f32.mrf.mxu3 }
 0x1ae   :  { %v1618_v48 = vpop.f32.mrf.mxu1 }
 0x1af   :  { %v2392_v43 = vmax.f32 %v2328_v5, 0.0  ;;  %v1954_v20 = vadd.f32 %v1953_v35, %v1785_v42  ;;  %v1619_v1 = vadd.f32 %v1618_v48, %v4005_v34  ;;  %v2943_v34 = vld [vmem:[%s5347_s0 + $0x2d8] sm:$0xf]  ;;  %v2948_v5 = vor.u32 %v3480_v31, %v2945_v7 }
 0x1b0   :  { %v2125_v23 = vpop.f32.mrf.mxu0  ;;  %v2952_v42 = vor.u32 %v3483_v47, %v2951_v14 }
 0x1b1   :  { %v2456_v46 = vpack.c.bf16 %v2392_v43, %v2392_v43  ;;  %v2123_v55 = vadd.f32 %v2122_v13, %v1954_v20  ;;  %1657 = vmatmul.bf16.gmra.mxu1 %v2920_v61  ;;  %1826 = vmatmul.bf16.gmra.mxu2 %v2924_v37  ;;  %v3482_v13 = vld [vmem:[%s5347_s0 + $0x2e8] sm:$0xf0] }
 0x1b2   :  { %1995 = vmatmul.bf16.gmra.mxu3 %v2928_v12  ;;  %v2944_v16 = vor.u32 %v3482_v13, %v2943_v34 }
 0x1b3   :  { %3374 = vmatmul.msk.bf16.gmra.mxu0 %vm1298_vm0, %v2932_v4  ;;  %2521 = vst.msk [vmem:[%s5350_s4 + $0x40] sm:$0xf] %vm2504_vm1, %v2456_v46  ;;  %v2261_v3 = vmul.f32 %v4297_v32, %v2123_v55 }
 0x1b4   :  { %v1787_v53 = vpop.f32.mrf.mxu2 }
 0x1b5   :  { %v2329_v8 = vadd.f32 %v4302_v51, %v2261_v3  ;;  %v1788_v63 = vadd.f32 %v1787_v53, %v1619_v1  ;;  %v1956_v29 = vpop.f32.mrf.mxu3 }
 0x1b6   :  { %v1620_v45 = vpop.f32.mrf.mxu1 }
 0x1b7   :  { %v2393_v57 = vmax.f32 %v2329_v8, 0.0  ;;  %v1957_v21 = vadd.f32 %v1956_v29, %v1788_v63  ;;  %v1621_v41 = vadd.f32 %v1620_v45, %v4014_v40  ;;  %v3484_v29 = vld [vmem:[%s5347_s0 + $0x2fc] sm:$0xf]  ;;  %v2957_v45 = vld [vmem:[%s5347_s0 + $0x30c] sm:$0xf0] }
 0x1b8   :  { %v2127_v49 = vpop.f32.mrf.mxu0 }
 0x1b9   :  { %v2457_v17 = vpack.c.bf16 %v2393_v57, %v2393_v57  ;;  %v2126_v62 = vadd.f32 %v2125_v23, %v1957_v21  ;;  %v3487_v57 = vld [vmem:[%s5347_s0 + $0x310] sm:$0xf0]  ;;  %v3485_v21 = vld [vmem:[%s5347_s0 + $0x304] sm:$0xf] }
 0x1bb   :  { %2522 = vst.msk [vmem:[%s5350_s4 + $0x44] sm:$0xf] %vm2504_vm1, %v2457_v17  ;;  %v2262_v56 = vmul.f32 %v4297_v32, %v2126_v62 }
 0x1bc   :  { %v1789_v26 = vpop.f32.mrf.mxu2 }
 0x1bd   :  { %v2330_v33 = vadd.f32 %v4302_v51, %v2262_v56  ;;  %v1790_v36 = vadd.f32 %v1789_v26, %v1621_v41  ;;  %v1958_v25 = vpop.f32.mrf.mxu3  ;;  %v2960_v56 = vor.u32 %v3484_v29, %v2957_v45  ;;  %v2972_v26 = vor.u32 %v3488_v39, %v2971_v19 }
 0x1be   :  { %v1623_v0 = vpop.f32.mrf.mxu1 }
 0x1bf   :  { %v2394_v35 = vmax.f32 %v2330_v33, 0.0  ;;  %v1959_v40 = vadd.f32 %v1958_v25, %v1790_v36  ;;  %v1624_v4 = vadd.f32 %v1623_v0, %v4046_v54  ;;  %v2963_v54 = vld [vmem:[%s5347_s0 + $0x300] sm:$0xf] }
 0x1c0   :  { %v2130_v61 = vpop.f32.mrf.mxu0  ;;  %v2964_v41 = vor.u32 %v3487_v57, %v2963_v54 }
 0x1c1   :  { %v2458_v37 = vpack.c.bf16 %v2394_v35, %v2394_v35  ;;  %v2128_v48 = vadd.f32 %v2127_v49, %v1959_v40  ;;  %1662 = vmatmul.bf16.gmra.mxu1 %v2940_v9  ;;  %1831 = vmatmul.bf16.gmra.mxu2 %v2944_v16  ;;  %v2965_v49 = vld [vmem:[%s5347_s0 + $0x314] sm:$0xf0] }
 0x1c2   :  { %2000 = vmatmul.bf16.gmra.mxu3 %v2948_v5  ;;  %v2968_v47 = vor.u32 %v3485_v21, %v2965_v49 }
 0x1c3   :  { %3375 = vmatmul.msk.bf16.gmra.mxu0 %vm1298_vm0, %v2952_v42  ;;  %2523 = vst.msk [vmem:[%s5350_s4 + $0x48] sm:$0xf] %vm2504_vm1, %v2458_v37  ;;  %v2263_v12 = vmul.f32 %v4297_v32, %v2128_v48 }
 0x1c4   :  { %v1792_v43 = vpop.f32.mrf.mxu2 }
 0x1c5   :  { %v2331_v20 = vadd.f32 %v4302_v51, %v2263_v12  ;;  %v1793_v23 = vadd.f32 %v1792_v43, %v1624_v4  ;;  %v1961_v46 = vpop.f32.mrf.mxu3 }
 0x1c6   :  { %v1625_v55 = vpop.f32.mrf.mxu1 }
 0x1c7   :  { %v2395_v3 = vmax.f32 %v2331_v20, 0.0  ;;  %v1962_v1 = vadd.f32 %v1961_v46, %v1793_v23  ;;  %v1626_v62 = vadd.f32 %v1625_v55, %v4055_v60  ;;  %v3489_v20 = vld [vmem:[%s5347_s0 + $0x324] sm:$0xf]  ;;  %v2977_v23 = vld [vmem:[%s5347_s0 + $0x334] sm:$0xf0] }
 0x1c8   :  { %v2132_v53 = vpop.f32.mrf.mxu0  ;;  %v3492_v46 = vld [vmem:[%s5347_s0 + $0x338] sm:$0xf0]  ;;  %v3490_v55 = vld [vmem:[%s5347_s0 + $0x32c] sm:$0xf]  ;;  %v2980_v21 = vor.u32 %v3489_v20, %v2977_v23 }
 0x1c9   :  { %v2459_v8 = vpack.c.bf16 %v2395_v3, %v2395_v3  ;;  %v2131_v63 = vadd.f32 %v2130_v61, %v1962_v1  ;;  %v2985_v3 = vld [vmem:[%s5347_s0 + $0x33c] sm:$0xf0] }
 0x1cb   :  { %2524 = vst.msk [vmem:[%s5350_s4 + $0x4c] sm:$0xf] %vm2504_vm1, %v2459_v8  ;;  %v2264_v17 = vmul.f32 %v4297_v32, %v2131_v63  ;;  %v2991_v8 = vld [vmem:[%s5347_s0 + $0x330] sm:$0xf]  ;;  %v3493_v63 = vld [vmem:[%s5347_s0 + $0x340] sm:$0xf0] }
 0x1cc   :  { %v1794_v34 = vpop.f32.mrf.mxu2  ;;  %v2992_v19 = vor.u32 %v3493_v63, %v2991_v8 }
 0x1cd   :  { %v2332_v13 = vadd.f32 %v4302_v51, %v2264_v17  ;;  %v1795_v31 = vadd.f32 %v1794_v34, %v1626_v62  ;;  %v1963_v7 = vpop.f32.mrf.mxu3  ;;  %v2988_v62 = vor.u32 %v3490_v55, %v2985_v3 }
 0x1ce   :  { %v1628_v14 = vpop.f32.mrf.mxu1 }
 0x1cf   :  { %v2396_v33 = vmax.f32 %v2332_v13, 0.0  ;;  %v1964_v60 = vadd.f32 %v1963_v7, %v1795_v31  ;;  %v1629_v0 = vadd.f32 %v1628_v14, %v4087_v10  ;;  %v2983_v10 = vld [vmem:[%s5347_s0 + $0x328] sm:$0xf] }
 0x1d0   :  { %v2135_v36 = vpop.f32.mrf.mxu0  ;;  %v2984_v49 = vor.u32 %v3492_v46, %v2983_v10 }
 0x1d1   :  { %v2460_v25 = vpack.c.bf16 %v2396_v33, %v2396_v33  ;;  %v2133_v9 = vadd.f32 %v2132_v53, %v1964_v60  ;;  %1667 = vmatmul.bf16.gmra.mxu1 %v2960_v56  ;;  %1836 = vmatmul.bf16.gmra.mxu2 %v2964_v41 }
 0x1d2   :  { %2005 = vmatmul.bf16.gmra.mxu3 %v2968_v47 }
 0x1d3   :  { %3376 = vmatmul.msk.bf16.gmra.mxu0 %vm1298_vm0, %v2972_v26  ;;  %2525 = vst.msk [vmem:[%s5350_s4 + $0x50] sm:$0xf] %vm2504_vm1, %v2460_v25  ;;  %v2265_v16 = vmul.f32 %v4297_v32, %v2133_v9 }
 0x1d4   :  { %v1797_v5 = vpop.f32.mrf.mxu2 }
 0x1d5   :  { %v2333_v42 = vadd.f32 %v4302_v51, %v2265_v16  ;;  %v1798_v35 = vadd.f32 %v1797_v5, %v1629_v0  ;;  %v1966_v40 = vpop.f32.mrf.mxu3  ;;  %v3494_v0 = vld [vmem:[%s5347_s0 + $0x34c] sm:$0xf]  ;;  %v3495_v5 = vld [vmem:[%s5347_s0 + $0x354] sm:$0xf] }
 0x1d6   :  { %v1630_v61 = vpop.f32.mrf.mxu1 }
 0x1d7   :  { %v2397_v37 = vmax.f32 %v2333_v42, 0.0  ;;  %v1967_v48 = vadd.f32 %v1966_v40, %v1798_v35  ;;  %v1631_v53 = vadd.f32 %v1630_v61, %v4096_v22  ;;  %v3005_v42 = vld [vmem:[%s5347_s0 + $0x364] sm:$0xf0]  ;;  %v4793_v35 = vld [vmem:[%s5348_s2] ss:$0 sm:$0xff] }
 0x1d8   :  { %v2137_v12 = vpop.f32.mrf.mxu0  ;;  %v3008_v55 = vor.u32 %v3495_v5, %v3005_v42 }
 0x1d9   :  { %v2461_v4 = vpack.c.bf16 %v2397_v37, %v2397_v37  ;;  %v2136_v43 = vadd.f32 %v2135_v36, %v1967_v48  ;;  %v3011_v37 = vld [vmem:[%s5347_s0 + $0x358] sm:$0xf]  ;;  %v3498_v48 = vld [vmem:[%s5347_s0 + $0x368] sm:$0xf0] }
 0x1da   :  { %v3012_v3 = vor.u32 %v3498_v48, %v3011_v37 }
 0x1db   :  { %2526 = vst.msk [vmem:[%s5350_s4 + $0x54] sm:$0xf] %vm2504_vm1, %v2461_v4  ;;  %v2266_v1 = vmul.f32 %v4297_v32, %v2136_v43  ;;  %v4806_v4 = vld [vmem:[%s5349_s3] ss:$0 sm:$0xff] }
 0x1dc   :  { %v1799_v29 = vpop.f32.mrf.mxu2 }
 0x1dd   :  { %v2334_v45 = vadd.f32 %v4302_v51, %v2266_v1  ;;  %v1800_v54 = vadd.f32 %v1799_v29, %v1631_v53  ;;  %v1968_v57 = vpop.f32.mrf.mxu3 }
 0x1de   :  { %v1633_v17 = vpop.f32.mrf.mxu1 }
 0x1df   :  { %v2398_v39 = vmax.f32 %v2334_v45, 0.0  ;;  %v1969_v22 = vadd.f32 %v1968_v57, %v1800_v54  ;;  %v1634_v56 = vadd.f32 %v1633_v17, %v4128_v44  ;;  %v3003_v44 = vld [vmem:[%s5347_s0 + $0x350] sm:$0xf] }
 0x1e0   :  { %v2140_v34 = vpop.f32.mrf.mxu0 }
 0x1e1   :  { %v2462_v13 = vpack.c.bf16 %v2398_v39, %v2398_v39  ;;  %v2138_v31 = vadd.f32 %v2137_v12, %v1969_v22  ;;  %1672 = vmatmul.bf16.gmra.mxu1 %v2980_v21  ;;  %1841 = vmatmul.bf16.gmra.mxu2 %v2984_v49 }
 0x1e2   :  { %2010 = vmatmul.bf16.gmra.mxu3 %v2988_v62 }
 0x1e3   :  { %3377 = vmatmul.msk.bf16.gmra.mxu0 %vm1298_vm0, %v2992_v19  ;;  %2527 = vst.msk [vmem:[%s5350_s4 + $0x58] sm:$0xf] %vm2504_vm1, %v2462_v13  ;;  %v2267_v7 = vmul.f32 %v4297_v32, %v2138_v31  ;;  %v2997_v32 = vld [vmem:[%s5347_s0 + $0x35c] sm:$0xf0]  ;;  %v3499_v31 = vld [vmem:[%s5347_s0 + $0x374] sm:$0xf] }
 0x1e4   :  { %v1802_v41 = vpop.f32.mrf.mxu2  ;;  %v3000_v10 = vor.u32 %v3494_v0, %v2997_v32 }
 0x1e5   :  { %v2335_v14 = vadd.f32 %v4302_v51, %v2267_v7  ;;  %v1803_v47 = vadd.f32 %v1802_v41, %v1634_v56  ;;  %v1971_v26 = vpop.f32.mrf.mxu3  ;;  %v3497_v51 = vld [vmem:[%s5347_s0 + $0x360] sm:$0xf0]  ;;  %v3017_v7 = vld [vmem:[%s5347_s0 + $0x384] sm:$0xf0]  ;;  %v3502_v56 = vld [vmem:[%s5347_s0 + $0x388] sm:$0xf0] }
 0x1e6   :  { %v1635_v33 = vpop.f32.mrf.mxu1  ;;  %v3500_v41 = vld [vmem:[%s5347_s0 + $0x37c] sm:$0xf]  ;;  %v3020_v0 = vor.u32 %v3499_v31, %v3017_v7 }
 0x1e7   :  { %v2399_v60 = vmax.f32 %v2335_v14, 0.0  ;;  %v1972_v36 = vadd.f32 %v1971_v26, %v1803_v47  ;;  %v1636_v61 = vadd.f32 %v1635_v33, %v4137_v52  ;;  %v3004_v52 = vor.u32 %v3497_v51, %v3003_v44  ;;  %v3025_v14 = vld [vmem:[%s5347_s0 + $0x38c] sm:$0xf0]  ;;  %v3031_v33 = vld [vmem:[%s5347_s0 + $0x380] sm:$0xf] }
 0x1e8   :  { %v2142_v25 = vpop.f32.mrf.mxu0  ;;  %v3028_v51 = vor.u32 %v3500_v41, %v3025_v14 }
 0x1e9   :  { %v2463_v9 = vpack.c.bf16 %v2399_v60, %v2399_v60  ;;  %v2141_v16 = vadd.f32 %v2140_v34, %v1972_v36  ;;  %v3503_v60 = vld [vmem:[%s5347_s0 + $0x390] sm:$0xf0] }
 0x1ea   :  { %v3032_v5 = vor.u32 %v3503_v60, %v3031_v33 }
 0x1eb   :  { %2528 = vst.msk [vmem:[%s5350_s4 + $0x5c] sm:$0xf] %vm2504_vm1, %v2463_v9  ;;  %v2268_v40 = vmul.f32 %v4793_v35, %v2141_v16 }
 0x1ec   :  { %v1804_v12 = vpop.f32.mrf.mxu2 }
 0x1ed   :  { %v2336_v43 = vadd.f32 %v4806_v4, %v2268_v40  ;;  %v1805_v20 = vadd.f32 %v1804_v12, %v1636_v61  ;;  %v1973_v23 = vpop.f32.mrf.mxu3 }
 0x1ee   :  { %v1638_v46 = vpop.f32.mrf.mxu1 }
 0x1ef   :  { %v2400_v1 = vmax.f32 %v2336_v43, 0.0  ;;  %v1974_v53 = vadd.f32 %v1973_v23, %v1805_v20  ;;  %v1639_v54 = vadd.f32 %v1638_v46, %v4169_v11  ;;  %v3023_v11 = vld [vmem:[%s5347_s0 + $0x378] sm:$0xf] }
 0x1f0   :  { %v2145_v8 = vpop.f32.mrf.mxu0  ;;  %v3024_v32 = vor.u32 %v3502_v56, %v3023_v11 }
 0x1f1   :  { %v2464_v63 = vpack.c.bf16 %v2400_v1, %v2400_v1  ;;  %v2143_v29 = vadd.f32 %v2142_v25, %v1974_v53  ;;  %1677 = vmatmul.bf16.gmra.mxu1 %v3000_v10  ;;  %1846 = vmatmul.bf16.gmra.mxu2 %v3004_v52 }
 0x1f2   :  { %2015 = vmatmul.bf16.gmra.mxu3 %v3008_v55 }
 0x1f3   :  { %3378 = vmatmul.msk.bf16.gmra.mxu0 %vm1298_vm0, %v3012_v3  ;;  %2529 = vst.msk [vmem:[%s5350_s4 + $0x60] sm:$0xf] %vm2504_vm1, %v2464_v63  ;;  %v2269_v45 = vmul.f32 %v4793_v35, %v2143_v29  ;;  %v3037_v63 = vld [vmem:[%s5347_s0 + $0x3ac] sm:$0xf0]  ;;  %v3507_v29 = vld [vmem:[%s5347_s0 + $0x3b0] sm:$0xf0] }
 0x1f4   :  { %v1807_v57 = vpop.f32.mrf.mxu2 }
 0x1f5   :  { %v2337_v21 = vadd.f32 %v4806_v4, %v2269_v45  ;;  %v1808_v49 = vadd.f32 %v1807_v57, %v1639_v54  ;;  %v1976_v17 = vpop.f32.mrf.mxu3  ;;  %v3505_v45 = vld [vmem:[%s5347_s0 + $0x3a4] sm:$0xf]  ;;  %v3045_v54 = vld [vmem:[%s5347_s0 + $0x3b4] sm:$0xf0] }
 0x1f6   :  { %v1640_v62 = vpop.f32.mrf.mxu1  ;;  %v3048_v7 = vor.u32 %v3505_v45, %v3045_v54 }
 0x1f7   :  { %v2401_v19 = vmax.f32 %v2337_v21, 0.0  ;;  %v1977_v39 = vadd.f32 %v1976_v17, %v1808_v49  ;;  %v1641_v26 = vadd.f32 %v1640_v62, %v4178_v28  ;;  %v3051_v49 = vld [vmem:[%s5347_s0 + $0x3a8] sm:$0xf]  ;;  %v3508_v17 = vld [vmem:[%s5347_s0 + $0x3b8] sm:$0xf0] }
 0x1f8   :  { %v2147_v22 = vpop.f32.mrf.mxu0  ;;  %v3052_v11 = vor.u32 %v3508_v17, %v3051_v49 }
 0x1f9   :  { %v2465_v34 = vpack.c.bf16 %v2401_v19, %v2401_v19  ;;  %v2146_v13 = vadd.f32 %v2145_v8, %v1977_v39  ;;  %v3504_v8 = vld [vmem:[%s5347_s0 + $0x39c] sm:$0xf] }
 0x1fb   :  { %2530 = vst.msk [vmem:[%s5350_s4 + $0x64] sm:$0xf] %vm2504_vm1, %v2465_v34  ;;  %v2270_v47 = vmul.f32 %v4793_v35, %v2146_v13  ;;  %v3040_v34 = vor.u32 %v3504_v8, %v3037_v63 }
 0x1fc   :  { %v1809_v36 = vpop.f32.mrf.mxu2 }
 0x1fd   :  { %v2338_v25 = vadd.f32 %v4806_v4, %v2270_v47  ;;  %v1810_v9 = vadd.f32 %v1809_v36, %v1641_v26  ;;  %v1978_v16 = vpop.f32.mrf.mxu3 }
 0x1fe   :  { %v1643_v44 = vpop.f32.mrf.mxu1 }
 0x1ff   :  { %v2402_v42 = vmax.f32 %v2338_v25, 0.0  ;;  %v1979_v28 = vadd.f32 %v1978_v16, %v1810_v9  ;;  %v1644_v12 = vadd.f32 %v1643_v44, %v4210_v2  ;;  %v3043_v2 = vld [vmem:[%s5347_s0 + $0x3a0] sm:$0xf] }
 0x200   :  { %v2150_v40 = vpop.f32.mrf.mxu0  ;;  %v3044_v13 = vor.u32 %v3507_v29, %v3043_v2 }
 0x201   :  { %v2466_v61 = vpack.c.bf16 %v2402_v42, %v2402_v42  ;;  %v2148_v37 = vadd.f32 %v2147_v22, %v1979_v28  ;;  %1682 = vmatmul.bf16.gmra.mxu1 %v3020_v0  ;;  %1851 = vmatmul.bf16.gmra.mxu2 %v3024_v32  ;;  %v3509_v42 = vld [vmem:[%s5347_s0 + $0x3c4] sm:$0xf]  ;;  %v3057_v28 = vld [vmem:[%s5347_s0 + $0x3d4] sm:$0xf0] }
 0x202   :  { %2020 = vmatmul.bf16.gmra.mxu3 %v3028_v51 }
 0x203   :  { %3379 = vmatmul.msk.bf16.gmra.mxu0 %vm1298_vm0, %v3032_v5  ;;  %2531 = vst.msk [vmem:[%s5350_s4 + $0x68] sm:$0xf] %vm2504_vm1, %v2466_v61  ;;  %v2271_v48 = vmul.f32 %v4793_v35, %v2148_v37  ;;  %v3510_v61 = vld [vmem:[%s5347_s0 + $0x3cc] sm:$0xf]  ;;  %v3065_v37 = vld [vmem:[%s5347_s0 + $0x3dc] sm:$0xf0] }
 0x204   :  { %v1812_v43 = vpop.f32.mrf.mxu2 }
 0x205   :  { %v2339_v20 = vadd.f32 %v4806_v4, %v2271_v48  ;;  %v1813_v23 = vadd.f32 %v1812_v43, %v1644_v12  ;;  %v1981_v10 = vpop.f32.mrf.mxu3  ;;  %v3071_v43 = vld [vmem:[%s5347_s0 + $0x3d0] sm:$0xf] }
 0x206   :  { %v1645_v52 = vpop.f32.mrf.mxu1 }
 0x207   :  { %v2403_v46 = vmax.f32 %v2339_v20, 0.0  ;;  %v1982_v55 = vadd.f32 %v1981_v10, %v1813_v23  ;;  %v1646_v21 = vadd.f32 %v1645_v52, %v4219_v27  ;;  %v3513_v20 = vld [vmem:[%s5347_s0 + $0x3e0] sm:$0xf0] }
 0x208   :  { %v2152_v3 = vpop.f32.mrf.mxu0  ;;  %v3072_v8 = vor.u32 %v3513_v20, %v3071_v43 }
 0x209   :  { %v2467_v1 = vpack.c.bf16 %v2403_v46, %v2403_v46  ;;  %v2151_v53 = vadd.f32 %v2150_v40, %v1982_v55  ;;  %v3512_v40 = vld [vmem:[%s5347_s0 + $0x3d8] sm:$0xf0]  ;;  %v3060_v55 = vor.u32 %v3509_v42, %v3057_v28 }
 0x20b   :  { %2532 = vst.msk [vmem:[%s5350_s4 + $0x6c] sm:$0xf] %vm2504_vm1, %v2467_v1  ;;  %v2272_v57 = vmul.f32 %v4793_v35, %v2151_v53  ;;  %v3068_v53 = vor.u32 %v3510_v61, %v3065_v37 }
 0x20c   :  { %v1814_v62 = vpop.f32.mrf.mxu2 }
 0x20d   :  { %v2340_v19 = vadd.f32 %v4806_v4, %v2272_v57  ;;  %v1815_v39 = vadd.f32 %v1814_v62, %v1646_v21  ;;  %v1983_v22 = vpop.f32.mrf.mxu3 }
 0x20e   :  { %v1648_v31 = vpop.f32.mrf.mxu1 }
 0x20f   :  { %v2404_v56 = vmax.f32 %v2340_v19, 0.0  ;;  %v1984_v27 = vadd.f32 %v1983_v22, %v1815_v39  ;;  %v1649_v33 = vadd.f32 %v1648_v31, %v4251_v24  ;;  %v3063_v24 = vld [vmem:[%s5347_s0 + $0x3c8] sm:$0xf] }
 0x210   :  { %v2155_v41 = vpop.f32.mrf.mxu0 }
 0x211   :  { %v2468_v14 = vpack.c.bf16 %v2404_v56, %v2404_v56  ;;  %v2153_v47 = vadd.f32 %v2152_v3, %v1984_v27  ;;  %1687 = vmatmul.bf16.gmra.mxu1 %v3040_v34  ;;  %1856 = vmatmul.bf16.gmra.mxu2 %v3044_v13  ;;  %v3064_v3 = vor.u32 %v3512_v40, %v3063_v24  ;;  %v3517_v56 = vld [vmem:[%s5347_s0 + $0x400] sm:$0xf0]  ;;  %v3515_v27 = vld [vmem:[%s5347_s0 + $0x3f4] sm:$0xf] }
 0x212   :  { %2025 = vmatmul.bf16.gmra.mxu3 %v3048_v7  ;;  %v3514_v7 = vld [vmem:[%s5347_s0 + $0x3ec] sm:$0xf] }
 0x213   :  { %3380 = vmatmul.msk.bf16.gmra.mxu0 %vm1298_vm0, %v3052_v11  ;;  %2533 = vst.msk [vmem:[%s5350_s4 + $0x70] sm:$0xf] %vm2504_vm1, %v2468_v14  ;;  %v2273_v26 = vmul.f32 %v4793_v35, %v2153_v47  ;;  %v3077_v11 = vld [vmem:[%s5347_s0 + $0x3fc] sm:$0xf0] }
 0x214   :  { %v1817_v60 = vpop.f32.mrf.mxu2 }
 0x215   :  { %v2341_v36 = vadd.f32 %v4806_v4, %v2273_v26  ;;  %v1818_v25 = vadd.f32 %v1817_v60, %v1649_v33  ;;  %v1986_v9 = vpop.f32.mrf.mxu3  ;;  %v3091_v26 = vld [vmem:[%s5347_s0 + $0x3f8] sm:$0xf]  ;;  %v3518_v33 = vld [vmem:[%s5347_s0 + $0x408] sm:$0xf0] }
 0x216   :  { %v1650_v16 = vpop.f32.mrf.mxu1 }
 0x217   :  { %v2405_v0 = vmax.f32 %v2341_v36, 0.0  ;;  %v1987_v32 = vadd.f32 %v1986_v9, %v1818_v25  ;;  %v1651_v12 = vadd.f32 %v1650_v16, %v4260_v59  ;;  %v3080_v16 = vor.u32 %v3514_v7, %v3077_v11 }
 0x218   :  { %v2157_v44 = vpop.f32.mrf.mxu0 }
 0x219   :  { %v2469_v51 = vpack.c.bf16 %v2405_v0, %v2405_v0  ;;  %v2156_v5 = vadd.f32 %v2155_v41, %v1987_v32  ;;  %v3085_v41 = vld [vmem:[%s5347_s0 + $0x404] sm:$0xf0] }
 0x21b   :  { %2534 = vst.msk [vmem:[%s5350_s4 + $0x74] sm:$0xf] %vm2504_vm1, %v2469_v51  ;;  %v2274_v48 = vmul.f32 %v4793_v35, %v2156_v5  ;;  %v3092_v51 = vor.u32 %v3518_v33, %v3091_v26 }
 0x21c   :  { %v1819_v23 = vpop.f32.mrf.mxu2 }
 0x21d   :  { %v2342_v10 = vadd.f32 %v4806_v4, %v2274_v48  ;;  %v1820_v52 = vadd.f32 %v1819_v23, %v1651_v12  ;;  %v1988_v46 = vpop.f32.mrf.mxu3 }
 0x21e   :  { %v1653_v1 = vpop.f32.mrf.mxu1 }
 0x21f   :  { %v2406_v63 = vmax.f32 %v2342_v10, 0.0  ;;  %v1989_v59 = vadd.f32 %v1988_v46, %v1820_v52  ;;  %v1654_v57 = vadd.f32 %v1653_v1, %v3969_v18  ;;  %v3083_v18 = vld [vmem:[%s5347_s0 + $0x3f0] sm:$0xf]  ;;  %v3097_v1 = vld [vmem:[%s5347_s0 + $0x424] sm:$0xf0] }
 0x220   :  { %v2160_v2 = vpop.f32.mrf.mxu0  ;;  %v3084_v0 = vor.u32 %v3517_v56, %v3083_v18 }
 0x221   :  { %v2470_v29 = vpack.c.bf16 %v2406_v63, %v2406_v63  ;;  %v2158_v45 = vadd.f32 %v2157_v44, %v1989_v59  ;;  %1692 = vmatmul.bf16.gmra.mxu1 %v3060_v55  ;;  %1861 = vmatmul.bf16.gmra.mxu2 %v3064_v3  ;;  %v3088_v44 = vor.u32 %v3515_v27, %v3085_v41  ;;  %v3519_v3 = vld [vmem:[%s5347_s0 + $0x414] sm:$0xf]  ;;  %v3105_v63 = vld [vmem:[%s5347_s0 + $0x42c] sm:$0xf0] }
 0x222   :  { %2030 = vmatmul.bf16.gmra.mxu3 %v3068_v53  ;;  %v3522_v53 = vld [vmem:[%s5347_s0 + $0x428] sm:$0xf0] }
 0x223   :  { %3381 = vmatmul.msk.bf16.gmra.mxu0 %vm1298_vm0, %v3072_v8  ;;  %2535 = vst.msk [vmem:[%s5350_s4 + $0x78] sm:$0xf] %vm2504_vm1, %v2470_v29  ;;  %v2275_v54 = vmul.f32 %v4793_v35, %v2158_v45  ;;  %v3520_v8 = vld [vmem:[%s5347_s0 + $0x41c] sm:$0xf]  ;;  %v3111_v29 = vld [vmem:[%s5347_s0 + $0x420] sm:$0xf] }
 0x224   :  { %v1822_v21 = vpop.f32.mrf.mxu2  ;;  %v3523_v45 = vld [vmem:[%s5347_s0 + $0x430] sm:$0xf0] }
 0x225   :  { %v2343_v49 = vadd.f32 %v4806_v4, %v2275_v54  ;;  %v1823_v17 = vadd.f32 %v1822_v21, %v1654_v57  ;;  %v1991_v62 = vpop.f32.mrf.mxu3 }
 0x226   :  { %v1655_v19 = vpop.f32.mrf.mxu1 }
 0x227   :  { %v2407_v39 = vmax.f32 %v2343_v49, 0.0  ;;  %v1992_v22 = vadd.f32 %v1991_v62, %v1823_v17  ;;  %v1656_v47 = vadd.f32 %v1655_v19, %v4001_v30  ;;  %v3100_v17 = vor.u32 %v3519_v3, %v3097_v1 }
 0x228   :  { %v2162_v34 = vpop.f32.mrf.mxu0 }
 0x229   :  { %v2471_v13 = vpack.c.bf16 %v2407_v39, %v2407_v39  ;;  %v2161_v31 = vadd.f32 %v2160_v2, %v1992_v22  ;;  %v3108_v39 = vor.u32 %v3520_v8, %v3105_v63  ;;  %v3112_v22 = vor.u32 %v3523_v45, %v3111_v29 }
 0x22b   :  { %2536 = vst.msk [vmem:[%s5350_s4 + $0x7c] sm:$0xf] %vm2504_vm1, %v2471_v13  ;;  %v2276_v14 = vmul.f32 %v4793_v35, %v2161_v31 }
 0x22c   :  { %v1824_v60 = vpop.f32.mrf.mxu2 }
 0x22d   :  { %v2344_v36 = vadd.f32 %v4806_v4, %v2276_v14  ;;  %v1825_v25 = vadd.f32 %v1824_v60, %v1656_v47  ;;  %v1993_v9 = vpop.f32.mrf.mxu3 }
 0x22e   :  { %v1658_v32 = vpop.f32.mrf.mxu1 }
 0x22f   :  { %v2408_v5 = vmax.f32 %v2344_v36, 0.0  ;;  %v1994_v30 = vadd.f32 %v1993_v9, %v1825_v25  ;;  %v1659_v61 = vadd.f32 %v1658_v32, %v4010_v38  ;;  %v3103_v38 = vld [vmem:[%s5347_s0 + $0x418] sm:$0xf]  ;;  %v3524_v9 = vld [vmem:[%s5347_s0 + $0x43c] sm:$0xf] }
 0x230   :  { %v2165_v42 = vpop.f32.mrf.mxu0  ;;  %v3104_v62 = vor.u32 %v3522_v53, %v3103_v38  ;;  %v3525_v32 = vld [vmem:[%s5347_s0 + $0x444] sm:$0xf] }
 0x231   :  { %v2472_v28 = vpack.c.bf16 %v2408_v5, %v2408_v5  ;;  %v2163_v24 = vadd.f32 %v2162_v34, %v1994_v30  ;;  %1697 = vmatmul.bf16.gmra.mxu1 %v3080_v16  ;;  %1866 = vmatmul.bf16.gmra.mxu2 %v3084_v0  ;;  %v3117_v16 = vld [vmem:[%s5347_s0 + $0x44c] sm:$0xf0]  ;;  %v3527_v0 = vld [vmem:[%s5347_s0 + $0x450] sm:$0xf0]  ;;  %v3131_v30 = vld [vmem:[%s5347_s0 + $0x448] sm:$0xf] }
 0x232   :  { %2035 = vmatmul.bf16.gmra.mxu3 %v3088_v44  ;;  %v3125_v44 = vld [vmem:[%s5347_s0 + $0x454] sm:$0xf0] }
 0x233   :  { %3382 = vmatmul.msk.bf16.gmra.mxu0 %vm1298_vm0, %v3092_v51  ;;  %2537 = vst.msk [vmem:[%s5350_s4 + $0x80] sm:$0xf] %vm2504_vm1, %v2472_v28  ;;  %v2277_v40 = vmul.f32 %v4793_v35, %v2163_v24 }
 0x234   :  { %v1827_v37 = vpop.f32.mrf.mxu2 }
 0x235   :  { %v2345_v48 = vadd.f32 %v4806_v4, %v2277_v40  ;;  %v1828_v12 = vadd.f32 %v1827_v37, %v1659_v61  ;;  %v1996_v43 = vpop.f32.mrf.mxu3  ;;  %v3120_v37 = vor.u32 %v3524_v9, %v3117_v16  ;;  %v5377_v9 = vld [vmem:[#allocation11_spill] sm:$0xff] }
 0x236   :  { %v1660_v20 = vpop.f32.mrf.mxu1 }
 0x237   :  { %v2409_v23 = vmax.f32 %v2345_v48, 0.0  ;;  %v1997_v10 = vadd.f32 %v1996_v43, %v1828_v12  ;;  %v1661_v2 = vadd.f32 %v1660_v20, %v4042_v50  ;;  %v3128_v43 = vor.u32 %v3525_v32, %v3125_v44 }
 0x238   :  { %v2167_v52 = vpop.f32.mrf.mxu0 }
 0x239   :  { %v2473_v46 = vpack.c.bf16 %v2409_v23, %v2409_v23  ;;  %v2166_v55 = vadd.f32 %v2165_v42, %v1997_v10  ;;  %v3528_v42 = vld [vmem:[%s5347_s0 + $0x458] sm:$0xf0] }
 0x23a   :  { %v3132_v20 = vor.u32 %v3528_v42, %v3131_v30 }
 0x23b   :  { %2538 = vst.msk [vmem:[%s5350_s4 + $0x84] sm:$0xf] %vm2504_vm1, %v2473_v46  ;;  %v2278_v59 = vmul.f32 %v4793_v35, %v2166_v55 }
 0x23c   :  { %v1829_v54 = vpop.f32.mrf.mxu2 }
 0x23d   :  { %v2346_v57 = vadd.f32 %v4806_v4, %v2278_v59  ;;  %v1830_v21 = vadd.f32 %v1829_v54, %v1661_v2  ;;  %v1998_v49 = vpop.f32.mrf.mxu3 }
 0x23e   :  { %v1663_v19 = vpop.f32.mrf.mxu1 }
 0x23f   :  { %v2410_v34 = vmax.f32 %v2346_v57, 0.0  ;;  %v1999_v50 = vadd.f32 %v1998_v49, %v1830_v21  ;;  %v1664_v18 = vadd.f32 %v1663_v19, %v4051_v58  ;;  %v3123_v58 = vld [vmem:[%s5347_s0 + $0x440] sm:$0xf]  ;;  %v3529_v57 = vld [vmem:[%s5347_s0 + $0x464] sm:$0xf] }
 0x240   :  { %v2170_v13 = vpop.f32.mrf.mxu0  ;;  %v3124_v48 = vor.u32 %v3527_v0, %v3123_v58  ;;  %v3137_v21 = vld [vmem:[%s5347_s0 + $0x474] sm:$0xf0]  ;;  %v3532_v49 = vld [vmem:[%s5347_s0 + $0x478] sm:$0xf0] }
 0x241   :  { %v2474_v31 = vpack.c.bf16 %v2410_v34, %v2410_v34  ;;  %v2168_v7 = vadd.f32 %v2167_v52, %v1999_v50  ;;  %1702 = vmatmul.bf16.gmra.mxu1 %v3100_v17  ;;  %1871 = vmatmul.bf16.gmra.mxu2 %v3104_v62  ;;  %v3530_v17 = vld [vmem:[%s5347_s0 + $0x46c] sm:$0xf]  ;;  %v3145_v62 = vld [vmem:[%s5347_s0 + $0x47c] sm:$0xf0]  ;;  %v3151_v34 = vld [vmem:[%s5347_s0 + $0x470] sm:$0xf] }
 0x242   :  { %2040 = vmatmul.bf16.gmra.mxu3 %v3108_v39  ;;  %v5376_v39 = vld [vmem:[#allocation9_spill] sm:$0xff]  ;;  %v3533_v50 = vld [vmem:[%s5347_s0 + $0x480] sm:$0xf0] }
 0x243   :  { %3383 = vmatmul.msk.bf16.gmra.mxu0 %vm1298_vm0, %v3112_v22  ;;  %2539 = vst.msk [vmem:[%s5350_s4 + $0x88] sm:$0xf] %vm2504_vm1, %v2474_v31  ;;  %v2279_v11 = vmul.f32 %v4793_v35, %v2168_v7 }
 0x244   :  { %v1832_v56 = vpop.f32.mrf.mxu2 }
 0x245   :  { %v2347_v27 = vadd.f32 %v4806_v4, %v2279_v11  ;;  %v1833_v41 = vadd.f32 %v1832_v56, %v1664_v18  ;;  %v2001_v14 = vpop.f32.mrf.mxu3  ;;  %v3140_v18 = vor.u32 %v3529_v57, %v3137_v21 }
 0x246   :  { %v1665_v47 = vpop.f32.mrf.mxu1 }
 0x247   :  { %v2411_v26 = vmax.f32 %v2347_v27, 0.0  ;;  %v2002_v33 = vadd.f32 %v2001_v14, %v1833_v41  ;;  %v1666_v5 = vadd.f32 %v1665_v47, %v4083_v6  ;;  %v3148_v41 = vor.u32 %v3530_v17, %v3145_v62 }
 0x248   :  { %v2172_v60 = vpop.f32.mrf.mxu0  ;;  %v3152_v14 = vor.u32 %v3533_v50, %v3151_v34 }
 0x249   :  { %v2475_v36 = vpack.c.bf16 %v2411_v26, %v2411_v26  ;;  %v2171_v25 = vadd.f32 %v2170_v13, %v2002_v33 }
 0x24b   :  { %2540 = vst.msk [vmem:[%s5350_s4 + $0x8c] sm:$0xf] %vm2504_vm1, %v2475_v36  ;;  %v2280_v51 = vmul.f32 %v4793_v35, %v2171_v25 }
 0x24c   :  { %v1834_v28 = vpop.f32.mrf.mxu2 }
 0x24d   :  { %v2348_v24 = vadd.f32 %v4806_v4, %v2280_v51  ;;  %v1835_v40 = vadd.f32 %v1834_v28, %v1666_v5  ;;  %v2003_v61 = vpop.f32.mrf.mxu3 }
 0x24e   :  { %v1668_v12 = vpop.f32.mrf.mxu1 }
 0x24f   :  { %v2412_v23 = vmax.f32 %v2348_v24, 0.0  ;;  %v2004_v6 = vadd.f32 %v2003_v61, %v1835_v40  ;;  %v1669_v3 = vadd.f32 %v1668_v12, %v4092_v15  ;;  %v3143_v15 = vld [vmem:[%s5347_s0 + $0x468] sm:$0xf]  ;;  %v3534_v40 = vld [vmem:[%s5347_s0 + $0x48c] sm:$0xf] }
 0x250   :  { %v2175_v10 = vpop.f32.mrf.mxu0  ;;  %v3144_v56 = vor.u32 %v3532_v49, %v3143_v15  ;;  %v3157_v61 = vld [vmem:[%s5347_s0 + $0x49c] sm:$0xf0]  ;;  %v3535_v12 = vld [vmem:[%s5347_s0 + $0x494] sm:$0xf]  ;;  %v5379_v15 = vld [vmem:[#allocation15_spill] sm:$0xff] }
 0x251   :  { %v2476_v52 = vpack.c.bf16 %v2412_v23, %v2412_v23  ;;  %v2173_v46 = vadd.f32 %v2172_v60, %v2004_v6  ;;  %1707 = vmatmul.bf16.gmra.mxu1 %v3120_v37  ;;  %1876 = vmatmul.bf16.gmra.mxu2 %v3124_v48  ;;  %v3163_v37 = vld [vmem:[%s5347_s0 + $0x490] sm:$0xf]  ;;  %v3537_v48 = vld [vmem:[%s5347_s0 + $0x4a0] sm:$0xf0]  ;;  %v5378_v23 = vld [vmem:[#allocation13_spill] sm:$0xff] }
 0x252   :  { %2045 = vmatmul.bf16.gmra.mxu3 %v3128_v43  ;;  %v3165_v43 = vld [vmem:[%s5347_s0 + $0x4a4] sm:$0xf0] }
 0x253   :  { %3384 = vmatmul.msk.bf16.gmra.mxu0 %vm1298_vm0, %v3132_v20  ;;  %2541 = vst.msk [vmem:[%s5350_s4 + $0x90] sm:$0xf] %vm2504_vm1, %v2476_v52  ;;  %v2281_v55 = vmul.f32 %v4793_v35, %v2173_v46  ;;  %v3538_v52 = vld [vmem:[%s5347_s0 + $0x4a8] sm:$0xf0] }
 0x254   :  { %v1837_v1 = vpop.f32.mrf.mxu2 }
 0x255   :  { %v2349_v38 = vadd.f32 %v4806_v4, %v2281_v55  ;;  %v1838_v53 = vadd.f32 %v1837_v1, %v1669_v3  ;;  %v2006_v8 = vpop.f32.mrf.mxu3 }
 0x256   :  { %v1670_v63 = vpop.f32.mrf.mxu1 }
 0x257   :  { %v2413_v59 = vmax.f32 %v2349_v38, 0.0  ;;  %v2007_v2 = vadd.f32 %v2006_v8, %v1838_v53  ;;  %v1671_v22 = vadd.f32 %v1670_v63, %v5376_v39  ;;  %v3160_v38 = vor.u32 %v3534_v40, %v3157_v61 }
 0x258   :  { %v2177_v29 = vpop.f32.mrf.mxu0  ;;  %v3164_v53 = vor.u32 %v3537_v48, %v3163_v37  ;;  %v3168_v63 = vor.u32 %v3535_v12, %v3165_v43  ;;  %v5381_v37 = vld [vmem:[#allocation19_spill] sm:$0xff] }
 0x259   :  { %v2477_v45 = vpack.c.bf16 %v2413_v59, %v2413_v59  ;;  %v2176_v54 = vadd.f32 %v2175_v10, %v2007_v2  ;;  %v3171_v10 = vld [vmem:[%s5347_s0 + $0x498] sm:$0xf] }
 0x25a   :  { %v3172_v59 = vor.u32 %v3538_v52, %v3171_v10 }
 0x25b   :  { %2542 = vst.msk [vmem:[%s5350_s4 + $0x94] sm:$0xf] %vm2504_vm1, %v2477_v45  ;;  %v2282_v19 = vmul.f32 %v4793_v35, %v2176_v54 }
 0x25c   :  { %v1839_v13 = vpop.f32.mrf.mxu2 }
 0x25d   :  { %v2350_v31 = vadd.f32 %v4806_v4, %v2282_v19  ;;  %v1840_v7 = vadd.f32 %v1839_v13, %v1671_v22  ;;  %v2008_v11 = vpop.f32.mrf.mxu3 }
 0x25e   :  { %v1673_v27 = vpop.f32.mrf.mxu1 }
 0x25f   :  { %v2414_v47 = vmax.f32 %v2350_v31, 0.0  ;;  %v2009_v26 = vadd.f32 %v2008_v11, %v1840_v7  ;;  %v1674_v16 = vadd.f32 %v1673_v27, %v5377_v9  ;;  %v3539_v11 = vld [vmem:[%s5347_s0 + $0x4b4] sm:$0xf]  ;;  %v3542_v27 = vld [vmem:[%s5347_s0 + $0x4c8] sm:$0xf0] }
 0x260   :  { %v2180_v33 = vpop.f32.mrf.mxu0 }
 0x261   :  { %v2478_v60 = vpack.c.bf16 %v2414_v47, %v2414_v47  ;;  %v2178_v36 = vadd.f32 %v2177_v29, %v2009_v26  ;;  %1712 = vmatmul.bf16.gmra.mxu1 %v3140_v18  ;;  %1881 = vmatmul.bf16.gmra.mxu2 %v3144_v56  ;;  %v3177_v18 = vld [vmem:[%s5347_s0 + $0x4c4] sm:$0xf0]  ;;  %v3183_v56 = vld [vmem:[%s5347_s0 + $0x4b8] sm:$0xf] }
 0x262   :  { %2050 = vmatmul.bf16.gmra.mxu3 %v3148_v41  ;;  %v3540_v41 = vld [vmem:[%s5347_s0 + $0x4bc] sm:$0xf] }
 0x263   :  { %3385 = vmatmul.msk.bf16.gmra.mxu0 %vm1298_vm0, %v3152_v14  ;;  %2543 = vst.msk [vmem:[%s5350_s4 + $0x98] sm:$0xf] %vm2504_vm1, %v2478_v60  ;;  %v2283_v25 = vmul.f32 %v4793_v35, %v2178_v36  ;;  %v3185_v14 = vld [vmem:[%s5347_s0 + $0x4cc] sm:$0xf0]  ;;  %v5380_v26 = vld [vmem:[#allocation17_spill] sm:$0xff] }
 0x264   :  { %v1842_v58 = vpop.f32.mrf.mxu2  ;;  %v3191_v60 = vld [vmem:[%s5347_s0 + $0x4c0] sm:$0xf]  ;;  %v3543_v36 = vld [vmem:[%s5347_s0 + $0x4d0] sm:$0xf0] }
 0x265   :  { %v2351_v0 = vadd.f32 %v4806_v4, %v2283_v25  ;;  %v1843_v32 = vadd.f32 %v1842_v58, %v1674_v16  ;;  %v2011_v44 = vpop.f32.mrf.mxu3 }
 0x266   :  { %v1675_v51 = vpop.f32.mrf.mxu1 }
 0x267   :  { %v2415_v5 = vmax.f32 %v2351_v0, 0.0  ;;  %v2012_v30 = vadd.f32 %v2011_v44, %v1843_v32  ;;  %v1676_v6 = vadd.f32 %v1675_v51, %v5378_v23  ;;  %v3180_v0 = vor.u32 %v3539_v11, %v3177_v18 }
 0x268   :  { %v2182_v42 = vpop.f32.mrf.mxu0  ;;  %v3184_v32 = vor.u32 %v3542_v27, %v3183_v56  ;;  %v3188_v51 = vor.u32 %v3540_v41, %v3185_v14  ;;  %v5383_v56 = vld [vmem:[#allocation23_spill] sm:$0xff] }
 0x269   :  { %v2479_v28 = vpack.c.bf16 %v2415_v5, %v2415_v5  ;;  %v2181_v24 = vadd.f32 %v2180_v33, %v2012_v30  ;;  %v3192_v5 = vor.u32 %v3543_v36, %v3191_v60 }
 0x26b   :  { %2544 = vst.msk [vmem:[%s5350_s4 + $0x9c] sm:$0xf] %vm2504_vm1, %v2479_v28  ;;  %v2284_v20 = vmul.f32 %v4793_v35, %v2181_v24 }
 0x26c   :  { %v1844_v46 = vpop.f32.mrf.mxu2 }
 0x26d   :  { %v2352_v55 = vadd.f32 %v4806_v4, %v2284_v20  ;;  %v1845_v3 = vadd.f32 %v1844_v46, %v1676_v6  ;;  %v2013_v1 = vpop.f32.mrf.mxu3 }
 0x26e   :  { %v1678_v8 = vpop.f32.mrf.mxu1 }
 0x26f   :  { %v2416_v2 = vmax.f32 %v2352_v55, 0.0  ;;  %v2014_v29 = vadd.f32 %v2013_v1, %v1845_v3  ;;  %v1679_v49 = vadd.f32 %v1678_v8, %v5379_v15  ;;  %v3544_v1 = vld [vmem:[%s5347_s0 + $0x4dc] sm:$0xf]  ;;  %v3547_v8 = vld [vmem:[%s5347_s0 + $0x4f0] sm:$0xf0] }
 0x270   :  { %v2185_v45 = vpop.f32.mrf.mxu0 }
 0x271   :  { %v2480_v54 = vpack.c.bf16 %v2416_v2, %v2416_v2  ;;  %v2183_v57 = vadd.f32 %v2182_v42, %v2014_v29  ;;  %1717 = vmatmul.bf16.gmra.mxu1 %v3160_v38  ;;  %1886 = vmatmul.bf16.gmra.mxu2 %v3164_v53  ;;  %v3197_v38 = vld [vmem:[%s5347_s0 + $0x4ec] sm:$0xf0]  ;;  %v3203_v53 = vld [vmem:[%s5347_s0 + $0x4e0] sm:$0xf]  ;;  %v5382_v29 = vld [vmem:[#allocation21_spill] sm:$0xff] }
 0x272   :  { %2055 = vmatmul.bf16.gmra.mxu3 %v3168_v63  ;;  %v3545_v63 = vld [vmem:[%s5347_s0 + $0x4e4] sm:$0xf] }
 0x273   :  { %3386 = vmatmul.msk.bf16.gmra.mxu0 %vm1298_vm0, %v3172_v59  ;;  %2545 = vst.msk [vmem:[%s5350_s4 + $0xa0] sm:$0xf] %vm2504_vm1, %v2480_v54  ;;  %v2285_v21 = vmul.f32 %v4793_v35, %v2183_v57  ;;  %v3205_v59 = vld [vmem:[%s5347_s0 + $0x4f4] sm:$0xf0]  ;;  %v3211_v54 = vld [vmem:[%s5347_s0 + $0x4e8] sm:$0xf] }
 0x274   :  { %v1847_v17 = vpop.f32.mrf.mxu2  ;;  %v3548_v57 = vld [vmem:[%s5347_s0 + $0x4f8] sm:$0xf0] }
 0x275   :  { %v2353_v62 = vadd.f32 %v4806_v4, %v2285_v21  ;;  %v1848_v19 = vadd.f32 %v1847_v17, %v1679_v49  ;;  %v2016_v39 = vpop.f32.mrf.mxu3 }
 0x276   :  { %v1680_v22 = vpop.f32.mrf.mxu1 }
 0x277   :  { %v2417_v34 = vmax.f32 %v2353_v62, 0.0  ;;  %v2017_v50 = vadd.f32 %v2016_v39, %v1848_v19  ;;  %v1681_v33 = vadd.f32 %v1680_v22, %v5380_v26  ;;  %v3200_v62 = vor.u32 %v3544_v1, %v3197_v38 }
 0x278   :  { %v2187_v13 = vpop.f32.mrf.mxu0  ;;  %v3204_v19 = vor.u32 %v3547_v8, %v3203_v53  ;;  %v3208_v22 = vor.u32 %v3545_v63, %v3205_v59  ;;  %v5386_v8 = vld [vmem:[#allocation3_spill] sm:$0xff] }
 0x279   :  { %v2481_v31 = vpack.c.bf16 %v2417_v34, %v2417_v34  ;;  %v2186_v7 = vadd.f32 %v2185_v45, %v2017_v50  ;;  %v3212_v34 = vor.u32 %v3548_v57, %v3211_v54 }
 0x27b   :  { %2546 = vst.msk [vmem:[%s5350_s4 + $0xa4] sm:$0xf] %vm2504_vm1, %v2481_v31  ;;  %v2286_v47 = vmul.f32 %v4793_v35, %v2186_v7 }
 0x27c   :  { %v1849_v25 = vpop.f32.mrf.mxu2 }
 0x27d   :  { %v2354_v9 = vadd.f32 %v4806_v4, %v2286_v47  ;;  %v1850_v16 = vadd.f32 %v1849_v25, %v1681_v33  ;;  %v2018_v58 = vpop.f32.mrf.mxu3 }
 0x27e   :  { %v1683_v44 = vpop.f32.mrf.mxu1 }
 0x27f   :  { %v2418_v30 = vmax.f32 %v2354_v9, 0.0  ;;  %v2019_v42 = vadd.f32 %v2018_v58, %v1850_v16  ;;  %v1684_v48 = vadd.f32 %v1683_v44, %v5381_v37 }
 0x280   :  { %v2190_v28 = vpop.f32.mrf.mxu0 }
 0x281   :  { %v2482_v24 = vpack.c.bf16 %v2418_v30, %v2418_v30  ;;  %v2188_v40 = vadd.f32 %v2187_v13, %v2019_v42  ;;  %1722 = vmatmul.bf16.gmra.mxu1 %v3180_v0  ;;  %1891 = vmatmul.bf16.gmra.mxu2 %v3184_v32  ;;  %v5384_v0 = vld [vmem:[#allocation25_spill] sm:$0xff] }
 0x282   :  { %2060 = vmatmul.bf16.gmra.mxu3 %v3188_v51 }
 0x283   :  { %3387 = vmatmul.msk.bf16.gmra.mxu0 %vm1298_vm0, %v3192_v5  ;;  %2547 = vst.msk [vmem:[%s5350_s4 + $0xa8] sm:$0xf] %vm2504_vm1, %v2482_v24  ;;  %v2287_v61 = vmul.f32 %v4793_v35, %v2188_v40 }
 0x284   :  { %v1852_v12 = vpop.f32.mrf.mxu2 }
 0x285   :  { %v2355_v43 = vadd.f32 %v4806_v4, %v2287_v61  ;;  %v1853_v20 = vadd.f32 %v1852_v12, %v1684_v48  ;;  %v2021_v23 = vpop.f32.mrf.mxu3  ;;  %v5385_v12 = vld [vmem:[#allocation2_spill] sm:$0xff] }
 0x286   :  { %v1685_v6 = vpop.f32.mrf.mxu1 }
 0x287   :  { %v2419_v10 = vmax.f32 %v2355_v43, 0.0  ;;  %v2022_v52 = vadd.f32 %v2021_v23, %v1853_v20  ;;  %v1686_v45 = vadd.f32 %v1685_v6, %v5382_v29 }
 0x288   :  { %v2192_v46 = vpop.f32.mrf.mxu0 }
 0x289   :  { %v2483_v55 = vpack.c.bf16 %v2419_v10, %v2419_v10  ;;  %v2191_v3 = vadd.f32 %v2190_v28, %v2022_v52 }
 0x28b   :  { %2548 = vst.msk [vmem:[%s5350_s4 + $0xac] sm:$0xf] %vm2504_vm1, %v2483_v55  ;;  %v2288_v2 = vmul.f32 %v4793_v35, %v2191_v3 }
 0x28c   :  { %v1854_v21 = vpop.f32.mrf.mxu2 }
 0x28d   :  { %v2356_v15 = vadd.f32 %v4806_v4, %v2288_v2  ;;  %v1855_v49 = vadd.f32 %v1854_v21, %v1686_v45  ;;  %v2023_v17 = vpop.f32.mrf.mxu3 }
 0x28e   :  { %v1688_v39 = vpop.f32.mrf.mxu1 }
 0x28f   :  { %v2420_v50 = vmax.f32 %v2356_v15, 0.0  ;;  %v2024_v13 = vadd.f32 %v2023_v17, %v1855_v49  ;;  %v1689_v27 = vadd.f32 %v1688_v39, %v5383_v56 }
 0x290   :  { %v2195_v31 = vpop.f32.mrf.mxu0 }
 0x291   :  { %v2484_v7 = vpack.c.bf16 %v2420_v50, %v2420_v50  ;;  %v2193_v11 = vadd.f32 %v2192_v46, %v2024_v13  ;;  %1727 = vmatmul.bf16.gmra.mxu1 %v3200_v62  ;;  %1896 = vmatmul.bf16.gmra.mxu2 %v3204_v19  ;;  %v5387_v19 = vld [vmem:[#allocation4_spill] sm:$0xff] }
 0x292   :  { %2065 = vmatmul.bf16.gmra.mxu3 %v3208_v22 }
 0x293   :  { %3388 = vmatmul.msk.bf16.gmra.mxu0 %vm1298_vm0, %v3212_v34  ;;  %2549 = vst.msk [vmem:[%s5350_s4 + $0xb0] sm:$0xf] %vm2504_vm1, %v2484_v7  ;;  %v2289_v18 = vmul.f32 %v4793_v35, %v2193_v11 }
 0x294   :  { %v1857_v41 = vpop.f32.mrf.mxu2 }
 0x295   :  { %v2357_v14 = vadd.f32 %v4806_v4, %v2289_v18  ;;  %v1858_v47 = vadd.f32 %v1857_v41, %v1689_v27  ;;  %v2026_v26 = vpop.f32.mrf.mxu3 }
 0x296   :  { %v1690_v33 = vpop.f32.mrf.mxu1 }
 0x297   :  { %v2421_v60 = vmax.f32 %v2357_v14, 0.0  ;;  %v2027_v36 = vadd.f32 %v2026_v26, %v1858_v47  ;;  %v1691_v32 = vadd.f32 %v1690_v33, %v5384_v0  ;;  %v5388_v14 = vld [vmem:[#allocation5_spill] sm:$0xff] }
 0x298   :  { %v2197_v25 = vpop.f32.mrf.mxu0 }
 0x299   :  { %v2485_v9 = vpack.c.bf16 %v2421_v60, %v2421_v60  ;;  %v2196_v16 = vadd.f32 %v2195_v31, %v2027_v36 }
 0x29b   :  { %2550 = vst.msk [vmem:[%s5350_s4 + $0xb4] sm:$0xf] %vm2504_vm1, %v2485_v9  ;;  %v2290_v58 = vmul.f32 %v4793_v35, %v2196_v16 }
 0x29c   :  { %v1859_v44 = vpop.f32.mrf.mxu2 }
 0x29d   :  { %v2358_v51 = vadd.f32 %v4806_v4, %v2290_v58  ;;  %v1860_v5 = vadd.f32 %v1859_v44, %v1691_v32  ;;  %v2028_v30 = vpop.f32.mrf.mxu3  ;;  %v5389_v44 = vld [vmem:[#allocation6_spill] sm:$0xff] }
 0x29e   :  { %v1693_v42 = vpop.f32.mrf.mxu1 }
 0x29f   :  { %v2422_v28 = vmax.f32 %v2358_v51, 0.0  ;;  %v2029_v24 = vadd.f32 %v2028_v30, %v1860_v5  ;;  %v1694_v43 = vadd.f32 %v1693_v42, %v5385_v12  ;;  %v5256_v30 = vld [vmem:[%s5349_s3] ss:$0 sm:$0xff] }
 0x2a0   :  { %v2200_v40 = vpop.f32.mrf.mxu0 }
 0x2a1   :  { %v2486_v61 = vpack.c.bf16 %v2422_v28, %v2422_v28  ;;  %v2198_v37 = vadd.f32 %v2197_v25, %v2029_v24 }
 0x2a3   :  { %2551 = vst.msk [vmem:[%s5350_s4 + $0xb8] sm:$0xf] %vm2504_vm1, %v2486_v61  ;;  %v2291_v48 = vmul.f32 %v4793_v35, %v2198_v37 }
 0x2a4   :  { %v1862_v20 = vpop.f32.mrf.mxu2 }
 0x2a5   :  { %v2359_v23 = vadd.f32 %v4806_v4, %v2291_v48  ;;  %v1863_v6 = vadd.f32 %v1862_v20, %v1694_v43  ;;  %v2031_v10 = vpop.f32.mrf.mxu3 }
 0x2a6   :  { %v1695_v52 = vpop.f32.mrf.mxu1 }
 0x2a7   :  { %v2423_v46 = vmax.f32 %v2359_v23, 0.0  ;;  %v2032_v55 = vadd.f32 %v2031_v10, %v1863_v6  ;;  %v1696_v63 = vadd.f32 %v1695_v52, %v5386_v8  ;;  %v5390_v23 = vld [vmem:[#allocation7_spill] sm:$0xff] }
 0x2a8   :  { %v2202_v3 = vpop.f32.mrf.mxu0 }
 0x2a9   :  { %v2487_v1 = vpack.c.bf16 %v2423_v46, %v2423_v46  ;;  %v2201_v38 = vadd.f32 %v2200_v40, %v2032_v55 }
 0x2ab   :  { %2552 = vst.msk [vmem:[%s5350_s4 + $0xbc] sm:$0xf] %vm2504_vm1, %v2487_v1  ;;  %v2292_v53 = vmul.f32 %v4793_v35, %v2201_v38 }
 0x2ac   :  { %v1864_v59 = vpop.f32.mrf.mxu2 }
 0x2ad   :  { %v2360_v2 = vadd.f32 %v4806_v4, %v2292_v53  ;;  %v1865_v29 = vadd.f32 %v1864_v59, %v1696_v63  ;;  %v2033_v45 = vpop.f32.mrf.mxu3 }
 0x2ae   :  { %v1698_v54 = vpop.f32.mrf.mxu1 }
 0x2af   :  { %v2424_v57 = vmax.f32 %v2360_v2, 0.0  ;;  %v2034_v21 = vadd.f32 %v2033_v45, %v1865_v29  ;;  %v1699_v39 = vadd.f32 %v1698_v54, %v5387_v19  ;;  %v5391_v2 = vld [vmem:[#allocation8_spill] sm:$0xff] }
 0x2b0   :  { %v2205_v15 = vpop.f32.mrf.mxu0 }
 0x2b1   :  { %v2488_v49 = vpack.c.bf16 %v2424_v57, %v2424_v57  ;;  %v2203_v17 = vadd.f32 %v2202_v3, %v2034_v21 }
 0x2b3   :  { %2553 = vst.msk [vmem:[%s5350_s4 + $0xc0] sm:$0xf] %vm2504_vm1, %v2488_v49  ;;  %v2293_v62 = vmul.f32 %v4793_v35, %v2203_v17 }
 0x2b4   :  { %v1867_v22 = vpop.f32.mrf.mxu2 }
 0x2b5   :  { %v2361_v34 = vadd.f32 %v4806_v4, %v2293_v62  ;;  %v1868_v50 = vadd.f32 %v1867_v22, %v1699_v39  ;;  %v2036_v13 = vpop.f32.mrf.mxu3 }
 0x2b6   :  { %v1700_v31 = vpop.f32.mrf.mxu1 }
 0x2b7   :  { %v2425_v7 = vmax.f32 %v2361_v34, 0.0  ;;  %v2037_v11 = vadd.f32 %v2036_v13, %v1868_v50  ;;  %v1701_v47 = vadd.f32 %v1700_v31, %v5388_v14  ;;  %v5392_v34 = vld [vmem:[#allocation10_spill] sm:$0xff] }
 0x2b8   :  { %v2207_v18 = vpop.f32.mrf.mxu0 }
 0x2b9   :  { %v2489_v56 = vpack.c.bf16 %v2425_v7, %v2425_v7  ;;  %v2206_v27 = vadd.f32 %v2205_v15, %v2037_v11 }
 0x2bb   :  { %2554 = vst.msk [vmem:[%s5350_s4 + $0xc4] sm:$0xf] %vm2504_vm1, %v2489_v56  ;;  %v2294_v41 = vmul.f32 %v4793_v35, %v2206_v27  ;;  %v5249_v35 = vld [vmem:[%s5348_s2] ss:$0 sm:$0xff] }
 0x2bc   :  { %v1869_v26 = vpop.f32.mrf.mxu2 }
 0x2bd   :  { %v2362_v33 = vadd.f32 %v4806_v4, %v2294_v41  ;;  %v1870_v60 = vadd.f32 %v1869_v26, %v1701_v47  ;;  %v2038_v36 = vpop.f32.mrf.mxu3 }
 0x2be   :  { %v1703_v25 = vpop.f32.mrf.mxu1 }
 0x2bf   :  { %v2426_v9 = vmax.f32 %v2362_v33, 0.0  ;;  %v2039_v16 = vadd.f32 %v2038_v36, %v1870_v60  ;;  %v1704_v51 = vadd.f32 %v1703_v25, %v5389_v44  ;;  %v5393_v33 = vld [vmem:[#allocation12_spill] sm:$0xff] }
 0x2c0   :  { %v2210_v58 = vpop.f32.mrf.mxu0 }
 0x2c1   :  { %v2490_v0 = vpack.c.bf16 %v2426_v9, %v2426_v9  ;;  %v2208_v32 = vadd.f32 %v2207_v18, %v2039_v16 }
 0x2c3   :  { %2555 = vst.msk [vmem:[%s5350_s4 + $0xc8] sm:$0xf] %vm2504_vm1, %v2490_v0  ;;  %v2295_v4 = vmul.f32 %v5249_v35, %v2208_v32 }
 0x2c4   :  { %v1872_v5 = vpop.f32.mrf.mxu2 }
 0x2c5   :  { %v2363_v42 = vadd.f32 %v5256_v30, %v2295_v4  ;;  %v1873_v28 = vadd.f32 %v1872_v5, %v1704_v51  ;;  %v2041_v24 = vpop.f32.mrf.mxu3 }
 0x2c6   :  { %v1705_v40 = vpop.f32.mrf.mxu1 }
 0x2c7   :  { %v2427_v61 = vmax.f32 %v2363_v42, 0.0  ;;  %v2042_v37 = vadd.f32 %v2041_v24, %v1873_v28  ;;  %v1706_v6 = vadd.f32 %v1705_v40, %v5390_v23  ;;  %v5394_v42 = vld [vmem:[#allocation14_spill] sm:$0xff] }
 0x2c8   :  { %v2212_v48 = vpop.f32.mrf.mxu0 }
 0x2c9   :  { %v2491_v12 = vpack.c.bf16 %v2427_v61, %v2427_v61  ;;  %v2211_v43 = vadd.f32 %v2210_v58, %v2042_v37 }
 0x2cb   :  { %2556 = vst.msk [vmem:[%s5350_s4 + $0xcc] sm:$0xf] %vm2504_vm1, %v2491_v12  ;;  %v2296_v20 = vmul.f32 %v5249_v35, %v2211_v43 }
 0x2cc   :  { %v1874_v10 = vpop.f32.mrf.mxu2 }
 0x2cd   :  { %v2364_v52 = vadd.f32 %v5256_v30, %v2296_v20  ;;  %v1875_v46 = vadd.f32 %v1874_v10, %v1706_v6  ;;  %v2043_v55 = vpop.f32.mrf.mxu3 }
 0x2ce   :  { %v1708_v3 = vpop.f32.mrf.mxu1 }
 0x2cf   :  { %v2428_v1 = vmax.f32 %v2364_v52, 0.0  ;;  %v2044_v38 = vadd.f32 %v2043_v55, %v1875_v46  ;;  %v1709_v29 = vadd.f32 %v1708_v3, %v5391_v2  ;;  %v5395_v52 = vld [vmem:[#allocation16_spill] sm:$0xff] }
 0x2d0   :  { %v2215_v53 = vpop.f32.mrf.mxu0 }
 0x2d1   :  { %v2492_v8 = vpack.c.bf16 %v2428_v1, %v2428_v1  ;;  %v2213_v63 = vadd.f32 %v2212_v48, %v2044_v38 }
 0x2d3   :  { %2557 = vst.msk [vmem:[%s5350_s4 + $0xd0] sm:$0xf] %vm2504_vm1, %v2492_v8  ;;  %v2297_v59 = vmul.f32 %v5249_v35, %v2213_v63 }
 0x2d4   :  { %v1877_v45 = vpop.f32.mrf.mxu2 }
 0x2d5   :  { %v2365_v54 = vadd.f32 %v5256_v30, %v2297_v59  ;;  %v1878_v57 = vadd.f32 %v1877_v45, %v1709_v29  ;;  %v2046_v21 = vpop.f32.mrf.mxu3 }
 0x2d6   :  { %v1710_v15 = vpop.f32.mrf.mxu1 }
 0x2d7   :  { %v2429_v49 = vmax.f32 %v2365_v54, 0.0  ;;  %v2047_v17 = vadd.f32 %v2046_v21, %v1878_v57  ;;  %v1711_v50 = vadd.f32 %v1710_v15, %v5392_v34  ;;  %v5396_v54 = vld [vmem:[#allocation18_spill] sm:$0xff] }
 0x2d8   :  { %v2217_v62 = vpop.f32.mrf.mxu0 }
 0x2d9   :  { %v2493_v19 = vpack.c.bf16 %v2429_v49, %v2429_v49  ;;  %v2216_v39 = vadd.f32 %v2215_v53, %v2047_v17 }
 0x2db   :  { %2558 = vst.msk [vmem:[%s5350_s4 + $0xd4] sm:$0xf] %vm2504_vm1, %v2493_v19  ;;  %v2298_v22 = vmul.f32 %v5249_v35, %v2216_v39 }
 0x2dc   :  { %v1879_v13 = vpop.f32.mrf.mxu2 }
 0x2dd   :  { %v2366_v31 = vadd.f32 %v5256_v30, %v2298_v22  ;;  %v1880_v7 = vadd.f32 %v1879_v13, %v1711_v50  ;;  %v2048_v11 = vpop.f32.mrf.mxu3 }
 0x2de   :  { %v1713_v18 = vpop.f32.mrf.mxu1 }
 0x2df   :  { %v2430_v56 = vmax.f32 %v2366_v31, 0.0  ;;  %v2049_v27 = vadd.f32 %v2048_v11, %v1880_v7  ;;  %v1714_v60 = vadd.f32 %v1713_v18, %v5393_v33  ;;  %v5397_v31 = vld [vmem:[#allocation20_spill] sm:$0xff] }
 0x2e0   :  { %v2220_v41 = vpop.f32.mrf.mxu0 }
 0x2e1   :  { %v2494_v14 = vpack.c.bf16 %v2430_v56, %v2430_v56  ;;  %v2218_v47 = vadd.f32 %v2217_v62, %v2049_v27 }
 0x2e3   :  { %2559 = vst.msk [vmem:[%s5350_s4 + $0xd8] sm:$0xf] %vm2504_vm1, %v2494_v14  ;;  %v2299_v26 = vmul.f32 %v5249_v35, %v2218_v47 }
 0x2e4   :  { %v1882_v36 = vpop.f32.mrf.mxu2 }
 0x2e5   :  { %v2367_v25 = vadd.f32 %v5256_v30, %v2299_v26  ;;  %v1883_v9 = vadd.f32 %v1882_v36, %v1714_v60  ;;  %v2051_v16 = vpop.f32.mrf.mxu3  ;;  %v5398_v36 = vld [vmem:[#allocation22_spill] sm:$0xff] }
 0x2e6   :  { %v1715_v58 = vpop.f32.mrf.mxu1 }
 0x2e7   :  { %v2431_v0 = vmax.f32 %v2367_v25, 0.0  ;;  %v2052_v32 = vadd.f32 %v2051_v16, %v1883_v9  ;;  %v1716_v28 = vadd.f32 %v1715_v58, %v5394_v42 }
 0x2e8   :  { %v2222_v4 = vpop.f32.mrf.mxu0 }
 0x2e9   :  { %v2495_v44 = vpack.c.bf16 %v2431_v0, %v2431_v0  ;;  %v2221_v51 = vadd.f32 %v2220_v41, %v2052_v32 }
 0x2eb   :  { %2560 = vst.msk [vmem:[%s5350_s4 + $0xdc] sm:$0xf] %vm2504_vm1, %v2495_v44  ;;  %v2300_v5 = vmul.f32 %v5249_v35, %v2221_v51 }
 0x2ec   :  { %v1884_v24 = vpop.f32.mrf.mxu2 }
 0x2ed   :  { %v2368_v40 = vadd.f32 %v5256_v30, %v2300_v5  ;;  %v1885_v61 = vadd.f32 %v1884_v24, %v1716_v28  ;;  %v2053_v37 = vpop.f32.mrf.mxu3  ;;  %v5399_v24 = vld [vmem:[#allocation24_spill] sm:$0xff] }
 0x2ee   :  { %v1718_v48 = vpop.f32.mrf.mxu1 }
 0x2ef   :  { %v2432_v12 = vmax.f32 %v2368_v40, 0.0  ;;  %v2054_v43 = vadd.f32 %v2053_v37, %v1885_v61  ;;  %v1719_v46 = vadd.f32 %v1718_v48, %v5395_v52 }
 0x2f0   :  { %v2225_v20 = vpop.f32.mrf.mxu0 }
 0x2f1   :  { %v2496_v23 = vpack.c.bf16 %v2432_v12, %v2432_v12  ;;  %v2223_v6 = vadd.f32 %v2222_v4, %v2054_v43 }
 0x2f3   :  { %2561 = vst.msk [vmem:[%s5350_s4 + $0xe0] sm:$0xf] %vm2504_vm1, %v2496_v23  ;;  %v2301_v10 = vmul.f32 %v5249_v35, %v2223_v6 }
 0x2f4   :  { %v1887_v55 = vpop.f32.mrf.mxu2 }
 0x2f5   :  { %v2369_v3 = vadd.f32 %v5256_v30, %v2301_v10  ;;  %v1888_v1 = vadd.f32 %v1887_v55, %v1719_v46  ;;  %v2056_v38 = vpop.f32.mrf.mxu3  ;;  %v5400_v55 = vld [vmem:[#allocation26_spill] sm:$0xff] }
 0x2f6   :  { %v1720_v53 = vpop.f32.mrf.mxu1 }
 0x2f7   :  { %v2433_v8 = vmax.f32 %v2369_v3, 0.0  ;;  %v2057_v63 = vadd.f32 %v2056_v38, %v1888_v1  ;;  %v1721_v57 = vadd.f32 %v1720_v53, %v5396_v54 }
 0x2f8   :  { %v2227_v59 = vpop.f32.mrf.mxu0 }
 0x2f9   :  { %v2497_v2 = vpack.c.bf16 %v2433_v8, %v2433_v8  ;;  %v2226_v29 = vadd.f32 %v2225_v20, %v2057_v63 }
 0x2fb   :  { %2562 = vst.msk [vmem:[%s5350_s4 + $0xe4] sm:$0xf] %vm2504_vm1, %v2497_v2  ;;  %v2302_v45 = vmul.f32 %v5249_v35, %v2226_v29 }
 0x2fc   :  { %v1889_v21 = vpop.f32.mrf.mxu2 }
 0x2fd   :  { %v2370_v15 = vadd.f32 %v5256_v30, %v2302_v45  ;;  %v1890_v49 = vadd.f32 %v1889_v21, %v1721_v57  ;;  %v2058_v17 = vpop.f32.mrf.mxu3 }
 0x2fe   :  { %v1723_v62 = vpop.f32.mrf.mxu1 }
 0x2ff   :  { %v2434_v19 = vmax.f32 %v2370_v15, 0.0  ;;  %v2059_v39 = vadd.f32 %v2058_v17, %v1890_v49  ;;  %v1724_v7 = vadd.f32 %v1723_v62, %v5397_v31 }
 0x300   :  { %v2230_v50 = vpop.f32.mrf.mxu0 }
 0x301   :  { %v2498_v22 = vpack.c.bf16 %v2434_v19, %v2434_v19  ;;  %v2228_v34 = vadd.f32 %v2227_v59, %v2059_v39 }
 0x303   :  { %2563 = vst.msk [vmem:[%s5350_s4 + $0xe8] sm:$0xf] %vm2504_vm1, %v2498_v22  ;;  %v2303_v13 = vmul.f32 %v5249_v35, %v2228_v34 }
 0x304   :  { %v1892_v11 = vpop.f32.mrf.mxu2 }
 0x305   :  { %v2371_v18 = vadd.f32 %v5256_v30, %v2303_v13  ;;  %v1893_v56 = vadd.f32 %v1892_v11, %v1724_v7  ;;  %v2061_v27 = vpop.f32.mrf.mxu3 }
 0x306   :  { %v1725_v41 = vpop.f32.mrf.mxu1 }
 0x307   :  { %v2435_v14 = vmax.f32 %v2371_v18, 0.0  ;;  %v2062_v47 = vadd.f32 %v2061_v27, %v1893_v56  ;;  %v1726_v25 = vadd.f32 %v1725_v41, %v5398_v36 }
 0x308   :  { %v2232_v9 = vpop.f32.mrf.mxu0 }
 0x309   :  { %v2499_v26 = vpack.c.bf16 %v2435_v14, %v2435_v14  ;;  %v2231_v33 = vadd.f32 %v2230_v50, %v2062_v47 }
 0x30b   :  { %2564 = vst.msk [vmem:[%s5350_s4 + $0xec] sm:$0xf] %vm2504_vm1, %v2499_v26  ;;  %v2304_v60 = vmul.f32 %v5249_v35, %v2231_v33 }
 0x30c   :  { %v1894_v16 = vpop.f32.mrf.mxu2 }
 0x30d   :  { %v2372_v58 = vadd.f32 %v5256_v30, %v2304_v60  ;;  %v1895_v0 = vadd.f32 %v1894_v16, %v1726_v25  ;;  %v2063_v32 = vpop.f32.mrf.mxu3 }
 0x30e   :  { %v1728_v4 = vpop.f32.mrf.mxu1 }
 0x30f   :  { %v2436_v44 = vmax.f32 %v2372_v58, 0.0  ;;  %v2064_v51 = vadd.f32 %v2063_v32, %v1895_v0  ;;  %v1729_v40 = vadd.f32 %v1728_v4, %v5399_v24 }
 0x310   :  { %v2235_v43 = vpop.f32.mrf.mxu0 }
 0x311   :  { %v2500_v5 = vpack.c.bf16 %v2436_v44, %v2436_v44  ;;  %v2233_v42 = vadd.f32 %v2232_v9, %v2064_v51 }
 0x313   :  { %2565 = vst.msk [vmem:[%s5350_s4 + $0xf0] sm:$0xf] %vm2504_vm1, %v2500_v5  ;;  %v2305_v28 = vmul.f32 %v5249_v35, %v2233_v42 }
 0x314   :  { %v1897_v61 = vpop.f32.mrf.mxu2 }
 0x315   :  { %v2373_v37 = vadd.f32 %v5256_v30, %v2305_v28  ;;  %v1898_v48 = vadd.f32 %v1897_v61, %v1729_v40  ;;  %v2066_v12 = vpop.f32.mrf.mxu3 }
 0x316   :  { %v1730_v6 = vpop.f32.mrf.mxu1 }
 0x317   :  { %v2437_v20 = vmax.f32 %v2373_v37, 0.0  ;;  %v2067_v23 = vadd.f32 %v2066_v12, %v1898_v48  ;;  %v1731_v3 = vadd.f32 %v1730_v6, %v5400_v55 }
 0x318   :  { %v2237_v2 = vpop.f32.mrf.mxu0 }
 0x319   :  { %v2501_v10 = vpack.c.bf16 %v2437_v20, %v2437_v20  ;;  %v2236_v52 = vadd.f32 %v2235_v43, %v2067_v23 }
 0x31b   :  { %2566 = vst.msk [vmem:[%s5350_s4 + $0xf4] sm:$0xf] %vm2504_vm1, %v2501_v10  ;;  %v2306_v46 = vmul.f32 %v5249_v35, %v2236_v52 }
 0x31c   :  { %v1899_v1 = vpop.f32.mrf.mxu2 }
 0x31d   :  { %v2374_v38 = vadd.f32 %v5256_v30, %v2306_v46  ;;  %v1900_v53 = vadd.f32 %v1899_v1, %v1731_v3  ;;  %v2068_v8 = vpop.f32.mrf.mxu3 }
 0x31f   :  { %v2438_v63 = vmax.f32 %v2374_v38, 0.0  ;;  %v2069_v59 = vadd.f32 %v2068_v8, %v1900_v53 }
 0x321   :  { %v2502_v29 = vpack.c.bf16 %v2438_v63, %v2438_v63  ;;  %v2238_v45 = vadd.f32 %v2237_v2, %v2069_v59 }
 0x323   :  { %2567 = vst.msk [vmem:[%s5350_s4 + $0xf8] sm:$0xf] %vm2504_vm1, %v2502_v29  ;;  %v2307_v54 = vmul.f32 %v5249_v35, %v2238_v45 }
 0x325   :  { %v2375_v57 = vadd.f32 %v5256_v30, %v2307_v54 }
 0x327   :  { %v2439_v21 = vmax.f32 %v2375_v57, 0.0 }
 0x329   :  { %v2503_v15 = vpack.c.bf16 %v2439_v21, %v2439_v21 }
 0x32b   :  { %2568 = vst.msk [vmem:[%s5350_s4 + $0xfc] sm:$0xf] %vm2504_vm1, %v2503_v15 }

// kernel: feature_extractor_forward.12
= control target key start
LH: loop header
LB: loop body
LE: loop exit
PB: predicated region body
PF: predicated region fallthrough
CT: control target
= control target key end

     0   :  { %vm554_vm0 = vcmask 523264   ;;  %s1860_s1 = inlined_call_operand.vmem [shape: bf16[576,128], index: 1, kind: input, shape index: {}]   ;;  %s1861_s0 = inlined_call_operand.vmem [shape: bf16[128,576], index: 0, kind: input, shape index: {}]   ;;  %s1862_s2 = inlined_call_operand.vmem [shape: f32[1,128], index: 2, kind: input, shape index: {}]   ;;  %s1863_s3 = inlined_call_operand.vmem [shape: f32[1,128], index: 3, kind: input, shape index: {}]   ;;  %s1864_s4 = inlined_call_operand.vmem [shape: bf16[128,128], index: 4, kind: output, shape index: {}]  }
   0x1   :  { %v1275_v0 = vld [vmem:[%s1860_s1 + $0x38] sm:$0xff]  ;;  %v1274_v1 = vld [vmem:[%s1860_s1 + $0x30] sm:$0xff]  ;;  %v1273_v2 = vld [vmem:[%s1860_s1 + $0x28] sm:$0xff] }
   0x2   :  { %1351 = vmatpush.bf16.msra.mxu1 %v1275_v0  ;;  %1352 = vmatpush.bf16.msra.mxu2 %v1275_v0  ;;  %v1272_v3 = vld [vmem:[%s1860_s1 + $0x20] sm:$0xff]  ;;  %v1271_v4 = vld [vmem:[%s1860_s1 + $0x18] sm:$0xff]  ;;  %v1270_v5 = vld [vmem:[%s1860_s1 + $0x10] sm:$0xff] }
   0x3   :  { %1353 = vmatpush.bf16.msra.mxu3 %v1275_v0  ;;  %579 = vmatpush.bf16.msra.mxu0 %v1275_v0  ;;  %v1269_v6 = vld [vmem:[%s1860_s1 + $0x8] sm:$0xff]  ;;  %v1268_v7 = vld [vmem:[%s1860_s1] sm:$0xff]  ;;  %v958_v8 = vld [vmem:[%s1861_s0 + $0x50] sm:$0xf] }
   0x4   :  { %v1240_v9 = vld [vmem:[%s1861_s0 + $0x60] sm:$0xf0]  ;;  %v998_v10 = vld [vmem:[%s1861_s0 + $0xa0] sm:$0xf]  ;;  %v1250_v11 = vld [vmem:[%s1861_s0 + $0xb0] sm:$0xf0] }
   0x5   :  { %v1038_v12 = vld [vmem:[%s1861_s0 + $0xf0] sm:$0xf]  ;;  %v1260_v13 = vld [vmem:[%s1861_s0 + $0x100] sm:$0xf0]  ;;  %v918_v14 = vld [vmem:[%s1861_s0] sm:$0xf]  ;;  %v959_v18 = vor.u32 %v1240_v9, %v958_v8  ;;  %v999_v19 = vor.u32 %v1250_v11, %v998_v10 }
   0x6   :  { %1354 = vmatpush.bf16.msra.mxu1 %v1274_v1  ;;  %1355 = vmatpush.bf16.msra.mxu2 %v1274_v1  ;;  %v1230_v15 = vld [vmem:[%s1861_s0 + $0x10] sm:$0xf0]  ;;  %v1291_v16 = vld [vmem:[%s1860_s1 + $0xb8] sm:$0xff]  ;;  %v1039_v20 = vor.u32 %v1260_v13, %v1038_v12  ;;  %v1289_v28 = vld [vmem:[%s1860_s1 + $0xa8] sm:$0xff] }
   0x7   :  { %1356 = vmatpush.bf16.msra.mxu3 %v1274_v1  ;;  %580 = vmatpush.bf16.msra.mxu0 %v1274_v1  ;;  %v1283_v17 = vld [vmem:[%s1860_s1 + $0x78] sm:$0xff]  ;;  %v919_v21 = vor.u32 %v1230_v15, %v918_v14  ;;  %v1290_v24 = vld [vmem:[%s1860_s1 + $0xb0] sm:$0xff]  ;;  %v1281_v29 = vld [vmem:[%s1860_s1 + $0x68] sm:$0xff] }
   0x8   :  { %v1299_v22 = vld [vmem:[%s1860_s1 + $0xf8] sm:$0xff]  ;;  %v1282_v25 = vld [vmem:[%s1860_s1 + $0x70] sm:$0xff]  ;;  %v1297_v30 = vld [vmem:[%s1860_s1 + $0xe8] sm:$0xff] }
   0x9   :  { %v1303_v23 = vld [vmem:[%s1860_s1 + $0x118] sm:$0xff]  ;;  %v1298_v26 = vld [vmem:[%s1860_s1 + $0xf0] sm:$0xff]  ;;  %v1301_v31 = vld [vmem:[%s1860_s1 + $0x108] sm:$0xff] }
   0xa   :  { %1357 = vmatpush.bf16.msra.mxu1 %v1273_v2  ;;  %1358 = vmatpush.bf16.msra.mxu2 %v1273_v2  ;;  %v1302_v27 = vld [vmem:[%s1860_s1 + $0x110] sm:$0xff]  ;;  %v1288_v32 = vld [vmem:[%s1860_s1 + $0xa0] sm:$0xff]  ;;  %v978_v35 = vld [vmem:[%s1861_s0 + $0x78] sm:$0xf] }
   0xb   :  { %1359 = vmatpush.bf16.msra.mxu3 %v1273_v2  ;;  %581 = vmatpush.bf16.msra.mxu0 %v1273_v2  ;;  %v1280_v33 = vld [vmem:[%s1860_s1 + $0x60] sm:$0xff]  ;;  %v1245_v36 = vld [vmem:[%s1861_s0 + $0x88] sm:$0xf0]  ;;  %v1018_v37 = vld [vmem:[%s1861_s0 + $0xc8] sm:$0xf] }
   0xc   :  { %v1296_v34 = vld [vmem:[%s1860_s1 + $0xe0] sm:$0xff]  ;;  %v1255_v38 = vld [vmem:[%s1861_s0 + $0xd8] sm:$0xf0]  ;;  %v1058_v39 = vld [vmem:[%s1861_s0 + $0x118] sm:$0xf]  ;;  %v979_v46 = vor.u32 %v1245_v36, %v978_v35 }
   0xd   :  { %v1265_v40 = vld [vmem:[%s1861_s0 + $0x128] sm:$0xf0]  ;;  %v938_v41 = vld [vmem:[%s1861_s0 + $0x28] sm:$0xf]  ;;  %v1235_v42 = vld [vmem:[%s1861_s0 + $0x38] sm:$0xf0]  ;;  %v1019_v47 = vor.u32 %v1255_v38, %v1018_v37 }
   0xe   :  { %1360 = vmatpush.bf16.msra.mxu1 %v1272_v3  ;;  %1361 = vmatpush.bf16.msra.mxu2 %v1272_v3  ;;  %v1300_v43 = vld [vmem:[%s1860_s1 + $0x100] sm:$0xff]  ;;  %v1287_v44 = vld [vmem:[%s1860_s1 + $0x98] sm:$0xff]  ;;  %v1059_v48 = vor.u32 %v1265_v40, %v1058_v39  ;;  %v939_v49 = vor.u32 %v1235_v42, %v938_v41  ;;  %v1286_v51 = vld [vmem:[%s1860_s1 + $0x90] sm:$0xff] }
   0xf   :  { %1362 = vmatpush.bf16.msra.mxu3 %v1272_v3  ;;  %582 = vmatpush.bf16.msra.mxu0 %v1272_v3  ;;  %v1279_v45 = vld [vmem:[%s1860_s1 + $0x58] sm:$0xff]  ;;  %v1278_v52 = vld [vmem:[%s1860_s1 + $0x50] sm:$0xff]  ;;  %v1285_v54 = vld [vmem:[%s1860_s1 + $0x88] sm:$0xff] }
  0x10   :  { %v1295_v50 = vld [vmem:[%s1860_s1 + $0xd8] sm:$0xff]  ;;  %v1294_v53 = vld [vmem:[%s1860_s1 + $0xd0] sm:$0xff]  ;;  %v1277_v55 = vld [vmem:[%s1860_s1 + $0x48] sm:$0xff] }
  0x11   :  { %v1293_v56 = vld [vmem:[%s1860_s1 + $0xc8] sm:$0xff]  ;;  %v1284_v57 = vld [vmem:[%s1860_s1 + $0x80] sm:$0xff]  ;;  %v920_v61 = vld [vmem:[%s1861_s0 + $0x14] sm:$0xf0] }
  0x12   :  { %1363 = vmatpush.bf16.msra.mxu1 %v1271_v4  ;;  %1364 = vmatpush.bf16.msra.mxu2 %v1271_v4  ;;  %v1276_v58 = vld [vmem:[%s1860_s1 + $0x40] sm:$0xff]  ;;  %v926_v62 = vld [vmem:[%s1861_s0 + $0x8] sm:$0xf]  ;;  %v1231_v63 = vld [vmem:[%s1861_s0 + $0x18] sm:$0xf0] }
  0x13   :  { %1365 = vmatpush.bf16.msra.mxu3 %v1271_v4  ;;  %583 = vmatpush.bf16.msra.mxu0 %v1271_v4  ;;  %v1292_v59 = vld [vmem:[%s1860_s1 + $0xc0] sm:$0xff]  ;;  %v1229_v0 = vld [vmem:[%s1861_s0 + $0xc] sm:$0xf]  ;;  %v934_v2 = vld [vmem:[%s1861_s0 + $0x10] sm:$0xf] }
  0x14   :  { %v1228_v60 = vld [vmem:[%s1861_s0 + $0x4] sm:$0xf]  ;;  %v928_v1 = vld [vmem:[%s1861_s0 + $0x1c] sm:$0xf0]  ;;  %v1233_v8 = vld [vmem:[%s1861_s0 + $0x2c] sm:$0xf] }
  0x15   :  { %v1232_v3 = vld [vmem:[%s1861_s0 + $0x20] sm:$0xf0]  ;;  %v923_v4 = vor.u32 %v1228_v60, %v920_v61  ;;  %v940_v9 = vld [vmem:[%s1861_s0 + $0x3c] sm:$0xf0]  ;;  %v946_v10 = vld [vmem:[%s1861_s0 + $0x30] sm:$0xf] }
  0x16   :  { %1366 = vmatpush.bf16.msra.mxu1 %v1270_v5  ;;  %1367 = vmatpush.bf16.msra.mxu2 %v1270_v5  ;;  %v1236_v11 = vld [vmem:[%s1861_s0 + $0x40] sm:$0xf0]  ;;  %v1234_v12 = vld [vmem:[%s1861_s0 + $0x34] sm:$0xf]  ;;  %v948_v13 = vld [vmem:[%s1861_s0 + $0x44] sm:$0xf0] }
  0x17   :  { %1368 = vmatpush.bf16.msra.mxu3 %v1270_v5  ;;  %584 = vmatpush.bf16.msra.mxu0 %v1270_v5  ;;  %v927_v5 = vor.u32 %v1231_v63, %v926_v62  ;;  %v954_v14 = vld [vmem:[%s1861_s0 + $0x38] sm:$0xf]  ;;  %v1237_v15 = vld [vmem:[%s1861_s0 + $0x48] sm:$0xf0]  ;;  %v1246_v35 = vld [vmem:[%s1861_s0 + $0x90] sm:$0xf0] }
  0x18   :  { %v1244_v36 = vld [vmem:[%s1861_s0 + $0x84] sm:$0xf]  ;;  %v988_v37 = vld [vmem:[%s1861_s0 + $0x94] sm:$0xf0]  ;;  %v994_v38 = vld [vmem:[%s1861_s0 + $0x88] sm:$0xf] }
  0x19   :  { %v1247_v39 = vld [vmem:[%s1861_s0 + $0x98] sm:$0xf0]  ;;  %v991_v42 = vor.u32 %v1244_v36, %v988_v37  ;;  %v1254_v60 = vld [vmem:[%s1861_s0 + $0xd4] sm:$0xf]  ;;  %v1028_v61 = vld [vmem:[%s1861_s0 + $0xe4] sm:$0xf0] }
  0x1a   :  { %1369 = vmatpush.bf16.msra.mxu1 %v1269_v6  ;;  %1370 = vmatpush.bf16.msra.mxu2 %v1269_v6  ;;  %v1034_v62 = vld [vmem:[%s1861_s0 + $0xd8] sm:$0xf]  ;;  %v1257_v63 = vld [vmem:[%s1861_s0 + $0xe8] sm:$0xf0] }
  0x1b   :  { %1371 = vmatpush.bf16.msra.mxu3 %v1269_v6  ;;  %585 = vmatpush.bf16.msra.mxu0 %v1269_v6  ;;  %v931_v6 = vor.u32 %v1229_v0, %v928_v1 }
  0x1e   :  { %1372 = vmatpush.bf16.msra.mxu1 %v1268_v7  ;;  %1373 = vmatpush.bf16.msra.mxu2 %v1268_v7 }
  0x1f   :  { %1374 = vmatpush.bf16.msra.mxu3 %v1268_v7  ;;  %586 = vmatpush.bf16.msra.mxu0 %v1268_v7  ;;  %v935_v7 = vor.u32 %v1232_v3, %v934_v2  ;;  %v1031_v2 = vor.u32 %v1254_v60, %v1028_v61  ;;  %v1035_v3 = vor.u32 %v1257_v63, %v1034_v62  ;;  %v1791_v61 = vld [vmem:[%s1863_s3] ss:$0 sm:$0xff] }
  0x21   :  { %597 = vmatmul.bf16.vlgmr.msra.gmra.mxu1 %v959_v18  ;;  %607 = vmatmul.bf16.vlgmr.msra.gmra.mxu2 %v999_v19  ;;  %v951_v18 = vor.u32 %v1234_v12, %v948_v13  ;;  %v955_v19 = vor.u32 %v1237_v15, %v954_v14 }
  0x22   :  { %677 = vmatpush.bf16.msrb.mxu2 %v1291_v16  ;;  %628 = vmatpush.bf16.msrb.mxu1 %v1283_v17  ;;  %v943_v16 = vor.u32 %v1233_v8, %v940_v9  ;;  %v947_v17 = vor.u32 %v1236_v11, %v946_v10  ;;  %v1259_v8 = vld [vmem:[%s1861_s0 + $0xfc] sm:$0xf]  ;;  %v1048_v9 = vld [vmem:[%s1861_s0 + $0x10c] sm:$0xf0]  ;;  %v1054_v10 = vld [vmem:[%s1861_s0 + $0x100] sm:$0xf] }
  0x23   :  { %617 = vmatmul.bf16.vlgmr.msra.gmra.mxu3 %v1039_v20  ;;  %587 = vmatmul.bf16.vlgmr.msra.gmra.mxu0 %v919_v21  ;;  %v1238_v20 = vld [vmem:[%s1861_s0 + $0x54] sm:$0xf]  ;;  %v960_v21 = vld [vmem:[%s1861_s0 + $0x64] sm:$0xf0]  ;;  %v1051_v15 = vor.u32 %v1259_v8, %v1048_v9 }
  0x24   :  { %726 = vmatpush.bf16.msrb.mxu3 %v1299_v22  ;;  %779 = vmatpush.bf16.msrb.mxu0 %v1303_v23  ;;  %v966_v22 = vld [vmem:[%s1861_s0 + $0x58] sm:$0xf]  ;;  %v1241_v23 = vld [vmem:[%s1861_s0 + $0x68] sm:$0xf0]  ;;  %v1262_v11 = vld [vmem:[%s1861_s0 + $0x110] sm:$0xf0] }
  0x26   :  { %678 = vmatpush.bf16.msrb.mxu2 %v1290_v24  ;;  %629 = vmatpush.bf16.msrb.mxu1 %v1282_v25  ;;  %v1239_v24 = vld [vmem:[%s1861_s0 + $0x5c] sm:$0xf]  ;;  %v968_v25 = vld [vmem:[%s1861_s0 + $0x6c] sm:$0xf0] }
  0x28   :  { %727 = vmatpush.bf16.msrb.mxu3 %v1298_v26  ;;  %780 = vmatpush.bf16.msrb.mxu0 %v1302_v27  ;;  %v974_v26 = vld [vmem:[%s1861_s0 + $0x60] sm:$0xf]  ;;  %v1242_v27 = vld [vmem:[%s1861_s0 + $0x70] sm:$0xf0] }
  0x2a   :  { %679 = vmatpush.bf16.msrb.mxu2 %v1289_v28  ;;  %630 = vmatpush.bf16.msrb.mxu1 %v1281_v29  ;;  %v963_v28 = vor.u32 %v1238_v20, %v960_v21  ;;  %v967_v29 = vor.u32 %v1241_v23, %v966_v22  ;;  %v1263_v22 = vld [vmem:[%s1861_s0 + $0x11c] sm:$0xf]  ;;  %v1060_v23 = vld [vmem:[%s1861_s0 + $0x12c] sm:$0xf0] }
  0x2c   :  { %728 = vmatpush.bf16.msrb.mxu3 %v1297_v30  ;;  %781 = vmatpush.bf16.msrb.mxu0 %v1301_v31  ;;  %v971_v30 = vor.u32 %v1239_v24, %v968_v25  ;;  %v975_v31 = vor.u32 %v1242_v27, %v974_v26  ;;  %v1066_v24 = vld [vmem:[%s1861_s0 + $0x120] sm:$0xf]  ;;  %v1266_v25 = vld [vmem:[%s1861_s0 + $0x130] sm:$0xf0]  ;;  %v1264_v26 = vld [vmem:[%s1861_s0 + $0x124] sm:$0xf] }
  0x2d   :  { %v1068_v27 = vld [vmem:[%s1861_s0 + $0x134] sm:$0xf0] }
  0x2e   :  { %680 = vmatpush.bf16.msrb.mxu2 %v1288_v32  ;;  %631 = vmatpush.bf16.msrb.mxu1 %v1280_v33  ;;  %v1243_v32 = vld [vmem:[%s1861_s0 + $0x7c] sm:$0xf]  ;;  %v980_v33 = vld [vmem:[%s1861_s0 + $0x8c] sm:$0xf0] }
  0x2f   :  { %v983_v40 = vor.u32 %v1243_v32, %v980_v33  ;;  %v1063_v32 = vor.u32 %v1263_v22, %v1060_v23  ;;  %v1067_v33 = vor.u32 %v1266_v25, %v1066_v24 }
  0x30   :  { %729 = vmatpush.bf16.msrb.mxu3 %v1296_v34  ;;  %782 = vmatpush.bf16.msrb.mxu0 %v1300_v43  ;;  %v986_v34 = vld [vmem:[%s1861_s0 + $0x80] sm:$0xf]  ;;  %v995_v43 = vor.u32 %v1247_v39, %v994_v38 }
  0x31   :  { %602 = vmatmul.bf16.gmra.mxu1 %v979_v46  ;;  %612 = vmatmul.bf16.gmra.mxu2 %v1019_v47  ;;  %v987_v41 = vor.u32 %v1246_v35, %v986_v34  ;;  %v1006_v46 = vld [vmem:[%s1861_s0 + $0xa8] sm:$0xf]  ;;  %v1251_v47 = vld [vmem:[%s1861_s0 + $0xb8] sm:$0xf0]  ;;  %v1071_v35 = vor.u32 %v1264_v26, %v1068_v27 }
  0x32   :  { %681 = vmatpush.bf16.msrb.mxu2 %v1287_v44  ;;  %632 = vmatpush.bf16.msrb.mxu1 %v1279_v45  ;;  %v1248_v44 = vld [vmem:[%s1861_s0 + $0xa4] sm:$0xf]  ;;  %v1000_v45 = vld [vmem:[%s1861_s0 + $0xb4] sm:$0xf0] }
  0x33   :  { %622 = vmatmul.bf16.gmra.mxu3 %v1059_v48  ;;  %592 = vmatmul.bf16.gmra.mxu0 %v939_v49  ;;  %v1249_v48 = vld [vmem:[%s1861_s0 + $0xac] sm:$0xf]  ;;  %v1008_v49 = vld [vmem:[%s1861_s0 + $0xbc] sm:$0xf0] }
  0x34   :  { %730 = vmatpush.bf16.msrb.mxu3 %v1295_v50  ;;  %v1014_v50 = vld [vmem:[%s1861_s0 + $0xb0] sm:$0xf] }
  0x36   :  { %682 = vmatpush.bf16.msrb.mxu2 %v1286_v51  ;;  %633 = vmatpush.bf16.msrb.mxu1 %v1278_v52  ;;  %v1252_v51 = vld [vmem:[%s1861_s0 + $0xc0] sm:$0xf0]  ;;  %v1003_v52 = vor.u32 %v1248_v44, %v1000_v45 }
  0x38   :  { %731 = vmatpush.bf16.msrb.mxu3 %v1294_v53  ;;  %v1007_v53 = vor.u32 %v1251_v47, %v1006_v46 }
  0x3a   :  { %683 = vmatpush.bf16.msrb.mxu2 %v1285_v54  ;;  %634 = vmatpush.bf16.msrb.mxu1 %v1277_v55  ;;  %v1011_v54 = vor.u32 %v1249_v48, %v1008_v49  ;;  %v1015_v55 = vor.u32 %v1252_v51, %v1014_v50 }
  0x3c   :  { %732 = vmatpush.bf16.msrb.mxu3 %v1293_v56  ;;  %v1253_v56 = vld [vmem:[%s1861_s0 + $0xcc] sm:$0xf] }
  0x3e   :  { %684 = vmatpush.bf16.msrb.mxu2 %v1284_v57  ;;  %635 = vmatpush.bf16.msrb.mxu1 %v1276_v58  ;;  %v1020_v57 = vld [vmem:[%s1861_s0 + $0xdc] sm:$0xf0]  ;;  %v1026_v58 = vld [vmem:[%s1861_s0 + $0xd0] sm:$0xf] }
  0x3f   :  { %v1023_v0 = vor.u32 %v1253_v56, %v1020_v57 }
  0x40   :  { %733 = vmatpush.bf16.msrb.mxu3 %v1292_v59  ;;  %v1256_v59 = vld [vmem:[%s1861_s0 + $0xe0] sm:$0xf0] }
  0x41   :  { %636 = vmatmul.bf16.vlgmr.msrb.gmra.mxu1 %v923_v4  ;;  %685 = vmatmul.bf16.vlgmr.msrb.gmra.mxu2 %v927_v5  ;;  %v1027_v1 = vor.u32 %v1256_v59, %v1026_v58  ;;  %v1258_v4 = vld [vmem:[%s1861_s0 + $0xf4] sm:$0xf]  ;;  %v1040_v5 = vld [vmem:[%s1861_s0 + $0x104] sm:$0xf0] }
  0x42   :  { %v1043_v12 = vor.u32 %v1258_v4, %v1040_v5 }
  0x43   :  { %734 = vmatmul.bf16.vlgmr.msrb.gmra.mxu3 %v931_v6  ;;  %1220 = vmatmul.msk.bf16.vlgmr.msrb.gmra.mxu0 %vm554_vm0, %v935_v7  ;;  %v1046_v6 = vld [vmem:[%s1861_s0 + $0xf8] sm:$0xf]  ;;  %v1261_v7 = vld [vmem:[%s1861_s0 + $0x108] sm:$0xf0] }
  0x44   :  { %v1047_v13 = vor.u32 %v1261_v7, %v1046_v6 }
  0x51   :  { %641 = vmatmul.bf16.gmra.mxu1 %v943_v16  ;;  %690 = vmatmul.bf16.gmra.mxu2 %v947_v17  ;;  %v1055_v16 = vor.u32 %v1262_v11, %v1054_v10 }
  0x53   :  { %739 = vmatmul.bf16.gmra.mxu3 %v951_v18  ;;  %1221 = vmatmul.msk.bf16.gmra.mxu0 %vm554_vm0, %v955_v19 }
  0x61   :  { %646 = vmatmul.bf16.gmra.mxu1 %v963_v28  ;;  %695 = vmatmul.bf16.gmra.mxu2 %v967_v29  ;;  %v1074_v28 = vld [vmem:[%s1861_s0 + $0x128] sm:$0xf]  ;;  %v1267_v29 = vld [vmem:[%s1861_s0 + $0x138] sm:$0xf0] }
  0x62   :  { %v1075_v36 = vor.u32 %v1267_v29, %v1074_v28 }
  0x63   :  { %744 = vmatmul.bf16.gmra.mxu3 %v971_v30  ;;  %1222 = vmatmul.msk.bf16.gmra.mxu0 %vm554_vm0, %v975_v31 }
  0x71   :  { %651 = vmatmul.bf16.gmra.mxu1 %v983_v40  ;;  %700 = vmatmul.bf16.gmra.mxu2 %v987_v41 }
  0x73   :  { %749 = vmatmul.bf16.gmra.mxu3 %v991_v42  ;;  %1223 = vmatmul.msk.bf16.gmra.mxu0 %vm554_vm0, %v995_v43 }
  0x81   :  { %656 = vmatmul.bf16.gmra.mxu1 %v1003_v52  ;;  %705 = vmatmul.bf16.gmra.mxu2 %v1007_v53 }
  0x83   :  { %754 = vmatmul.bf16.gmra.mxu3 %v1011_v54  ;;  %1224 = vmatmul.msk.bf16.gmra.mxu0 %vm554_vm0, %v1015_v55  ;;  %v1785_v54 = vld [vmem:[%s1862_s2] ss:$0 sm:$0xff] }
  0x91   :  { %661 = vmatmul.bf16.gmra.mxu1 %v1023_v0  ;;  %710 = vmatmul.bf16.gmra.mxu2 %v1027_v1 }
  0x93   :  { %759 = vmatmul.bf16.gmra.mxu3 %v1031_v2  ;;  %1225 = vmatmul.msk.bf16.gmra.mxu0 %vm554_vm0, %v1035_v3 }
  0x9e   :  { %v1732_v14 = vpop.f32.mrf.mxu1 }
  0xa0   :  { %v588_v17 = vpop.f32.mrf.mxu0 }
  0xa1   :  { %666 = vmatmul.bf16.gmra.mxu1 %v1043_v12  ;;  %715 = vmatmul.bf16.gmra.mxu2 %v1047_v13 }
  0xa3   :  { %764 = vmatmul.bf16.gmra.mxu3 %v1051_v15  ;;  %1226 = vmatmul.msk.bf16.gmra.mxu0 %vm554_vm0, %v1055_v16 }
  0xa4   :  { %v1735_v18 = vpop.f32.mrf.mxu2 }
  0xa6   :  { %v1737_v19 = vpop.f32.mrf.mxu3  ;;  %v1739_v20 = vpop.f32.mrf.mxu1 }
  0xa8   :  { %v590_v21 = vpop.f32.mrf.mxu0 }
  0xac   :  { %v1765_v30 = vpop.f32.mrf.mxu2 }
  0xae   :  { %v1767_v31 = vpop.f32.mrf.mxu3  ;;  %v1769_v34 = vpop.f32.mrf.mxu1 }
  0xb0   :  { %v593_v37 = vpop.f32.mrf.mxu0 }
  0xb1   :  { %671 = vmatmul.bf16.gmra.mxu1 %v1063_v32  ;;  %720 = vmatmul.bf16.gmra.mxu2 %v1067_v33 }
  0xb3   :  { %769 = vmatmul.bf16.gmra.mxu3 %v1071_v35  ;;  %1227 = vmatmul.msk.bf16.gmra.mxu0 %vm554_vm0, %v1075_v36 }
  0xb4   :  { %v1772_v38 = vpop.f32.mrf.mxu2 }
  0xb6   :  { %v1774_v39 = vpop.f32.mrf.mxu3  ;;  %v1776_v40 = vpop.f32.mrf.mxu1 }
  0xb8   :  { %v595_v41 = vpop.f32.mrf.mxu0 }
  0xbc   :  { %v1778_v42 = vpop.f32.mrf.mxu2 }
  0xbe   :  { %v1780_v43 = vpop.f32.mrf.mxu3  ;;  %v637_v44 = vpop.f32.mrf.mxu1 }
  0xbf   :  { %v638_v46 = vadd.f32 %v637_v44, %v588_v17 }
  0xc0   :  { %v784_v45 = vpop.f32.mrf.mxu0 }
  0xc4   :  { %v686_v47 = vpop.f32.mrf.mxu2 }
  0xc5   :  { %v687_v48 = vadd.f32 %v686_v47, %v638_v46 }
  0xc6   :  { %v735_v49 = vpop.f32.mrf.mxu3  ;;  %v639_v50 = vpop.f32.mrf.mxu1 }
  0xc7   :  { %v736_v51 = vadd.f32 %v735_v49, %v687_v48  ;;  %v640_v55 = vadd.f32 %v639_v50, %v590_v21 }
  0xc8   :  { %v786_v52 = vpop.f32.mrf.mxu0 }
  0xc9   :  { %v785_v53 = vadd.f32 %v784_v45, %v736_v51 }
  0xcb   :  { %v828_v60 = vmul.f32 %v1785_v54, %v785_v53 }
  0xcc   :  { %v688_v56 = vpop.f32.mrf.mxu2 }
  0xcd   :  { %v689_v57 = vadd.f32 %v688_v56, %v640_v55  ;;  %v848_v1 = vadd.f32 %v1791_v61, %v828_v60 }
  0xce   :  { %v737_v58 = vpop.f32.mrf.mxu3  ;;  %v642_v59 = vpop.f32.mrf.mxu1 }
  0xcf   :  { %v738_v62 = vadd.f32 %v737_v58, %v689_v57  ;;  %v643_v3 = vadd.f32 %v642_v59, %v593_v37  ;;  %v864_v9 = vmax.f32 %v848_v1, 0.0 }
  0xd0   :  { %v789_v63 = vpop.f32.mrf.mxu0 }
  0xd1   :  { %v787_v0 = vadd.f32 %v786_v52, %v738_v62 }
  0xd3   :  { %v829_v2 = vmul.f32 %v1785_v54, %v787_v0 }
  0xd4   :  { %v691_v4 = vpop.f32.mrf.mxu2 }
  0xd5   :  { %v849_v5 = vadd.f32 %v1791_v61, %v829_v2  ;;  %v692_v6 = vadd.f32 %v691_v4, %v643_v3 }
  0xd6   :  { %v740_v7 = vpop.f32.mrf.mxu3  ;;  %v644_v8 = vpop.f32.mrf.mxu1 }
  0xd7   :  { %v865_v10 = vmax.f32 %v849_v5, 0.0  ;;  %v741_v11 = vadd.f32 %v740_v7, %v692_v6  ;;  %v645_v16 = vadd.f32 %v644_v8, %v595_v41 }
  0xd8   :  { %v791_v12 = vpop.f32.mrf.mxu0 }
  0xd9   :  { %v1307_v13 = vpack.c.bf16 %v865_v10, %v864_v9  ;;  %v790_v15 = vadd.f32 %v789_v63, %v741_v11 }
  0xdb   :  { %1308 = vst [vmem:[%s1864_s4] sm:$0xff] %v1307_v13   ;;  %v830_v24 = vmul.f32 %v1785_v54, %v790_v15 }
  0xdc   :  { %v693_v17 = vpop.f32.mrf.mxu2 }
  0xdd   :  { %v694_v21 = vadd.f32 %v693_v17, %v645_v16  ;;  %v850_v28 = vadd.f32 %v1791_v61, %v830_v24 }
  0xde   :  { %v742_v22 = vpop.f32.mrf.mxu3  ;;  %v647_v23 = vpop.f32.mrf.mxu1 }
  0xdf   :  { %v743_v25 = vadd.f32 %v742_v22, %v694_v21  ;;  %v648_v32 = vadd.f32 %v647_v23, %v1732_v14  ;;  %v866_v44 = vmax.f32 %v850_v28, 0.0 }
  0xe0   :  { %v794_v26 = vpop.f32.mrf.mxu0 }
  0xe1   :  { %v792_v27 = vadd.f32 %v791_v12, %v743_v25 }
  0xe3   :  { %v831_v29 = vmul.f32 %v1785_v54, %v792_v27 }
  0xe4   :  { %v696_v33 = vpop.f32.mrf.mxu2 }
  0xe5   :  { %v851_v35 = vadd.f32 %v1791_v61, %v831_v29  ;;  %v697_v36 = vadd.f32 %v696_v33, %v648_v32 }
  0xe6   :  { %v745_v37 = vpop.f32.mrf.mxu3  ;;  %v649_v41 = vpop.f32.mrf.mxu1 }
  0xe7   :  { %v867_v45 = vmax.f32 %v851_v35, 0.0  ;;  %v746_v46 = vadd.f32 %v745_v37, %v697_v36  ;;  %v650_v50 = vadd.f32 %v649_v41, %v1739_v20 }
  0xe8   :  { %v796_v47 = vpop.f32.mrf.mxu0 }
  0xe9   :  { %v1312_v48 = vpack.c.bf16 %v867_v45, %v866_v44  ;;  %v795_v49 = vadd.f32 %v794_v26, %v746_v46 }
  0xeb   :  { %1344 = vst [vmem:[%s1864_s4 + $0x8] sm:$0xff] %v1312_v48   ;;  %v832_v55 = vmul.f32 %v1785_v54, %v795_v49 }
  0xec   :  { %v698_v51 = vpop.f32.mrf.mxu2 }
  0xed   :  { %v699_v14 = vadd.f32 %v698_v51, %v650_v50  ;;  %v852_v59 = vadd.f32 %v1791_v61, %v832_v55 }
  0xee   :  { %v747_v52 = vpop.f32.mrf.mxu3  ;;  %v652_v53 = vpop.f32.mrf.mxu1 }
  0xef   :  { %v748_v56 = vadd.f32 %v747_v52, %v699_v14  ;;  %v653_v62 = vadd.f32 %v652_v53, %v1769_v34  ;;  %v868_v3 = vmax.f32 %v852_v59, 0.0 }
  0xf0   :  { %v799_v57 = vpop.f32.mrf.mxu0 }
  0xf1   :  { %v797_v58 = vadd.f32 %v796_v47, %v748_v56 }
  0xf3   :  { %v833_v60 = vmul.f32 %v1785_v54, %v797_v58 }
  0xf4   :  { %v701_v63 = vpop.f32.mrf.mxu2 }
  0xf5   :  { %v853_v0 = vadd.f32 %v1791_v61, %v833_v60  ;;  %v702_v1 = vadd.f32 %v701_v63, %v653_v62 }
  0xf6   :  { %v750_v20 = vpop.f32.mrf.mxu3  ;;  %v654_v2 = vpop.f32.mrf.mxu1 }
  0xf7   :  { %v869_v4 = vmax.f32 %v853_v0, 0.0  ;;  %v751_v5 = vadd.f32 %v750_v20, %v702_v1  ;;  %v655_v9 = vadd.f32 %v654_v2, %v1776_v40 }
  0xf8   :  { %v801_v6 = vpop.f32.mrf.mxu0 }
  0xf9   :  { %v1317_v7 = vpack.c.bf16 %v869_v4, %v868_v3  ;;  %v800_v8 = vadd.f32 %v799_v57, %v751_v5 }
  0xfb   :  { %1345 = vst [vmem:[%s1864_s4 + $0x10] sm:$0xff] %v1317_v7   ;;  %v834_v13 = vmul.f32 %v1785_v54, %v800_v8 }
  0xfc   :  { %v703_v10 = vpop.f32.mrf.mxu2 }
  0xfd   :  { %v704_v34 = vadd.f32 %v703_v10, %v655_v9  ;;  %v854_v21 = vadd.f32 %v1791_v61, %v834_v13 }
  0xfe   :  { %v752_v11 = vpop.f32.mrf.mxu3  ;;  %v657_v12 = vpop.f32.mrf.mxu1 }
  0xff   :  { %v753_v15 = vadd.f32 %v752_v11, %v704_v34  ;;  %v658_v23 = vadd.f32 %v657_v12, %v1735_v18  ;;  %v870_v28 = vmax.f32 %v854_v21, 0.0 }
 0x100   :  { %v804_v16 = vpop.f32.mrf.mxu0 }
 0x101   :  { %v802_v17 = vadd.f32 %v801_v6, %v753_v15 }
 0x103   :  { %v835_v22 = vmul.f32 %v1785_v54, %v802_v17 }
 0x104   :  { %v706_v24 = vpop.f32.mrf.mxu2 }
 0x105   :  { %v855_v25 = vadd.f32 %v1791_v61, %v835_v22  ;;  %v707_v26 = vadd.f32 %v706_v24, %v658_v23 }
 0x106   :  { %v755_v40 = vpop.f32.mrf.mxu3  ;;  %v659_v27 = vpop.f32.mrf.mxu1 }
 0x107   :  { %v871_v29 = vmax.f32 %v855_v25, 0.0  ;;  %v756_v32 = vadd.f32 %v755_v40, %v707_v26  ;;  %v660_v37 = vadd.f32 %v659_v27, %v1765_v30 }
 0x108   :  { %v806_v33 = vpop.f32.mrf.mxu0 }
 0x109   :  { %v1322_v35 = vpack.c.bf16 %v871_v29, %v870_v28  ;;  %v805_v36 = vadd.f32 %v804_v16, %v756_v32 }
 0x10b   :  { %1346 = vst [vmem:[%s1864_s4 + $0x18] sm:$0xff] %v1322_v35   ;;  %v836_v46 = vmul.f32 %v1785_v54, %v805_v36 }
 0x10c   :  { %v708_v41 = vpop.f32.mrf.mxu2 }
 0x10d   :  { %v709_v18 = vadd.f32 %v708_v41, %v660_v37  ;;  %v856_v50 = vadd.f32 %v1791_v61, %v836_v46 }
 0x10e   :  { %v757_v44 = vpop.f32.mrf.mxu3  ;;  %v662_v45 = vpop.f32.mrf.mxu1 }
 0x10f   :  { %v758_v47 = vadd.f32 %v757_v44, %v709_v18  ;;  %v663_v14 = vadd.f32 %v662_v45, %v1772_v38  ;;  %v872_v57 = vmax.f32 %v856_v50, 0.0 }
 0x110   :  { %v809_v48 = vpop.f32.mrf.mxu0 }
 0x111   :  { %v807_v49 = vadd.f32 %v806_v33, %v758_v47 }
 0x113   :  { %v837_v51 = vmul.f32 %v1785_v54, %v807_v49 }
 0x114   :  { %v711_v52 = vpop.f32.mrf.mxu2 }
 0x115   :  { %v857_v53 = vadd.f32 %v1791_v61, %v837_v51  ;;  %v712_v55 = vadd.f32 %v711_v52, %v663_v14 }
 0x116   :  { %v760_v30 = vpop.f32.mrf.mxu3  ;;  %v664_v56 = vpop.f32.mrf.mxu1 }
 0x117   :  { %v873_v58 = vmax.f32 %v857_v53, 0.0  ;;  %v761_v59 = vadd.f32 %v760_v30, %v712_v55  ;;  %v665_v0 = vadd.f32 %v664_v56, %v1778_v42 }
 0x118   :  { %v811_v60 = vpop.f32.mrf.mxu0 }
 0x119   :  { %v1327_v62 = vpack.c.bf16 %v873_v58, %v872_v57  ;;  %v810_v63 = vadd.f32 %v809_v48, %v761_v59 }
 0x11b   :  { %1347 = vst [vmem:[%s1864_s4 + $0x20] sm:$0xff] %v1327_v62   ;;  %v838_v3 = vmul.f32 %v1785_v54, %v810_v63 }
 0x11c   :  { %v713_v1 = vpop.f32.mrf.mxu2 }
 0x11d   :  { %v714_v38 = vadd.f32 %v713_v1, %v665_v0  ;;  %v858_v7 = vadd.f32 %v1791_v61, %v838_v3 }
 0x11e   :  { %v762_v20 = vpop.f32.mrf.mxu3  ;;  %v667_v2 = vpop.f32.mrf.mxu1 }
 0x11f   :  { %v763_v4 = vadd.f32 %v762_v20, %v714_v38  ;;  %v668_v9 = vadd.f32 %v667_v2, %v1737_v19  ;;  %v874_v13 = vmax.f32 %v858_v7, 0.0 }
 0x120   :  { %v814_v6 = vpop.f32.mrf.mxu0 }
 0x121   :  { %v812_v5 = vadd.f32 %v811_v60, %v763_v4 }
 0x123   :  { %v839_v8 = vmul.f32 %v1785_v54, %v812_v5 }
 0x124   :  { %v716_v10 = vpop.f32.mrf.mxu2 }
 0x125   :  { %v859_v34 = vadd.f32 %v1791_v61, %v839_v8  ;;  %v717_v11 = vadd.f32 %v716_v10, %v668_v9 }
 0x126   :  { %v765_v42 = vpop.f32.mrf.mxu3  ;;  %v669_v12 = vpop.f32.mrf.mxu1 }
 0x127   :  { %v875_v15 = vmax.f32 %v859_v34, 0.0  ;;  %v766_v16 = vadd.f32 %v765_v42, %v717_v11  ;;  %v670_v22 = vadd.f32 %v669_v12, %v1767_v31 }
 0x128   :  { %v816_v23 = vpop.f32.mrf.mxu0 }
 0x129   :  { %v1332_v17 = vpack.c.bf16 %v875_v15, %v874_v13  ;;  %v815_v21 = vadd.f32 %v814_v6, %v766_v16 }
 0x12b   :  { %1348 = vst [vmem:[%s1864_s4 + $0x28] sm:$0xff] %v1332_v17   ;;  %v840_v40 = vmul.f32 %v1785_v54, %v815_v21 }
 0x12c   :  { %v718_v24 = vpop.f32.mrf.mxu2 }
 0x12d   :  { %v719_v19 = vadd.f32 %v718_v24, %v670_v22  ;;  %v860_v29 = vadd.f32 %v1791_v61, %v840_v40 }
 0x12e   :  { %v767_v25 = vpop.f32.mrf.mxu3  ;;  %v672_v26 = vpop.f32.mrf.mxu1 }
 0x12f   :  { %v768_v27 = vadd.f32 %v767_v25, %v719_v19  ;;  %v673_v33 = vadd.f32 %v672_v26, %v1774_v39  ;;  %v876_v18 = vmax.f32 %v860_v29, 0.0 }
 0x130   :  { %v819_v41 = vpop.f32.mrf.mxu0 }
 0x131   :  { %v817_v28 = vadd.f32 %v816_v23, %v768_v27 }
 0x133   :  { %v841_v32 = vmul.f32 %v1785_v54, %v817_v28 }
 0x134   :  { %v721_v35 = vpop.f32.mrf.mxu2 }
 0x135   :  { %v861_v36 = vadd.f32 %v1791_v61, %v841_v32  ;;  %v722_v37 = vadd.f32 %v721_v35, %v673_v33 }
 0x136   :  { %v770_v31 = vpop.f32.mrf.mxu3  ;;  %v674_v46 = vpop.f32.mrf.mxu1 }
 0x137   :  { %v877_v44 = vmax.f32 %v861_v36, 0.0  ;;  %v771_v45 = vadd.f32 %v770_v31, %v722_v37  ;;  %v675_v49 = vadd.f32 %v674_v46, %v1780_v43 }
 0x138   :  { %v821_v53 = vpop.f32.mrf.mxu0 }
 0x139   :  { %v1337_v47 = vpack.c.bf16 %v877_v44, %v876_v18  ;;  %v820_v48 = vadd.f32 %v819_v41, %v771_v45 }
 0x13b   :  { %1349 = vst [vmem:[%s1864_s4 + $0x30] sm:$0xff] %v1337_v47   ;;  %v842_v14 = vmul.f32 %v1785_v54, %v820_v48 }
 0x13c   :  { %v723_v50 = vpop.f32.mrf.mxu2 }
 0x13d   :  { %v724_v39 = vadd.f32 %v723_v50, %v675_v49  ;;  %v862_v30 = vadd.f32 %v1791_v61, %v842_v14 }
 0x13e   :  { %v772_v51 = vpop.f32.mrf.mxu3 }
 0x13f   :  { %v773_v52 = vadd.f32 %v772_v51, %v724_v39  ;;  %v878_v58 = vmax.f32 %v862_v30, 0.0 }
 0x141   :  { %v822_v55 = vadd.f32 %v821_v53, %v773_v52 }
 0x143   :  { %v843_v56 = vmul.f32 %v1785_v54, %v822_v55 }
 0x145   :  { %v863_v57 = vadd.f32 %v1791_v61, %v843_v56 }
 0x147   :  { %v879_v59 = vmax.f32 %v863_v57, 0.0 }
 0x149   :  { %v1342_v60 = vpack.c.bf16 %v879_v59, %v878_v58 }
 0x14b   :  { %1350 = vst [vmem:[%s1864_s4 + $0x38] sm:$0xff] %v1342_v60  }

// kernel: feature_extractor_forward.14
= control target key start
LH: loop header
LB: loop body
LE: loop exit
PB: predicated region body
PF: predicated region fallthrough
CT: control target
= control target key end

     0   :  { %s305_s0 = inlined_call_operand.vmem [shape: bf16[4,2,4,4,128], index: 0, kind: input, shape index: {}]   ;;  %s306_s1 = inlined_call_operand.vmem [shape: bf16[2,4,4,128], index: 1, kind: output, shape index: {}]  }
   0x1   :  { %v8_v0 = vld [vmem:[%s305_s0] sm:$0x3]  ;;  %v151_v1 = vld [vmem:[%s305_s0 + $0x10] sm:$0x3]  ;;  %v9_v7 = vld [vmem:[%s305_s0 + $0x2] sm:$0x3] }
   0x2   :  { %v159_v2 = vld [vmem:[%s305_s0 + $0x20] sm:$0x3]  ;;  %v25_v3 = vunpack.c.l.bf16 %v8_v0  ;;  %v33_v4 = vunpack.c.l.bf16 %v151_v1  ;;  %v167_v5 = vld [vmem:[%s305_s0 + $0x30] sm:$0x3]  ;;  %v152_v8 = vld [vmem:[%s305_s0 + $0x12] sm:$0x3]  ;;  %v26_v10 = vunpack.c.l.bf16 %v9_v7 }
   0x3   :  { %v75_v6 = vunpack.c.l.bf16 %v159_v2  ;;  %v83_v9 = vunpack.c.l.bf16 %v167_v5  ;;  %v34_v11 = vunpack.c.l.bf16 %v152_v8  ;;  %v160_v12 = vld [vmem:[%s305_s0 + $0x22] sm:$0x3]  ;;  %v168_v13 = vld [vmem:[%s305_s0 + $0x32] sm:$0x3]  ;;  %v10_v14 = vld [vmem:[%s305_s0 + $0x4] sm:$0x3] }
   0x4   :  { %v41_v15 = vmax.f32 %v25_v3, %v33_v4  ;;  %v76_v16 = vunpack.c.l.bf16 %v160_v12  ;;  %v84_v17 = vunpack.c.l.bf16 %v168_v13  ;;  %v153_v18 = vld [vmem:[%s305_s0 + $0x14] sm:$0x3]  ;;  %v27_v19 = vunpack.c.l.bf16 %v10_v14  ;;  %v161_v20 = vld [vmem:[%s305_s0 + $0x24] sm:$0x3]  ;;  %v11_v26 = vld [vmem:[%s305_s0 + $0x6] sm:$0x3] }
   0x5   :  { %v169_v21 = vld [vmem:[%s305_s0 + $0x34] sm:$0x3]  ;;  %v91_v22 = vmax.f32 %v75_v6, %v83_v9  ;;  %v42_v23 = vmax.f32 %v26_v10, %v34_v11  ;;  %v35_v24 = vunpack.c.l.bf16 %v153_v18  ;;  %v77_v25 = vunpack.c.l.bf16 %v161_v20  ;;  %v154_v27 = vld [vmem:[%s305_s0 + $0x16] sm:$0x3]  ;;  %v162_v28 = vld [vmem:[%s305_s0 + $0x26] sm:$0x3] }
   0x6   :  { %v92_v29 = vmax.f32 %v76_v16, %v84_v17  ;;  %v85_v30 = vunpack.c.l.bf16 %v169_v21  ;;  %v28_v31 = vunpack.c.l.bf16 %v11_v26  ;;  %v36_v32 = vunpack.c.l.bf16 %v154_v27  ;;  %v170_v33 = vld [vmem:[%s305_s0 + $0x36] sm:$0x3]  ;;  %v12_v34 = vld [vmem:[%s305_s0 + $0x8] sm:$0x3]  ;;  %v155_v35 = vld [vmem:[%s305_s0 + $0x18] sm:$0x3] }
   0x7   :  { %v123_v36 = vmax.f32 %v41_v15, %v91_v22  ;;  %v43_v37 = vmax.f32 %v27_v19, %v35_v24  ;;  %v78_v38 = vunpack.c.l.bf16 %v162_v28  ;;  %v86_v39 = vunpack.c.l.bf16 %v170_v33  ;;  %v163_v40 = vld [vmem:[%s305_s0 + $0x28] sm:$0x3]  ;;  %v171_v41 = vld [vmem:[%s305_s0 + $0x38] sm:$0x3]  ;;  %v13_v42 = vld [vmem:[%s305_s0 + $0xa] sm:$0x3] }
   0x8   :  { %v124_v43 = vmax.f32 %v42_v23, %v92_v29  ;;  %v93_v44 = vmax.f32 %v77_v25, %v85_v30  ;;  %v44_v45 = vmax.f32 %v28_v31, %v36_v32  ;;  %v29_v46 = vunpack.c.l.bf16 %v12_v34  ;;  %v156_v47 = vld [vmem:[%s305_s0 + $0x1a] sm:$0x3]  ;;  %v164_v48 = vld [vmem:[%s305_s0 + $0x2a] sm:$0x3]  ;;  %v14_v54 = vld [vmem:[%s305_s0 + $0xc] sm:$0x3] }
   0x9   :  { %v131_v49 = vpack.c.bf16 %v123_v36, %v123_v36  ;;  %v94_v50 = vmax.f32 %v78_v38, %v86_v39  ;;  %v37_v51 = vunpack.c.l.bf16 %v155_v35  ;;  %v79_v52 = vunpack.c.l.bf16 %v163_v40  ;;  %v172_v53 = vld [vmem:[%s305_s0 + $0x3a] sm:$0x3]  ;;  %v157_v59 = vld [vmem:[%s305_s0 + $0x1c] sm:$0x3]  ;;  %v165_v60 = vld [vmem:[%s305_s0 + $0x2c] sm:$0x3] }
   0xa   :  { %v132_v55 = vpack.c.bf16 %v124_v43, %v124_v43  ;;  %v125_v56 = vmax.f32 %v43_v37, %v93_v44  ;;  %v87_v57 = vunpack.c.l.bf16 %v171_v41  ;;  %v30_v58 = vunpack.c.l.bf16 %v13_v42  ;;  %v173_v61 = vld [vmem:[%s305_s0 + $0x3c] sm:$0x3]  ;;  %v15_v2 = vld [vmem:[%s305_s0 + $0xe] sm:$0x3]  ;;  %v158_v3 = vld [vmem:[%s305_s0 + $0x1e] sm:$0x3] }
   0xb   :  { %139 = vst [vmem:[%s306_s1] sm:$0x3] %v131_v49  ;;  %v126_v62 = vmax.f32 %v44_v45, %v94_v50  ;;  %v45_v63 = vmax.f32 %v29_v46, %v37_v51  ;;  %v38_v0 = vunpack.c.l.bf16 %v156_v47  ;;  %v80_v1 = vunpack.c.l.bf16 %v164_v48  ;;  %v166_v8 = vld [vmem:[%s305_s0 + $0x2e] sm:$0x3]  ;;  %v174_v9 = vld [vmem:[%s305_s0 + $0x3e] sm:$0x3] }
   0xc   :  { %140 = vst [vmem:[%s306_s1 + $0x2] sm:$0x3] %v132_v55  ;;  %v133_v4 = vpack.c.bf16 %v125_v56, %v125_v56  ;;  %v95_v5 = vmax.f32 %v79_v52, %v87_v57  ;;  %v88_v6 = vunpack.c.l.bf16 %v172_v53  ;;  %v31_v7 = vunpack.c.l.bf16 %v14_v54 }
   0xd   :  { %v134_v10 = vpack.c.bf16 %v126_v62, %v126_v62  ;;  %v46_v11 = vmax.f32 %v30_v58, %v38_v0  ;;  %v39_v12 = vunpack.c.l.bf16 %v157_v59  ;;  %v81_v13 = vunpack.c.l.bf16 %v165_v60 }
   0xe   :  { %141 = vst [vmem:[%s306_s1 + $0x4] sm:$0x3] %v133_v4  ;;  %v127_v14 = vmax.f32 %v45_v63, %v95_v5  ;;  %v96_v15 = vmax.f32 %v80_v1, %v88_v6  ;;  %v89_v16 = vunpack.c.l.bf16 %v173_v61  ;;  %v32_v17 = vunpack.c.l.bf16 %v15_v2 }
   0xf   :  { %142 = vst [vmem:[%s306_s1 + $0x6] sm:$0x3] %v134_v10  ;;  %v47_v18 = vmax.f32 %v31_v7, %v39_v12  ;;  %v40_v19 = vunpack.c.l.bf16 %v158_v3  ;;  %v82_v20 = vunpack.c.l.bf16 %v166_v8  ;;  %v90_v21 = vunpack.c.l.bf16 %v174_v9 }
  0x10   :  { %v135_v22 = vpack.c.bf16 %v127_v14, %v127_v14  ;;  %v128_v23 = vmax.f32 %v46_v11, %v96_v15  ;;  %v97_v24 = vmax.f32 %v81_v13, %v89_v16 }
  0x11   :  { %v48_v25 = vmax.f32 %v32_v17, %v40_v19  ;;  %v98_v26 = vmax.f32 %v82_v20, %v90_v21 }
  0x12   :  { %143 = vst [vmem:[%s306_s1 + $0x8] sm:$0x3] %v135_v22  ;;  %v136_v27 = vpack.c.bf16 %v128_v23, %v128_v23  ;;  %v129_v28 = vmax.f32 %v47_v18, %v97_v24 }
  0x13   :  { %v130_v29 = vmax.f32 %v48_v25, %v98_v26 }
  0x14   :  { %144 = vst [vmem:[%s306_s1 + $0xa] sm:$0x3] %v136_v27  ;;  %v137_v30 = vpack.c.bf16 %v129_v28, %v129_v28 }
  0x15   :  { %v138_v31 = vpack.c.bf16 %v130_v29, %v130_v29 }
  0x16   :  { %145 = vst [vmem:[%s306_s1 + $0xc] sm:$0x3] %v137_v30 }
  0x17   :  { %146 = vst [vmem:[%s306_s1 + $0xe] sm:$0x3] %v138_v31 }

// kernel: feature_extractor_forward.13
= control target key start
LH: loop header
LB: loop body
LE: loop exit
PB: predicated region body
PF: predicated region fallthrough
CT: control target
= control target key end

     0   :  { %s3190_s1 = inlined_call_operand.vmem [shape: bf16[1152,128], index: 1, kind: input, shape index: {}]   ;;  %s3191_s0 = inlined_call_operand.vmem [shape: bf16[128,1152], index: 0, kind: input, shape index: {}]   ;;  %s3192_s2 = inlined_call_operand.vmem [shape: f32[1,128], index: 2, kind: input, shape index: {}]   ;;  %s3193_s3 = inlined_call_operand.vmem [shape: f32[1,128], index: 3, kind: input, shape index: {}]   ;;  %s3194_s4 = inlined_call_operand.vmem [shape: bf16[128,128], index: 4, kind: output, shape index: {}]  }
   0x1   :  { %v2229_v0 = vld [vmem:[%s3190_s1 + $0x38] sm:$0xff]  ;;  %v2228_v1 = vld [vmem:[%s3190_s1 + $0x30] sm:$0xff]  ;;  %v2227_v2 = vld [vmem:[%s3190_s1 + $0x28] sm:$0xff] }
   0x2   :  { %2341 = vmatpush.bf16.msra.mxu1 %v2229_v0  ;;  %2342 = vmatpush.bf16.msra.mxu2 %v2229_v0  ;;  %v2226_v3 = vld [vmem:[%s3190_s1 + $0x20] sm:$0xff]  ;;  %v2225_v4 = vld [vmem:[%s3190_s1 + $0x18] sm:$0xff]  ;;  %v2224_v5 = vld [vmem:[%s3190_s1 + $0x10] sm:$0xff] }
   0x3   :  { %2343 = vmatpush.bf16.msra.mxu3 %v2229_v0  ;;  %1041 = vmatpush.bf16.msra.mxu0 %v2229_v0  ;;  %v2223_v6 = vld [vmem:[%s3190_s1 + $0x8] sm:$0xff]  ;;  %v2222_v7 = vld [vmem:[%s3190_s1] sm:$0xff]  ;;  %v1648_v8 = vld [vmem:[%s3191_s0 + $0x90] sm:$0xf] }
   0x4   :  { %v2172_v9 = vld [vmem:[%s3191_s0 + $0xb0] sm:$0xf0]  ;;  %v1720_v10 = vld [vmem:[%s3191_s0 + $0x120] sm:$0xf]  ;;  %v2190_v11 = vld [vmem:[%s3191_s0 + $0x140] sm:$0xf0] }
   0x5   :  { %v1792_v12 = vld [vmem:[%s3191_s0 + $0x1b0] sm:$0xf]  ;;  %v2208_v13 = vld [vmem:[%s3191_s0 + $0x1d0] sm:$0xf0]  ;;  %v1576_v14 = vld [vmem:[%s3191_s0] sm:$0xf]  ;;  %v1649_v18 = vor.u32 %v2172_v9, %v1648_v8  ;;  %v1721_v19 = vor.u32 %v2190_v11, %v1720_v10 }
   0x6   :  { %2344 = vmatpush.bf16.msra.mxu1 %v2228_v1  ;;  %2345 = vmatpush.bf16.msra.mxu2 %v2228_v1  ;;  %v2154_v15 = vld [vmem:[%s3191_s0 + $0x20] sm:$0xf0]  ;;  %v2245_v16 = vld [vmem:[%s3190_s1 + $0xb8] sm:$0xff]  ;;  %v1793_v20 = vor.u32 %v2208_v13, %v1792_v12  ;;  %v2244_v24 = vld [vmem:[%s3190_s1 + $0xb0] sm:$0xff] }
   0x7   :  { %2346 = vmatpush.bf16.msra.mxu3 %v2228_v1  ;;  %1042 = vmatpush.bf16.msra.mxu0 %v2228_v1  ;;  %v2237_v17 = vld [vmem:[%s3190_s1 + $0x78] sm:$0xff]  ;;  %v1577_v21 = vor.u32 %v2154_v15, %v1576_v14  ;;  %v2236_v25 = vld [vmem:[%s3190_s1 + $0x70] sm:$0xff]  ;;  %v2243_v28 = vld [vmem:[%s3190_s1 + $0xa8] sm:$0xff] }
   0x8   :  { %v2253_v22 = vld [vmem:[%s3190_s1 + $0xf8] sm:$0xff]  ;;  %v2252_v26 = vld [vmem:[%s3190_s1 + $0xf0] sm:$0xff]  ;;  %v2235_v29 = vld [vmem:[%s3190_s1 + $0x68] sm:$0xff] }
   0x9   :  { %v2261_v23 = vld [vmem:[%s3190_s1 + $0x138] sm:$0xff]  ;;  %v2260_v27 = vld [vmem:[%s3190_s1 + $0x130] sm:$0xff]  ;;  %v2251_v30 = vld [vmem:[%s3190_s1 + $0xe8] sm:$0xff] }
   0xa   :  { %2347 = vmatpush.bf16.msra.mxu1 %v2227_v2  ;;  %2348 = vmatpush.bf16.msra.mxu2 %v2227_v2  ;;  %v2259_v31 = vld [vmem:[%s3190_s1 + $0x128] sm:$0xff]  ;;  %v2242_v32 = vld [vmem:[%s3190_s1 + $0xa0] sm:$0xff]  ;;  %v1684_v36 = vld [vmem:[%s3191_s0 + $0xd8] sm:$0xf] }
   0xb   :  { %2349 = vmatpush.bf16.msra.mxu3 %v2227_v2  ;;  %1043 = vmatpush.bf16.msra.mxu0 %v2227_v2  ;;  %v2234_v33 = vld [vmem:[%s3190_s1 + $0x60] sm:$0xff]  ;;  %v2181_v37 = vld [vmem:[%s3191_s0 + $0xf8] sm:$0xf0]  ;;  %v1756_v38 = vld [vmem:[%s3191_s0 + $0x168] sm:$0xf] }
   0xc   :  { %v2250_v34 = vld [vmem:[%s3190_s1 + $0xe0] sm:$0xff]  ;;  %v2199_v39 = vld [vmem:[%s3191_s0 + $0x188] sm:$0xf0]  ;;  %v1828_v40 = vld [vmem:[%s3191_s0 + $0x1f8] sm:$0xf]  ;;  %v1685_v46 = vor.u32 %v2181_v37, %v1684_v36 }
   0xd   :  { %v2258_v35 = vld [vmem:[%s3190_s1 + $0x120] sm:$0xff]  ;;  %v2217_v41 = vld [vmem:[%s3191_s0 + $0x218] sm:$0xf0]  ;;  %v1612_v42 = vld [vmem:[%s3191_s0 + $0x48] sm:$0xf]  ;;  %v1757_v47 = vor.u32 %v2199_v39, %v1756_v38 }
   0xe   :  { %2350 = vmatpush.bf16.msra.mxu1 %v2226_v3  ;;  %2351 = vmatpush.bf16.msra.mxu2 %v2226_v3  ;;  %v2163_v43 = vld [vmem:[%s3191_s0 + $0x68] sm:$0xf0]  ;;  %v2241_v44 = vld [vmem:[%s3190_s1 + $0x98] sm:$0xff]  ;;  %v1829_v48 = vor.u32 %v2217_v41, %v1828_v40  ;;  %v2240_v52 = vld [vmem:[%s3190_s1 + $0x90] sm:$0xff] }
   0xf   :  { %2352 = vmatpush.bf16.msra.mxu3 %v2226_v3  ;;  %1044 = vmatpush.bf16.msra.mxu0 %v2226_v3  ;;  %v2233_v45 = vld [vmem:[%s3190_s1 + $0x58] sm:$0xff]  ;;  %v1613_v49 = vor.u32 %v2163_v43, %v1612_v42  ;;  %v2232_v53 = vld [vmem:[%s3190_s1 + $0x50] sm:$0xff]  ;;  %v2239_v56 = vld [vmem:[%s3190_s1 + $0x88] sm:$0xff] }
  0x10   :  { %v2249_v50 = vld [vmem:[%s3190_s1 + $0xd8] sm:$0xff]  ;;  %v2248_v54 = vld [vmem:[%s3190_s1 + $0xd0] sm:$0xff]  ;;  %v2231_v57 = vld [vmem:[%s3190_s1 + $0x48] sm:$0xff] }
  0x11   :  { %v2257_v51 = vld [vmem:[%s3190_s1 + $0x118] sm:$0xff]  ;;  %v2256_v55 = vld [vmem:[%s3190_s1 + $0x110] sm:$0xff]  ;;  %v2247_v58 = vld [vmem:[%s3190_s1 + $0xc8] sm:$0xff] }
  0x12   :  { %2353 = vmatpush.bf16.msra.mxu1 %v2225_v4  ;;  %2354 = vmatpush.bf16.msra.mxu2 %v2225_v4  ;;  %v2255_v59 = vld [vmem:[%s3190_s1 + $0x108] sm:$0xff]  ;;  %v2238_v60 = vld [vmem:[%s3190_s1 + $0x80] sm:$0xff]  ;;  %v2277_v2 = vld [vmem:[%s3190_s1 + $0x1b8] sm:$0xff] }
  0x13   :  { %2355 = vmatpush.bf16.msra.mxu3 %v2225_v4  ;;  %1045 = vmatpush.bf16.msra.mxu0 %v2225_v4  ;;  %v2230_v61 = vld [vmem:[%s3190_s1 + $0x40] sm:$0xff]  ;;  %v1578_v1 = vld [vmem:[%s3191_s0 + $0x24] sm:$0xf0]  ;;  %v2269_v3 = vld [vmem:[%s3190_s1 + $0x178] sm:$0xff] }
  0x14   :  { %v2150_v62 = vld [vmem:[%s3191_s0 + $0x4] sm:$0xf]  ;;  %v1584_v4 = vld [vmem:[%s3191_s0 + $0x8] sm:$0xf]  ;;  %v1592_v8 = vld [vmem:[%s3191_s0 + $0x10] sm:$0xf] }
  0x15   :  { %v2246_v63 = vld [vmem:[%s3190_s1 + $0xc0] sm:$0xff]  ;;  %v2156_v9 = vld [vmem:[%s3191_s0 + $0x30] sm:$0xf0]  ;;  %v2285_v10 = vld [vmem:[%s3190_s1 + $0x1f8] sm:$0xff]  ;;  %v1581_v12 = vor.u32 %v2150_v62, %v1578_v1 }
  0x16   :  { %2356 = vmatpush.bf16.msra.mxu1 %v2224_v5  ;;  %2357 = vmatpush.bf16.msra.mxu2 %v2224_v5  ;;  %v2254_v0 = vld [vmem:[%s3190_s1 + $0x100] sm:$0xff]  ;;  %v2293_v11 = vld [vmem:[%s3190_s1 + $0x238] sm:$0xff]  ;;  %v1593_v15 = vor.u32 %v2156_v9, %v1592_v8  ;;  %v2168_v40 = vld [vmem:[%s3191_s0 + $0x94] sm:$0xf] }
  0x17   :  { %2358 = vmatpush.bf16.msra.mxu3 %v2224_v5  ;;  %1046 = vmatpush.bf16.msra.mxu0 %v2224_v5  ;;  %v2155_v5 = vld [vmem:[%s3191_s0 + $0x28] sm:$0xf0]  ;;  %v2274_v36 = vld [vmem:[%s3190_s1 + $0x1a0] sm:$0xff]  ;;  %v1650_v41 = vld [vmem:[%s3191_s0 + $0xb4] sm:$0xf0] }
  0x18   :  { %v1585_v13 = vor.u32 %v2155_v5, %v1584_v4  ;;  %v2282_v37 = vld [vmem:[%s3190_s1 + $0x1e0] sm:$0xff]  ;;  %v1656_v42 = vld [vmem:[%s3191_s0 + $0x98] sm:$0xf]  ;;  %v2173_v43 = vld [vmem:[%s3191_s0 + $0xb8] sm:$0xf0] }
  0x19   :  { %v2266_v38 = vld [vmem:[%s3190_s1 + $0x160] sm:$0xff]  ;;  %v1700_v62 = vld [vmem:[%s3191_s0 + $0xe8] sm:$0xf]  ;;  %v2272_v4 = vld [vmem:[%s3190_s1 + $0x190] sm:$0xff] }
  0x1a   :  { %2359 = vmatpush.bf16.msra.mxu1 %v2223_v6  ;;  %2360 = vmatpush.bf16.msra.mxu2 %v2223_v6  ;;  %v2290_v39 = vld [vmem:[%s3190_s1 + $0x220] sm:$0xff]  ;;  %v2280_v5 = vld [vmem:[%s3190_s1 + $0x1d0] sm:$0xff]  ;;  %v1722_v9 = vld [vmem:[%s3191_s0 + $0x144] sm:$0xf0] }
  0x1b   :  { %2361 = vmatpush.bf16.msra.mxu3 %v2223_v6  ;;  %1047 = vmatpush.bf16.msra.mxu0 %v2223_v6  ;;  %v2151_v6 = vld [vmem:[%s3191_s0 + $0xc] sm:$0xf]  ;;  %v2186_v8 = vld [vmem:[%s3191_s0 + $0x124] sm:$0xf] }
  0x1e   :  { %2362 = vmatpush.bf16.msra.mxu1 %v2222_v7  ;;  %2363 = vmatpush.bf16.msra.mxu2 %v2222_v7 }
  0x1f   :  { %2364 = vmatpush.bf16.msra.mxu3 %v2222_v7  ;;  %1048 = vmatpush.bf16.msra.mxu0 %v2222_v7  ;;  %v1586_v7 = vld [vmem:[%s3191_s0 + $0x2c] sm:$0xf0] }
  0x20   :  { %v1589_v14 = vor.u32 %v2151_v6, %v1586_v7  ;;  %v2264_v6 = vld [vmem:[%s3190_s1 + $0x150] sm:$0xff] }
  0x21   :  { %1059 = vmatmul.bf16.vlgmr.msra.gmra.mxu1 %v1649_v18  ;;  %1069 = vmatmul.bf16.vlgmr.msra.gmra.mxu2 %v1721_v19  ;;  %v2284_v18 = vld [vmem:[%s3190_s1 + $0x1f0] sm:$0xff] }
  0x22   :  { %1139 = vmatpush.bf16.msrb.mxu2 %v2245_v16  ;;  %1090 = vmatpush.bf16.msrb.mxu1 %v2237_v17  ;;  %v2276_v16 = vld [vmem:[%s3190_s1 + $0x1b0] sm:$0xff] }
  0x23   :  { %1079 = vmatmul.bf16.vlgmr.msra.gmra.mxu3 %v1793_v20  ;;  %1049 = vmatmul.bf16.vlgmr.msra.gmra.mxu0 %v1577_v21  ;;  %v2268_v17 = vld [vmem:[%s3190_s1 + $0x170] sm:$0xff]  ;;  %v2275_v20 = vld [vmem:[%s3190_s1 + $0x1a8] sm:$0xff] }
  0x24   :  { %1188 = vmatpush.bf16.msrb.mxu3 %v2253_v22  ;;  %1237 = vmatpush.bf16.msrb.mxu0 %v2261_v23  ;;  %v2292_v19 = vld [vmem:[%s3190_s1 + $0x230] sm:$0xff]  ;;  %v2267_v21 = vld [vmem:[%s3190_s1 + $0x168] sm:$0xff] }
  0x25   :  { %v2283_v22 = vld [vmem:[%s3190_s1 + $0x1e8] sm:$0xff]  ;;  %v2288_v7 = vld [vmem:[%s3190_s1 + $0x210] sm:$0xff] }
  0x26   :  { %1140 = vmatpush.bf16.msrb.mxu2 %v2244_v24  ;;  %1091 = vmatpush.bf16.msrb.mxu1 %v2236_v25  ;;  %v2291_v23 = vld [vmem:[%s3190_s1 + $0x228] sm:$0xff]  ;;  %v1614_v25 = vld [vmem:[%s3191_s0 + $0x6c] sm:$0xf0] }
  0x27   :  { %v2159_v24 = vld [vmem:[%s3191_s0 + $0x4c] sm:$0xf] }
  0x28   :  { %1189 = vmatpush.bf16.msrb.mxu3 %v2252_v26  ;;  %1238 = vmatpush.bf16.msrb.mxu0 %v2260_v27  ;;  %v1620_v26 = vld [vmem:[%s3191_s0 + $0x50] sm:$0xf]  ;;  %v2164_v27 = vld [vmem:[%s3191_s0 + $0x70] sm:$0xf0] }
  0x2a   :  { %1141 = vmatpush.bf16.msrb.mxu2 %v2243_v28  ;;  %1092 = vmatpush.bf16.msrb.mxu1 %v2235_v29  ;;  %v2160_v28 = vld [vmem:[%s3191_s0 + $0x54] sm:$0xf]  ;;  %v1622_v29 = vld [vmem:[%s3191_s0 + $0x74] sm:$0xf0] }
  0x2c   :  { %1190 = vmatpush.bf16.msrb.mxu3 %v2251_v30  ;;  %1239 = vmatpush.bf16.msrb.mxu0 %v2259_v31  ;;  %v1628_v30 = vld [vmem:[%s3191_s0 + $0x58] sm:$0xf]  ;;  %v2165_v31 = vld [vmem:[%s3191_s0 + $0x78] sm:$0xf0] }
  0x2e   :  { %1142 = vmatpush.bf16.msrb.mxu2 %v2242_v32  ;;  %1093 = vmatpush.bf16.msrb.mxu1 %v2234_v33  ;;  %v1617_v32 = vor.u32 %v2159_v24, %v1614_v25  ;;  %v1621_v33 = vor.u32 %v2164_v27, %v1620_v26  ;;  %v2195_v24 = vld [vmem:[%s3191_s0 + $0x16c] sm:$0xf]  ;;  %v1758_v25 = vld [vmem:[%s3191_s0 + $0x18c] sm:$0xf0]  ;;  %v2200_v27 = vld [vmem:[%s3191_s0 + $0x190] sm:$0xf0] }
  0x2f   :  { %v1764_v26 = vld [vmem:[%s3191_s0 + $0x170] sm:$0xf] }
  0x30   :  { %1191 = vmatpush.bf16.msrb.mxu3 %v2250_v34  ;;  %1240 = vmatpush.bf16.msrb.mxu0 %v2258_v35  ;;  %v1625_v34 = vor.u32 %v2160_v28, %v1622_v29  ;;  %v1629_v35 = vor.u32 %v2165_v31, %v1628_v30  ;;  %v2196_v28 = vld [vmem:[%s3191_s0 + $0x174] sm:$0xf]  ;;  %v1766_v29 = vld [vmem:[%s3191_s0 + $0x194] sm:$0xf0]  ;;  %v2201_v31 = vld [vmem:[%s3191_s0 + $0x198] sm:$0xf0] }
  0x31   :  { %1064 = vmatmul.bf16.gmra.mxu1 %v1685_v46  ;;  %1074 = vmatmul.bf16.gmra.mxu2 %v1757_v47  ;;  %v1664_v46 = vld [vmem:[%s3191_s0 + $0xa0] sm:$0xf]  ;;  %v2174_v47 = vld [vmem:[%s3191_s0 + $0xc0] sm:$0xf0]  ;;  %v1772_v30 = vld [vmem:[%s3191_s0 + $0x178] sm:$0xf] }
  0x32   :  { %1143 = vmatpush.bf16.msrb.mxu2 %v2241_v44  ;;  %1094 = vmatpush.bf16.msrb.mxu1 %v2233_v45  ;;  %v2169_v44 = vld [vmem:[%s3191_s0 + $0x9c] sm:$0xf]  ;;  %v1658_v45 = vld [vmem:[%s3191_s0 + $0xbc] sm:$0xf0] }
  0x33   :  { %1084 = vmatmul.bf16.gmra.mxu3 %v1829_v48  ;;  %1054 = vmatmul.bf16.gmra.mxu0 %v1613_v49  ;;  %v1653_v48 = vor.u32 %v2168_v40, %v1650_v41  ;;  %v1657_v49 = vor.u32 %v2173_v43, %v1656_v42  ;;  %v2204_v40 = vld [vmem:[%s3191_s0 + $0x1b4] sm:$0xf]  ;;  %v1794_v41 = vld [vmem:[%s3191_s0 + $0x1d4] sm:$0xf0]  ;;  %v2209_v43 = vld [vmem:[%s3191_s0 + $0x1d8] sm:$0xf0] }
  0x34   :  { %1192 = vmatpush.bf16.msrb.mxu3 %v2249_v50  ;;  %1241 = vmatpush.bf16.msrb.mxu0 %v2257_v51  ;;  %v1661_v50 = vor.u32 %v2169_v44, %v1658_v45  ;;  %v1665_v51 = vor.u32 %v2174_v47, %v1664_v46  ;;  %v1800_v42 = vld [vmem:[%s3191_s0 + $0x1b8] sm:$0xf]  ;;  %v2205_v44 = vld [vmem:[%s3191_s0 + $0x1bc] sm:$0xf]  ;;  %v1802_v45 = vld [vmem:[%s3191_s0 + $0x1dc] sm:$0xf0] }
  0x35   :  { %v1808_v46 = vld [vmem:[%s3191_s0 + $0x1c0] sm:$0xf]  ;;  %v2210_v47 = vld [vmem:[%s3191_s0 + $0x1e0] sm:$0xf0] }
  0x36   :  { %1144 = vmatpush.bf16.msrb.mxu2 %v2240_v52  ;;  %1095 = vmatpush.bf16.msrb.mxu1 %v2232_v53  ;;  %v2273_v52 = vld [vmem:[%s3190_s1 + $0x198] sm:$0xff] }
  0x37   :  { %v2281_v53 = vld [vmem:[%s3190_s1 + $0x1d8] sm:$0xff] }
  0x38   :  { %1193 = vmatpush.bf16.msrb.mxu3 %v2248_v54  ;;  %1242 = vmatpush.bf16.msrb.mxu0 %v2256_v55  ;;  %v2265_v54 = vld [vmem:[%s3190_s1 + $0x158] sm:$0xff] }
  0x39   :  { %v2289_v55 = vld [vmem:[%s3190_s1 + $0x218] sm:$0xff] }
  0x3a   :  { %1145 = vmatpush.bf16.msrb.mxu2 %v2239_v56  ;;  %1096 = vmatpush.bf16.msrb.mxu1 %v2231_v57  ;;  %v2177_v56 = vld [vmem:[%s3191_s0 + $0xdc] sm:$0xf]  ;;  %v1686_v57 = vld [vmem:[%s3191_s0 + $0xfc] sm:$0xf0] }
  0x3c   :  { %1194 = vmatpush.bf16.msrb.mxu3 %v2247_v58  ;;  %1243 = vmatpush.bf16.msrb.mxu0 %v2255_v59  ;;  %v1692_v58 = vld [vmem:[%s3191_s0 + $0xe0] sm:$0xf]  ;;  %v2182_v59 = vld [vmem:[%s3191_s0 + $0x100] sm:$0xf0] }
  0x3d   :  { %v1693_v1 = vor.u32 %v2182_v59, %v1692_v58  ;;  %v2213_v58 = vld [vmem:[%s3191_s0 + $0x1fc] sm:$0xf]  ;;  %v1830_v59 = vld [vmem:[%s3191_s0 + $0x21c] sm:$0xf0] }
  0x3e   :  { %1146 = vmatpush.bf16.msrb.mxu2 %v2238_v60  ;;  %1097 = vmatpush.bf16.msrb.mxu1 %v2230_v61  ;;  %v2178_v60 = vld [vmem:[%s3191_s0 + $0xe4] sm:$0xf]  ;;  %v1694_v61 = vld [vmem:[%s3191_s0 + $0x104] sm:$0xf0] }
  0x40   :  { %1195 = vmatpush.bf16.msrb.mxu3 %v2246_v63  ;;  %1244 = vmatpush.bf16.msrb.mxu0 %v2254_v0  ;;  %v2183_v63 = vld [vmem:[%s3191_s0 + $0x108] sm:$0xf0]  ;;  %v1689_v0 = vor.u32 %v2177_v56, %v1686_v57 }
  0x41   :  { %1098 = vmatmul.bf16.vlgmr.msrb.gmra.mxu1 %v1581_v12  ;;  %1147 = vmatmul.bf16.vlgmr.msrb.gmra.mxu2 %v1585_v13  ;;  %v2187_v12 = vld [vmem:[%s3191_s0 + $0x12c] sm:$0xf]  ;;  %v1730_v13 = vld [vmem:[%s3191_s0 + $0x14c] sm:$0xf0] }
  0x42   :  { %1335 = vmatpush.bf16.msra.mxu2 %v2277_v2  ;;  %1286 = vmatpush.bf16.msra.mxu1 %v2269_v3  ;;  %v1697_v2 = vor.u32 %v2178_v60, %v1694_v61  ;;  %v1701_v3 = vor.u32 %v2183_v63, %v1700_v62  ;;  %v1836_v60 = vld [vmem:[%s3191_s0 + $0x200] sm:$0xf]  ;;  %v2218_v61 = vld [vmem:[%s3191_s0 + $0x220] sm:$0xf0]  ;;  %v1838_v63 = vld [vmem:[%s3191_s0 + $0x224] sm:$0xf0] }
  0x43   :  { %1196 = vmatmul.bf16.vlgmr.msrb.gmra.mxu3 %v1589_v14  ;;  %1245 = vmatmul.bf16.vlgmr.msrb.gmra.mxu0 %v1593_v15  ;;  %v1736_v14 = vld [vmem:[%s3191_s0 + $0x130] sm:$0xf]  ;;  %v2192_v15 = vld [vmem:[%s3191_s0 + $0x150] sm:$0xf0]  ;;  %v2214_v62 = vld [vmem:[%s3191_s0 + $0x204] sm:$0xf] }
  0x44   :  { %1384 = vmatpush.bf16.msra.mxu3 %v2285_v10  ;;  %1433 = vmatpush.bf16.msra.mxu0 %v2293_v11  ;;  %v1728_v10 = vld [vmem:[%s3191_s0 + $0x128] sm:$0xf]  ;;  %v2191_v11 = vld [vmem:[%s3191_s0 + $0x148] sm:$0xf0] }
  0x46   :  { %1336 = vmatpush.bf16.msra.mxu2 %v2276_v16  ;;  %1287 = vmatpush.bf16.msra.mxu1 %v2268_v17  ;;  %v1725_v16 = vor.u32 %v2186_v8, %v1722_v9  ;;  %v1729_v17 = vor.u32 %v2191_v11, %v1728_v10 }
  0x48   :  { %1385 = vmatpush.bf16.msra.mxu3 %v2284_v18  ;;  %1434 = vmatpush.bf16.msra.mxu0 %v2292_v19  ;;  %v1733_v18 = vor.u32 %v2187_v12, %v1730_v13  ;;  %v1737_v19 = vor.u32 %v2192_v15, %v1736_v14  ;;  %v2152_v14 = vld [vmem:[%s3191_s0 + $0x14] sm:$0xf]  ;;  %v1594_v15 = vld [vmem:[%s3191_s0 + $0x34] sm:$0xf0] }
  0x4a   :  { %1337 = vmatpush.bf16.msra.mxu2 %v2275_v20  ;;  %1288 = vmatpush.bf16.msra.mxu1 %v2267_v21  ;;  %v2271_v20 = vld [vmem:[%s3190_s1 + $0x188] sm:$0xff] }
  0x4b   :  { %v2279_v21 = vld [vmem:[%s3190_s1 + $0x1c8] sm:$0xff] }
  0x4c   :  { %1386 = vmatpush.bf16.msra.mxu3 %v2283_v22  ;;  %1435 = vmatpush.bf16.msra.mxu0 %v2291_v23  ;;  %v2263_v22 = vld [vmem:[%s3190_s1 + $0x148] sm:$0xff] }
  0x4d   :  { %v2287_v23 = vld [vmem:[%s3190_s1 + $0x208] sm:$0xff] }
  0x4e   :  { %1338 = vmatpush.bf16.msra.mxu2 %v2274_v36  ;;  %1289 = vmatpush.bf16.msra.mxu1 %v2266_v38  ;;  %v2270_v36 = vld [vmem:[%s3190_s1 + $0x180] sm:$0xff] }
  0x4f   :  { %v2262_v38 = vld [vmem:[%s3190_s1 + $0x140] sm:$0xff] }
  0x50   :  { %1387 = vmatpush.bf16.msra.mxu3 %v2282_v37  ;;  %1436 = vmatpush.bf16.msra.mxu0 %v2290_v39  ;;  %v2278_v37 = vld [vmem:[%s3190_s1 + $0x1c0] sm:$0xff] }
  0x51   :  { %1103 = vmatmul.bf16.gmra.mxu1 %v1617_v32  ;;  %1152 = vmatmul.bf16.gmra.mxu2 %v1621_v33  ;;  %v1761_v32 = vor.u32 %v2195_v24, %v1758_v25  ;;  %v1765_v33 = vor.u32 %v2200_v27, %v1764_v26  ;;  %v2286_v39 = vld [vmem:[%s3190_s1 + $0x200] sm:$0xff]  ;;  %v1597_v24 = vor.u32 %v2152_v14, %v1594_v15 }
  0x52   :  { %1339 = vmatpush.bf16.msra.mxu2 %v2273_v52  ;;  %1290 = vmatpush.bf16.msra.mxu1 %v2265_v54  ;;  %v1809_v52 = vor.u32 %v2210_v47, %v1808_v46  ;;  %v2167_v46 = vld [vmem:[%s3191_s0 + $0x88] sm:$0xf0]  ;;  %v2170_v14 = vld [vmem:[%s3191_s0 + $0xa4] sm:$0xf] }
  0x53   :  { %1201 = vmatmul.bf16.gmra.mxu3 %v1625_v34  ;;  %1250 = vmatmul.bf16.gmra.mxu0 %v1629_v35  ;;  %v1769_v34 = vor.u32 %v2196_v28, %v1766_v29  ;;  %v1773_v35 = vor.u32 %v2201_v31, %v1772_v30 }
  0x54   :  { %1388 = vmatpush.bf16.msra.mxu3 %v2281_v53  ;;  %1437 = vmatpush.bf16.msra.mxu0 %v2289_v55 }
  0x56   :  { %1340 = vmatpush.bf16.msra.mxu2 %v2272_v4  ;;  %1291 = vmatpush.bf16.msra.mxu1 %v2264_v6  ;;  %v1833_v4 = vor.u32 %v2213_v58, %v1830_v59 }
  0x58   :  { %1389 = vmatpush.bf16.msra.mxu3 %v2280_v5  ;;  %1438 = vmatpush.bf16.msra.mxu0 %v2288_v7  ;;  %v1837_v5 = vor.u32 %v2218_v61, %v1836_v60  ;;  %v1841_v7 = vor.u32 %v2214_v62, %v1838_v63 }
  0x5a   :  { %1341 = vmatpush.bf16.msra.mxu2 %v2271_v20  ;;  %1292 = vmatpush.bf16.msra.mxu1 %v2263_v22  ;;  %v1608_v20 = vld [vmem:[%s3191_s0 + $0x20] sm:$0xf] }
  0x5c   :  { %1390 = vmatpush.bf16.msra.mxu3 %v2279_v21  ;;  %1439 = vmatpush.bf16.msra.mxu0 %v2287_v23  ;;  %v2158_v21 = vld [vmem:[%s3191_s0 + $0x40] sm:$0xf0] }
  0x5d   :  { %v1609_v28 = vor.u32 %v2158_v21, %v1608_v20  ;;  %v2176_v20 = vld [vmem:[%s3191_s0 + $0xd0] sm:$0xf0] }
  0x5e   :  { %1342 = vmatpush.bf16.msra.mxu2 %v2270_v36  ;;  %1293 = vmatpush.bf16.msra.mxu1 %v2262_v38  ;;  %v2161_v38 = vld [vmem:[%s3191_s0 + $0x5c] sm:$0xf] }
  0x60   :  { %1391 = vmatpush.bf16.msra.mxu3 %v2278_v37  ;;  %1440 = vmatpush.bf16.msra.mxu0 %v2286_v39  ;;  %v1630_v39 = vld [vmem:[%s3191_s0 + $0x7c] sm:$0xf0] }
  0x61   :  { %1108 = vmatmul.bf16.gmra.mxu1 %v1653_v48  ;;  %1157 = vmatmul.bf16.gmra.mxu2 %v1657_v49  ;;  %v1797_v48 = vor.u32 %v2204_v40, %v1794_v41  ;;  %v1801_v49 = vor.u32 %v2209_v43, %v1800_v42  ;;  %v1636_v41 = vld [vmem:[%s3191_s0 + $0x60] sm:$0xf]  ;;  %v2166_v42 = vld [vmem:[%s3191_s0 + $0x80] sm:$0xf0] }
  0x62   :  { %v2162_v43 = vld [vmem:[%s3191_s0 + $0x64] sm:$0xf] }
  0x63   :  { %1206 = vmatmul.bf16.gmra.mxu3 %v1661_v50  ;;  %1255 = vmatmul.bf16.gmra.mxu0 %v1665_v51  ;;  %v1805_v51 = vor.u32 %v2205_v44, %v1802_v45  ;;  %v1638_v44 = vld [vmem:[%s3191_s0 + $0x84] sm:$0xf0] }
  0x64   :  { %v1644_v45 = vld [vmem:[%s3191_s0 + $0x68] sm:$0xf] }
  0x65   :  { %v1645_v58 = vor.u32 %v2167_v46, %v1644_v45  ;;  %v1708_v45 = vld [vmem:[%s3191_s0 + $0xf0] sm:$0xf]  ;;  %v2184_v46 = vld [vmem:[%s3191_s0 + $0x110] sm:$0xf0] }
  0x71   :  { %1113 = vmatmul.bf16.gmra.mxu1 %v1689_v0  ;;  %1162 = vmatmul.bf16.gmra.mxu2 %v1693_v1  ;;  %v1844_v0 = vld [vmem:[%s3191_s0 + $0x208] sm:$0xf]  ;;  %v2219_v1 = vld [vmem:[%s3191_s0 + $0x228] sm:$0xf0] }
  0x72   :  { %v1845_v8 = vor.u32 %v2219_v1, %v1844_v0 }
  0x73   :  { %1211 = vmatmul.bf16.gmra.mxu3 %v1697_v2  ;;  %1260 = vmatmul.bf16.gmra.mxu0 %v1701_v3 }
  0x81   :  { %1118 = vmatmul.bf16.gmra.mxu1 %v1725_v16  ;;  %1167 = vmatmul.bf16.gmra.mxu2 %v1729_v17  ;;  %v1600_v16 = vld [vmem:[%s3191_s0 + $0x18] sm:$0xf]  ;;  %v2157_v17 = vld [vmem:[%s3191_s0 + $0x38] sm:$0xf0] }
  0x82   :  { %v1601_v25 = vor.u32 %v2157_v17, %v1600_v16  ;;  %v1672_v16 = vld [vmem:[%s3191_s0 + $0xa8] sm:$0xf]  ;;  %v2175_v17 = vld [vmem:[%s3191_s0 + $0xc8] sm:$0xf0] }
  0x83   :  { %1216 = vmatmul.bf16.gmra.mxu3 %v1733_v18  ;;  %1265 = vmatmul.bf16.gmra.mxu0 %v1737_v19  ;;  %v2153_v18 = vld [vmem:[%s3191_s0 + $0x1c] sm:$0xf]  ;;  %v1602_v19 = vld [vmem:[%s3191_s0 + $0x3c] sm:$0xf0] }
  0x84   :  { %v1605_v27 = vor.u32 %v2153_v18, %v1602_v19  ;;  %v1674_v18 = vld [vmem:[%s3191_s0 + $0xcc] sm:$0xf0] }
  0x85   :  { %v1680_v19 = vld [vmem:[%s3191_s0 + $0xb0] sm:$0xf] }
  0x91   :  { %1123 = vmatmul.bf16.gmra.mxu1 %v1761_v32  ;;  %1172 = vmatmul.bf16.gmra.mxu2 %v1765_v33 }
  0x93   :  { %1221 = vmatmul.bf16.gmra.mxu3 %v1769_v34  ;;  %1270 = vmatmul.bf16.gmra.mxu0 %v1773_v35 }
  0x9e   :  { %v2824_v50 = vpop.f32.mrf.mxu1 }
  0xa0   :  { %v1050_v53 = vpop.f32.mrf.mxu0 }
  0xa1   :  { %1128 = vmatmul.bf16.gmra.mxu1 %v1797_v48  ;;  %1177 = vmatmul.bf16.gmra.mxu2 %v1801_v49 }
  0xa3   :  { %1226 = vmatmul.bf16.gmra.mxu3 %v1805_v51  ;;  %1275 = vmatmul.bf16.gmra.mxu0 %v1809_v52  ;;  %v1633_v51 = vor.u32 %v2161_v38, %v1630_v39  ;;  %v1637_v52 = vor.u32 %v2166_v42, %v1636_v41 }
  0xa4   :  { %v2826_v54 = vpop.f32.mrf.mxu2 }
  0xa6   :  { %v2828_v55 = vpop.f32.mrf.mxu3  ;;  %v2830_v56 = vpop.f32.mrf.mxu1 }
  0xa8   :  { %v1052_v57 = vpop.f32.mrf.mxu0 }
  0xac   :  { %v2856_v2 = vpop.f32.mrf.mxu2 }
  0xae   :  { %v2858_v3 = vpop.f32.mrf.mxu3  ;;  %v2860_v6 = vpop.f32.mrf.mxu1 }
  0xb0   :  { %v1055_v9 = vpop.f32.mrf.mxu0 }
  0xb1   :  { %1133 = vmatmul.bf16.gmra.mxu1 %v1833_v4  ;;  %1182 = vmatmul.bf16.gmra.mxu2 %v1837_v5 }
  0xb3   :  { %1231 = vmatmul.bf16.gmra.mxu3 %v1841_v7  ;;  %1280 = vmatmul.bf16.gmra.mxu0 %v1845_v8 }
  0xb4   :  { %v2862_v10 = vpop.f32.mrf.mxu2 }
  0xb6   :  { %v2864_v11 = vpop.f32.mrf.mxu3  ;;  %v2866_v12 = vpop.f32.mrf.mxu1 }
  0xb8   :  { %v1057_v13 = vpop.f32.mrf.mxu0 }
  0xbc   :  { %v2892_v22 = vpop.f32.mrf.mxu2 }
  0xbe   :  { %v2894_v23 = vpop.f32.mrf.mxu3  ;;  %v1099_v26 = vpop.f32.mrf.mxu1 }
  0xbf   :  { %v1100_v29 = vadd.f32 %v1099_v26, %v1050_v53 }
  0xc0   :  { %v1246_v30 = vpop.f32.mrf.mxu0 }
  0xc1   :  { %1294 = vmatmul.bf16.vlgmr.msra.gmra.mxu1 %v1597_v24  ;;  %1343 = vmatmul.bf16.vlgmr.msra.gmra.mxu2 %v1601_v25 }
  0xc3   :  { %1392 = vmatmul.bf16.vlgmr.msra.gmra.mxu3 %v1605_v27  ;;  %1441 = vmatmul.bf16.vlgmr.msra.gmra.mxu0 %v1609_v28  ;;  %v1673_v27 = vor.u32 %v2175_v17, %v1672_v16 }
  0xc4   :  { %v1148_v31 = vpop.f32.mrf.mxu2 }
  0xc5   :  { %v1149_v32 = vadd.f32 %v1148_v31, %v1100_v29 }
  0xc6   :  { %v1197_v33 = vpop.f32.mrf.mxu3  ;;  %v1101_v34 = vpop.f32.mrf.mxu1 }
  0xc7   :  { %v1198_v35 = vadd.f32 %v1197_v33, %v1149_v32  ;;  %v1102_v36 = vadd.f32 %v1101_v34, %v1052_v57  ;;  %v1641_v57 = vor.u32 %v2162_v43, %v1638_v44  ;;  %v2179_v43 = vld [vmem:[%s3191_s0 + $0xec] sm:$0xf] }
  0xc8   :  { %v1248_v37 = vpop.f32.mrf.mxu0 }
  0xc9   :  { %v2902_v40 = vadd.f32 %v1246_v30, %v1198_v35  ;;  %v1681_v30 = vor.u32 %v2176_v20, %v1680_v19  ;;  %v1744_v19 = vld [vmem:[%s3191_s0 + $0x138] sm:$0xf]  ;;  %v2193_v20 = vld [vmem:[%s3191_s0 + $0x158] sm:$0xf0] }
  0xcc   :  { %v1150_v47 = vpop.f32.mrf.mxu2 }
  0xcd   :  { %v1151_v48 = vadd.f32 %v1150_v47, %v1102_v36  ;;  %v1710_v47 = vld [vmem:[%s3191_s0 + $0x114] sm:$0xf0] }
  0xce   :  { %v1199_v49 = vpop.f32.mrf.mxu3  ;;  %v1104_v53 = vpop.f32.mrf.mxu1 }
  0xcf   :  { %v1200_v59 = vadd.f32 %v1199_v49, %v1151_v48  ;;  %v1105_v60 = vadd.f32 %v1104_v53, %v1055_v9  ;;  %v1666_v9 = vld [vmem:[%s3191_s0 + $0xc4] sm:$0xf0]  ;;  %v1716_v48 = vld [vmem:[%s3191_s0 + $0xf8] sm:$0xf]  ;;  %v2185_v49 = vld [vmem:[%s3191_s0 + $0x118] sm:$0xf0] }
  0xd0   :  { %v1251_v61 = vpop.f32.mrf.mxu0  ;;  %v1669_v26 = vor.u32 %v2170_v14, %v1666_v9 }
  0xd1   :  { %1299 = vmatmul.bf16.gmra.mxu1 %v1633_v51  ;;  %1348 = vmatmul.bf16.gmra.mxu2 %v1637_v52  ;;  %v2922_v62 = vadd.f32 %v1248_v37, %v1200_v59 }
  0xd3   :  { %1397 = vmatmul.bf16.gmra.mxu3 %v1641_v57  ;;  %1446 = vmatmul.bf16.gmra.mxu0 %v1645_v58  ;;  %v1709_v58 = vor.u32 %v2184_v46, %v1708_v45  ;;  %v2197_v46 = vld [vmem:[%s3191_s0 + $0x17c] sm:$0xf] }
  0xd4   :  { %v1153_v63 = vpop.f32.mrf.mxu2 }
  0xd5   :  { %v1154_v0 = vadd.f32 %v1153_v63, %v1105_v60 }
  0xd6   :  { %v1202_v1 = vpop.f32.mrf.mxu3  ;;  %v1106_v4 = vpop.f32.mrf.mxu1 }
  0xd7   :  { %v1203_v5 = vadd.f32 %v1202_v1, %v1154_v0  ;;  %v1107_v7 = vadd.f32 %v1106_v4, %v1057_v13  ;;  %v2171_v13 = vld [vmem:[%s3191_s0 + $0xac] sm:$0xf] }
  0xd8   :  { %v1253_v8 = vpop.f32.mrf.mxu0  ;;  %v1677_v29 = vor.u32 %v2171_v13, %v1674_v18  ;;  %v2188_v13 = vld [vmem:[%s3191_s0 + $0x134] sm:$0xf] }
  0xd9   :  { %v2930_v15 = vadd.f32 %v1251_v61, %v1203_v5  ;;  %v1717_v61 = vor.u32 %v2185_v49, %v1716_v48  ;;  %v2202_v48 = vld [vmem:[%s3191_s0 + $0x1a0] sm:$0xf0] }
  0xda   :  { %v2198_v49 = vld [vmem:[%s3191_s0 + $0x184] sm:$0xf] }
  0xdc   :  { %v1155_v21 = vpop.f32.mrf.mxu2 }
  0xdd   :  { %v1156_v24 = vadd.f32 %v1155_v21, %v1107_v7  ;;  %v1746_v21 = vld [vmem:[%s3191_s0 + $0x15c] sm:$0xf0] }
  0xde   :  { %v1204_v25 = vpop.f32.mrf.mxu3  ;;  %v1109_v28 = vpop.f32.mrf.mxu1 }
  0xdf   :  { %v1205_v31 = vadd.f32 %v1204_v25, %v1156_v24  ;;  %v1110_v32 = vadd.f32 %v1109_v28, %v2824_v50  ;;  %v1702_v50 = vld [vmem:[%s3191_s0 + $0x10c] sm:$0xf0]  ;;  %v1752_v24 = vld [vmem:[%s3191_s0 + $0x140] sm:$0xf]  ;;  %v2194_v25 = vld [vmem:[%s3191_s0 + $0x160] sm:$0xf0] }
  0xe0   :  { %v1256_v33 = vpop.f32.mrf.mxu0  ;;  %v1705_v57 = vor.u32 %v2179_v43, %v1702_v50 }
  0xe1   :  { %1304 = vmatmul.bf16.gmra.mxu1 %v1669_v26  ;;  %1353 = vmatmul.bf16.gmra.mxu2 %v1673_v27  ;;  %v2951_v34 = vadd.f32 %v1253_v8, %v1205_v31 }
  0xe3   :  { %1402 = vmatmul.bf16.gmra.mxu3 %v1677_v29  ;;  %1451 = vmatmul.bf16.gmra.mxu0 %v1681_v30  ;;  %v1745_v30 = vor.u32 %v2193_v20, %v1744_v19  ;;  %v2206_v20 = vld [vmem:[%s3191_s0 + $0x1c4] sm:$0xf] }
  0xe4   :  { %v1158_v35 = vpop.f32.mrf.mxu2 }
  0xe5   :  { %v1159_v36 = vadd.f32 %v1158_v35, %v1110_v32 }
  0xe6   :  { %v1207_v37 = vpop.f32.mrf.mxu3  ;;  %v1111_v38 = vpop.f32.mrf.mxu1 }
  0xe7   :  { %v1208_v39 = vadd.f32 %v1207_v37, %v1159_v36  ;;  %v1112_v41 = vadd.f32 %v1111_v38, %v2830_v56  ;;  %v2180_v56 = vld [vmem:[%s3191_s0 + $0xf4] sm:$0xf] }
  0xe8   :  { %v1258_v42 = vpop.f32.mrf.mxu0  ;;  %v1713_v60 = vor.u32 %v2180_v56, %v1710_v47  ;;  %v1774_v56 = vld [vmem:[%s3191_s0 + $0x19c] sm:$0xf0] }
  0xe9   :  { %v2960_v44 = vadd.f32 %v1256_v33, %v1208_v39  ;;  %v1753_v33 = vor.u32 %v2194_v25, %v1752_v24  ;;  %v2211_v24 = vld [vmem:[%s3191_s0 + $0x1e8] sm:$0xf0] }
  0xea   :  { %v2207_v25 = vld [vmem:[%s3191_s0 + $0x1cc] sm:$0xf] }
  0xec   :  { %v1160_v51 = vpop.f32.mrf.mxu2 }
  0xed   :  { %v1161_v52 = vadd.f32 %v1160_v51, %v1112_v41 }
  0xee   :  { %v1209_v53 = vpop.f32.mrf.mxu3  ;;  %v1114_v59 = vpop.f32.mrf.mxu1 }
  0xef   :  { %v1210_v63 = vadd.f32 %v1209_v53, %v1161_v52  ;;  %v1115_v0 = vadd.f32 %v1114_v59, %v2860_v6  ;;  %v1738_v6 = vld [vmem:[%s3191_s0 + $0x154] sm:$0xf0]  ;;  %v1782_v52 = vld [vmem:[%s3191_s0 + $0x1a4] sm:$0xf0] }
  0xf0   :  { %v1261_v1 = vpop.f32.mrf.mxu0  ;;  %v1741_v29 = vor.u32 %v2188_v13, %v1738_v6  ;;  %v1788_v53 = vld [vmem:[%s3191_s0 + $0x188] sm:$0xf] }
  0xf1   :  { %1309 = vmatmul.bf16.gmra.mxu1 %v1705_v57  ;;  %1358 = vmatmul.bf16.gmra.mxu2 %v1709_v58  ;;  %v2981_v4 = vadd.f32 %v1258_v42, %v1210_v63  ;;  %v2203_v57 = vld [vmem:[%s3191_s0 + $0x1a8] sm:$0xf0] }
  0xf3   :  { %1407 = vmatmul.bf16.gmra.mxu3 %v1713_v60  ;;  %1456 = vmatmul.bf16.gmra.mxu0 %v1717_v61  ;;  %v1777_v61 = vor.u32 %v2197_v46, %v1774_v56 }
  0xf4   :  { %v1163_v5 = vpop.f32.mrf.mxu2 }
  0xf5   :  { %v1164_v7 = vadd.f32 %v1163_v5, %v1115_v0 }
  0xf6   :  { %v1212_v8 = vpop.f32.mrf.mxu3  ;;  %v1116_v14 = vpop.f32.mrf.mxu1 }
  0xf7   :  { %v1213_v9 = vadd.f32 %v1212_v8, %v1164_v7  ;;  %v1117_v16 = vadd.f32 %v1116_v14, %v2866_v12  ;;  %v2189_v12 = vld [vmem:[%s3191_s0 + $0x13c] sm:$0xf] }
  0xf8   :  { %v1263_v17 = vpop.f32.mrf.mxu0  ;;  %v1749_v32 = vor.u32 %v2189_v12, %v1746_v21  ;;  %v1810_v12 = vld [vmem:[%s3191_s0 + $0x1e4] sm:$0xf0] }
  0xf9   :  { %v2990_v18 = vadd.f32 %v1261_v1, %v1213_v9  ;;  %v1785_v1 = vor.u32 %v2198_v49, %v1782_v52  ;;  %v2215_v49 = vld [vmem:[%s3191_s0 + $0x20c] sm:$0xf] }
  0xfc   :  { %v1165_v26 = vpop.f32.mrf.mxu2 }
  0xfd   :  { %v1166_v27 = vadd.f32 %v1165_v26, %v1117_v16 }
  0xfe   :  { %v1214_v28 = vpop.f32.mrf.mxu3  ;;  %v1119_v31 = vpop.f32.mrf.mxu1 }
  0xff   :  { %v1215_v35 = vadd.f32 %v1214_v28, %v1166_v27  ;;  %v1120_v38 = vadd.f32 %v1119_v31, %v2826_v54  ;;  %v1780_v54 = vld [vmem:[%s3191_s0 + $0x180] sm:$0xf]  ;;  %v1818_v27 = vld [vmem:[%s3191_s0 + $0x1ec] sm:$0xf0] }
 0x100   :  { %v1266_v36 = vpop.f32.mrf.mxu0  ;;  %v1781_v63 = vor.u32 %v2202_v48, %v1780_v54  ;;  %v1824_v28 = vld [vmem:[%s3191_s0 + $0x1d0] sm:$0xf] }
 0x101   :  { %1314 = vmatmul.bf16.gmra.mxu1 %v1741_v29  ;;  %1363 = vmatmul.bf16.gmra.mxu2 %v1745_v30  ;;  %v3010_v37 = vadd.f32 %v1263_v17, %v1215_v35  ;;  %v2212_v29 = vld [vmem:[%s3191_s0 + $0x1f0] sm:$0xf0] }
 0x103   :  { %1412 = vmatmul.bf16.gmra.mxu3 %v1749_v32  ;;  %1461 = vmatmul.bf16.gmra.mxu0 %v1753_v33  ;;  %v1813_v33 = vor.u32 %v2206_v20, %v1810_v12 }
 0x104   :  { %v1168_v39 = vpop.f32.mrf.mxu2 }
 0x105   :  { %v1169_v41 = vadd.f32 %v1168_v39, %v1120_v38  ;;  %v1821_v38 = vor.u32 %v2207_v25, %v1818_v27 }
 0x106   :  { %v1217_v42 = vpop.f32.mrf.mxu3  ;;  %v1121_v43 = vpop.f32.mrf.mxu1 }
 0x107   :  { %v1218_v50 = vadd.f32 %v1217_v42, %v1169_v41  ;;  %v1122_v51 = vadd.f32 %v1121_v43, %v2856_v2  ;;  %v1789_v2 = vor.u32 %v2203_v57, %v1788_v53  ;;  %v2220_v53 = vld [vmem:[%s3191_s0 + $0x230] sm:$0xf0] }
 0x108   :  { %v1268_v45 = vpop.f32.mrf.mxu0  ;;  %v2216_v57 = vld [vmem:[%s3191_s0 + $0x214] sm:$0xf] }
 0x109   :  { %v3019_v47 = vadd.f32 %v1266_v36, %v1218_v50 }
 0x10c   :  { %v1170_v58 = vpop.f32.mrf.mxu2 }
 0x10d   :  { %v1171_v59 = vadd.f32 %v1170_v58, %v1122_v51  ;;  %v1846_v51 = vld [vmem:[%s3191_s0 + $0x22c] sm:$0xf0] }
 0x10e   :  { %v1219_v60 = vpop.f32.mrf.mxu3  ;;  %v1124_v0 = vpop.f32.mrf.mxu1 }
 0x10f   :  { %v1220_v5 = vadd.f32 %v1219_v60, %v1171_v59  ;;  %v1125_v14 = vadd.f32 %v1124_v0, %v2862_v10  ;;  %v1816_v10 = vld [vmem:[%s3191_s0 + $0x1c8] sm:$0xf]  ;;  %v1854_v59 = vld [vmem:[%s3191_s0 + $0x234] sm:$0xf0] }
 0x110   :  { %v1271_v7 = vpop.f32.mrf.mxu0  ;;  %v1817_v35 = vor.u32 %v2211_v24, %v1816_v10  ;;  %v1860_v60 = vld [vmem:[%s3191_s0 + $0x218] sm:$0xf] }
 0x111   :  { %1319 = vmatmul.bf16.gmra.mxu1 %v1777_v61  ;;  %1368 = vmatmul.bf16.gmra.mxu2 %v1781_v63  ;;  %v3040_v8 = vadd.f32 %v1268_v45, %v1220_v5  ;;  %v2221_v61 = vld [vmem:[%s3191_s0 + $0x238] sm:$0xf0] }
 0x113   :  { %1417 = vmatmul.bf16.gmra.mxu3 %v1785_v1  ;;  %1466 = vmatmul.bf16.gmra.mxu0 %v1789_v2  ;;  %v1849_v2 = vor.u32 %v2215_v49, %v1846_v51 }
 0x114   :  { %v1173_v9 = vpop.f32.mrf.mxu2 }
 0x115   :  { %v1174_v16 = vadd.f32 %v1173_v9, %v1125_v14  ;;  %v1857_v14 = vor.u32 %v2216_v57, %v1854_v59 }
 0x116   :  { %v1222_v17 = vpop.f32.mrf.mxu3  ;;  %v1126_v13 = vpop.f32.mrf.mxu1 }
 0x117   :  { %v1223_v6 = vadd.f32 %v1222_v17, %v1174_v16  ;;  %v1127_v26 = vadd.f32 %v1126_v13, %v2892_v22  ;;  %v1825_v22 = vor.u32 %v2212_v29, %v1824_v28 }
 0x118   :  { %v1273_v19 = vpop.f32.mrf.mxu0 }
 0x119   :  { %v3049_v21 = vadd.f32 %v1271_v7, %v1223_v6 }
 0x11c   :  { %v1175_v30 = vpop.f32.mrf.mxu2 }
 0x11d   :  { %v1176_v31 = vadd.f32 %v1175_v30, %v1127_v26 }
 0x11e   :  { %v1224_v32 = vpop.f32.mrf.mxu3  ;;  %v1129_v36 = vpop.f32.mrf.mxu1 }
 0x11f   :  { %v1225_v39 = vadd.f32 %v1224_v32, %v1176_v31  ;;  %v1130_v43 = vadd.f32 %v1129_v36, %v2828_v55  ;;  %v1852_v55 = vld [vmem:[%s3191_s0 + $0x210] sm:$0xf] }
 0x120   :  { %v1276_v41 = vpop.f32.mrf.mxu0  ;;  %v1853_v5 = vor.u32 %v2220_v53, %v1852_v55 }
 0x121   :  { %1324 = vmatmul.bf16.gmra.mxu1 %v1813_v33  ;;  %1373 = vmatmul.bf16.gmra.mxu2 %v1817_v35  ;;  %v3070_v42 = vadd.f32 %v1273_v19, %v1225_v39 }
 0x123   :  { %1422 = vmatmul.bf16.gmra.mxu3 %v1821_v38  ;;  %1471 = vmatmul.bf16.gmra.mxu0 %v1825_v22 }
 0x124   :  { %v1178_v50 = vpop.f32.mrf.mxu2 }
 0x125   :  { %v1179_v45 = vadd.f32 %v1178_v50, %v1130_v43 }
 0x126   :  { %v1227_v46 = vpop.f32.mrf.mxu3  ;;  %v1131_v56 = vpop.f32.mrf.mxu1 }
 0x127   :  { %v1228_v54 = vadd.f32 %v1227_v46, %v1179_v45  ;;  %v1132_v58 = vadd.f32 %v1131_v56, %v2858_v3  ;;  %v1861_v3 = vor.u32 %v2221_v61, %v1860_v60 }
 0x128   :  { %v1278_v48 = vpop.f32.mrf.mxu0 }
 0x129   :  { %v3079_v52 = vadd.f32 %v1276_v41, %v1228_v54 }
 0x12c   :  { %v1180_v63 = vpop.f32.mrf.mxu2 }
 0x12d   :  { %v1181_v0 = vadd.f32 %v1180_v63, %v1132_v58 }
 0x12e   :  { %v1229_v1 = vpop.f32.mrf.mxu3  ;;  %v1134_v7 = vpop.f32.mrf.mxu1 }
 0x12f   :  { %v1230_v9 = vadd.f32 %v1229_v1, %v1181_v0  ;;  %v1135_v13 = vadd.f32 %v1134_v7, %v2864_v11 }
 0x130   :  { %v1281_v16 = vpop.f32.mrf.mxu0 }
 0x131   :  { %1329 = vmatmul.bf16.gmra.mxu1 %v1849_v2  ;;  %1378 = vmatmul.bf16.gmra.mxu2 %v1853_v5  ;;  %v3100_v17 = vadd.f32 %v1278_v48, %v1230_v9  ;;  %v3119_v48 = vld [vmem:[%s3193_s3] ss:$0 sm:$0xff] }
 0x133   :  { %1427 = vmatmul.bf16.gmra.mxu3 %v1857_v14  ;;  %1476 = vmatmul.bf16.gmra.mxu0 %v1861_v3 }
 0x134   :  { %v1183_v6 = vpop.f32.mrf.mxu2 }
 0x135   :  { %v1184_v19 = vadd.f32 %v1183_v6, %v1135_v13 }
 0x136   :  { %v1232_v20 = vpop.f32.mrf.mxu3  ;;  %v1136_v12 = vpop.f32.mrf.mxu1 }
 0x137   :  { %v1233_v10 = vadd.f32 %v1232_v20, %v1184_v19  ;;  %v1137_v26 = vadd.f32 %v1136_v12, %v2894_v23  ;;  %v3112_v23 = vld [vmem:[%s3192_s2] ss:$0 sm:$0xff] }
 0x138   :  { %v1283_v24 = vpop.f32.mrf.mxu0 }
 0x139   :  { %v3103_v25 = vadd.f32 %v1281_v16, %v1233_v10 }
 0x13c   :  { %v1185_v27 = vpop.f32.mrf.mxu2 }
 0x13d   :  { %v1186_v28 = vadd.f32 %v1185_v27, %v1137_v26 }
 0x13e   :  { %v1234_v29 = vpop.f32.mrf.mxu3  ;;  %v1295_v30 = vpop.f32.mrf.mxu1 }
 0x13f   :  { %v1235_v31 = vadd.f32 %v1234_v29, %v1186_v28  ;;  %v1296_v11 = vadd.f32 %v1295_v30, %v2902_v40 }
 0x140   :  { %v1442_v32 = vpop.f32.mrf.mxu0 }
 0x141   :  { %v3106_v33 = vadd.f32 %v1283_v24, %v1235_v31 }
 0x144   :  { %v1344_v35 = vpop.f32.mrf.mxu2 }
 0x145   :  { %v1345_v36 = vadd.f32 %v1344_v35, %v1296_v11 }
 0x146   :  { %v1393_v38 = vpop.f32.mrf.mxu3  ;;  %v1297_v22 = vpop.f32.mrf.mxu1 }
 0x147   :  { %v1394_v39 = vadd.f32 %v1393_v38, %v1345_v36  ;;  %v1298_v50 = vadd.f32 %v1297_v22, %v2922_v62 }
 0x148   :  { %v1444_v41 = vpop.f32.mrf.mxu0 }
 0x149   :  { %v1443_v43 = vadd.f32 %v1442_v32, %v1394_v39 }
 0x14b   :  { %v1486_v40 = vmul.f32 %v3112_v23, %v1443_v43 }
 0x14c   :  { %v1346_v45 = vpop.f32.mrf.mxu2 }
 0x14d   :  { %v1347_v46 = vadd.f32 %v1346_v45, %v1298_v50  ;;  %v1506_v53 = vadd.f32 %v3119_v48, %v1486_v40 }
 0x14e   :  { %v1395_v56 = vpop.f32.mrf.mxu3  ;;  %v1300_v54 = vpop.f32.mrf.mxu1 }
 0x14f   :  { %v1396_v49 = vadd.f32 %v1395_v56, %v1347_v46  ;;  %v1301_v62 = vadd.f32 %v1300_v54, %v2930_v15  ;;  %v1522_v0 = vmax.f32 %v1506_v53, 0.0 }
 0x150   :  { %v1447_v51 = vpop.f32.mrf.mxu0 }
 0x151   :  { %v1445_v55 = vadd.f32 %v1444_v41, %v1396_v49 }
 0x153   :  { %v1487_v57 = vmul.f32 %v3112_v23, %v1445_v55 }
 0x154   :  { %v1349_v58 = vpop.f32.mrf.mxu2 }
 0x155   :  { %v1507_v59 = vadd.f32 %v3119_v48, %v1487_v57  ;;  %v1350_v60 = vadd.f32 %v1349_v58, %v1301_v62 }
 0x156   :  { %v1398_v61 = vpop.f32.mrf.mxu3  ;;  %v1302_v63 = vpop.f32.mrf.mxu1 }
 0x157   :  { %v1523_v1 = vmax.f32 %v1507_v59, 0.0  ;;  %v1399_v2 = vadd.f32 %v1398_v61, %v1350_v60  ;;  %v1303_v3 = vadd.f32 %v1302_v63, %v2951_v34 }
 0x158   :  { %v1449_v5 = vpop.f32.mrf.mxu0 }
 0x159   :  { %v2297_v7 = vpack.c.bf16 %v1523_v1, %v1522_v0  ;;  %v1448_v14 = vadd.f32 %v1447_v51, %v1399_v2 }
 0x15b   :  { %2298 = vst [vmem:[%s3194_s4] sm:$0xff] %v2297_v7   ;;  %v1488_v6 = vmul.f32 %v3112_v23, %v1448_v14 }
 0x15c   :  { %v1351_v9 = vpop.f32.mrf.mxu2 }
 0x15d   :  { %v1352_v15 = vadd.f32 %v1351_v9, %v1303_v3  ;;  %v1508_v10 = vadd.f32 %v3119_v48, %v1488_v6 }
 0x15e   :  { %v1400_v16 = vpop.f32.mrf.mxu3  ;;  %v1305_v13 = vpop.f32.mrf.mxu1 }
 0x15f   :  { %v1401_v19 = vadd.f32 %v1400_v16, %v1352_v15  ;;  %v1306_v26 = vadd.f32 %v1305_v13, %v2960_v44  ;;  %v1524_v31 = vmax.f32 %v1508_v10, 0.0 }
 0x160   :  { %v1452_v20 = vpop.f32.mrf.mxu0 }
 0x161   :  { %v1450_v12 = vadd.f32 %v1449_v5, %v1401_v19 }
 0x163   :  { %v1489_v24 = vmul.f32 %v3112_v23, %v1450_v12 }
 0x164   :  { %v1354_v27 = vpop.f32.mrf.mxu2 }
 0x165   :  { %v1509_v28 = vadd.f32 %v3119_v48, %v1489_v24  ;;  %v1355_v29 = vadd.f32 %v1354_v27, %v1306_v26 }
 0x166   :  { %v1403_v34 = vpop.f32.mrf.mxu3  ;;  %v1307_v30 = vpop.f32.mrf.mxu1 }
 0x167   :  { %v1525_v32 = vmax.f32 %v1509_v28, 0.0  ;;  %v1404_v11 = vadd.f32 %v1403_v34, %v1355_v29  ;;  %v1308_v22 = vadd.f32 %v1307_v30, %v2981_v4 }
 0x168   :  { %v1454_v35 = vpop.f32.mrf.mxu0 }
 0x169   :  { %v2302_v36 = vpack.c.bf16 %v1525_v32, %v1524_v31  ;;  %v1453_v38 = vadd.f32 %v1452_v20, %v1404_v11 }
 0x16b   :  { %2334 = vst [vmem:[%s3194_s4 + $0x8] sm:$0xff] %v2302_v36   ;;  %v1490_v50 = vmul.f32 %v3112_v23, %v1453_v38 }
 0x16c   :  { %v1356_v39 = vpop.f32.mrf.mxu2 }
 0x16d   :  { %v1357_v44 = vadd.f32 %v1356_v39, %v1308_v22  ;;  %v1510_v54 = vadd.f32 %v3119_v48, %v1490_v50 }
 0x16e   :  { %v1405_v41 = vpop.f32.mrf.mxu3  ;;  %v1310_v43 = vpop.f32.mrf.mxu1 }
 0x16f   :  { %v1406_v45 = vadd.f32 %v1405_v41, %v1357_v44  ;;  %v1311_v49 = vadd.f32 %v1310_v43, %v2990_v18  ;;  %v1526_v62 = vmax.f32 %v1510_v54, 0.0 }
 0x170   :  { %v1457_v46 = vpop.f32.mrf.mxu0 }
 0x171   :  { %v1455_v56 = vadd.f32 %v1454_v35, %v1406_v45 }
 0x173   :  { %v1491_v40 = vmul.f32 %v3112_v23, %v1455_v56 }
 0x174   :  { %v1359_v51 = vpop.f32.mrf.mxu2 }
 0x175   :  { %v1511_v55 = vadd.f32 %v3119_v48, %v1491_v40  ;;  %v1360_v53 = vadd.f32 %v1359_v51, %v1311_v49 }
 0x176   :  { %v1408_v4 = vpop.f32.mrf.mxu3  ;;  %v1312_v57 = vpop.f32.mrf.mxu1 }
 0x177   :  { %v1527_v58 = vmax.f32 %v1511_v55, 0.0  ;;  %v1409_v59 = vadd.f32 %v1408_v4, %v1360_v53  ;;  %v1313_v0 = vadd.f32 %v1312_v57, %v3010_v37 }
 0x178   :  { %v1459_v60 = vpop.f32.mrf.mxu0 }
 0x179   :  { %v2307_v61 = vpack.c.bf16 %v1527_v58, %v1526_v62  ;;  %v1458_v63 = vadd.f32 %v1457_v46, %v1409_v59 }
 0x17b   :  { %2335 = vst [vmem:[%s3194_s4 + $0x10] sm:$0xff] %v2307_v61   ;;  %v1492_v7 = vmul.f32 %v3112_v23, %v1458_v63 }
 0x17c   :  { %v1361_v1 = vpop.f32.mrf.mxu2 }
 0x17d   :  { %v1362_v18 = vadd.f32 %v1361_v1, %v1313_v0  ;;  %v1512_v15 = vadd.f32 %v3119_v48, %v1492_v7 }
 0x17e   :  { %v1410_v2 = vpop.f32.mrf.mxu3  ;;  %v1315_v5 = vpop.f32.mrf.mxu1 }
 0x17f   :  { %v1411_v14 = vadd.f32 %v1410_v2, %v1362_v18  ;;  %v1316_v13 = vadd.f32 %v1315_v5, %v3019_v47  ;;  %v1528_v10 = vmax.f32 %v1512_v15, 0.0 }
 0x180   :  { %v1462_v3 = vpop.f32.mrf.mxu0 }
 0x181   :  { %v1460_v9 = vadd.f32 %v1459_v60, %v1411_v14 }
 0x183   :  { %v1493_v16 = vmul.f32 %v3112_v23, %v1460_v9 }
 0x184   :  { %v1364_v6 = vpop.f32.mrf.mxu2 }
 0x185   :  { %v1513_v19 = vadd.f32 %v3119_v48, %v1493_v16  ;;  %v1365_v20 = vadd.f32 %v1364_v6, %v1316_v13 }
 0x186   :  { %v1413_v37 = vpop.f32.mrf.mxu3  ;;  %v1317_v12 = vpop.f32.mrf.mxu1 }
 0x187   :  { %v1529_v24 = vmax.f32 %v1513_v19, 0.0  ;;  %v1414_v26 = vadd.f32 %v1413_v37, %v1365_v20  ;;  %v1318_v34 = vadd.f32 %v1317_v12, %v3040_v8 }
 0x188   :  { %v1464_v27 = vpop.f32.mrf.mxu0 }
 0x189   :  { %v2312_v28 = vpack.c.bf16 %v1529_v24, %v1528_v10  ;;  %v1463_v29 = vadd.f32 %v1462_v3, %v1414_v26 }
 0x18b   :  { %2336 = vst [vmem:[%s3194_s4 + $0x18] sm:$0xff] %v2312_v28   ;;  %v1494_v11 = vmul.f32 %v3112_v23, %v1463_v29 }
 0x18c   :  { %v1366_v30 = vpop.f32.mrf.mxu2 }
 0x18d   :  { %v1367_v47 = vadd.f32 %v1366_v30, %v1318_v34  ;;  %v1514_v22 = vadd.f32 %v3119_v48, %v1494_v11 }
 0x18e   :  { %v1415_v31 = vpop.f32.mrf.mxu3  ;;  %v1320_v32 = vpop.f32.mrf.mxu1 }
 0x18f   :  { %v1416_v35 = vadd.f32 %v1415_v31, %v1367_v47  ;;  %v1321_v44 = vadd.f32 %v1320_v32, %v3049_v21  ;;  %v1530_v46 = vmax.f32 %v1514_v22, 0.0 }
 0x190   :  { %v1467_v36 = vpop.f32.mrf.mxu0 }
 0x191   :  { %v1465_v38 = vadd.f32 %v1464_v27, %v1416_v35 }
 0x193   :  { %v1495_v39 = vmul.f32 %v3112_v23, %v1465_v38 }
 0x194   :  { %v1369_v41 = vpop.f32.mrf.mxu2 }
 0x195   :  { %v1515_v43 = vadd.f32 %v3119_v48, %v1495_v39  ;;  %v1370_v50 = vadd.f32 %v1369_v41, %v1321_v44 }
 0x196   :  { %v1418_v8 = vpop.f32.mrf.mxu3  ;;  %v1322_v45 = vpop.f32.mrf.mxu1 }
 0x197   :  { %v1531_v56 = vmax.f32 %v1515_v43, 0.0  ;;  %v1419_v54 = vadd.f32 %v1418_v8, %v1370_v50  ;;  %v1323_v55 = vadd.f32 %v1322_v45, %v3070_v42 }
 0x198   :  { %v1469_v40 = vpop.f32.mrf.mxu0 }
 0x199   :  { %v2317_v49 = vpack.c.bf16 %v1531_v56, %v1530_v46  ;;  %v1468_v51 = vadd.f32 %v1467_v36, %v1419_v54 }
 0x19b   :  { %2337 = vst [vmem:[%s3194_s4 + $0x20] sm:$0xff] %v2317_v49   ;;  %v1496_v62 = vmul.f32 %v3112_v23, %v1468_v51 }
 0x19c   :  { %v1371_v53 = vpop.f32.mrf.mxu2 }
 0x19d   :  { %v1372_v21 = vadd.f32 %v1371_v53, %v1323_v55  ;;  %v1516_v61 = vadd.f32 %v3119_v48, %v1496_v62 }
 0x19e   :  { %v1420_v4 = vpop.f32.mrf.mxu3  ;;  %v1325_v57 = vpop.f32.mrf.mxu1 }
 0x19f   :  { %v1421_v58 = vadd.f32 %v1420_v4, %v1372_v21  ;;  %v1326_v0 = vadd.f32 %v1325_v57, %v3079_v52  ;;  %v1532_v7 = vmax.f32 %v1516_v61, 0.0 }
 0x1a0   :  { %v1472_v60 = vpop.f32.mrf.mxu0 }
 0x1a1   :  { %v1470_v59 = vadd.f32 %v1469_v40, %v1421_v58 }
 0x1a3   :  { %v1497_v63 = vmul.f32 %v3112_v23, %v1470_v59 }
 0x1a4   :  { %v1374_v1 = vpop.f32.mrf.mxu2 }
 0x1a5   :  { %v1517_v18 = vadd.f32 %v3119_v48, %v1497_v63  ;;  %v1375_v2 = vadd.f32 %v1374_v1, %v1326_v0 }
 0x1a6   :  { %v1423_v42 = vpop.f32.mrf.mxu3  ;;  %v1327_v5 = vpop.f32.mrf.mxu1 }
 0x1a7   :  { %v1533_v14 = vmax.f32 %v1517_v18, 0.0  ;;  %v1424_v3 = vadd.f32 %v1423_v42, %v1375_v2  ;;  %v1328_v16 = vadd.f32 %v1327_v5, %v3100_v17 }
 0x1a8   :  { %v1474_v13 = vpop.f32.mrf.mxu0 }
 0x1a9   :  { %v2322_v9 = vpack.c.bf16 %v1533_v14, %v1532_v7  ;;  %v1473_v15 = vadd.f32 %v1472_v60, %v1424_v3 }
 0x1ab   :  { %2338 = vst [vmem:[%s3194_s4 + $0x28] sm:$0xff] %v2322_v9   ;;  %v1498_v37 = vmul.f32 %v3112_v23, %v1473_v15 }
 0x1ac   :  { %v1376_v6 = vpop.f32.mrf.mxu2 }
 0x1ad   :  { %v1377_v52 = vadd.f32 %v1376_v6, %v1328_v16  ;;  %v1518_v24 = vadd.f32 %v3119_v48, %v1498_v37 }
 0x1ae   :  { %v1425_v19 = vpop.f32.mrf.mxu3  ;;  %v1330_v20 = vpop.f32.mrf.mxu1 }
 0x1af   :  { %v1426_v12 = vadd.f32 %v1425_v19, %v1377_v52  ;;  %v1331_v27 = vadd.f32 %v1330_v20, %v3103_v25  ;;  %v1534_v47 = vmax.f32 %v1518_v24, 0.0 }
 0x1b0   :  { %v1477_v30 = vpop.f32.mrf.mxu0 }
 0x1b1   :  { %v1475_v10 = vadd.f32 %v1474_v13, %v1426_v12 }
 0x1b3   :  { %v1499_v26 = vmul.f32 %v3112_v23, %v1475_v10 }
 0x1b4   :  { %v1379_v28 = vpop.f32.mrf.mxu2 }
 0x1b5   :  { %v1519_v29 = vadd.f32 %v3119_v48, %v1499_v26  ;;  %v1380_v34 = vadd.f32 %v1379_v28, %v1331_v27 }
 0x1b6   :  { %v1428_v17 = vpop.f32.mrf.mxu3  ;;  %v1332_v11 = vpop.f32.mrf.mxu1 }
 0x1b7   :  { %v1535_v31 = vmax.f32 %v1519_v29, 0.0  ;;  %v1429_v32 = vadd.f32 %v1428_v17, %v1380_v34  ;;  %v1333_v38 = vadd.f32 %v1332_v11, %v3106_v33 }
 0x1b8   :  { %v1479_v43 = vpop.f32.mrf.mxu0 }
 0x1b9   :  { %v2327_v35 = vpack.c.bf16 %v1535_v31, %v1534_v47  ;;  %v1478_v36 = vadd.f32 %v1477_v30, %v1429_v32 }
 0x1bb   :  { %2339 = vst [vmem:[%s3194_s4 + $0x30] sm:$0xff] %v2327_v35   ;;  %v1500_v44 = vmul.f32 %v3112_v23, %v1478_v36 }
 0x1bc   :  { %v1381_v22 = vpop.f32.mrf.mxu2 }
 0x1bd   :  { %v1382_v25 = vadd.f32 %v1381_v22, %v1333_v38  ;;  %v1520_v8 = vadd.f32 %v3119_v48, %v1500_v44 }
 0x1be   :  { %v1430_v39 = vpop.f32.mrf.mxu3 }
 0x1bf   :  { %v1431_v41 = vadd.f32 %v1430_v39, %v1382_v25  ;;  %v1536_v56 = vmax.f32 %v1520_v8, 0.0 }
 0x1c1   :  { %v1480_v50 = vadd.f32 %v1479_v43, %v1431_v41 }
 0x1c3   :  { %v1501_v45 = vmul.f32 %v3112_v23, %v1480_v50 }
 0x1c5   :  { %v1521_v46 = vadd.f32 %v3119_v48, %v1501_v45 }
 0x1c7   :  { %v1537_v54 = vmax.f32 %v1521_v46, 0.0 }
 0x1c9   :  { %v2332_v40 = vpack.c.bf16 %v1537_v54, %v1536_v56 }
 0x1cb   :  { %2340 = vst [vmem:[%s3194_s4 + $0x38] sm:$0xff] %v2332_v40  }

// kernel: feature_extractor_forward.15
= control target key start
LH: loop header
LB: loop body
LE: loop exit
PB: predicated region body
PF: predicated region fallthrough
CT: control target
= control target key end

     0   :  { %s3308_s1 = inlined_call_operand.vmem [shape: bf16[1152,256], index: 1, kind: input, shape index: {}]   ;;  %s3309_s0 = inlined_call_operand.vmem [shape: bf16[32,1152], index: 0, kind: input, shape index: {}]   ;;  %s3310_s2 = inlined_call_operand.vmem [shape: f32[1,256], index: 2, kind: input, shape index: {}]   ;;  %s3311_s3 = inlined_call_operand.vmem [shape: f32[1,256], index: 3, kind: input, shape index: {}]   ;;  %s3312_s4 = inlined_call_operand.vmem [shape: bf16[32,256], index: 4, kind: output, shape index: {}]  }
   0x1   :  { %v1513_v0 = vld [vmem:[%s3308_s1 + $0x70] sm:$0xf]  ;;  %v2064_v1 = vld [vmem:[%s3308_s1 + $0x74] sm:$0xf0]  ;;  %v1505_v11 = vld [vmem:[%s3308_s1 + $0x60] sm:$0xf] }
   0x2   :  { %v1577_v2 = vld [vmem:[%s3308_s1 + $0xf0] sm:$0xf]  ;;  %v1514_v3 = vor.u32 %v2064_v1, %v1513_v0  ;;  %v2080_v4 = vld [vmem:[%s3308_s1 + $0xf4] sm:$0xf0]  ;;  %v2062_v13 = vld [vmem:[%s3308_s1 + $0x64] sm:$0xf0] }
   0x3   :  { %v1641_v5 = vld [vmem:[%s3308_s1 + $0x170] sm:$0xf]  ;;  %v2096_v6 = vld [vmem:[%s3308_s1 + $0x174] sm:$0xf0]  ;;  %v1578_v7 = vor.u32 %v2080_v4, %v1577_v2  ;;  %v1569_v14 = vld [vmem:[%s3308_s1 + $0xe0] sm:$0xf]  ;;  %v1506_v16 = vor.u32 %v2062_v13, %v1505_v11 }
   0x4   :  { %v1642_v8 = vor.u32 %v2096_v6, %v1641_v5  ;;  %v1705_v9 = vld [vmem:[%s3308_s1 + $0x1f0] sm:$0xf]  ;;  %v2112_v10 = vld [vmem:[%s3308_s1 + $0x1f4] sm:$0xf0]  ;;  %993 = vmatpush.bf16.msra.mxu0 %v1514_v3  ;;  %v2078_v15 = vld [vmem:[%s3308_s1 + $0xe4] sm:$0xf0] }
   0x5   :  { %v1706_v12 = vor.u32 %v2112_v10, %v1705_v9  ;;  %1012 = vmatpush.bf16.msra.mxu1 %v1578_v7  ;;  %v1570_v17 = vor.u32 %v2078_v15, %v1569_v14  ;;  %v1633_v18 = vld [vmem:[%s3308_s1 + $0x160] sm:$0xf]  ;;  %v2094_v19 = vld [vmem:[%s3308_s1 + $0x164] sm:$0xf0]  ;;  %v1497_v23 = vld [vmem:[%s3308_s1 + $0x50] sm:$0xf] }
   0x6   :  { %1031 = vmatpush.bf16.msra.mxu2 %v1642_v8  ;;  %v1697_v20 = vld [vmem:[%s3308_s1 + $0x1e0] sm:$0xf]  ;;  %v1634_v21 = vor.u32 %v2094_v19, %v1633_v18  ;;  %v2110_v22 = vld [vmem:[%s3308_s1 + $0x1e4] sm:$0xf0]  ;;  %v2060_v24 = vld [vmem:[%s3308_s1 + $0x54] sm:$0xf0] }
   0x7   :  { %1050 = vmatpush.bf16.msra.mxu3 %v1706_v12  ;;  %v1698_v25 = vor.u32 %v2110_v22, %v1697_v20  ;;  %v1561_v26 = vld [vmem:[%s3308_s1 + $0xd0] sm:$0xf]  ;;  %v2076_v27 = vld [vmem:[%s3308_s1 + $0xd4] sm:$0xf0]  ;;  %v1498_v29 = vor.u32 %v2060_v24, %v1497_v23  ;;  %v1489_v35 = vld [vmem:[%s3308_s1 + $0x40] sm:$0xf] }
   0x8   :  { %v1625_v28 = vld [vmem:[%s3308_s1 + $0x150] sm:$0xf]  ;;  %994 = vmatpush.bf16.msra.mxu0 %v1506_v16  ;;  %v2092_v30 = vld [vmem:[%s3308_s1 + $0x154] sm:$0xf0]  ;;  %v1562_v33 = vor.u32 %v2076_v27, %v1561_v26  ;;  %v2058_v36 = vld [vmem:[%s3308_s1 + $0x44] sm:$0xf0] }
   0x9   :  { %v1689_v31 = vld [vmem:[%s3308_s1 + $0x1d0] sm:$0xf]  ;;  %v2108_v32 = vld [vmem:[%s3308_s1 + $0x1d4] sm:$0xf0]  ;;  %1013 = vmatpush.bf16.msra.mxu1 %v1570_v17  ;;  %v1626_v34 = vor.u32 %v2092_v30, %v1625_v28  ;;  %v1553_v37 = vld [vmem:[%s3308_s1 + $0xc0] sm:$0xf]  ;;  %v1490_v44 = vor.u32 %v2058_v36, %v1489_v35 }
   0xa   :  { %1032 = vmatpush.bf16.msra.mxu2 %v1634_v21  ;;  %v1690_v38 = vor.u32 %v2108_v32, %v1689_v31  ;;  %v2074_v39 = vld [vmem:[%s3308_s1 + $0xc4] sm:$0xf0]  ;;  %v1617_v40 = vld [vmem:[%s3308_s1 + $0x140] sm:$0xf]  ;;  %v1481_v47 = vld [vmem:[%s3308_s1 + $0x30] sm:$0xf] }
   0xb   :  { %1051 = vmatpush.bf16.msra.mxu3 %v1698_v25  ;;  %v2090_v41 = vld [vmem:[%s3308_s1 + $0x144] sm:$0xf0]  ;;  %v1681_v42 = vld [vmem:[%s3308_s1 + $0x1c0] sm:$0xf]  ;;  %v1554_v45 = vor.u32 %v2074_v39, %v1553_v37  ;;  %v2056_v48 = vld [vmem:[%s3308_s1 + $0x34] sm:$0xf0] }
   0xc   :  { %v2106_v43 = vld [vmem:[%s3308_s1 + $0x1c4] sm:$0xf0]  ;;  %995 = vmatpush.bf16.msra.mxu0 %v1498_v29  ;;  %v1618_v46 = vor.u32 %v2090_v41, %v1617_v40  ;;  %v1545_v49 = vld [vmem:[%s3308_s1 + $0xb0] sm:$0xf]  ;;  %v2072_v51 = vld [vmem:[%s3308_s1 + $0xb4] sm:$0xf0]  ;;  %v1482_v56 = vor.u32 %v2056_v48, %v1481_v47 }
   0xd   :  { %1014 = vmatpush.bf16.msra.mxu1 %v1562_v33  ;;  %v1682_v50 = vor.u32 %v2106_v43, %v1681_v42  ;;  %v1609_v52 = vld [vmem:[%s3308_s1 + $0x130] sm:$0xf]  ;;  %v2088_v53 = vld [vmem:[%s3308_s1 + $0x134] sm:$0xf0]  ;;  %v1546_v57 = vor.u32 %v2072_v51, %v1545_v49  ;;  %v1473_v59 = vld [vmem:[%s3308_s1 + $0x20] sm:$0xf] }
   0xe   :  { %1033 = vmatpush.bf16.msra.mxu2 %v1626_v34  ;;  %v1673_v54 = vld [vmem:[%s3308_s1 + $0x1b0] sm:$0xf]  ;;  %v2104_v55 = vld [vmem:[%s3308_s1 + $0x1b4] sm:$0xf0]  ;;  %v1610_v58 = vor.u32 %v2088_v53, %v1609_v52  ;;  %v2054_v60 = vld [vmem:[%s3308_s1 + $0x24] sm:$0xf0] }
   0xf   :  { %1052 = vmatpush.bf16.msra.mxu3 %v1690_v38  ;;  %v1537_v61 = vld [vmem:[%s3308_s1 + $0xa0] sm:$0xf]  ;;  %v1674_v62 = vor.u32 %v2104_v55, %v1673_v54  ;;  %v2070_v63 = vld [vmem:[%s3308_s1 + $0xa4] sm:$0xf0]  ;;  %v1474_v4 = vor.u32 %v2054_v60, %v1473_v59  ;;  %v1465_v7 = vld [vmem:[%s3308_s1 + $0x10] sm:$0xf] }
  0x10   :  { %996 = vmatpush.bf16.msra.mxu0 %v1490_v44  ;;  %v1601_v0 = vld [vmem:[%s3308_s1 + $0x120] sm:$0xf]  ;;  %v2086_v1 = vld [vmem:[%s3308_s1 + $0x124] sm:$0xf0]  ;;  %v1538_v5 = vor.u32 %v2070_v63, %v1537_v61  ;;  %v2052_v8 = vld [vmem:[%s3308_s1 + $0x14] sm:$0xf0] }
  0x11   :  { %1015 = vmatpush.bf16.msra.mxu1 %v1554_v45  ;;  %v1665_v2 = vld [vmem:[%s3308_s1 + $0x1a0] sm:$0xf]  ;;  %v2102_v3 = vld [vmem:[%s3308_s1 + $0x1a4] sm:$0xf0]  ;;  %v1602_v6 = vor.u32 %v2086_v1, %v1601_v0  ;;  %v1529_v9 = vld [vmem:[%s3308_s1 + $0x90] sm:$0xf]  ;;  %v1466_v17 = vor.u32 %v2052_v8, %v1465_v7 }
  0x12   :  { %1034 = vmatpush.bf16.msra.mxu2 %v1618_v46  ;;  %v1666_v10 = vor.u32 %v2102_v3, %v1665_v2  ;;  %v2068_v11 = vld [vmem:[%s3308_s1 + $0x94] sm:$0xf0]  ;;  %v1593_v12 = vld [vmem:[%s3308_s1 + $0x110] sm:$0xf]  ;;  %v1457_v16 = vld [vmem:[%s3308_s1] sm:$0xf] }
  0x13   :  { %1053 = vmatpush.bf16.msra.mxu3 %v1682_v50  ;;  %v2084_v13 = vld [vmem:[%s3308_s1 + $0x114] sm:$0xf0]  ;;  %v1657_v14 = vld [vmem:[%s3308_s1 + $0x190] sm:$0xf]  ;;  %v2050_v18 = vld [vmem:[%s3308_s1 + $0x4] sm:$0xf0]  ;;  %v1530_v21 = vor.u32 %v2068_v11, %v1529_v9 }
  0x14   :  { %997 = vmatpush.bf16.msra.mxu0 %v1482_v56  ;;  %v2100_v15 = vld [vmem:[%s3308_s1 + $0x194] sm:$0xf0]  ;;  %v1521_v19 = vld [vmem:[%s3308_s1 + $0x80] sm:$0xf]  ;;  %v2066_v20 = vld [vmem:[%s3308_s1 + $0x84] sm:$0xf0]  ;;  %v1594_v22 = vor.u32 %v2084_v13, %v1593_v12  ;;  %v1458_v34 = vor.u32 %v2050_v18, %v1457_v16 }
  0x15   :  { %1016 = vmatpush.bf16.msra.mxu1 %v1546_v57  ;;  %v1585_v23 = vld [vmem:[%s3308_s1 + $0x100] sm:$0xf]  ;;  %v2082_v24 = vld [vmem:[%s3308_s1 + $0x104] sm:$0xf0]  ;;  %v1658_v26 = vor.u32 %v2100_v15, %v1657_v14  ;;  %v2035_v29 = vld [vmem:[%s3309_s0 + $0x20] sm:$0xf0]  ;;  %v1522_v38 = vor.u32 %v2066_v20, %v1521_v19 }
  0x16   :  { %1035 = vmatpush.bf16.msra.mxu2 %v1610_v58  ;;  %v1649_v25 = vld [vmem:[%s3308_s1 + $0x180] sm:$0xf]  ;;  %v2098_v27 = vld [vmem:[%s3308_s1 + $0x184] sm:$0xf0]  ;;  %v2031_v30 = vld [vmem:[%s3309_s0 + $0x4] sm:$0xf]  ;;  %v1586_v39 = vor.u32 %v2082_v24, %v1585_v23 }
  0x17   :  { %1054 = vmatpush.bf16.msra.mxu3 %v1674_v62  ;;  %v1385_v28 = vld [vmem:[%s3309_s0] sm:$0xf]  ;;  %v1387_v31 = vld [vmem:[%s3309_s0 + $0x24] sm:$0xf0]  ;;  %v1897_v32 = vld [vmem:[%s3308_s1 + $0x370] sm:$0xf]  ;;  %v1650_v43 = vor.u32 %v2098_v27, %v1649_v25 }
  0x18   :  { %998 = vmatpush.bf16.msra.mxu0 %v1474_v4  ;;  %v2160_v33 = vld [vmem:[%s3308_s1 + $0x374] sm:$0xf0]  ;;  %v1393_v35 = vld [vmem:[%s3309_s0 + $0x8] sm:$0xf]  ;;  %v1833_v36 = vld [vmem:[%s3308_s1 + $0x2f0] sm:$0xf]  ;;  %v2471_v48 = vor.u32 %v2035_v29, %v1385_v28  ;;  %v2482_v53 = vor.u32 %v2031_v30, %v1387_v31 }
  0x19   :  { %1017 = vmatpush.bf16.msra.mxu1 %v1538_v5  ;;  %v2144_v37 = vld [vmem:[%s3308_s1 + $0x2f4] sm:$0xf0]  ;;  %v2036_v40 = vld [vmem:[%s3309_s0 + $0x28] sm:$0xf0]  ;;  %v1395_v42 = vld [vmem:[%s3309_s0 + $0x2c] sm:$0xf0]  ;;  %v1898_v44 = vor.u32 %v2160_v33, %v1897_v32 }
  0x1a   :  { %1036 = vmatpush.bf16.msra.mxu2 %v1602_v6  ;;  %v2032_v41 = vld [vmem:[%s3309_s0 + $0xc] sm:$0xf]  ;;  %v1769_v45 = vld [vmem:[%s3308_s1 + $0x270] sm:$0xf]  ;;  %v2128_v46 = vld [vmem:[%s3308_s1 + $0x274] sm:$0xf0]  ;;  %v1834_v49 = vor.u32 %v2144_v37, %v1833_v36  ;;  %v2484_v54 = vor.u32 %v2036_v40, %v1393_v35 }
  0x1b   :  { %1055 = vmatpush.bf16.msra.mxu3 %v1666_v10  ;;  %v1961_v47 = vld [vmem:[%s3308_s1 + $0x3f0] sm:$0xf]  ;;  %v2176_v50 = vld [vmem:[%s3308_s1 + $0x3f4] sm:$0xf0]  ;;  %v1889_v51 = vld [vmem:[%s3308_s1 + $0x360] sm:$0xf]  ;;  %v2492_v57 = vor.u32 %v2032_v41, %v1395_v42  ;;  %v1770_v58 = vor.u32 %v2128_v46, %v1769_v45 }
  0x1c   :  { %999 = vmatpush.bf16.msra.mxu0 %v1466_v17  ;;  %v2158_v52 = vld [vmem:[%s3308_s1 + $0x364] sm:$0xf0]  ;;  %v1825_v55 = vld [vmem:[%s3308_s1 + $0x2e0] sm:$0xf]  ;;  %v1962_v59 = vor.u32 %v2176_v50, %v1961_v47  ;;  %v1881_v2 = vld [vmem:[%s3308_s1 + $0x350] sm:$0xf] }
  0x1d   :  { %1018 = vmatpush.bf16.msra.mxu1 %v1530_v21  ;;  %v2142_v56 = vld [vmem:[%s3308_s1 + $0x2e4] sm:$0xf0]  ;;  %v1890_v60 = vor.u32 %v2158_v52, %v1889_v51  ;;  %v1761_v61 = vld [vmem:[%s3308_s1 + $0x260] sm:$0xf]  ;;  %v2156_v3 = vld [vmem:[%s3308_s1 + $0x354] sm:$0xf0] }
  0x1e   :  { %1037 = vmatpush.bf16.msra.mxu2 %v1594_v22  ;;  %v2126_v62 = vld [vmem:[%s3308_s1 + $0x264] sm:$0xf0]  ;;  %v1953_v63 = vld [vmem:[%s3308_s1 + $0x3e0] sm:$0xf]  ;;  %v1826_v0 = vor.u32 %v2142_v56, %v1825_v55  ;;  %v1817_v4 = vld [vmem:[%s3308_s1 + $0x2d0] sm:$0xf]  ;;  %v1882_v8 = vor.u32 %v2156_v3, %v1881_v2 }
  0x1f   :  { %1056 = vmatpush.bf16.msra.mxu3 %v1658_v26  ;;  %v2174_v1 = vld [vmem:[%s3308_s1 + $0x3e4] sm:$0xf0]  ;;  %v2140_v5 = vld [vmem:[%s3308_s1 + $0x2d4] sm:$0xf0]  ;;  %v1762_v6 = vor.u32 %v2126_v62, %v1761_v61  ;;  %v1753_v9 = vld [vmem:[%s3308_s1 + $0x250] sm:$0xf] }
  0x20   :  { %1000 = vmatpush.bf16.msra.mxu0 %v1458_v34  ;;  %v1954_v7 = vor.u32 %v2174_v1, %v1953_v63  ;;  %v2124_v10 = vld [vmem:[%s3308_s1 + $0x254] sm:$0xf0]  ;;  %v1945_v11 = vld [vmem:[%s3308_s1 + $0x3d0] sm:$0xf]  ;;  %v1818_v12 = vor.u32 %v2140_v5, %v1817_v4  ;;  %v1873_v14 = vld [vmem:[%s3308_s1 + $0x340] sm:$0xf] }
  0x21   :  { %1019 = vmatpush.bf16.msra.mxu1 %v1522_v38  ;;  %v2172_v13 = vld [vmem:[%s3308_s1 + $0x3d4] sm:$0xf0]  ;;  %v2154_v15 = vld [vmem:[%s3308_s1 + $0x344] sm:$0xf0]  ;;  %v1809_v16 = vld [vmem:[%s3308_s1 + $0x2c0] sm:$0xf]  ;;  %v1754_v18 = vor.u32 %v2124_v10, %v1753_v9 }
  0x22   :  { %1038 = vmatpush.bf16.msra.mxu2 %v1586_v39  ;;  %v2138_v17 = vld [vmem:[%s3308_s1 + $0x2c4] sm:$0xf0]  ;;  %v1745_v19 = vld [vmem:[%s3308_s1 + $0x240] sm:$0xf]  ;;  %v1946_v22 = vor.u32 %v2172_v13, %v1945_v11  ;;  %v1874_v23 = vor.u32 %v2154_v15, %v1873_v14  ;;  %v2044_v26 = vld [vmem:[%s3309_s0 + $0x68] sm:$0xf0] }
  0x23   :  { %1057 = vmatpush.bf16.msra.mxu3 %v1650_v43  ;;  %1001 = vmatmul.bf16.vlgmr.msra.gmra.mxu0 %v2471_v48  ;;  %v2122_v20 = vld [vmem:[%s3308_s1 + $0x244] sm:$0xf0]  ;;  %v1937_v21 = vld [vmem:[%s3308_s1 + $0x3c0] sm:$0xf]  ;;  %v1810_v27 = vor.u32 %v2138_v17, %v1809_v16  ;;  %v2040_v28 = vld [vmem:[%s3309_s0 + $0x4c] sm:$0xf] }
  0x24   :  { %1020 = vmatmul.bf16.vlgmr.msra.gmra.mxu1 %v2482_v53  ;;  %1069 = vmatpush.bf16.msrb.mxu0 %v1770_v58  ;;  %v2170_v24 = vld [vmem:[%s3308_s1 + $0x3c4] sm:$0xf0]  ;;  %v1423_v29 = vld [vmem:[%s3309_s0 + $0x6c] sm:$0xf0]  ;;  %v2152_v31 = vld [vmem:[%s3308_s1 + $0x334] sm:$0xf0]  ;;  %v1746_v35 = vor.u32 %v2122_v20, %v1745_v19 }
  0x25   :  { %1088 = vmatpush.bf16.msrb.mxu1 %v1834_v49  ;;  %1039 = vmatmul.bf16.vlgmr.msra.gmra.mxu2 %v2484_v54  ;;  %v1421_v25 = vld [vmem:[%s3309_s0 + $0x48] sm:$0xf]  ;;  %v1865_v30 = vld [vmem:[%s3308_s1 + $0x330] sm:$0xf]  ;;  %v2136_v34 = vld [vmem:[%s3308_s1 + $0x2b4] sm:$0xf0]  ;;  %v1938_v39 = vor.u32 %v2170_v24, %v1937_v21  ;;  %v2614_v50 = vor.u32 %v2040_v28, %v1423_v29 }
  0x26   :  { %1107 = vmatpush.bf16.msrb.mxu2 %v1898_v44  ;;  %1058 = vmatmul.bf16.vlgmr.msra.gmra.mxu3 %v2492_v57  ;;  %v1429_v32 = vld [vmem:[%s3309_s0 + $0x50] sm:$0xf]  ;;  %v2045_v36 = vld [vmem:[%s3309_s0 + $0x70] sm:$0xf0]  ;;  %v1431_v38 = vld [vmem:[%s3309_s0 + $0x74] sm:$0xf0]  ;;  %v1866_v40 = vor.u32 %v2152_v31, %v1865_v30  ;;  %v2603_v44 = vor.u32 %v2044_v26, %v1421_v25 }
  0x27   :  { %1126 = vmatpush.bf16.msrb.mxu3 %v1962_v59  ;;  %v1801_v33 = vld [vmem:[%s3308_s1 + $0x2b0] sm:$0xf]  ;;  %v2041_v37 = vld [vmem:[%s3309_s0 + $0x54] sm:$0xf]  ;;  %v2120_v42 = vld [vmem:[%s3308_s1 + $0x234] sm:$0xf0]  ;;  %v2616_v51 = vor.u32 %v2045_v36, %v1429_v32 }
  0x28   :  { %1070 = vmatpush.bf16.msrb.mxu0 %v1762_v6  ;;  %v1737_v41 = vld [vmem:[%s3308_s1 + $0x230] sm:$0xf]  ;;  %v1802_v45 = vor.u32 %v2136_v34, %v1801_v33  ;;  %v2168_v46 = vld [vmem:[%s3308_s1 + $0x3b4] sm:$0xf0]  ;;  %v1857_v47 = vld [vmem:[%s3308_s1 + $0x320] sm:$0xf]  ;;  %v2624_v56 = vor.u32 %v2041_v37, %v1431_v38 }
  0x29   :  { %1089 = vmatpush.bf16.msrb.mxu1 %v1826_v0  ;;  %v1929_v43 = vld [vmem:[%s3308_s1 + $0x3b0] sm:$0xf]  ;;  %v2150_v49 = vld [vmem:[%s3308_s1 + $0x324] sm:$0xf0]  ;;  %v1793_v52 = vld [vmem:[%s3308_s1 + $0x2a0] sm:$0xf]  ;;  %v1738_v58 = vor.u32 %v2120_v42, %v1737_v41 }
  0x2a   :  { %1108 = vmatpush.bf16.msrb.mxu2 %v1890_v60  ;;  %v2134_v55 = vld [vmem:[%s3308_s1 + $0x2a4] sm:$0xf0]  ;;  %v1930_v59 = vor.u32 %v2168_v46, %v1929_v43  ;;  %v1858_v60 = vor.u32 %v2150_v49, %v1857_v47  ;;  %v1729_v61 = vld [vmem:[%s3308_s1 + $0x220] sm:$0xf]  ;;  %v1849_v2 = vld [vmem:[%s3308_s1 + $0x310] sm:$0xf] }
  0x2b   :  { %1127 = vmatpush.bf16.msrb.mxu3 %v1954_v7  ;;  %v2118_v62 = vld [vmem:[%s3308_s1 + $0x224] sm:$0xf0]  ;;  %v1921_v63 = vld [vmem:[%s3308_s1 + $0x3a0] sm:$0xf]  ;;  %v1794_v0 = vor.u32 %v2134_v55, %v1793_v52  ;;  %v2148_v3 = vld [vmem:[%s3308_s1 + $0x314] sm:$0xf0] }
  0x2c   :  { %1071 = vmatpush.bf16.msrb.mxu0 %v1754_v18  ;;  %v2166_v1 = vld [vmem:[%s3308_s1 + $0x3a4] sm:$0xf0]  ;;  %v1785_v4 = vld [vmem:[%s3308_s1 + $0x290] sm:$0xf]  ;;  %v2132_v5 = vld [vmem:[%s3308_s1 + $0x294] sm:$0xf0]  ;;  %v1730_v6 = vor.u32 %v2118_v62, %v1729_v61  ;;  %v1850_v9 = vor.u32 %v2148_v3, %v1849_v2 }
  0x2d   :  { %1090 = vmatpush.bf16.msrb.mxu1 %v1818_v12  ;;  %v1721_v7 = vld [vmem:[%s3308_s1 + $0x210] sm:$0xf]  ;;  %v2116_v10 = vld [vmem:[%s3308_s1 + $0x214] sm:$0xf0]  ;;  %v1786_v13 = vor.u32 %v2132_v5, %v1785_v4  ;;  %v1841_v14 = vld [vmem:[%s3308_s1 + $0x300] sm:$0xf] }
  0x2e   :  { %1109 = vmatpush.bf16.msrb.mxu2 %v1882_v8  ;;  %v1922_v8 = vor.u32 %v2166_v1, %v1921_v63  ;;  %v1913_v11 = vld [vmem:[%s3308_s1 + $0x390] sm:$0xf]  ;;  %v2164_v12 = vld [vmem:[%s3308_s1 + $0x394] sm:$0xf0]  ;;  %v2146_v15 = vld [vmem:[%s3308_s1 + $0x304] sm:$0xf0]  ;;  %v1722_v20 = vor.u32 %v2116_v10, %v1721_v7 }
  0x2f   :  { %1128 = vmatpush.bf16.msrb.mxu3 %v1946_v22  ;;  %v1777_v16 = vld [vmem:[%s3308_s1 + $0x280] sm:$0xf]  ;;  %v2130_v17 = vld [vmem:[%s3308_s1 + $0x284] sm:$0xf0]  ;;  %v2079_v18 = vld [vmem:[%s3308_s1 + $0xf4] sm:$0xf]  ;;  %v1914_v24 = vor.u32 %v2164_v12, %v1913_v11  ;;  %v1842_v25 = vor.u32 %v2146_v15, %v1841_v14 }
  0x30   :  { %1072 = vmatpush.bf16.msrb.mxu0 %v1746_v35  ;;  %v1579_v19 = vld [vmem:[%s3308_s1 + $0xf8] sm:$0xf0]  ;;  %v1713_v21 = vld [vmem:[%s3308_s1 + $0x200] sm:$0xf]  ;;  %v2063_v22 = vld [vmem:[%s3308_s1 + $0x74] sm:$0xf]  ;;  %v1778_v29 = vor.u32 %v2130_v17, %v1777_v16 }
  0x31   :  { %1091 = vmatpush.bf16.msrb.mxu1 %v1810_v27  ;;  %v2114_v26 = vld [vmem:[%s3308_s1 + $0x204] sm:$0xf0]  ;;  %v1905_v27 = vld [vmem:[%s3308_s1 + $0x380] sm:$0xf]  ;;  %v1401_v30 = vld [vmem:[%s3309_s0 + $0x10] sm:$0xf]  ;;  %v1582_v34 = vor.u32 %v2079_v18, %v1579_v19 }
  0x32   :  { %1110 = vmatpush.bf16.msrb.mxu2 %v1874_v23  ;;  %v1515_v23 = vld [vmem:[%s3308_s1 + $0x78] sm:$0xf0]  ;;  %v2162_v28 = vld [vmem:[%s3308_s1 + $0x384] sm:$0xf0]  ;;  %v2037_v31 = vld [vmem:[%s3309_s0 + $0x30] sm:$0xf0]  ;;  %v1714_v42 = vor.u32 %v2114_v26, %v1713_v21 }
  0x33   :  { %1129 = vmatpush.bf16.msrb.mxu3 %v1938_v39  ;;  %1006 = vmatmul.bf16.gmra.mxu0 %v2603_v44  ;;  %v2033_v32 = vld [vmem:[%s3309_s0 + $0x14] sm:$0xf]  ;;  %v1403_v33 = vld [vmem:[%s3309_s0 + $0x34] sm:$0xf0]  ;;  %v2025_v35 = vld [vmem:[%s3308_s1 + $0x470] sm:$0xf]  ;;  %v1518_v38 = vor.u32 %v2063_v22, %v1515_v23  ;;  %v1906_v47 = vor.u32 %v2162_v28, %v1905_v27 }
  0x34   :  { %1025 = vmatmul.bf16.gmra.mxu1 %v2614_v50  ;;  %1073 = vmatpush.bf16.msrb.mxu0 %v1738_v58  ;;  %v2192_v36 = vld [vmem:[%s3308_s1 + $0x474] sm:$0xf0]  ;;  %v2095_v37 = vld [vmem:[%s3308_s1 + $0x174] sm:$0xf]  ;;  %v1643_v39 = vld [vmem:[%s3308_s1 + $0x178] sm:$0xf0]  ;;  %v2761_v1 = vor.u32 %v2033_v32, %v1403_v33 }
  0x35   :  { %1092 = vmatpush.bf16.msrb.mxu1 %v1802_v45  ;;  %1044 = vmatmul.bf16.gmra.mxu2 %v2616_v51  ;;  %v1571_v41 = vld [vmem:[%s3308_s1 + $0xe8] sm:$0xf0]  ;;  %v1409_v43 = vld [vmem:[%s3309_s0 + $0x18] sm:$0xf]  ;;  %v2038_v45 = vld [vmem:[%s3309_s0 + $0x38] sm:$0xf0]  ;;  %v2026_v52 = vor.u32 %v2192_v36, %v2025_v35 }
  0x36   :  { %1111 = vmatpush.bf16.msrb.mxu2 %v1866_v40  ;;  %1063 = vmatmul.bf16.gmra.mxu3 %v2624_v56  ;;  %v2077_v40 = vld [vmem:[%s3308_s1 + $0xe4] sm:$0xf]  ;;  %v2034_v46 = vld [vmem:[%s3309_s0 + $0x1c] sm:$0xf]  ;;  %v1411_v49 = vld [vmem:[%s3309_s0 + $0x3c] sm:$0xf0]  ;;  %v2772_v5 = vor.u32 %v2038_v45, %v1409_v43 }
  0x37   :  { %1130 = vmatpush.bf16.msrb.mxu3 %v1930_v59  ;;  %v2017_v55 = vld [vmem:[%s3308_s1 + $0x460] sm:$0xf]  ;;  %v2190_v58 = vld [vmem:[%s3308_s1 + $0x464] sm:$0xf0]  ;;  %v1646_v59 = vor.u32 %v2095_v37, %v1643_v39  ;;  %v2061_v61 = vld [vmem:[%s3308_s1 + $0x64] sm:$0xf] }
  0x38   :  { %1074 = vmatpush.bf16.msrb.mxu0 %v1730_v6  ;;  %v1507_v62 = vld [vmem:[%s3308_s1 + $0x68] sm:$0xf0]  ;;  %v2093_v63 = vld [vmem:[%s3308_s1 + $0x164] sm:$0xf]  ;;  %v2075_v3 = vld [vmem:[%s3308_s1 + $0xd4] sm:$0xf]  ;;  %v2774_v6 = vor.u32 %v2034_v46, %v1411_v49  ;;  %v2018_v7 = vor.u32 %v2190_v58, %v2017_v55 }
  0x39   :  { %1093 = vmatpush.bf16.msrb.mxu1 %v1794_v0  ;;  %v2759_v0 = vor.u32 %v2037_v31, %v1401_v30  ;;  %v1635_v2 = vld [vmem:[%s3308_s1 + $0x168] sm:$0xf0]  ;;  %v1563_v4 = vld [vmem:[%s3308_s1 + $0xd8] sm:$0xf0]  ;;  %v2188_v10 = vld [vmem:[%s3308_s1 + $0x454] sm:$0xf0] }
  0x3a   :  { %1112 = vmatpush.bf16.msrb.mxu2 %v1858_v60  ;;  %v1574_v60 = vor.u32 %v2077_v40, %v1571_v41  ;;  %v1638_v11 = vor.u32 %v2093_v63, %v1635_v2  ;;  %v1566_v12 = vor.u32 %v2075_v3, %v1563_v4  ;;  %v1499_v14 = vld [vmem:[%s3308_s1 + $0x58] sm:$0xf0]  ;;  %v2091_v15 = vld [vmem:[%s3308_s1 + $0x154] sm:$0xf]  ;;  %v2073_v17 = vld [vmem:[%s3308_s1 + $0xc4] sm:$0xf] }
  0x3b   :  { %1131 = vmatpush.bf16.msrb.mxu3 %v1922_v8  ;;  %v1510_v8 = vor.u32 %v2061_v61, %v1507_v62  ;;  %v1627_v16 = vld [vmem:[%s3308_s1 + $0x158] sm:$0xf0]  ;;  %v1555_v18 = vld [vmem:[%s3308_s1 + $0xc8] sm:$0xf0]  ;;  %v2001_v21 = vld [vmem:[%s3308_s1 + $0x440] sm:$0xf] }
  0x3c   :  { %1075 = vmatpush.bf16.msrb.mxu0 %v1722_v20  ;;  %v2186_v22 = vld [vmem:[%s3308_s1 + $0x444] sm:$0xf0]  ;;  %v1630_v23 = vor.u32 %v2091_v15, %v1627_v16  ;;  %v1491_v26 = vld [vmem:[%s3308_s1 + $0x48] sm:$0xf0]  ;;  %v2089_v27 = vld [vmem:[%s3308_s1 + $0x144] sm:$0xf] }
  0x3d   :  { %1094 = vmatpush.bf16.msrb.mxu1 %v1786_v13  ;;  %v2059_v13 = vld [vmem:[%s3308_s1 + $0x54] sm:$0xf]  ;;  %v1619_v28 = vld [vmem:[%s3308_s1 + $0x148] sm:$0xf0]  ;;  %v1547_v30 = vld [vmem:[%s3308_s1 + $0xb8] sm:$0xf0]  ;;  %v2002_v31 = vor.u32 %v2186_v22, %v2001_v21 }
  0x3e   :  { %1113 = vmatpush.bf16.msrb.mxu2 %v1850_v9  ;;  %v2009_v9 = vld [vmem:[%s3308_s1 + $0x450] sm:$0xf]  ;;  %v1502_v20 = vor.u32 %v2059_v13, %v1499_v14  ;;  %v1622_v35 = vor.u32 %v2089_v27, %v1619_v28  ;;  %v1437_v36 = vld [vmem:[%s3309_s0 + $0x58] sm:$0xf]  ;;  %v2046_v37 = vld [vmem:[%s3309_s0 + $0x78] sm:$0xf0] }
  0x3f   :  { %1132 = vmatpush.bf16.msrb.mxu3 %v1914_v24  ;;  %v2010_v19 = vor.u32 %v2188_v10, %v2009_v9  ;;  %v1558_v24 = vor.u32 %v2073_v17, %v1555_v18  ;;  %v1993_v33 = vld [vmem:[%s3308_s1 + $0x430] sm:$0xf]  ;;  %v1439_v39 = vld [vmem:[%s3309_s0 + $0x7c] sm:$0xf0]  ;;  %v2055_v41 = vld [vmem:[%s3308_s1 + $0x34] sm:$0xf] }
  0x40   :  { %1076 = vmatpush.bf16.msrb.mxu0 %v1714_v42  ;;  %v1483_v42 = vld [vmem:[%s3308_s1 + $0x38] sm:$0xf0]  ;;  %v2087_v43 = vld [vmem:[%s3308_s1 + $0x134] sm:$0xf]  ;;  %v2069_v46 = vld [vmem:[%s3308_s1 + $0xa4] sm:$0xf] }
  0x41   :  { %1095 = vmatpush.bf16.msrb.mxu1 %v1778_v29  ;;  %v2071_v29 = vld [vmem:[%s3308_s1 + $0xb4] sm:$0xf]  ;;  %v1611_v45 = vld [vmem:[%s3308_s1 + $0x138] sm:$0xf0]  ;;  %v1445_v49 = vld [vmem:[%s3309_s0 + $0x60] sm:$0xf] }
  0x42   :  { %1114 = vmatpush.bf16.msrb.mxu2 %v1842_v25  ;;  %v2057_v25 = vld [vmem:[%s3308_s1 + $0x44] sm:$0xf]  ;;  %v1550_v40 = vor.u32 %v2071_v29, %v1547_v30  ;;  %v1447_v58 = vld [vmem:[%s3309_s0 + $0x84] sm:$0xf0]  ;;  %v1985_v61 = vld [vmem:[%s3308_s1 + $0x420] sm:$0xf]  ;;  %v1614_v63 = vor.u32 %v2087_v43, %v1611_v45 }
  0x43   :  { %1133 = vmatpush.bf16.msrb.mxu3 %v1906_v47  ;;  %1077 = vmatmul.bf16.vlgmr.msrb.gmra.mxu0 %v2759_v0  ;;  %v1494_v32 = vor.u32 %v2057_v25, %v1491_v26  ;;  %v1539_v47 = vld [vmem:[%s3308_s1 + $0xa8] sm:$0xf0]  ;;  %v2043_v55 = vld [vmem:[%s3309_s0 + $0x64] sm:$0xf]  ;;  %v2182_v62 = vld [vmem:[%s3308_s1 + $0x424] sm:$0xf0] }
  0x44   :  { %1145 = vmatpush.bf16.msra.mxu0 %v2026_v52  ;;  %1096 = vmatmul.bf16.vlgmr.msrb.gmra.mxu1 %v2761_v1  ;;  %v2047_v52 = vld [vmem:[%s3309_s0 + $0x80] sm:$0xf0]  ;;  %v1542_v2 = vor.u32 %v2069_v46, %v1539_v47  ;;  %v1475_v4 = vld [vmem:[%s3308_s1 + $0x28] sm:$0xf0]  ;;  %v2906_v14 = vor.u32 %v2043_v55, %v1447_v58  ;;  %v1986_v15 = vor.u32 %v2182_v62, %v1985_v61  ;;  %v1977_v17 = vld [vmem:[%s3308_s1 + $0x410] sm:$0xf] }
  0x45   :  { %1164 = vmatpush.bf16.msra.mxu1 %v1518_v38  ;;  %1115 = vmatmul.bf16.vlgmr.msrb.gmra.mxu2 %v2772_v5  ;;  %v2042_v38 = vld [vmem:[%s3309_s0 + $0x5c] sm:$0xf]  ;;  %v2053_v3 = vld [vmem:[%s3308_s1 + $0x24] sm:$0xf]  ;;  %v1603_v10 = vld [vmem:[%s3308_s1 + $0x128] sm:$0xf0]  ;;  %v2904_v13 = vor.u32 %v2047_v52, %v1445_v49 }
  0x46   :  { %1183 = vmatpush.bf16.msra.mxu2 %v1582_v34  ;;  %1134 = vmatmul.bf16.vlgmr.msrb.gmra.mxu3 %v2774_v6  ;;  %v2184_v34 = vld [vmem:[%s3308_s1 + $0x434] sm:$0xf0]  ;;  %v2893_v9 = vor.u32 %v2042_v38, %v1439_v39  ;;  %v1478_v16 = vor.u32 %v2053_v3, %v1475_v4  ;;  %v2051_v21 = vld [vmem:[%s3308_s1 + $0x14] sm:$0xf]  ;;  %v1467_v22 = vld [vmem:[%s3308_s1 + $0x18] sm:$0xf0] }
  0x47   :  { %1202 = vmatpush.bf16.msra.mxu3 %v1646_v59  ;;  %v1994_v59 = vor.u32 %v2184_v34, %v1993_v33  ;;  %v2180_v18 = vld [vmem:[%s3308_s1 + $0x414] sm:$0xf0]  ;;  %v2065_v25 = vld [vmem:[%s3308_s1 + $0x84] sm:$0xf]  ;;  %v1523_v26 = vld [vmem:[%s3308_s1 + $0x88] sm:$0xf0]  ;;  %v1470_v30 = vor.u32 %v2051_v21, %v1467_v22 }
  0x48   :  { %1146 = vmatpush.bf16.msra.mxu0 %v2018_v7  ;;  %v2085_v7 = vld [vmem:[%s3308_s1 + $0x124] sm:$0xf]  ;;  %v2143_v27 = vld [vmem:[%s3308_s1 + $0x2f4] sm:$0xf]  ;;  %v1835_v28 = vld [vmem:[%s3308_s1 + $0x2f8] sm:$0xf0]  ;;  %v1978_v29 = vor.u32 %v2180_v18, %v1977_v17 }
  0x49   :  { %1165 = vmatpush.bf16.msra.mxu1 %v1510_v8  ;;  %v2891_v8 = vor.u32 %v2046_v37, %v1437_v36  ;;  %v2049_v33 = vld [vmem:[%s3308_s1 + $0x4] sm:$0xf]  ;;  %v1459_v36 = vld [vmem:[%s3308_s1 + $0x8] sm:$0xf0]  ;;  %v1838_v39 = vor.u32 %v2143_v27, %v1835_v28  ;;  %v1771_v43 = vld [vmem:[%s3308_s1 + $0x278] sm:$0xf0] }
  0x4a   :  { %1184 = vmatpush.bf16.msra.mxu2 %v1574_v60  ;;  %v1486_v60 = vor.u32 %v2055_v41, %v1483_v42  ;;  %v2081_v37 = vld [vmem:[%s3308_s1 + $0x104] sm:$0xf]  ;;  %v1587_v38 = vld [vmem:[%s3308_s1 + $0x108] sm:$0xf0]  ;;  %v1707_v41 = vld [vmem:[%s3308_s1 + $0x1f8] sm:$0xf0]  ;;  %v1462_v49 = vor.u32 %v2049_v33, %v1459_v36 }
  0x4b   :  { %1203 = vmatpush.bf16.msra.mxu3 %v1638_v11  ;;  %v2067_v11 = vld [vmem:[%s3308_s1 + $0x94] sm:$0xf]  ;;  %v1899_v46 = vld [vmem:[%s3308_s1 + $0x378] sm:$0xf0]  ;;  %v2141_v52 = vld [vmem:[%s3308_s1 + $0x2e4] sm:$0xf]  ;;  %v1590_v58 = vor.u32 %v2081_v37, %v1587_v38 }
  0x4c   :  { %1147 = vmatpush.bf16.msra.mxu0 %v2010_v19  ;;  %v1606_v19 = vor.u32 %v2085_v7, %v1603_v10  ;;  %v2127_v42 = vld [vmem:[%s3308_s1 + $0x274] sm:$0xf]  ;;  %v1827_v55 = vld [vmem:[%s3308_s1 + $0x2e8] sm:$0xf0]  ;;  %v2109_v62 = vld [vmem:[%s3308_s1 + $0x1e4] sm:$0xf] }
  0x4d   :  { %1166 = vmatpush.bf16.msra.mxu1 %v1502_v20  ;;  %v2159_v45 = vld [vmem:[%s3308_s1 + $0x374] sm:$0xf]  ;;  %v2039_v3 = vld [vmem:[%s3309_s0 + $0x40] sm:$0xf0]  ;;  %v1830_v4 = vor.u32 %v2141_v52, %v1827_v55  ;;  %v1763_v10 = vld [vmem:[%s3308_s1 + $0x268] sm:$0xf0] }
  0x4e   :  { %1185 = vmatpush.bf16.msra.mxu2 %v1566_v12  ;;  %v1531_v12 = vld [vmem:[%s3308_s1 + $0x98] sm:$0xf0]  ;;  %v1902_v61 = vor.u32 %v2159_v45, %v1899_v46  ;;  %v2125_v7 = vld [vmem:[%s3308_s1 + $0x264] sm:$0xf]  ;;  %v2155_v27 = vld [vmem:[%s3308_s1 + $0x354] sm:$0xf] }
  0x4f   :  { %1204 = vmatpush.bf16.msra.mxu3 %v1630_v23  ;;  %v1534_v20 = vor.u32 %v2067_v11, %v1531_v12  ;;  %v2083_v23 = vld [vmem:[%s3308_s1 + $0x114] sm:$0xf]  ;;  %v2157_v12 = vld [vmem:[%s3308_s1 + $0x364] sm:$0xf]  ;;  %v1819_v18 = vld [vmem:[%s3308_s1 + $0x2d8] sm:$0xf0]  ;;  %v1766_v21 = vor.u32 %v2125_v7, %v1763_v10 }
  0x50   :  { %1148 = vmatpush.bf16.msra.mxu0 %v2002_v31  ;;  %v1969_v31 = vld [vmem:[%s3308_s1 + $0x400] sm:$0xf]  ;;  %v1883_v28 = vld [vmem:[%s3308_s1 + $0x358] sm:$0xf0]  ;;  %v2135_v38 = vld [vmem:[%s3308_s1 + $0x2b4] sm:$0xf] }
  0x51   :  { %1167 = vmatpush.bf16.msra.mxu1 %v1494_v32  ;;  %v2178_v32 = vld [vmem:[%s3308_s1 + $0x404] sm:$0xf0]  ;;  %v2119_v45 = vld [vmem:[%s3308_s1 + $0x234] sm:$0xf]  ;;  %v1739_v46 = vld [vmem:[%s3308_s1 + $0x238] sm:$0xf0] }
  0x52   :  { %1186 = vmatpush.bf16.msra.mxu2 %v1558_v24  ;;  %v1595_v24 = vld [vmem:[%s3308_s1 + $0x118] sm:$0xf0]  ;;  %v1970_v47 = vor.u32 %v2178_v32, %v1969_v31  ;;  %v2105_v31 = vld [vmem:[%s3308_s1 + $0x1c4] sm:$0xf]  ;;  %v1683_v32 = vld [vmem:[%s3308_s1 + $0x1c8] sm:$0xf0] }
  0x53   :  { %1205 = vmatpush.bf16.msra.mxu3 %v1622_v35  ;;  %1082 = vmatmul.bf16.gmra.mxu0 %v2891_v8  ;;  %v1598_v34 = vor.u32 %v2083_v23, %v1595_v24  ;;  %v1526_v35 = vor.u32 %v2065_v25, %v1523_v26  ;;  %v2123_v23 = vld [vmem:[%s3308_s1 + $0x254] sm:$0xf]  ;;  %v1755_v24 = vld [vmem:[%s3308_s1 + $0x258] sm:$0xf0]  ;;  %v1686_v37 = vor.u32 %v2105_v31, %v1683_v32  ;;  %v1731_v7 = vld [vmem:[%s3308_s1 + $0x228] sm:$0xf0] }
  0x54   :  { %1149 = vmatpush.bf16.msra.mxu0 %v1994_v59  ;;  %1101 = vmatmul.bf16.gmra.mxu1 %v2893_v9  ;;  %v1758_v33 = vor.u32 %v2123_v23, %v1755_v24  ;;  %v2151_v52 = vld [vmem:[%s3308_s1 + $0x334] sm:$0xf]  ;;  %v1867_v55 = vld [vmem:[%s3308_s1 + $0x338] sm:$0xf0]  ;;  %v1779_v31 = vld [vmem:[%s3308_s1 + $0x288] sm:$0xf0] }
  0x55   :  { %1168 = vmatpush.bf16.msra.mxu1 %v1486_v60  ;;  %1120 = vmatmul.bf16.gmra.mxu2 %v2904_v13  ;;  %v1774_v60 = vor.u32 %v2127_v42, %v1771_v43  ;;  %v2115_v24 = vld [vmem:[%s3308_s1 + $0x214] sm:$0xf]  ;;  %v2097_v32 = vld [vmem:[%s3308_s1 + $0x184] sm:$0xf] }
  0x56   :  { %1187 = vmatpush.bf16.msra.mxu2 %v1550_v40  ;;  %1139 = vmatmul.bf16.gmra.mxu3 %v2906_v14  ;;  %v2111_v40 = vld [vmem:[%s3308_s1 + $0x1f4] sm:$0xf] }
  0x57   :  { %1206 = vmatpush.bf16.msra.mxu3 %v1614_v63  ;;  %v1710_v59 = vor.u32 %v2111_v40, %v1707_v41  ;;  %v1699_v63 = vld [vmem:[%s3308_s1 + $0x1e8] sm:$0xf0]  ;;  %v2103_v40 = vld [vmem:[%s3308_s1 + $0x1b4] sm:$0xf]  ;;  %v1675_v41 = vld [vmem:[%s3308_s1 + $0x1b8] sm:$0xf0] }
  0x58   :  { %1150 = vmatpush.bf16.msra.mxu0 %v1986_v15  ;;  %v1702_v11 = vor.u32 %v2109_v62, %v1699_v63  ;;  %v1891_v15 = vld [vmem:[%s3308_s1 + $0x368] sm:$0xf0]  ;;  %v1453_v62 = vld [vmem:[%s3309_s0 + $0x68] sm:$0xf] }
  0x59   :  { %1169 = vmatpush.bf16.msra.mxu1 %v1478_v16  ;;  %v2139_v16 = vld [vmem:[%s3308_s1 + $0x2d4] sm:$0xf]  ;;  %v1894_v22 = vor.u32 %v2157_v12, %v1891_v15  ;;  %v2048_v63 = vld [vmem:[%s3309_s0 + $0x88] sm:$0xf0]  ;;  %v2149_v12 = vld [vmem:[%s3308_s1 + $0x324] sm:$0xf] }
  0x5a   :  { %1188 = vmatpush.bf16.msra.mxu2 %v1542_v2  ;;  %v1417_v2 = vld [vmem:[%s3309_s0 + $0x20] sm:$0xf]  ;;  %v1822_v25 = vor.u32 %v2139_v16, %v1819_v18  ;;  %v1859_v15 = vld [vmem:[%s3308_s1 + $0x328] sm:$0xf0]  ;;  %v2131_v16 = vld [vmem:[%s3308_s1 + $0x294] sm:$0xf]  ;;  %v3119_v18 = vor.u32 %v2048_v63, %v1453_v62 }
  0x5b   :  { %1207 = vmatpush.bf16.msra.mxu3 %v1606_v19  ;;  %v3011_v17 = vor.u32 %v2039_v3, %v1417_v2  ;;  %v2107_v19 = vld [vmem:[%s3308_s1 + $0x1d4] sm:$0xf]  ;;  %v1742_v2 = vor.u32 %v2119_v45, %v1739_v46  ;;  %v1870_v3 = vor.u32 %v2151_v52, %v1867_v55  ;;  %v1862_v23 = vor.u32 %v2149_v12, %v1859_v15  ;;  %v2019_v52 = vld [vmem:[%s3308_s1 + $0x468] sm:$0xf0] }
  0x5c   :  { %1151 = vmatpush.bf16.msra.mxu0 %v1978_v29  ;;  %v2137_v29 = vld [vmem:[%s3308_s1 + $0x2c4] sm:$0xf] }
  0x5d   :  { %1170 = vmatpush.bf16.msra.mxu1 %v1470_v30  ;;  %v1811_v30 = vld [vmem:[%s3308_s1 + $0x2c8] sm:$0xf0] }
  0x5e   :  { %1189 = vmatpush.bf16.msra.mxu2 %v1534_v20  ;;  %v1691_v20 = vld [vmem:[%s3308_s1 + $0x1d8] sm:$0xf0]  ;;  %v1814_v36 = vor.u32 %v2137_v29, %v1811_v30  ;;  %v2129_v30 = vld [vmem:[%s3308_s1 + $0x284] sm:$0xf] }
  0x5f   :  { %1208 = vmatpush.bf16.msra.mxu3 %v1598_v34  ;;  %v1694_v26 = vor.u32 %v2107_v19, %v1691_v20  ;;  %v2121_v34 = vld [vmem:[%s3308_s1 + $0x244] sm:$0xf]  ;;  %v1787_v19 = vld [vmem:[%s3308_s1 + $0x298] sm:$0xf0]  ;;  %v2099_v20 = vld [vmem:[%s3308_s1 + $0x194] sm:$0xf] }
  0x60   :  { %1152 = vmatpush.bf16.msra.mxu0 %v1970_v47  ;;  %v1851_v29 = vld [vmem:[%s3308_s1 + $0x318] sm:$0xf0] }
  0x61   :  { %1171 = vmatpush.bf16.msra.mxu1 %v1462_v49  ;;  %v1678_v49 = vor.u32 %v2103_v40, %v1675_v41  ;;  %v2027_v40 = vld [vmem:[%s3308_s1 + $0x478] sm:$0xf0]  ;;  %v2173_v41 = vld [vmem:[%s3308_s1 + $0x3e4] sm:$0xf] }
  0x62   :  { %1190 = vmatpush.bf16.msra.mxu2 %v1526_v35  ;;  %v1747_v35 = vld [vmem:[%s3308_s1 + $0x248] sm:$0xf0] }
  0x63   :  { %1209 = vmatpush.bf16.msra.mxu3 %v1590_v58  ;;  %1153 = vmatmul.bf16.vlgmr.msra.gmra.mxu0 %v3011_v17  ;;  %v1750_v42 = vor.u32 %v2121_v34, %v1747_v35  ;;  %v2133_v58 = vld [vmem:[%s3308_s1 + $0x2a4] sm:$0xf] }
  0x64   :  { %1221 = vmatpush.bf16.msrb.mxu0 %v1710_v59  ;;  %1172 = vmatmul.bf16.vlgmr.msra.gmra.mxu1 %v2471_v48  ;;  %v1886_v48 = vor.u32 %v2155_v27, %v1883_v28  ;;  %v1795_v59 = vld [vmem:[%s3308_s1 + $0x2a8] sm:$0xf0]  ;;  %v2147_v28 = vld [vmem:[%s3308_s1 + $0x314] sm:$0xf] }
  0x65   :  { %1240 = vmatpush.bf16.msrb.mxu1 %v1774_v60  ;;  %1191 = vmatmul.bf16.vlgmr.msra.gmra.mxu2 %v2482_v53  ;;  %v2153_v53 = vld [vmem:[%s3308_s1 + $0x344] sm:$0xf]  ;;  %v1798_v10 = vor.u32 %v2133_v58, %v1795_v59  ;;  %v1854_v35 = vor.u32 %v2147_v28, %v1851_v29  ;;  %v2171_v58 = vld [vmem:[%s3308_s1 + $0x3d4] sm:$0xf]  ;;  %v1947_v59 = vld [vmem:[%s3308_s1 + $0x3d8] sm:$0xf0] }
  0x66   :  { %1259 = vmatpush.bf16.msrb.mxu2 %v1838_v39  ;;  %1210 = vmatmul.bf16.vlgmr.msra.gmra.mxu3 %v2484_v54  ;;  %v1875_v54 = vld [vmem:[%s3308_s1 + $0x348] sm:$0xf0]  ;;  %v1803_v39 = vld [vmem:[%s3308_s1 + $0x2b8] sm:$0xf0]  ;;  %v2101_v60 = vld [vmem:[%s3308_s1 + $0x1a4] sm:$0xf]  ;;  %v1950_v62 = vor.u32 %v2171_v58, %v1947_v59 }
  0x67   :  { %1278 = vmatpush.bf16.msrb.mxu3 %v1902_v61  ;;  %v1878_v43 = vor.u32 %v2153_v53, %v1875_v54  ;;  %v1806_v47 = vor.u32 %v2135_v38, %v1803_v39  ;;  %v1667_v61 = vld [vmem:[%s3308_s1 + $0x1a8] sm:$0xf0]  ;;  %v2145_v53 = vld [vmem:[%s3308_s1 + $0x304] sm:$0xf]  ;;  %v2191_v39 = vld [vmem:[%s3308_s1 + $0x474] sm:$0xf] }
  0x68   :  { %1222 = vmatpush.bf16.msrb.mxu0 %v1702_v11  ;;  %v1670_v11 = vor.u32 %v2101_v60, %v1667_v61  ;;  %v1843_v54 = vld [vmem:[%s3308_s1 + $0x308] sm:$0xf0]  ;;  %v2030_v46 = vor.u32 %v2191_v39, %v2027_v40  ;;  %v2187_v60 = vld [vmem:[%s3308_s1 + $0x454] sm:$0xf]  ;;  %v2011_v61 = vld [vmem:[%s3308_s1 + $0x458] sm:$0xf0] }
  0x69   :  { %1241 = vmatpush.bf16.msrb.mxu1 %v1766_v21  ;;  %v1659_v21 = vld [vmem:[%s3308_s1 + $0x198] sm:$0xf0]  ;;  %v1846_v45 = vor.u32 %v2145_v53, %v1843_v54  ;;  %v2014_v63 = vor.u32 %v2187_v60, %v2011_v61 }
  0x6a   :  { %1260 = vmatpush.bf16.msrb.mxu2 %v1830_v4  ;;  %v2117_v4 = vld [vmem:[%s3308_s1 + $0x224] sm:$0xf]  ;;  %v1662_v27 = vor.u32 %v2099_v20, %v1659_v21  ;;  %v1987_v21 = vld [vmem:[%s3308_s1 + $0x428] sm:$0xf0] }
  0x6b   :  { %1279 = vmatpush.bf16.msrb.mxu3 %v1894_v22  ;;  %v1734_v22 = vor.u32 %v2117_v4, %v1731_v7  ;;  %v2185_v4 = vld [vmem:[%s3308_s1 + $0x444] sm:$0xf]  ;;  %v2003_v7 = vld [vmem:[%s3308_s1 + $0x448] sm:$0xf0] }
  0x6c   :  { %1223 = vmatpush.bf16.msrb.mxu0 %v1694_v26  ;;  %v1790_v26 = vor.u32 %v2131_v16, %v1787_v19  ;;  %v2165_v16 = vld [vmem:[%s3308_s1 + $0x3a4] sm:$0xf]  ;;  %v1923_v19 = vld [vmem:[%s3308_s1 + $0x3a8] sm:$0xf0] }
  0x6d   :  { %1242 = vmatpush.bf16.msrb.mxu1 %v1758_v33  ;;  %v1651_v33 = vld [vmem:[%s3308_s1 + $0x188] sm:$0xf0]  ;;  %v2181_v20 = vld [vmem:[%s3308_s1 + $0x424] sm:$0xf] }
  0x6e   :  { %1261 = vmatpush.bf16.msrb.mxu2 %v1822_v25  ;;  %v1723_v25 = vld [vmem:[%s3308_s1 + $0x218] sm:$0xf0] }
  0x6f   :  { %1280 = vmatpush.bf16.msrb.mxu3 %v1886_v48  ;;  %v1963_v48 = vld [vmem:[%s3308_s1 + $0x3f8] sm:$0xf0]  ;;  %v1726_v34 = vor.u32 %v2115_v24, %v1723_v25  ;;  %v2163_v24 = vld [vmem:[%s3308_s1 + $0x394] sm:$0xf] }
  0x70   :  { %1224 = vmatpush.bf16.msrb.mxu0 %v1686_v37  ;;  %v1715_v37 = vld [vmem:[%s3308_s1 + $0x208] sm:$0xf0]  ;;  %v1915_v25 = vld [vmem:[%s3308_s1 + $0x398] sm:$0xf0] }
  0x71   :  { %1243 = vmatpush.bf16.msrb.mxu1 %v1750_v42  ;;  %v1955_v42 = vld [vmem:[%s3308_s1 + $0x3e8] sm:$0xf0]  ;;  %v1918_v28 = vor.u32 %v2163_v24, %v1915_v25 }
  0x72   :  { %1262 = vmatpush.bf16.msrb.mxu2 %v1814_v36  ;;  %v2113_v36 = vld [vmem:[%s3308_s1 + $0x204] sm:$0xf] }
  0x73   :  { %1281 = vmatpush.bf16.msrb.mxu3 %v1878_v43  ;;  %1158 = vmatmul.bf16.gmra.mxu0 %v3119_v18  ;;  %v1718_v43 = vor.u32 %v2113_v36, %v1715_v37 }
  0x74   :  { %1225 = vmatpush.bf16.msrb.mxu0 %v1678_v49  ;;  %1177 = vmatmul.bf16.gmra.mxu1 %v2603_v44  ;;  %v2175_v44 = vld [vmem:[%s3308_s1 + $0x3f4] sm:$0xf]  ;;  %v2189_v49 = vld [vmem:[%s3308_s1 + $0x464] sm:$0xf] }
  0x75   :  { %1244 = vmatpush.bf16.msrb.mxu1 %v1742_v2  ;;  %1196 = vmatmul.bf16.gmra.mxu2 %v2614_v50  ;;  %v1782_v50 = vor.u32 %v2129_v30, %v1779_v31  ;;  %v1966_v38 = vor.u32 %v2175_v44, %v1963_v48  ;;  %v2022_v55 = vor.u32 %v2189_v49, %v2019_v52  ;;  %v2169_v2 = vld [vmem:[%s3308_s1 + $0x3c4] sm:$0xf]  ;;  %v1907_v31 = vld [vmem:[%s3308_s1 + $0x388] sm:$0xf0] }
  0x76   :  { %1263 = vmatpush.bf16.msrb.mxu2 %v1806_v47  ;;  %1215 = vmatmul.bf16.gmra.mxu3 %v2616_v51  ;;  %v1654_v51 = vor.u32 %v2097_v32, %v1651_v33  ;;  %v1958_v47 = vor.u32 %v2173_v41, %v1955_v42  ;;  %v2161_v30 = vld [vmem:[%s3308_s1 + $0x384] sm:$0xf]  ;;  %v1971_v33 = vld [vmem:[%s3308_s1 + $0x408] sm:$0xf0] }
  0x77   :  { %1282 = vmatpush.bf16.msrb.mxu3 %v1870_v3  ;;  %v1939_v3 = vld [vmem:[%s3308_s1 + $0x3c8] sm:$0xf0]  ;;  %v2177_v32 = vld [vmem:[%s3308_s1 + $0x404] sm:$0xf]  ;;  %v1910_v44 = vor.u32 %v2161_v30, %v1907_v31 }
  0x78   :  { %1226 = vmatpush.bf16.msrb.mxu0 %v1670_v11  ;;  %v1931_v11 = vld [vmem:[%s3308_s1 + $0x3b8] sm:$0xf0] }
  0x79   :  { %1245 = vmatpush.bf16.msrb.mxu1 %v1734_v22  ;;  %v1926_v22 = vor.u32 %v2165_v16, %v1923_v19 }
  0x7a   :  { %1264 = vmatpush.bf16.msrb.mxu2 %v1798_v10  ;;  %v1942_v10 = vor.u32 %v2169_v2, %v1939_v3 }
  0x7b   :  { %1283 = vmatpush.bf16.msrb.mxu3 %v1862_v23  ;;  %v1990_v23 = vor.u32 %v2181_v20, %v1987_v21 }
  0x7c   :  { %1227 = vmatpush.bf16.msrb.mxu0 %v1662_v27  ;;  %v1979_v27 = vld [vmem:[%s3308_s1 + $0x418] sm:$0xf0] }
  0x7d   :  { %1246 = vmatpush.bf16.msrb.mxu1 %v1726_v34 }
  0x7e   :  { %1265 = vmatpush.bf16.msrb.mxu2 %v1790_v26  ;;  %v2179_v26 = vld [vmem:[%s3308_s1 + $0x414] sm:$0xf] }
  0x7f   :  { %1284 = vmatpush.bf16.msrb.mxu3 %v1854_v35  ;;  %v1982_v29 = vor.u32 %v2179_v26, %v1979_v27 }
  0x80   :  { %1228 = vmatpush.bf16.msrb.mxu0 %v1654_v51 }
  0x81   :  { %1247 = vmatpush.bf16.msrb.mxu1 %v1718_v43 }
  0x82   :  { %1266 = vmatpush.bf16.msrb.mxu2 %v1782_v50 }
  0x83   :  { %1285 = vmatpush.bf16.msrb.mxu3 %v1846_v45  ;;  %1229 = vmatmul.bf16.vlgmr.msrb.gmra.mxu0 %v2492_v57  ;;  %v2006_v57 = vor.u32 %v2185_v4, %v2003_v7 }
  0x84   :  { %1297 = vmatpush.bf16.msra.mxu0 %v1966_v38  ;;  %1248 = vmatmul.bf16.vlgmr.msrb.gmra.mxu1 %v2759_v0  ;;  %v2167_v0 = vld [vmem:[%s3308_s1 + $0x3b4] sm:$0xf] }
  0x85   :  { %1316 = vmatpush.bf16.msra.mxu1 %v2030_v46  ;;  %1267 = vmatmul.bf16.vlgmr.msrb.gmra.mxu2 %v2761_v1  ;;  %v2183_v1 = vld [vmem:[%s3308_s1 + $0x434] sm:$0xf]  ;;  %v1934_v12 = vor.u32 %v2167_v0, %v1931_v11 }
  0x86   :  { %2193 = vmatpush.bf16.msra.mxu2 %v1966_v38  ;;  %1286 = vmatmul.bf16.vlgmr.msrb.gmra.mxu3 %v2772_v5  ;;  %v1995_v5 = vld [vmem:[%s3308_s1 + $0x438] sm:$0xf0] }
  0x87   :  { %2201 = vmatpush.bf16.msra.mxu3 %v2030_v46  ;;  %v1998_v15 = vor.u32 %v2183_v1, %v1995_v5 }
  0x88   :  { %1298 = vmatpush.bf16.msra.mxu0 %v1958_v47 }
  0x89   :  { %1317 = vmatpush.bf16.msra.mxu1 %v2022_v55 }
  0x8a   :  { %2194 = vmatpush.bf16.msra.mxu2 %v1958_v47 }
  0x8b   :  { %2202 = vmatpush.bf16.msra.mxu3 %v2022_v55 }
  0x8c   :  { %1299 = vmatpush.bf16.msra.mxu0 %v1950_v62 }
  0x8d   :  { %1318 = vmatpush.bf16.msra.mxu1 %v2014_v63 }
  0x8e   :  { %2195 = vmatpush.bf16.msra.mxu2 %v1950_v62 }
  0x8f   :  { %2203 = vmatpush.bf16.msra.mxu3 %v2014_v63 }
  0x90   :  { %1300 = vmatpush.bf16.msra.mxu0 %v1942_v10 }
  0x91   :  { %1319 = vmatpush.bf16.msra.mxu1 %v2006_v57 }
  0x92   :  { %2196 = vmatpush.bf16.msra.mxu2 %v1942_v10 }
  0x93   :  { %2204 = vmatpush.bf16.msra.mxu3 %v2006_v57  ;;  %1234 = vmatmul.bf16.gmra.mxu0 %v2624_v56  ;;  %v1974_v56 = vor.u32 %v2177_v32, %v1971_v33 }
  0x94   :  { %1301 = vmatpush.bf16.msra.mxu0 %v1934_v12  ;;  %1253 = vmatmul.bf16.gmra.mxu1 %v2891_v8 }
  0x95   :  { %1320 = vmatpush.bf16.msra.mxu1 %v1998_v15  ;;  %1272 = vmatmul.bf16.gmra.mxu2 %v2893_v9 }
  0x96   :  { %2197 = vmatpush.bf16.msra.mxu2 %v1934_v12  ;;  %1291 = vmatmul.bf16.gmra.mxu3 %v2904_v13 }
  0x97   :  { %2205 = vmatpush.bf16.msra.mxu3 %v1998_v15 }
  0x98   :  { %1302 = vmatpush.bf16.msra.mxu0 %v1926_v22 }
  0x99   :  { %1321 = vmatpush.bf16.msra.mxu1 %v1990_v23 }
  0x9a   :  { %2198 = vmatpush.bf16.msra.mxu2 %v1926_v22 }
  0x9b   :  { %2206 = vmatpush.bf16.msra.mxu3 %v1990_v23 }
  0x9c   :  { %1303 = vmatpush.bf16.msra.mxu0 %v1918_v28 }
  0x9d   :  { %1322 = vmatpush.bf16.msra.mxu1 %v1982_v29 }
  0x9e   :  { %2199 = vmatpush.bf16.msra.mxu2 %v1918_v28 }
  0x9f   :  { %2207 = vmatpush.bf16.msra.mxu3 %v1982_v29 }
  0xa0   :  { %1304 = vmatpush.bf16.msra.mxu0 %v1910_v44  ;;  %v1002_v8 = vpop.f32.mrf.mxu0 }
  0xa1   :  { %1323 = vmatpush.bf16.msra.mxu1 %v1974_v56  ;;  %v1021_v48 = vpop.f32.mrf.mxu1 }
  0xa2   :  { %2200 = vmatpush.bf16.msra.mxu2 %v1910_v44  ;;  %v1022_v34 = vadd.f32 %v1021_v48, %v1002_v8 }
  0xa3   :  { %2208 = vmatpush.bf16.msra.mxu3 %v1974_v56  ;;  %1305 = vmatmul.bf16.vlgmr.msra.gmra.mxu0 %v2774_v6 }
  0xa4   :  { %1324 = vmatmul.bf16.vlgmr.msra.gmra.mxu1 %v3011_v17 }
  0xa5   :  { %1310 = vmatmul.bf16.vlgmr.msra.gmra.mxu2 %v2906_v14 }
  0xa6   :  { %1329 = vmatmul.bf16.vlgmr.msra.gmra.mxu3 %v3119_v18 }
  0xa8   :  { %v1040_v9 = vpop.f32.mrf.mxu2  ;;  %v1004_v36 = vpop.f32.mrf.mxu0 }
  0xa9   :  { %v1041_v13 = vadd.f32 %v1040_v9, %v1022_v34  ;;  %v1059_v35 = vpop.f32.mrf.mxu3  ;;  %v1023_v50 = vpop.f32.mrf.mxu1 }
  0xaa   :  { %v1024_v37 = vadd.f32 %v1023_v50, %v1004_v36 }
  0xab   :  { %v1060_v51 = vadd.f32 %v1059_v35, %v1041_v13 }
  0xb0   :  { %v1042_v53 = vpop.f32.mrf.mxu2  ;;  %v1007_v39 = vpop.f32.mrf.mxu0 }
  0xb1   :  { %v1043_v54 = vadd.f32 %v1042_v53, %v1024_v37  ;;  %v1061_v38 = vpop.f32.mrf.mxu3  ;;  %v1026_v40 = vpop.f32.mrf.mxu1 }
  0xb2   :  { %v1027_v6 = vadd.f32 %v1026_v40, %v1007_v39 }
  0xb3   :  { %v1062_v41 = vadd.f32 %v1061_v38, %v1043_v54 }
  0xb8   :  { %v1045_v42 = vpop.f32.mrf.mxu2  ;;  %v1009_v14 = vpop.f32.mrf.mxu0 }
  0xb9   :  { %v1046_v17 = vadd.f32 %v1045_v42, %v1027_v6  ;;  %v1064_v43 = vpop.f32.mrf.mxu3  ;;  %v1028_v45 = vpop.f32.mrf.mxu1 }
  0xba   :  { %v1029_v46 = vadd.f32 %v1028_v45, %v1009_v14 }
  0xbb   :  { %v1065_v18 = vadd.f32 %v1064_v43, %v1046_v17 }
  0xc0   :  { %v1047_v47 = vpop.f32.mrf.mxu2  ;;  %v1078_v55 = vpop.f32.mrf.mxu0 }
  0xc1   :  { %v1048_v49 = vadd.f32 %v1047_v47, %v1029_v46  ;;  %v1066_v52 = vpop.f32.mrf.mxu3  ;;  %v1097_v58 = vpop.f32.mrf.mxu1  ;;  %v1079_v60 = vadd.f32 %v1078_v55, %v1060_v51 }
  0xc3   :  { %v1067_v59 = vadd.f32 %v1066_v52, %v1048_v49  ;;  %v1098_v61 = vadd.f32 %v1097_v58, %v1079_v60 }
  0xc8   :  { %v1116_v62 = vpop.f32.mrf.mxu2  ;;  %v1080_v3 = vpop.f32.mrf.mxu0 }
  0xc9   :  { %v1135_v63 = vpop.f32.mrf.mxu3  ;;  %v1117_v2 = vadd.f32 %v1116_v62, %v1098_v61  ;;  %v1099_v4 = vpop.f32.mrf.mxu1  ;;  %v1081_v7 = vadd.f32 %v1080_v3, %v1062_v41 }
  0xcb   :  { %v1136_v10 = vadd.f32 %v1135_v63, %v1117_v2  ;;  %v1100_v57 = vadd.f32 %v1099_v4, %v1081_v7  ;;  %v1335_v2 = vld [vmem:[%s3310_s2] sm:$0x3] }
  0xd0   :  { %v1118_v0 = vpop.f32.mrf.mxu2  ;;  %v1083_v5 = vpop.f32.mrf.mxu0 }
  0xd1   :  { %v1137_v11 = vpop.f32.mrf.mxu3  ;;  %v1119_v1 = vadd.f32 %v1118_v0, %v1100_v57  ;;  %v1102_v12 = vpop.f32.mrf.mxu1  ;;  %v1084_v15 = vadd.f32 %v1083_v5, %v1065_v18  ;;  %v1337_v57 = vperm.slane %v1335_v2, 0  ;;  %v1349_v0 = vld [vmem:[%s3311_s3] sm:$0x3] }
  0xd3   :  { %v1138_v16 = vadd.f32 %v1137_v11, %v1119_v1  ;;  %v1103_v19 = vadd.f32 %v1102_v12, %v1084_v15 }
  0xd8   :  { %v1121_v20 = vpop.f32.mrf.mxu2  ;;  %v1085_v23 = vpop.f32.mrf.mxu0 }
  0xd9   :  { %v1140_v21 = vpop.f32.mrf.mxu3  ;;  %v1122_v22 = vadd.f32 %v1121_v20, %v1103_v19  ;;  %v1104_v24 = vpop.f32.mrf.mxu1  ;;  %v1086_v25 = vadd.f32 %v1085_v23, %v1067_v59 }
  0xdb   :  { %v3278_v26 = vadd.f32 %v1140_v21, %v1122_v22  ;;  %v1105_v27 = vadd.f32 %v1104_v24, %v1086_v25  ;;  %v1338_v25 = vperm.slane %v1335_v2, 1 }
  0xe0   :  { %v1123_v28 = vpop.f32.mrf.mxu2  ;;  %v1154_v31 = vpop.f32.mrf.mxu0 }
  0xe1   :  { %v1142_v29 = vpop.f32.mrf.mxu3  ;;  %v1124_v30 = vadd.f32 %v1123_v28, %v1105_v27  ;;  %v1173_v32 = vpop.f32.mrf.mxu1  ;;  %v1155_v33 = vadd.f32 %v1154_v31, %v1136_v10  ;;  %v1352_v31 = vperm.slane %v1349_v0, 1 }
  0xe3   :  { %v3280_v44 = vadd.f32 %v1142_v29, %v1124_v30  ;;  %v1341_v22 = vmul.f32 %v1337_v57, %v1155_v33 }
  0xe8   :  { %v1192_v56 = vpop.f32.mrf.mxu2  ;;  %v1156_v48 = vpop.f32.mrf.mxu0 }
  0xe9   :  { %v1211_v8 = vpop.f32.mrf.mxu3  ;;  %v1175_v34 = vpop.f32.mrf.mxu1  ;;  %v3282_v9 = vadd.f32 %v1156_v48, %v1138_v16  ;;  %v1193_v14 = vadd.f32 %v1192_v56, %v1173_v32  ;;  %v1351_v16 = vperm.slane %v1349_v0, 0 }
  0xeb   :  { %v1212_v49 = vadd.f32 %v1211_v8, %v1193_v14  ;;  %v1355_v8 = vadd.f32 %v1351_v16, %v1341_v22 }
  0xf0   :  { %v1194_v13 = vpop.f32.mrf.mxu2  ;;  %v1159_v36 = vpop.f32.mrf.mxu0 }
  0xf1   :  { %v1213_v35 = vpop.f32.mrf.mxu3  ;;  %v1178_v50 = vpop.f32.mrf.mxu1  ;;  %v1195_v58 = vadd.f32 %v1194_v13, %v1175_v34  ;;  %v1160_v32 = vadd.f32 %v1159_v36, %v3278_v26 }
  0xf3   :  { %v1214_v4 = vadd.f32 %v1213_v35, %v1195_v58 }
  0xf8   :  { %v1197_v51 = vpop.f32.mrf.mxu2  ;;  %v3284_v53 = vpop.f32.mrf.mxu0 }
  0xf9   :  { %v1216_v37 = vpop.f32.mrf.mxu3  ;;  %v1180_v54 = vpop.f32.mrf.mxu1  ;;  %v1198_v55 = vadd.f32 %v1197_v51, %v1178_v50 }
  0xfb   :  { %v1217_v3 = vadd.f32 %v1216_v37, %v1198_v55  ;;  %v1345_v37 = vmul.f32 %v1337_v57, %v1160_v32 }
  0xfd   :  { %v1359_v14 = vadd.f32 %v1351_v16, %v1345_v37 }
  0xff   :  { %v1367_v58 = vmax.f32 %v1359_v14, 0.0 }
 0x100   :  { %v1199_v38 = vpop.f32.mrf.mxu2  ;;  %v1230_v40 = vpop.f32.mrf.mxu0 }
 0x101   :  { %v1218_v39 = vpop.f32.mrf.mxu3  ;;  %v1249_v41 = vpop.f32.mrf.mxu1  ;;  %v1231_v52 = vadd.f32 %v1230_v40, %v1212_v49  ;;  %v1200_v1 = vadd.f32 %v1199_v38, %v1180_v54  ;;  %v1363_v40 = vmax.f32 %v1355_v8, 0.0 }
 0x103   :  { %v1250_v63 = vadd.f32 %v1249_v41, %v1231_v52  ;;  %v1219_v27 = vadd.f32 %v1218_v39, %v1200_v1  ;;  %v1343_v39 = vmul.f32 %v1337_v57, %v3282_v9 }
 0x108   :  { %v1268_v6 = vpop.f32.mrf.mxu2  ;;  %v1232_v17 = vpop.f32.mrf.mxu0 }
 0x109   :  { %v1287_v42 = vpop.f32.mrf.mxu3  ;;  %v1251_v43 = vpop.f32.mrf.mxu1  ;;  %v1269_v7 = vadd.f32 %v1268_v6, %v1250_v63  ;;  %v1233_v11 = vadd.f32 %v1232_v17, %v1214_v4 }
 0x10b   :  { %v1288_v5 = vadd.f32 %v1287_v42, %v1269_v7  ;;  %v1252_v23 = vadd.f32 %v1251_v43, %v1233_v11 }
 0x110   :  { %v1270_v45 = vpop.f32.mrf.mxu2  ;;  %v1235_v46 = vpop.f32.mrf.mxu0 }
 0x111   :  { %v1289_v18 = vpop.f32.mrf.mxu3  ;;  %v1254_v47 = vpop.f32.mrf.mxu1  ;;  %v1236_v10 = vadd.f32 %v1235_v46, %v1217_v3  ;;  %v1271_v29 = vadd.f32 %v1270_v45, %v1252_v23  ;;  %v1162_v45 = vadd.f32 %v3284_v53, %v3280_v44  ;;  %v1357_v46 = vadd.f32 %v1351_v16, %v1343_v39 }
 0x113   :  { %v1255_v19 = vadd.f32 %v1254_v47, %v1236_v10  ;;  %v1290_v13 = vadd.f32 %v1289_v18, %v1271_v29 }
 0x118   :  { %v1273_v59 = vpop.f32.mrf.mxu2  ;;  %v1237_v61 = vpop.f32.mrf.mxu0 }
 0x119   :  { %v1292_v60 = vpop.f32.mrf.mxu3  ;;  %v1256_v62 = vpop.f32.mrf.mxu1  ;;  %v1274_v28 = vadd.f32 %v1273_v59, %v1255_v19  ;;  %v1238_v56 = vadd.f32 %v1237_v61, %v1219_v27  ;;  %v1347_v59 = vmul.f32 %v1337_v57, %v1162_v45 }
 0x11b   :  { %v1293_v34 = vadd.f32 %v1292_v60, %v1274_v28  ;;  %v1257_v33 = vadd.f32 %v1256_v62, %v1238_v56  ;;  %v1365_v62 = vmax.f32 %v1357_v46, 0.0  ;;  %v1361_v4 = vadd.f32 %v1351_v16, %v1347_v59 }
 0x11d   :  { %v1369_v57 = vmax.f32 %v1361_v4, 0.0 }
 0x120   :  { %v1275_v12 = vpop.f32.mrf.mxu2  ;;  %v1306_v20 = vpop.f32.mrf.mxu0 }
 0x121   :  { %v1294_v15 = vpop.f32.mrf.mxu3  ;;  %v1325_v21 = vpop.f32.mrf.mxu1  ;;  %v1307_v24 = vadd.f32 %v1306_v20, %v1288_v5  ;;  %v1276_v42 = vadd.f32 %v1275_v12, %v1257_v33 }
 0x123   :  { %v1326_v30 = vadd.f32 %v1325_v21, %v1307_v24  ;;  %v1295_v49 = vadd.f32 %v1294_v15, %v1276_v42 }
 0x125   :  { %v1342_v48 = vmul.f32 %v1338_v25, %v1326_v30 }
 0x127   :  { %v1356_v35 = vadd.f32 %v1352_v31, %v1342_v48 }
 0x128   :  { %v1311_v50 = vpop.f32.mrf.mxu2  ;;  %v1308_v38 = vpop.f32.mrf.mxu0 }
 0x129   :  { %v1330_v51 = vpop.f32.mrf.mxu3  ;;  %v1312_v54 = vadd.f32 %v1311_v50, %v1293_v34  ;;  %v1364_v41 = vmax.f32 %v1356_v35, 0.0  ;;  %v1309_v6 = vadd.f32 %v1308_v38, %v1290_v13  ;;  %v1327_v26 = vpop.f32.mrf.mxu1 }
 0x12b   :  { %v1331_v17 = vadd.f32 %v1330_v51, %v1312_v54  ;;  %v1371_v36 = vpack.c.bf16 %v1364_v41, %v1363_v40  ;;  %v1328_v43 = vadd.f32 %v1327_v26, %v1309_v6 }
 0x12d   :  { %v1346_v18 = vmul.f32 %v1338_v25, %v1331_v17  ;;  %1375 = vst [vmem:[%s3312_s4] sm:$0xff] %v1371_v36  ;;  %v1344_v47 = vmul.f32 %v1338_v25, %v1328_v43 }
 0x12f   :  { %v1360_v9 = vadd.f32 %v1352_v31, %v1346_v18  ;;  %v1358_v52 = vadd.f32 %v1352_v31, %v1344_v47 }
 0x130   :  { %v1313_v55 = vpop.f32.mrf.mxu2 }
 0x131   :  { %v1368_v60 = vmax.f32 %v1360_v9, 0.0  ;;  %v1314_v61 = vadd.f32 %v1313_v55, %v1295_v49  ;;  %v1366_v63 = vmax.f32 %v1358_v52, 0.0  ;;  %v1332_v2 = vpop.f32.mrf.mxu3 }
 0x133   :  { %v1373_v3 = vpack.c.bf16 %v1368_v60, %v1367_v58  ;;  %v1333_v44 = vadd.f32 %v1332_v2, %v1314_v61  ;;  %v1372_v53 = vpack.c.bf16 %v1366_v63, %v1365_v62 }
 0x135   :  { %1377 = vst [vmem:[%s3312_s4 + $0x10] sm:$0xff] %v1373_v3  ;;  %v1348_v7 = vmul.f32 %v1338_v25, %v1333_v44 }
 0x136   :  { %1376 = vst [vmem:[%s3312_s4 + $0x8] sm:$0xff] %v1372_v53 }
 0x137   :  { %v1362_v10 = vadd.f32 %v1352_v31, %v1348_v7 }
 0x139   :  { %v1370_v0 = vmax.f32 %v1362_v10, 0.0 }
 0x13b   :  { %v1374_v11 = vpack.c.bf16 %v1370_v0, %v1369_v57 }
 0x13d   :  { %1378 = vst [vmem:[%s3312_s4 + $0x18] sm:$0xff] %v1374_v11 }

// kernel: feature_extractor_forward.16
= control target key start
LH: loop header
LB: loop body
LE: loop exit
PB: predicated region body
PF: predicated region fallthrough
CT: control target
= control target key end

     0   :  { %s6510_s1 = inlined_call_operand.vmem [shape: bf16[2304,256], index: 1, kind: input, shape index: {}]   ;;  %s6511_s0 = inlined_call_operand.vmem [shape: bf16[32,2304], index: 0, kind: input, shape index: {}]   ;;  %s6512_s2 = inlined_call_operand.vmem [shape: f32[1,256], index: 2, kind: input, shape index: {}]   ;;  %s6513_s3 = inlined_call_operand.vmem [shape: f32[1,256], index: 3, kind: input, shape index: {}]   ;;  %s6514_s4 = inlined_call_operand.vmem [shape: bf16[32,256], index: 4, kind: output, shape index: {}]  }
   0x1   :  { %v2895_v0 = vld [vmem:[%s6510_s1 + $0x70] sm:$0xf]  ;;  %v4040_v1 = vld [vmem:[%s6510_s1 + $0x74] sm:$0xf0]  ;;  %v2887_v11 = vld [vmem:[%s6510_s1 + $0x60] sm:$0xf] }
   0x2   :  { %v2959_v2 = vld [vmem:[%s6510_s1 + $0xf0] sm:$0xf]  ;;  %v2896_v3 = vor.u32 %v4040_v1, %v2895_v0  ;;  %v4056_v4 = vld [vmem:[%s6510_s1 + $0xf4] sm:$0xf0]  ;;  %v4038_v13 = vld [vmem:[%s6510_s1 + $0x64] sm:$0xf0] }
   0x3   :  { %v3023_v5 = vld [vmem:[%s6510_s1 + $0x170] sm:$0xf]  ;;  %v4072_v6 = vld [vmem:[%s6510_s1 + $0x174] sm:$0xf0]  ;;  %v2960_v7 = vor.u32 %v4056_v4, %v2959_v2  ;;  %v2951_v14 = vld [vmem:[%s6510_s1 + $0xe0] sm:$0xf]  ;;  %v2888_v16 = vor.u32 %v4038_v13, %v2887_v11 }
   0x4   :  { %v3024_v8 = vor.u32 %v4072_v6, %v3023_v5  ;;  %v3087_v9 = vld [vmem:[%s6510_s1 + $0x1f0] sm:$0xf]  ;;  %v4088_v10 = vld [vmem:[%s6510_s1 + $0x1f4] sm:$0xf0]  ;;  %1961 = vmatpush.bf16.msra.mxu0 %v2896_v3  ;;  %v4054_v15 = vld [vmem:[%s6510_s1 + $0xe4] sm:$0xf0] }
   0x5   :  { %v3088_v12 = vor.u32 %v4088_v10, %v3087_v9  ;;  %1980 = vmatpush.bf16.msra.mxu1 %v2960_v7  ;;  %v2952_v17 = vor.u32 %v4054_v15, %v2951_v14  ;;  %v3015_v18 = vld [vmem:[%s6510_s1 + $0x160] sm:$0xf]  ;;  %v4070_v19 = vld [vmem:[%s6510_s1 + $0x164] sm:$0xf0]  ;;  %v2879_v23 = vld [vmem:[%s6510_s1 + $0x50] sm:$0xf] }
   0x6   :  { %1999 = vmatpush.bf16.msra.mxu2 %v3024_v8  ;;  %v3079_v20 = vld [vmem:[%s6510_s1 + $0x1e0] sm:$0xf]  ;;  %v3016_v21 = vor.u32 %v4070_v19, %v3015_v18  ;;  %v4086_v22 = vld [vmem:[%s6510_s1 + $0x1e4] sm:$0xf0]  ;;  %v4036_v24 = vld [vmem:[%s6510_s1 + $0x54] sm:$0xf0] }
   0x7   :  { %2018 = vmatpush.bf16.msra.mxu3 %v3088_v12  ;;  %v3080_v25 = vor.u32 %v4086_v22, %v3079_v20  ;;  %v2943_v26 = vld [vmem:[%s6510_s1 + $0xd0] sm:$0xf]  ;;  %v4052_v27 = vld [vmem:[%s6510_s1 + $0xd4] sm:$0xf0]  ;;  %v2880_v29 = vor.u32 %v4036_v24, %v2879_v23  ;;  %v2871_v35 = vld [vmem:[%s6510_s1 + $0x40] sm:$0xf] }
   0x8   :  { %v3007_v28 = vld [vmem:[%s6510_s1 + $0x150] sm:$0xf]  ;;  %1962 = vmatpush.bf16.msra.mxu0 %v2888_v16  ;;  %v4068_v30 = vld [vmem:[%s6510_s1 + $0x154] sm:$0xf0]  ;;  %v2944_v33 = vor.u32 %v4052_v27, %v2943_v26  ;;  %v4034_v36 = vld [vmem:[%s6510_s1 + $0x44] sm:$0xf0] }
   0x9   :  { %v3071_v31 = vld [vmem:[%s6510_s1 + $0x1d0] sm:$0xf]  ;;  %v4084_v32 = vld [vmem:[%s6510_s1 + $0x1d4] sm:$0xf0]  ;;  %1981 = vmatpush.bf16.msra.mxu1 %v2952_v17  ;;  %v3008_v34 = vor.u32 %v4068_v30, %v3007_v28  ;;  %v2935_v37 = vld [vmem:[%s6510_s1 + $0xc0] sm:$0xf]  ;;  %v2872_v44 = vor.u32 %v4034_v36, %v2871_v35 }
   0xa   :  { %2000 = vmatpush.bf16.msra.mxu2 %v3016_v21  ;;  %v3072_v38 = vor.u32 %v4084_v32, %v3071_v31  ;;  %v4050_v39 = vld [vmem:[%s6510_s1 + $0xc4] sm:$0xf0]  ;;  %v2999_v40 = vld [vmem:[%s6510_s1 + $0x140] sm:$0xf]  ;;  %v2863_v47 = vld [vmem:[%s6510_s1 + $0x30] sm:$0xf] }
   0xb   :  { %2019 = vmatpush.bf16.msra.mxu3 %v3080_v25  ;;  %v4066_v41 = vld [vmem:[%s6510_s1 + $0x144] sm:$0xf0]  ;;  %v3063_v42 = vld [vmem:[%s6510_s1 + $0x1c0] sm:$0xf]  ;;  %v2936_v45 = vor.u32 %v4050_v39, %v2935_v37  ;;  %v4032_v48 = vld [vmem:[%s6510_s1 + $0x34] sm:$0xf0] }
   0xc   :  { %v4082_v43 = vld [vmem:[%s6510_s1 + $0x1c4] sm:$0xf0]  ;;  %1963 = vmatpush.bf16.msra.mxu0 %v2880_v29  ;;  %v3000_v46 = vor.u32 %v4066_v41, %v2999_v40  ;;  %v2927_v49 = vld [vmem:[%s6510_s1 + $0xb0] sm:$0xf]  ;;  %v4048_v51 = vld [vmem:[%s6510_s1 + $0xb4] sm:$0xf0]  ;;  %v2864_v56 = vor.u32 %v4032_v48, %v2863_v47 }
   0xd   :  { %1982 = vmatpush.bf16.msra.mxu1 %v2944_v33  ;;  %v3064_v50 = vor.u32 %v4082_v43, %v3063_v42  ;;  %v2991_v52 = vld [vmem:[%s6510_s1 + $0x130] sm:$0xf]  ;;  %v4064_v53 = vld [vmem:[%s6510_s1 + $0x134] sm:$0xf0]  ;;  %v2928_v57 = vor.u32 %v4048_v51, %v2927_v49  ;;  %v2855_v59 = vld [vmem:[%s6510_s1 + $0x20] sm:$0xf] }
   0xe   :  { %2001 = vmatpush.bf16.msra.mxu2 %v3008_v34  ;;  %v3055_v54 = vld [vmem:[%s6510_s1 + $0x1b0] sm:$0xf]  ;;  %v4080_v55 = vld [vmem:[%s6510_s1 + $0x1b4] sm:$0xf0]  ;;  %v2992_v58 = vor.u32 %v4064_v53, %v2991_v52  ;;  %v4030_v60 = vld [vmem:[%s6510_s1 + $0x24] sm:$0xf0] }
   0xf   :  { %2020 = vmatpush.bf16.msra.mxu3 %v3072_v38  ;;  %v2919_v61 = vld [vmem:[%s6510_s1 + $0xa0] sm:$0xf]  ;;  %v3056_v62 = vor.u32 %v4080_v55, %v3055_v54  ;;  %v4046_v63 = vld [vmem:[%s6510_s1 + $0xa4] sm:$0xf0]  ;;  %v2856_v4 = vor.u32 %v4030_v60, %v2855_v59  ;;  %v2847_v7 = vld [vmem:[%s6510_s1 + $0x10] sm:$0xf] }
  0x10   :  { %1964 = vmatpush.bf16.msra.mxu0 %v2872_v44  ;;  %v2983_v0 = vld [vmem:[%s6510_s1 + $0x120] sm:$0xf]  ;;  %v4062_v1 = vld [vmem:[%s6510_s1 + $0x124] sm:$0xf0]  ;;  %v2920_v5 = vor.u32 %v4046_v63, %v2919_v61  ;;  %v4028_v8 = vld [vmem:[%s6510_s1 + $0x14] sm:$0xf0] }
  0x11   :  { %1983 = vmatpush.bf16.msra.mxu1 %v2936_v45  ;;  %v3047_v2 = vld [vmem:[%s6510_s1 + $0x1a0] sm:$0xf]  ;;  %v4078_v3 = vld [vmem:[%s6510_s1 + $0x1a4] sm:$0xf0]  ;;  %v2984_v6 = vor.u32 %v4062_v1, %v2983_v0  ;;  %v2911_v9 = vld [vmem:[%s6510_s1 + $0x90] sm:$0xf]  ;;  %v2848_v17 = vor.u32 %v4028_v8, %v2847_v7 }
  0x12   :  { %2002 = vmatpush.bf16.msra.mxu2 %v3000_v46  ;;  %v3048_v10 = vor.u32 %v4078_v3, %v3047_v2  ;;  %v4044_v11 = vld [vmem:[%s6510_s1 + $0x94] sm:$0xf0]  ;;  %v2975_v12 = vld [vmem:[%s6510_s1 + $0x110] sm:$0xf]  ;;  %v2839_v16 = vld [vmem:[%s6510_s1] sm:$0xf] }
  0x13   :  { %2021 = vmatpush.bf16.msra.mxu3 %v3064_v50  ;;  %v4060_v13 = vld [vmem:[%s6510_s1 + $0x114] sm:$0xf0]  ;;  %v3039_v14 = vld [vmem:[%s6510_s1 + $0x190] sm:$0xf]  ;;  %v4026_v18 = vld [vmem:[%s6510_s1 + $0x4] sm:$0xf0]  ;;  %v2912_v21 = vor.u32 %v4044_v11, %v2911_v9 }
  0x14   :  { %1965 = vmatpush.bf16.msra.mxu0 %v2864_v56  ;;  %v4076_v15 = vld [vmem:[%s6510_s1 + $0x194] sm:$0xf0]  ;;  %v2903_v19 = vld [vmem:[%s6510_s1 + $0x80] sm:$0xf]  ;;  %v4042_v20 = vld [vmem:[%s6510_s1 + $0x84] sm:$0xf0]  ;;  %v2976_v22 = vor.u32 %v4060_v13, %v2975_v12  ;;  %v2840_v34 = vor.u32 %v4026_v18, %v2839_v16 }
  0x15   :  { %1984 = vmatpush.bf16.msra.mxu1 %v2928_v57  ;;  %v2967_v23 = vld [vmem:[%s6510_s1 + $0x100] sm:$0xf]  ;;  %v4058_v24 = vld [vmem:[%s6510_s1 + $0x104] sm:$0xf0]  ;;  %v3040_v26 = vor.u32 %v4076_v15, %v3039_v14  ;;  %v3989_v30 = vld [vmem:[%s6511_s0 + $0x4] sm:$0xf]  ;;  %v2904_v38 = vor.u32 %v4042_v20, %v2903_v19 }
  0x16   :  { %2003 = vmatpush.bf16.msra.mxu2 %v2992_v58  ;;  %v3031_v25 = vld [vmem:[%s6510_s1 + $0x180] sm:$0xf]  ;;  %v4074_v27 = vld [vmem:[%s6510_s1 + $0x184] sm:$0xf0]  ;;  %v2697_v31 = vld [vmem:[%s6511_s0 + $0x48] sm:$0xf0]  ;;  %v2968_v39 = vor.u32 %v4058_v24, %v2967_v23 }
  0x17   :  { %2022 = vmatpush.bf16.msra.mxu3 %v3056_v62  ;;  %v2695_v28 = vld [vmem:[%s6511_s0] sm:$0xf]  ;;  %v3998_v29 = vld [vmem:[%s6511_s0 + $0x44] sm:$0xf0]  ;;  %v3279_v32 = vld [vmem:[%s6510_s1 + $0x370] sm:$0xf]  ;;  %v3032_v43 = vor.u32 %v4074_v27, %v3031_v25  ;;  %v4586_v53 = vor.u32 %v3989_v30, %v2697_v31 }
  0x18   :  { %1966 = vmatpush.bf16.msra.mxu0 %v2856_v4  ;;  %v4136_v33 = vld [vmem:[%s6510_s1 + $0x374] sm:$0xf0]  ;;  %v2703_v35 = vld [vmem:[%s6511_s0 + $0x8] sm:$0xf]  ;;  %v3215_v36 = vld [vmem:[%s6510_s1 + $0x2f0] sm:$0xf]  ;;  %v4575_v48 = vor.u32 %v3998_v29, %v2695_v28 }
  0x19   :  { %1985 = vmatpush.bf16.msra.mxu1 %v2920_v5  ;;  %v4120_v37 = vld [vmem:[%s6510_s1 + $0x2f4] sm:$0xf0]  ;;  %v3999_v40 = vld [vmem:[%s6511_s0 + $0x4c] sm:$0xf0]  ;;  %v3990_v41 = vld [vmem:[%s6511_s0 + $0xc] sm:$0xf]  ;;  %v3280_v44 = vor.u32 %v4136_v33, %v3279_v32 }
  0x1a   :  { %2004 = vmatpush.bf16.msra.mxu2 %v2984_v6  ;;  %v2705_v42 = vld [vmem:[%s6511_s0 + $0x50] sm:$0xf0]  ;;  %v3151_v45 = vld [vmem:[%s6510_s1 + $0x270] sm:$0xf]  ;;  %v4104_v46 = vld [vmem:[%s6510_s1 + $0x274] sm:$0xf0]  ;;  %v3216_v49 = vor.u32 %v4120_v37, %v3215_v36  ;;  %v4588_v54 = vor.u32 %v3999_v40, %v2703_v35 }
  0x1b   :  { %2023 = vmatpush.bf16.msra.mxu3 %v3048_v10  ;;  %v3343_v47 = vld [vmem:[%s6510_s1 + $0x3f0] sm:$0xf]  ;;  %v4152_v50 = vld [vmem:[%s6510_s1 + $0x3f4] sm:$0xf0]  ;;  %v3271_v51 = vld [vmem:[%s6510_s1 + $0x360] sm:$0xf]  ;;  %v4596_v57 = vor.u32 %v3990_v41, %v2705_v42  ;;  %v3152_v58 = vor.u32 %v4104_v46, %v3151_v45 }
  0x1c   :  { %1967 = vmatpush.bf16.msra.mxu0 %v2848_v17  ;;  %v4134_v52 = vld [vmem:[%s6510_s1 + $0x364] sm:$0xf0]  ;;  %v3207_v55 = vld [vmem:[%s6510_s1 + $0x2e0] sm:$0xf]  ;;  %v3344_v59 = vor.u32 %v4152_v50, %v3343_v47  ;;  %v3263_v2 = vld [vmem:[%s6510_s1 + $0x350] sm:$0xf] }
  0x1d   :  { %1986 = vmatpush.bf16.msra.mxu1 %v2912_v21  ;;  %v4118_v56 = vld [vmem:[%s6510_s1 + $0x2e4] sm:$0xf0]  ;;  %v3272_v60 = vor.u32 %v4134_v52, %v3271_v51  ;;  %v3143_v61 = vld [vmem:[%s6510_s1 + $0x260] sm:$0xf]  ;;  %v4132_v3 = vld [vmem:[%s6510_s1 + $0x354] sm:$0xf0] }
  0x1e   :  { %2005 = vmatpush.bf16.msra.mxu2 %v2976_v22  ;;  %v4102_v62 = vld [vmem:[%s6510_s1 + $0x264] sm:$0xf0]  ;;  %v3335_v63 = vld [vmem:[%s6510_s1 + $0x3e0] sm:$0xf]  ;;  %v3208_v0 = vor.u32 %v4118_v56, %v3207_v55  ;;  %v3199_v4 = vld [vmem:[%s6510_s1 + $0x2d0] sm:$0xf]  ;;  %v3264_v8 = vor.u32 %v4132_v3, %v3263_v2 }
  0x1f   :  { %2024 = vmatpush.bf16.msra.mxu3 %v3040_v26  ;;  %v4150_v1 = vld [vmem:[%s6510_s1 + $0x3e4] sm:$0xf0]  ;;  %v4116_v5 = vld [vmem:[%s6510_s1 + $0x2d4] sm:$0xf0]  ;;  %v3144_v6 = vor.u32 %v4102_v62, %v3143_v61  ;;  %v3135_v9 = vld [vmem:[%s6510_s1 + $0x250] sm:$0xf] }
  0x20   :  { %1968 = vmatpush.bf16.msra.mxu0 %v2840_v34  ;;  %v3336_v7 = vor.u32 %v4150_v1, %v3335_v63  ;;  %v4100_v10 = vld [vmem:[%s6510_s1 + $0x254] sm:$0xf0]  ;;  %v3327_v11 = vld [vmem:[%s6510_s1 + $0x3d0] sm:$0xf]  ;;  %v3200_v12 = vor.u32 %v4116_v5, %v3199_v4  ;;  %v3255_v14 = vld [vmem:[%s6510_s1 + $0x340] sm:$0xf] }
  0x21   :  { %1987 = vmatpush.bf16.msra.mxu1 %v2904_v38  ;;  %v4148_v13 = vld [vmem:[%s6510_s1 + $0x3d4] sm:$0xf0]  ;;  %v4130_v15 = vld [vmem:[%s6510_s1 + $0x344] sm:$0xf0]  ;;  %v3191_v16 = vld [vmem:[%s6510_s1 + $0x2c0] sm:$0xf]  ;;  %v3136_v18 = vor.u32 %v4100_v10, %v3135_v9 }
  0x22   :  { %2006 = vmatpush.bf16.msra.mxu2 %v2968_v39  ;;  %v4114_v17 = vld [vmem:[%s6510_s1 + $0x2c4] sm:$0xf0]  ;;  %v3127_v19 = vld [vmem:[%s6510_s1 + $0x240] sm:$0xf]  ;;  %v3328_v22 = vor.u32 %v4148_v13, %v3327_v11  ;;  %v3256_v23 = vor.u32 %v4130_v15, %v3255_v14  ;;  %v2767_v25 = vld [vmem:[%s6511_s0 + $0x90] sm:$0xf] }
  0x23   :  { %2025 = vmatpush.bf16.msra.mxu3 %v3032_v43  ;;  %1969 = vmatmul.bf16.vlgmr.msra.gmra.mxu0 %v4575_v48  ;;  %v4098_v20 = vld [vmem:[%s6510_s1 + $0x244] sm:$0xf0]  ;;  %v3319_v21 = vld [vmem:[%s6510_s1 + $0x3c0] sm:$0xf]  ;;  %v4016_v26 = vld [vmem:[%s6511_s0 + $0xd4] sm:$0xf0]  ;;  %v3192_v27 = vor.u32 %v4114_v17, %v3191_v16 }
  0x24   :  { %1988 = vmatmul.bf16.vlgmr.msra.gmra.mxu1 %v4586_v53  ;;  %2037 = vmatpush.bf16.msrb.mxu0 %v3152_v58  ;;  %v4146_v24 = vld [vmem:[%s6510_s1 + $0x3c4] sm:$0xf0]  ;;  %v4007_v28 = vld [vmem:[%s6511_s0 + $0x94] sm:$0xf]  ;;  %v2769_v29 = vld [vmem:[%s6511_s0 + $0xd8] sm:$0xf0]  ;;  %v3128_v35 = vor.u32 %v4098_v20, %v3127_v19 }
  0x25   :  { %2056 = vmatpush.bf16.msrb.mxu1 %v3216_v49  ;;  %2007 = vmatmul.bf16.vlgmr.msra.gmra.mxu2 %v4588_v54  ;;  %v3247_v30 = vld [vmem:[%s6510_s1 + $0x330] sm:$0xf]  ;;  %v4128_v31 = vld [vmem:[%s6510_s1 + $0x334] sm:$0xf0]  ;;  %v4017_v36 = vld [vmem:[%s6511_s0 + $0xdc] sm:$0xf0]  ;;  %v3320_v39 = vor.u32 %v4146_v24, %v3319_v21  ;;  %v4718_v50 = vor.u32 %v4007_v28, %v2769_v29 }
  0x26   :  { %2075 = vmatpush.bf16.msrb.mxu2 %v3280_v44  ;;  %2026 = vmatmul.bf16.vlgmr.msra.gmra.mxu3 %v4596_v57  ;;  %v2775_v32 = vld [vmem:[%s6511_s0 + $0x98] sm:$0xf]  ;;  %v3183_v33 = vld [vmem:[%s6510_s1 + $0x2b0] sm:$0xf]  ;;  %v4008_v37 = vld [vmem:[%s6511_s0 + $0x9c] sm:$0xf]  ;;  %v3248_v40 = vor.u32 %v4128_v31, %v3247_v30  ;;  %v4707_v44 = vor.u32 %v4016_v26, %v2767_v25 }
  0x27   :  { %2094 = vmatpush.bf16.msrb.mxu3 %v3344_v59  ;;  %v4112_v34 = vld [vmem:[%s6510_s1 + $0x2b4] sm:$0xf0]  ;;  %v2777_v38 = vld [vmem:[%s6511_s0 + $0xe0] sm:$0xf0]  ;;  %v3119_v41 = vld [vmem:[%s6510_s1 + $0x230] sm:$0xf]  ;;  %v4720_v51 = vor.u32 %v4017_v36, %v2775_v32 }
  0x28   :  { %2038 = vmatpush.bf16.msrb.mxu0 %v3144_v6  ;;  %v4096_v42 = vld [vmem:[%s6510_s1 + $0x234] sm:$0xf0]  ;;  %v3311_v43 = vld [vmem:[%s6510_s1 + $0x3b0] sm:$0xf]  ;;  %v3184_v45 = vor.u32 %v4112_v34, %v3183_v33  ;;  %v3239_v47 = vld [vmem:[%s6510_s1 + $0x320] sm:$0xf]  ;;  %v4728_v56 = vor.u32 %v4008_v37, %v2777_v38 }
  0x29   :  { %2057 = vmatpush.bf16.msrb.mxu1 %v3208_v0  ;;  %v4144_v46 = vld [vmem:[%s6510_s1 + $0x3b4] sm:$0xf0]  ;;  %v4126_v49 = vld [vmem:[%s6510_s1 + $0x324] sm:$0xf0]  ;;  %v3175_v52 = vld [vmem:[%s6510_s1 + $0x2a0] sm:$0xf]  ;;  %v3120_v58 = vor.u32 %v4096_v42, %v3119_v41 }
  0x2a   :  { %2076 = vmatpush.bf16.msrb.mxu2 %v3272_v60  ;;  %v4110_v55 = vld [vmem:[%s6510_s1 + $0x2a4] sm:$0xf0]  ;;  %v3312_v59 = vor.u32 %v4144_v46, %v3311_v43  ;;  %v3240_v60 = vor.u32 %v4126_v49, %v3239_v47  ;;  %v3111_v61 = vld [vmem:[%s6510_s1 + $0x220] sm:$0xf]  ;;  %v3231_v2 = vld [vmem:[%s6510_s1 + $0x310] sm:$0xf] }
  0x2b   :  { %2095 = vmatpush.bf16.msrb.mxu3 %v3336_v7  ;;  %v4094_v62 = vld [vmem:[%s6510_s1 + $0x224] sm:$0xf0]  ;;  %v3303_v63 = vld [vmem:[%s6510_s1 + $0x3a0] sm:$0xf]  ;;  %v3176_v0 = vor.u32 %v4110_v55, %v3175_v52  ;;  %v4124_v3 = vld [vmem:[%s6510_s1 + $0x314] sm:$0xf0] }
  0x2c   :  { %2039 = vmatpush.bf16.msrb.mxu0 %v3136_v18  ;;  %v4142_v1 = vld [vmem:[%s6510_s1 + $0x3a4] sm:$0xf0]  ;;  %v3167_v4 = vld [vmem:[%s6510_s1 + $0x290] sm:$0xf]  ;;  %v4108_v5 = vld [vmem:[%s6510_s1 + $0x294] sm:$0xf0]  ;;  %v3112_v6 = vor.u32 %v4094_v62, %v3111_v61  ;;  %v3232_v9 = vor.u32 %v4124_v3, %v3231_v2 }
  0x2d   :  { %2058 = vmatpush.bf16.msrb.mxu1 %v3200_v12  ;;  %v3103_v7 = vld [vmem:[%s6510_s1 + $0x210] sm:$0xf]  ;;  %v4092_v10 = vld [vmem:[%s6510_s1 + $0x214] sm:$0xf0]  ;;  %v3168_v13 = vor.u32 %v4108_v5, %v3167_v4  ;;  %v3223_v14 = vld [vmem:[%s6510_s1 + $0x300] sm:$0xf] }
  0x2e   :  { %2077 = vmatpush.bf16.msrb.mxu2 %v3264_v8  ;;  %v3304_v8 = vor.u32 %v4142_v1, %v3303_v63  ;;  %v3295_v11 = vld [vmem:[%s6510_s1 + $0x390] sm:$0xf]  ;;  %v4140_v12 = vld [vmem:[%s6510_s1 + $0x394] sm:$0xf0]  ;;  %v4122_v15 = vld [vmem:[%s6510_s1 + $0x304] sm:$0xf0]  ;;  %v3104_v20 = vor.u32 %v4092_v10, %v3103_v7 }
  0x2f   :  { %2096 = vmatpush.bf16.msrb.mxu3 %v3328_v22  ;;  %v3159_v16 = vld [vmem:[%s6510_s1 + $0x280] sm:$0xf]  ;;  %v4106_v17 = vld [vmem:[%s6510_s1 + $0x284] sm:$0xf0]  ;;  %v3535_v18 = vld [vmem:[%s6510_s1 + $0x570] sm:$0xf]  ;;  %v3296_v24 = vor.u32 %v4140_v12, %v3295_v11  ;;  %v3224_v25 = vor.u32 %v4122_v15, %v3223_v14 }
  0x30   :  { %2040 = vmatpush.bf16.msrb.mxu0 %v3128_v35  ;;  %v4200_v19 = vld [vmem:[%s6510_s1 + $0x574] sm:$0xf0]  ;;  %v3095_v21 = vld [vmem:[%s6510_s1 + $0x200] sm:$0xf]  ;;  %v3471_v22 = vld [vmem:[%s6510_s1 + $0x4f0] sm:$0xf]  ;;  %v3160_v29 = vor.u32 %v4106_v17, %v3159_v16 }
  0x31   :  { %2059 = vmatpush.bf16.msrb.mxu1 %v3192_v27  ;;  %v4090_v26 = vld [vmem:[%s6510_s1 + $0x204] sm:$0xf0]  ;;  %v3287_v27 = vld [vmem:[%s6510_s1 + $0x380] sm:$0xf]  ;;  %v2711_v30 = vld [vmem:[%s6511_s0 + $0x10] sm:$0xf]  ;;  %v3536_v34 = vor.u32 %v4200_v19, %v3535_v18 }
  0x32   :  { %2078 = vmatpush.bf16.msrb.mxu2 %v3256_v23  ;;  %v4184_v23 = vld [vmem:[%s6510_s1 + $0x4f4] sm:$0xf0]  ;;  %v4138_v28 = vld [vmem:[%s6510_s1 + $0x384] sm:$0xf0]  ;;  %v3991_v32 = vld [vmem:[%s6511_s0 + $0x14] sm:$0xf]  ;;  %v3096_v42 = vor.u32 %v4090_v26, %v3095_v21 }
  0x33   :  { %2097 = vmatpush.bf16.msrb.mxu3 %v3320_v39  ;;  %1974 = vmatmul.bf16.gmra.mxu0 %v4707_v44  ;;  %v4000_v31 = vld [vmem:[%s6511_s0 + $0x54] sm:$0xf0]  ;;  %v2713_v33 = vld [vmem:[%s6511_s0 + $0x58] sm:$0xf0]  ;;  %v3407_v35 = vld [vmem:[%s6510_s1 + $0x470] sm:$0xf]  ;;  %v3472_v38 = vor.u32 %v4184_v23, %v3471_v22  ;;  %v3288_v47 = vor.u32 %v4138_v28, %v3287_v27 }
  0x34   :  { %1993 = vmatmul.bf16.gmra.mxu1 %v4718_v50  ;;  %2041 = vmatpush.bf16.msrb.mxu0 %v3120_v58  ;;  %v4168_v36 = vld [vmem:[%s6510_s1 + $0x474] sm:$0xf0]  ;;  %v3599_v37 = vld [vmem:[%s6510_s1 + $0x5f0] sm:$0xf]  ;;  %v4198_v41 = vld [vmem:[%s6510_s1 + $0x564] sm:$0xf0]  ;;  %v4865_v1 = vor.u32 %v3991_v32, %v2713_v33 }
  0x35   :  { %2060 = vmatpush.bf16.msrb.mxu1 %v3184_v45  ;;  %2012 = vmatmul.bf16.gmra.mxu2 %v4720_v51  ;;  %v4216_v39 = vld [vmem:[%s6510_s1 + $0x5f4] sm:$0xf0]  ;;  %v4001_v45 = vld [vmem:[%s6511_s0 + $0x5c] sm:$0xf0]  ;;  %v3992_v46 = vld [vmem:[%s6511_s0 + $0x1c] sm:$0xf]  ;;  %v3408_v52 = vor.u32 %v4168_v36, %v3407_v35 }
  0x36   :  { %2079 = vmatpush.bf16.msrb.mxu2 %v3248_v40  ;;  %2031 = vmatmul.bf16.gmra.mxu3 %v4728_v56  ;;  %v3527_v40 = vld [vmem:[%s6510_s1 + $0x560] sm:$0xf]  ;;  %v2719_v43 = vld [vmem:[%s6511_s0 + $0x18] sm:$0xf]  ;;  %v2721_v49 = vld [vmem:[%s6511_s0 + $0x60] sm:$0xf0] }
  0x37   :  { %2098 = vmatpush.bf16.msrb.mxu3 %v3312_v59  ;;  %v3399_v55 = vld [vmem:[%s6510_s1 + $0x460] sm:$0xf]  ;;  %v4166_v58 = vld [vmem:[%s6510_s1 + $0x464] sm:$0xf0]  ;;  %v3600_v59 = vor.u32 %v4216_v39, %v3599_v37  ;;  %v3519_v3 = vld [vmem:[%s6510_s1 + $0x550] sm:$0xf]  ;;  %v4876_v5 = vor.u32 %v4001_v45, %v2719_v43 }
  0x38   :  { %2042 = vmatpush.bf16.msrb.mxu0 %v3112_v6  ;;  %v3463_v61 = vld [vmem:[%s6510_s1 + $0x4e0] sm:$0xf]  ;;  %v4182_v62 = vld [vmem:[%s6510_s1 + $0x4e4] sm:$0xf0]  ;;  %v4196_v4 = vld [vmem:[%s6510_s1 + $0x554] sm:$0xf0]  ;;  %v4878_v6 = vor.u32 %v3992_v46, %v2721_v49  ;;  %v3400_v7 = vor.u32 %v4166_v58, %v3399_v55 }
  0x39   :  { %2061 = vmatpush.bf16.msrb.mxu1 %v3176_v0  ;;  %v3591_v63 = vld [vmem:[%s6510_s1 + $0x5e0] sm:$0xf]  ;;  %v4863_v0 = vor.u32 %v4000_v31, %v2711_v30  ;;  %v4214_v2 = vld [vmem:[%s6510_s1 + $0x5e4] sm:$0xf0]  ;;  %v4164_v10 = vld [vmem:[%s6510_s1 + $0x454] sm:$0xf0]  ;;  %v3520_v12 = vor.u32 %v4196_v4, %v3519_v3 }
  0x3a   :  { %2080 = vmatpush.bf16.msrb.mxu2 %v3240_v60  ;;  %v3528_v60 = vor.u32 %v4198_v41, %v3527_v40  ;;  %v3592_v11 = vor.u32 %v4214_v2, %v3591_v63  ;;  %v4180_v14 = vld [vmem:[%s6510_s1 + $0x4d4] sm:$0xf0]  ;;  %v3583_v15 = vld [vmem:[%s6510_s1 + $0x5d0] sm:$0xf]  ;;  %v3511_v17 = vld [vmem:[%s6510_s1 + $0x540] sm:$0xf] }
  0x3b   :  { %2099 = vmatpush.bf16.msrb.mxu3 %v3304_v8  ;;  %v3464_v8 = vor.u32 %v4182_v62, %v3463_v61  ;;  %v4212_v16 = vld [vmem:[%s6510_s1 + $0x5d4] sm:$0xf0]  ;;  %v4194_v18 = vld [vmem:[%s6510_s1 + $0x544] sm:$0xf0]  ;;  %v3383_v21 = vld [vmem:[%s6510_s1 + $0x440] sm:$0xf] }
  0x3c   :  { %2043 = vmatpush.bf16.msrb.mxu0 %v3104_v20  ;;  %v4162_v22 = vld [vmem:[%s6510_s1 + $0x444] sm:$0xf0]  ;;  %v3584_v23 = vor.u32 %v4212_v16, %v3583_v15  ;;  %v3575_v27 = vld [vmem:[%s6510_s1 + $0x5c0] sm:$0xf]  ;;  %v4192_v30 = vld [vmem:[%s6510_s1 + $0x534] sm:$0xf0] }
  0x3d   :  { %2062 = vmatpush.bf16.msrb.mxu1 %v3168_v13  ;;  %v3455_v13 = vld [vmem:[%s6510_s1 + $0x4d0] sm:$0xf]  ;;  %v4178_v26 = vld [vmem:[%s6510_s1 + $0x4c4] sm:$0xf0]  ;;  %v3384_v31 = vor.u32 %v4162_v22, %v3383_v21  ;;  %v2783_v36 = vld [vmem:[%s6511_s0 + $0xa0] sm:$0xf] }
  0x3e   :  { %2081 = vmatpush.bf16.msrb.mxu2 %v3232_v9  ;;  %v3391_v9 = vld [vmem:[%s6510_s1 + $0x450] sm:$0xf]  ;;  %v3456_v20 = vor.u32 %v4180_v14, %v3455_v13  ;;  %v4210_v28 = vld [vmem:[%s6510_s1 + $0x5c4] sm:$0xf0]  ;;  %v2785_v39 = vld [vmem:[%s6511_s0 + $0xe8] sm:$0xf0] }
  0x3f   :  { %2100 = vmatpush.bf16.msrb.mxu3 %v3296_v24  ;;  %v3392_v19 = vor.u32 %v4164_v10, %v3391_v9  ;;  %v3512_v24 = vor.u32 %v4194_v18, %v3511_v17  ;;  %v3375_v33 = vld [vmem:[%s6510_s1 + $0x430] sm:$0xf]  ;;  %v3576_v35 = vor.u32 %v4210_v28, %v3575_v27  ;;  %v4018_v37 = vld [vmem:[%s6511_s0 + $0xe4] sm:$0xf0]  ;;  %v4208_v45 = vld [vmem:[%s6510_s1 + $0x5b4] sm:$0xf0] }
  0x40   :  { %2044 = vmatpush.bf16.msrb.mxu0 %v3096_v42  ;;  %v3439_v41 = vld [vmem:[%s6510_s1 + $0x4b0] sm:$0xf]  ;;  %v4176_v42 = vld [vmem:[%s6510_s1 + $0x4b4] sm:$0xf0]  ;;  %v3495_v46 = vld [vmem:[%s6510_s1 + $0x520] sm:$0xf] }
  0x41   :  { %2063 = vmatpush.bf16.msrb.mxu1 %v3160_v29  ;;  %v3503_v29 = vld [vmem:[%s6510_s1 + $0x530] sm:$0xf]  ;;  %v2791_v49 = vld [vmem:[%s6511_s0 + $0xa8] sm:$0xf]  ;;  %v4010_v55 = vld [vmem:[%s6511_s0 + $0xac] sm:$0xf] }
  0x42   :  { %2082 = vmatpush.bf16.msrb.mxu2 %v3224_v25  ;;  %v3447_v25 = vld [vmem:[%s6510_s1 + $0x4c0] sm:$0xf]  ;;  %v3504_v40 = vor.u32 %v4192_v30, %v3503_v29  ;;  %v3567_v43 = vld [vmem:[%s6510_s1 + $0x5b0] sm:$0xf]  ;;  %v2793_v58 = vld [vmem:[%s6511_s0 + $0xf0] sm:$0xf0] }
  0x43   :  { %2101 = vmatpush.bf16.msrb.mxu3 %v3288_v47  ;;  %2045 = vmatmul.bf16.vlgmr.msrb.gmra.mxu0 %v4863_v0  ;;  %v3448_v32 = vor.u32 %v4178_v26, %v3447_v25  ;;  %v4190_v47 = vld [vmem:[%s6510_s1 + $0x524] sm:$0xf0]  ;;  %v3367_v61 = vld [vmem:[%s6510_s1 + $0x420] sm:$0xf]  ;;  %v3568_v63 = vor.u32 %v4208_v45, %v3567_v43  ;;  %v5010_v14 = vor.u32 %v4010_v55, %v2793_v58  ;;  %v3359_v17 = vld [vmem:[%s6510_s1 + $0x410] sm:$0xf] }
  0x44   :  { %2113 = vmatpush.bf16.msra.mxu0 %v3408_v52  ;;  %2064 = vmatmul.bf16.vlgmr.msrb.gmra.mxu1 %v4865_v1  ;;  %v4019_v52 = vld [vmem:[%s6511_s0 + $0xec] sm:$0xf0]  ;;  %v4158_v62 = vld [vmem:[%s6510_s1 + $0x424] sm:$0xf0]  ;;  %v3496_v2 = vor.u32 %v4190_v47, %v3495_v46  ;;  %v3431_v3 = vld [vmem:[%s6510_s1 + $0x4a0] sm:$0xf] }
  0x45   :  { %2132 = vmatpush.bf16.msra.mxu1 %v3472_v38  ;;  %2083 = vmatmul.bf16.vlgmr.msrb.gmra.mxu2 %v4876_v5  ;;  %v4009_v38 = vld [vmem:[%s6511_s0 + $0xa4] sm:$0xf]  ;;  %v4174_v4 = vld [vmem:[%s6510_s1 + $0x4a4] sm:$0xf0]  ;;  %v5008_v13 = vor.u32 %v4019_v52, %v2791_v49  ;;  %v3368_v15 = vor.u32 %v4158_v62, %v3367_v61  ;;  %v4156_v18 = vld [vmem:[%s6510_s1 + $0x414] sm:$0xf0] }
  0x46   :  { %2151 = vmatpush.bf16.msra.mxu2 %v3536_v34  ;;  %2102 = vmatmul.bf16.vlgmr.msrb.gmra.mxu3 %v4878_v6  ;;  %v4160_v34 = vld [vmem:[%s6510_s1 + $0x434] sm:$0xf0]  ;;  %v4997_v9 = vor.u32 %v4009_v38, %v2785_v39  ;;  %v4206_v10 = vld [vmem:[%s6510_s1 + $0x5a4] sm:$0xf0]  ;;  %v3432_v16 = vor.u32 %v4174_v4, %v3431_v3  ;;  %v3423_v21 = vld [vmem:[%s6510_s1 + $0x490] sm:$0xf]  ;;  %v3360_v29 = vor.u32 %v4156_v18, %v3359_v17 }
  0x47   :  { %2170 = vmatpush.bf16.msra.mxu3 %v3600_v59  ;;  %v3376_v59 = vor.u32 %v4160_v34, %v3375_v33  ;;  %v4172_v22 = vld [vmem:[%s6510_s1 + $0x494] sm:$0xf0]  ;;  %v3479_v25 = vld [vmem:[%s6510_s1 + $0x500] sm:$0xf]  ;;  %v4186_v26 = vld [vmem:[%s6510_s1 + $0x504] sm:$0xf0] }
  0x48   :  { %2114 = vmatpush.bf16.msra.mxu0 %v3400_v7  ;;  %v3559_v7 = vld [vmem:[%s6510_s1 + $0x5a0] sm:$0xf]  ;;  %v3791_v27 = vld [vmem:[%s6510_s1 + $0x770] sm:$0xf]  ;;  %v4264_v28 = vld [vmem:[%s6510_s1 + $0x774] sm:$0xf0]  ;;  %v3424_v30 = vor.u32 %v4172_v22, %v3423_v21 }
  0x49   :  { %2133 = vmatpush.bf16.msra.mxu1 %v3464_v8  ;;  %v4995_v8 = vor.u32 %v4018_v37, %v2783_v36  ;;  %v3415_v33 = vld [vmem:[%s6510_s1 + $0x480] sm:$0xf]  ;;  %v4170_v36 = vld [vmem:[%s6510_s1 + $0x484] sm:$0xf0]  ;;  %v3792_v39 = vor.u32 %v4264_v28, %v3791_v27  ;;  %v4248_v43 = vld [vmem:[%s6510_s1 + $0x6f4] sm:$0xf0] }
  0x4a   :  { %2152 = vmatpush.bf16.msra.mxu2 %v3528_v60  ;;  %v3440_v60 = vor.u32 %v4176_v42, %v3439_v41  ;;  %v3543_v37 = vld [vmem:[%s6510_s1 + $0x580] sm:$0xf]  ;;  %v4202_v38 = vld [vmem:[%s6510_s1 + $0x584] sm:$0xf0]  ;;  %v4232_v41 = vld [vmem:[%s6510_s1 + $0x674] sm:$0xf0]  ;;  %v3416_v49 = vor.u32 %v4170_v36, %v3415_v33 }
  0x4b   :  { %2171 = vmatpush.bf16.msra.mxu3 %v3592_v11  ;;  %v3487_v11 = vld [vmem:[%s6510_s1 + $0x510] sm:$0xf]  ;;  %v4280_v46 = vld [vmem:[%s6510_s1 + $0x7f4] sm:$0xf0]  ;;  %v3783_v52 = vld [vmem:[%s6510_s1 + $0x760] sm:$0xf]  ;;  %v3544_v58 = vor.u32 %v4202_v38, %v3543_v37 }
  0x4c   :  { %2115 = vmatpush.bf16.msra.mxu0 %v3392_v19  ;;  %v3560_v19 = vor.u32 %v4206_v10, %v3559_v7  ;;  %v3727_v42 = vld [vmem:[%s6510_s1 + $0x6f0] sm:$0xf]  ;;  %v4262_v55 = vld [vmem:[%s6510_s1 + $0x764] sm:$0xf0]  ;;  %v3993_v61 = vld [vmem:[%s6511_s0 + $0x24] sm:$0xf] }
  0x4d   :  { %2134 = vmatpush.bf16.msra.mxu1 %v3456_v20  ;;  %v3855_v45 = vld [vmem:[%s6510_s1 + $0x7f0] sm:$0xf]  ;;  %v3655_v4 = vld [vmem:[%s6510_s1 + $0x660] sm:$0xf]  ;;  %v4230_v7 = vld [vmem:[%s6510_s1 + $0x664] sm:$0xf0] }
  0x4e   :  { %2153 = vmatpush.bf16.msra.mxu2 %v3520_v12  ;;  %v4188_v12 = vld [vmem:[%s6510_s1 + $0x514] sm:$0xf0]  ;;  %v3856_v3 = vor.u32 %v4280_v46, %v3855_v45  ;;  %v2735_v10 = vld [vmem:[%s6511_s0 + $0x28] sm:$0xf]  ;;  %v3719_v17 = vld [vmem:[%s6510_s1 + $0x6e0] sm:$0xf] }
  0x4f   :  { %2172 = vmatpush.bf16.msra.mxu3 %v3584_v23  ;;  %v3488_v20 = vor.u32 %v4188_v12, %v3487_v11  ;;  %v3551_v23 = vld [vmem:[%s6510_s1 + $0x590] sm:$0xf]  ;;  %v3994_v12 = vld [vmem:[%s6511_s0 + $0x2c] sm:$0xf]  ;;  %v4246_v18 = vld [vmem:[%s6510_s1 + $0x6e4] sm:$0xf0] }
  0x50   :  { %2116 = vmatpush.bf16.msra.mxu0 %v3384_v31  ;;  %v3351_v31 = vld [vmem:[%s6510_s1 + $0x400] sm:$0xf]  ;;  %v4003_v11 = vld [vmem:[%s6511_s0 + $0x6c] sm:$0xf0]  ;;  %v4278_v21 = vld [vmem:[%s6510_s1 + $0x7e4] sm:$0xf0] }
  0x51   :  { %2135 = vmatpush.bf16.msra.mxu1 %v3448_v32  ;;  %v4154_v32 = vld [vmem:[%s6510_s1 + $0x404] sm:$0xf0]  ;;  %v3775_v22 = vld [vmem:[%s6510_s1 + $0x750] sm:$0xf]  ;;  %v4228_v27 = vld [vmem:[%s6510_s1 + $0x654] sm:$0xf0]  ;;  %v5146_v28 = vor.u32 %v4003_v11, %v2735_v10 }
  0x52   :  { %2154 = vmatpush.bf16.msra.mxu2 %v3512_v24  ;;  %v4204_v24 = vld [vmem:[%s6510_s1 + $0x594] sm:$0xf0]  ;;  %v3352_v47 = vor.u32 %v4154_v32, %v3351_v31  ;;  %v3711_v32 = vld [vmem:[%s6510_s1 + $0x6d0] sm:$0xf]  ;;  %v3767_v38 = vld [vmem:[%s6510_s1 + $0x740] sm:$0xf] }
  0x53   :  { %2173 = vmatpush.bf16.msra.mxu3 %v3576_v35  ;;  %2050 = vmatmul.bf16.gmra.mxu0 %v4995_v8  ;;  %v3552_v34 = vor.u32 %v4204_v24, %v3551_v23  ;;  %v3480_v35 = vor.u32 %v4186_v26, %v3479_v25  ;;  %v4260_v25 = vld [vmem:[%s6510_s1 + $0x754] sm:$0xf0]  ;;  %v3647_v26 = vld [vmem:[%s6510_s1 + $0x650] sm:$0xf]  ;;  %v3703_v45 = vld [vmem:[%s6510_s1 + $0x6c0] sm:$0xf] }
  0x54   :  { %2117 = vmatpush.bf16.msra.mxu0 %v3376_v59  ;;  %2069 = vmatmul.bf16.gmra.mxu1 %v4997_v9  ;;  %v2727_v59 = vld [vmem:[%s6511_s0 + $0x20] sm:$0xf]  ;;  %v4244_v33 = vld [vmem:[%s6510_s1 + $0x6d4] sm:$0xf0]  ;;  %v3839_v36 = vld [vmem:[%s6510_s1 + $0x7d0] sm:$0xf] }
  0x55   :  { %2136 = vmatpush.bf16.msra.mxu1 %v3440_v60  ;;  %2088 = vmatmul.bf16.gmra.mxu2 %v5008_v13  ;;  %v4002_v60 = vld [vmem:[%s6511_s0 + $0x64] sm:$0xf0]  ;;  %v4276_v37 = vld [vmem:[%s6510_s1 + $0x7d4] sm:$0xf0]  ;;  %v4011_v10 = vld [vmem:[%s6511_s0 + $0xb4] sm:$0xf] }
  0x56   :  { %2155 = vmatpush.bf16.msra.mxu2 %v3504_v40  ;;  %2107 = vmatmul.bf16.gmra.mxu3 %v5010_v14  ;;  %v3663_v40 = vld [vmem:[%s6510_s1 + $0x670] sm:$0xf]  ;;  %v5133_v23 = vor.u32 %v4002_v60, %v2727_v59  ;;  %v4242_v46 = vld [vmem:[%s6510_s1 + $0x6c4] sm:$0xf0]  ;;  %v4256_v59 = vld [vmem:[%s6510_s1 + $0x734] sm:$0xf0] }
  0x57   :  { %2174 = vmatpush.bf16.msra.mxu3 %v3568_v63  ;;  %v3664_v62 = vor.u32 %v4232_v41, %v3663_v40  ;;  %v2729_v63 = vld [vmem:[%s6511_s0 + $0x68] sm:$0xf0]  ;;  %v3639_v40 = vld [vmem:[%s6510_s1 + $0x640] sm:$0xf]  ;;  %v4226_v41 = vld [vmem:[%s6510_s1 + $0x644] sm:$0xf0] }
  0x58   :  { %2118 = vmatpush.bf16.msra.mxu0 %v3368_v15  ;;  %v3784_v15 = vor.u32 %v4262_v55, %v3783_v52  ;;  %v5135_v24 = vor.u32 %v3993_v61, %v2729_v63  ;;  %v3831_v52 = vld [vmem:[%s6510_s1 + $0x7c0] sm:$0xf]  ;;  %v4274_v55 = vld [vmem:[%s6510_s1 + $0x7c4] sm:$0xf0]  ;;  %v3631_v60 = vld [vmem:[%s6510_s1 + $0x630] sm:$0xf] }
  0x59   :  { %2137 = vmatpush.bf16.msra.mxu1 %v3432_v16  ;;  %v2737_v16 = vld [vmem:[%s6511_s0 + $0x70] sm:$0xf0]  ;;  %v4224_v61 = vld [vmem:[%s6510_s1 + $0x634] sm:$0xf0]  ;;  %v3832_v63 = vor.u32 %v4274_v55, %v3831_v52  ;;  %v2801_v11 = vld [vmem:[%s6511_s0 + $0xf8] sm:$0xf0] }
  0x5a   :  { %2156 = vmatpush.bf16.msra.mxu2 %v3496_v2  ;;  %v3728_v2 = vor.u32 %v4248_v43, %v3727_v42  ;;  %v3712_v42 = vor.u32 %v4244_v33, %v3711_v32  ;;  %v3840_v43 = vor.u32 %v4276_v37, %v3839_v36  ;;  %v3687_v32 = vld [vmem:[%s6510_s1 + $0x6a0] sm:$0xf]  ;;  %v4238_v33 = vld [vmem:[%s6510_s1 + $0x6a4] sm:$0xf0]  ;;  %v3679_v52 = vld [vmem:[%s6510_s1 + $0x690] sm:$0xf] }
  0x5b   :  { %2175 = vmatpush.bf16.msra.mxu3 %v3560_v19  ;;  %v3656_v19 = vor.u32 %v4230_v7, %v3655_v4  ;;  %v2799_v4 = vld [vmem:[%s6511_s0 + $0xb0] sm:$0xf]  ;;  %v4020_v7 = vld [vmem:[%s6511_s0 + $0xf4] sm:$0xf0]  ;;  %v3815_v36 = vld [vmem:[%s6510_s1 + $0x7a0] sm:$0xf] }
  0x5c   :  { %2119 = vmatpush.bf16.msra.mxu0 %v3360_v29  ;;  %v5148_v29 = vor.u32 %v3994_v12, %v2737_v16  ;;  %v3823_v16 = vld [vmem:[%s6510_s1 + $0x7b0] sm:$0xf]  ;;  %v4270_v37 = vld [vmem:[%s6510_s1 + $0x7a4] sm:$0xf0]  ;;  %v4236_v55 = vld [vmem:[%s6510_s1 + $0x694] sm:$0xf0] }
  0x5d   :  { %2138 = vmatpush.bf16.msra.mxu1 %v3424_v30  ;;  %v3720_v30 = vor.u32 %v4246_v18, %v3719_v17  ;;  %v4272_v17 = vld [vmem:[%s6510_s1 + $0x7b4] sm:$0xf0]  ;;  %v3751_v18 = vld [vmem:[%s6510_s1 + $0x720] sm:$0xf] }
  0x5e   :  { %2157 = vmatpush.bf16.msra.mxu2 %v3488_v20  ;;  %v3847_v20 = vld [vmem:[%s6510_s1 + $0x7e0] sm:$0xf] }
  0x5f   :  { %2176 = vmatpush.bf16.msra.mxu3 %v3552_v34  ;;  %v3848_v31 = vor.u32 %v4278_v21, %v3847_v20  ;;  %v3776_v34 = vor.u32 %v4260_v25, %v3775_v22  ;;  %v3623_v20 = vld [vmem:[%s6510_s1 + $0x620] sm:$0xf]  ;;  %v4222_v21 = vld [vmem:[%s6510_s1 + $0x624] sm:$0xf0]  ;;  %v2807_v22 = vld [vmem:[%s6511_s0 + $0xb8] sm:$0xf] }
  0x60   :  { %2120 = vmatpush.bf16.msra.mxu0 %v3352_v47  ;;  %v4021_v25 = vld [vmem:[%s6511_s0 + $0xfc] sm:$0xf0] }
  0x61   :  { %2139 = vmatpush.bf16.msra.mxu1 %v3416_v49  ;;  %v3640_v49 = vor.u32 %v4226_v41, %v3639_v40  ;;  %v5267_v40 = vor.u32 %v4011_v10, %v2801_v11  ;;  %v4252_v41 = vld [vmem:[%s6510_s1 + $0x714] sm:$0xf0]  ;;  %v3919_v10 = vld [vmem:[%s6510_s1 + $0x870] sm:$0xf] }
  0x62   :  { %2158 = vmatpush.bf16.msra.mxu2 %v3480_v35  ;;  %v3648_v35 = vor.u32 %v4228_v27, %v3647_v26  ;;  %v4012_v26 = vld [vmem:[%s6511_s0 + $0xbc] sm:$0xf]  ;;  %v2809_v27 = vld [vmem:[%s6511_s0 + $0x100] sm:$0xf0]  ;;  %v4296_v11 = vld [vmem:[%s6510_s1 + $0x874] sm:$0xf0] }
  0x63   :  { %2177 = vmatpush.bf16.msra.mxu3 %v3544_v58  ;;  %2121 = vmatmul.bf16.vlgmr.msra.gmra.mxu0 %v5133_v23  ;;  %v3759_v58 = vld [vmem:[%s6510_s1 + $0x730] sm:$0xf] }
  0x64   :  { %2189 = vmatpush.bf16.msrb.mxu0 %v3664_v62  ;;  %2140 = vmatmul.bf16.vlgmr.msra.gmra.mxu1 %v5135_v24  ;;  %v3704_v62 = vor.u32 %v4242_v46, %v3703_v45  ;;  %v3760_v12 = vor.u32 %v4256_v59, %v3759_v58  ;;  %v5278_v45 = vor.u32 %v4021_v25, %v2807_v22  ;;  %v3807_v58 = vld [vmem:[%s6510_s1 + $0x790] sm:$0xf]  ;;  %v4312_v25 = vld [vmem:[%s6510_s1 + $0x8f4] sm:$0xf0] }
  0x65   :  { %2208 = vmatpush.bf16.msrb.mxu1 %v3728_v2  ;;  %2159 = vmatmul.bf16.vlgmr.msra.gmra.mxu2 %v5146_v28  ;;  %v3695_v2 = vld [vmem:[%s6510_s1 + $0x6b0] sm:$0xf]  ;;  %v5280_v46 = vor.u32 %v4012_v26, %v2809_v27  ;;  %v3920_v27 = vor.u32 %v4296_v11, %v3919_v10 }
  0x66   :  { %2227 = vmatpush.bf16.msrb.mxu2 %v3792_v39  ;;  %v4258_v39 = vld [vmem:[%s6510_s1 + $0x744] sm:$0xf0]  ;;  %2178 = vmatmul.bf16.vlgmr.msra.gmra.mxu3 %v5148_v29  ;;  %v3983_v22 = vld [vmem:[%s6510_s1 + $0x8f0] sm:$0xf] }
  0x67   :  { %2246 = vmatpush.bf16.msrb.mxu3 %v3856_v3  ;;  %v3768_v47 = vor.u32 %v4258_v39, %v3767_v38  ;;  %v4240_v3 = vld [vmem:[%s6510_s1 + $0x6b4] sm:$0xf0]  ;;  %v3743_v38 = vld [vmem:[%s6510_s1 + $0x710] sm:$0xf]  ;;  %v5265_v39 = vor.u32 %v4020_v7, %v2799_v4  ;;  %v4039_v4 = vld [vmem:[%s6510_s1 + $0x74] sm:$0xf] }
  0x68   :  { %2190 = vmatpush.bf16.msrb.mxu0 %v3656_v19  ;;  %v4254_v19 = vld [vmem:[%s6510_s1 + $0x724] sm:$0xf0]  ;;  %v3744_v59 = vor.u32 %v4252_v41, %v3743_v38  ;;  %v2897_v7 = vld [vmem:[%s6510_s1 + $0x78] sm:$0xf0]  ;;  %v2743_v38 = vld [vmem:[%s6511_s0 + $0x30] sm:$0xf] }
  0x69   :  { %2209 = vmatpush.bf16.msrb.mxu1 %v3720_v30  ;;  %v3696_v30 = vor.u32 %v4240_v3, %v3695_v2  ;;  %v3607_v2 = vld [vmem:[%s6510_s1 + $0x600] sm:$0xf]  ;;  %v4218_v3 = vld [vmem:[%s6510_s1 + $0x604] sm:$0xf0]  ;;  %v2900_v26 = vor.u32 %v4039_v4, %v2897_v7  ;;  %v4004_v41 = vld [vmem:[%s6511_s0 + $0x74] sm:$0xf0] }
  0x6a   :  { %2228 = vmatpush.bf16.msrb.mxu2 %v3784_v15  ;;  %v3632_v15 = vor.u32 %v4224_v61, %v3631_v60  ;;  %v4268_v61 = vld [vmem:[%s6510_s1 + $0x794] sm:$0xf0]  ;;  %v4035_v4 = vld [vmem:[%s6510_s1 + $0x54] sm:$0xf]  ;;  %v2881_v7 = vld [vmem:[%s6510_s1 + $0x58] sm:$0xf0] }
  0x6b   :  { %2247 = vmatpush.bf16.msrb.mxu3 %v3848_v31  ;;  %v3824_v31 = vor.u32 %v4272_v17, %v3823_v16  ;;  %v3671_v16 = vld [vmem:[%s6510_s1 + $0x680] sm:$0xf]  ;;  %v4234_v17 = vld [vmem:[%s6510_s1 + $0x684] sm:$0xf0] }
  0x6c   :  { %2191 = vmatpush.bf16.msrb.mxu0 %v3648_v35  ;;  %v3624_v35 = vor.u32 %v4222_v21, %v3623_v20  ;;  %v3608_v20 = vor.u32 %v4218_v3, %v3607_v2  ;;  %v4266_v21 = vld [vmem:[%s6510_s1 + $0x784] sm:$0xf0]  ;;  %v3996_v2 = vld [vmem:[%s6511_s0 + $0x3c] sm:$0xf]  ;;  %v2753_v3 = vld [vmem:[%s6511_s0 + $0x80] sm:$0xf0] }
  0x6d   :  { %2210 = vmatpush.bf16.msrb.mxu1 %v3712_v42  ;;  %v3615_v42 = vld [vmem:[%s6510_s1 + $0x610] sm:$0xf] }
  0x6e   :  { %2229 = vmatpush.bf16.msrb.mxu2 %v3776_v34  ;;  %v3752_v34 = vor.u32 %v4254_v19, %v3751_v18  ;;  %v3799_v18 = vld [vmem:[%s6510_s1 + $0x780] sm:$0xf] }
  0x6f   :  { %2248 = vmatpush.bf16.msrb.mxu3 %v3840_v43  ;;  %v4220_v43 = vld [vmem:[%s6510_s1 + $0x614] sm:$0xf0] }
  0x70   :  { %2192 = vmatpush.bf16.msrb.mxu0 %v3640_v49  ;;  %v3816_v49 = vor.u32 %v4270_v37, %v3815_v36  ;;  %v3616_v60 = vor.u32 %v4220_v43, %v3615_v42  ;;  %v3672_v36 = vor.u32 %v4234_v17, %v3671_v16  ;;  %v3800_v37 = vor.u32 %v4266_v21, %v3799_v18  ;;  %v3995_v42 = vld [vmem:[%s6511_s0 + $0x34] sm:$0xf]  ;;  %v2745_v43 = vld [vmem:[%s6511_s0 + $0x78] sm:$0xf0]  ;;  %v3967_v16 = vld [vmem:[%s6510_s1 + $0x8d0] sm:$0xf] }
  0x71   :  { %2211 = vmatpush.bf16.msrb.mxu1 %v3704_v62  ;;  %v3735_v62 = vld [vmem:[%s6510_s1 + $0x700] sm:$0xf]  ;;  %v5409_v17 = vor.u32 %v4004_v41, %v2743_v38  ;;  %v5411_v18 = vor.u32 %v3995_v42, %v2745_v43  ;;  %v2945_v21 = vld [vmem:[%s6510_s1 + $0xd8] sm:$0xf0]  ;;  %v4049_v38 = vld [vmem:[%s6510_s1 + $0xc4] sm:$0xf] }
  0x72   :  { %2230 = vmatpush.bf16.msrb.mxu2 %v3768_v47  ;;  %v3688_v47 = vor.u32 %v4238_v33, %v3687_v32  ;;  %v4037_v32 = vld [vmem:[%s6510_s1 + $0x64] sm:$0xf]  ;;  %v2889_v33 = vld [vmem:[%s6510_s1 + $0x68] sm:$0xf0] }
  0x73   :  { %2249 = vmatpush.bf16.msrb.mxu3 %v3832_v63  ;;  %v4250_v63 = vld [vmem:[%s6510_s1 + $0x704] sm:$0xf0]  ;;  %2126 = vmatmul.bf16.gmra.mxu0 %v5265_v39  ;;  %v2937_v41 = vld [vmem:[%s6510_s1 + $0xc8] sm:$0xf0] }
  0x74   :  { %2193 = vmatpush.bf16.msrb.mxu0 %v3632_v15  ;;  %2145 = vmatmul.bf16.gmra.mxu1 %v5267_v40  ;;  %v3808_v15 = vor.u32 %v4268_v61, %v3807_v58  ;;  %v3736_v19 = vor.u32 %v4250_v63, %v3735_v62  ;;  %v2953_v61 = vld [vmem:[%s6510_s1 + $0xe8] sm:$0xf0]  ;;  %v2751_v62 = vld [vmem:[%s6511_s0 + $0x38] sm:$0xf]  ;;  %v4005_v63 = vld [vmem:[%s6511_s0 + $0x7c] sm:$0xf0] }
  0x75   :  { %2212 = vmatpush.bf16.msrb.mxu1 %v3696_v30  ;;  %2164 = vmatmul.bf16.gmra.mxu2 %v5278_v45  ;;  %v4055_v30 = vld [vmem:[%s6510_s1 + $0xf4] sm:$0xf] }
  0x76   :  { %2231 = vmatpush.bf16.msrb.mxu2 %v3760_v12  ;;  %2183 = vmatmul.bf16.gmra.mxu3 %v5280_v46  ;;  %v3680_v12 = vor.u32 %v4236_v55, %v3679_v52  ;;  %v3975_v52 = vld [vmem:[%s6510_s1 + $0x8e0] sm:$0xf]  ;;  %v2892_v55 = vor.u32 %v4037_v32, %v2889_v33 }
  0x77   :  { %2250 = vmatpush.bf16.msrb.mxu3 %v3824_v31  ;;  %v2961_v31 = vld [vmem:[%s6510_s1 + $0xf8] sm:$0xf0] }
  0x78   :  { %2194 = vmatpush.bf16.msrb.mxu0 %v3624_v35  ;;  %v4294_v35 = vld [vmem:[%s6510_s1 + $0x864] sm:$0xf0] }
  0x79   :  { %2213 = vmatpush.bf16.msrb.mxu1 %v3688_v47  ;;  %v3984_v47 = vor.u32 %v4312_v25, %v3983_v22  ;;  %v5422_v22 = vor.u32 %v4005_v63, %v2751_v62  ;;  %v5424_v25 = vor.u32 %v3996_v2, %v2753_v3  ;;  %v4047_v62 = vld [vmem:[%s6510_s1 + $0xb4] sm:$0xf]  ;;  %v2929_v63 = vld [vmem:[%s6510_s1 + $0xb8] sm:$0xf0] }
  0x7a   :  { %2232 = vmatpush.bf16.msrb.mxu2 %v3752_v34  ;;  %v3911_v34 = vld [vmem:[%s6510_s1 + $0x860] sm:$0xf] }
  0x7b   :  { %2251 = vmatpush.bf16.msrb.mxu3 %v3816_v49  ;;  %v2964_v49 = vor.u32 %v4055_v30, %v2961_v31  ;;  %v3912_v58 = vor.u32 %v4294_v35, %v3911_v34  ;;  %v4033_v30 = vld [vmem:[%s6510_s1 + $0x44] sm:$0xf]  ;;  %v2873_v31 = vld [vmem:[%s6510_s1 + $0x48] sm:$0xf0]  ;;  %v3895_v34 = vld [vmem:[%s6510_s1 + $0x840] sm:$0xf] }
  0x7c   :  { %2195 = vmatpush.bf16.msrb.mxu0 %v3616_v60  ;;  %v4053_v60 = vld [vmem:[%s6510_s1 + $0xe4] sm:$0xf]  ;;  %v4290_v35 = vld [vmem:[%s6510_s1 + $0x844] sm:$0xf0]  ;;  %v2876_v42 = vor.u32 %v4033_v30, %v2873_v31  ;;  %v2921_v31 = vld [vmem:[%s6510_s1 + $0xa8] sm:$0xf0] }
  0x7d   :  { %2214 = vmatpush.bf16.msrb.mxu1 %v3680_v12  ;;  %v2956_v11 = vor.u32 %v4053_v60, %v2953_v61  ;;  %v3903_v12 = vld [vmem:[%s6510_s1 + $0x850] sm:$0xf]  ;;  %v3896_v43 = vor.u32 %v4290_v35, %v3895_v34  ;;  %v4304_v61 = vld [vmem:[%s6510_s1 + $0x8b4] sm:$0xf0]  ;;  %v4045_v30 = vld [vmem:[%s6510_s1 + $0xa4] sm:$0xf] }
  0x7e   :  { %2233 = vmatpush.bf16.msrb.mxu2 %v3744_v59  ;;  %v4310_v59 = vld [vmem:[%s6510_s1 + $0x8e4] sm:$0xf0]  ;;  %v3951_v60 = vld [vmem:[%s6510_s1 + $0x8b0] sm:$0xf]  ;;  %v4014_v34 = vld [vmem:[%s6511_s0 + $0xcc] sm:$0xf] }
  0x7f   :  { %2252 = vmatpush.bf16.msrb.mxu3 %v3808_v15  ;;  %v3976_v10 = vor.u32 %v4310_v59, %v3975_v52  ;;  %v4292_v15 = vld [vmem:[%s6510_s1 + $0x854] sm:$0xf0]  ;;  %v2825_v35 = vld [vmem:[%s6511_s0 + $0x110] sm:$0xf0] }
  0x80   :  { %2196 = vmatpush.bf16.msrb.mxu0 %v3608_v20  ;;  %v4051_v20 = vld [vmem:[%s6510_s1 + $0xd4] sm:$0xf]  ;;  %v4288_v59 = vld [vmem:[%s6510_s1 + $0x834] sm:$0xf0] }
  0x81   :  { %2215 = vmatpush.bf16.msrb.mxu1 %v3672_v36  ;;  %v2948_v33 = vor.u32 %v4051_v20, %v2945_v21  ;;  %v3959_v36 = vld [vmem:[%s6510_s1 + $0x8c0] sm:$0xf]  ;;  %v4286_v21 = vld [vmem:[%s6510_s1 + $0x824] sm:$0xf0] }
  0x82   :  { %2234 = vmatpush.bf16.msrb.mxu2 %v3736_v19  ;;  %v4308_v19 = vld [vmem:[%s6510_s1 + $0x8d4] sm:$0xf0]  ;;  %v3879_v20 = vld [vmem:[%s6510_s1 + $0x820] sm:$0xf] }
  0x83   :  { %2253 = vmatpush.bf16.msrb.mxu3 %v3800_v37  ;;  %v3968_v32 = vor.u32 %v4308_v19, %v3967_v16  ;;  %2197 = vmatmul.bf16.vlgmr.msrb.gmra.mxu0 %v5409_v17  ;;  %v4306_v37 = vld [vmem:[%s6510_s1 + $0x8c4] sm:$0xf0]  ;;  %v3952_v16 = vor.u32 %v4304_v61, %v3951_v60  ;;  %v2932_v19 = vor.u32 %v4047_v62, %v2929_v63  ;;  %v4043_v60 = vld [vmem:[%s6510_s1 + $0x94] sm:$0xf]  ;;  %v2913_v61 = vld [vmem:[%s6510_s1 + $0x98] sm:$0xf0] }
  0x84   :  { %2265 = vmatpush.bf16.msra.mxu0 %v3920_v27  ;;  %v3904_v27 = vor.u32 %v4292_v15, %v3903_v12  ;;  %2216 = vmatmul.bf16.vlgmr.msrb.gmra.mxu1 %v5411_v18  ;;  %v3960_v52 = vor.u32 %v4306_v37, %v3959_v36  ;;  %v4013_v12 = vld [vmem:[%s6511_s0 + $0xc4] sm:$0xf]  ;;  %v2817_v15 = vld [vmem:[%s6511_s0 + $0x108] sm:$0xf0]  ;;  %v3880_v37 = vor.u32 %v4286_v21, %v3879_v20 }
  0x85   :  { %2284 = vmatpush.bf16.msra.mxu1 %v3984_v47  ;;  %2235 = vmatmul.bf16.vlgmr.msrb.gmra.mxu2 %v5422_v22  ;;  %v4031_v47 = vld [vmem:[%s6510_s1 + $0x34] sm:$0xf]  ;;  %v5556_v63 = vor.u32 %v4014_v34, %v2825_v35  ;;  %v4041_v20 = vld [vmem:[%s6510_s1 + $0x84] sm:$0xf]  ;;  %v2905_v21 = vld [vmem:[%s6510_s1 + $0x88] sm:$0xf0] }
  0x86   :  { %2303 = vmatpush.bf16.msra.mxu2 %v2900_v26  ;;  %v2884_v26 = vor.u32 %v4035_v4, %v2881_v7  ;;  %2254 = vmatmul.bf16.vlgmr.msrb.gmra.mxu3 %v5424_v25  ;;  %v4029_v4 = vld [vmem:[%s6510_s1 + $0x24] sm:$0xf]  ;;  %v2857_v7 = vld [vmem:[%s6510_s1 + $0x28] sm:$0xf0]  ;;  %v3089_v35 = vld [vmem:[%s6510_s1 + $0x1f8] sm:$0xf0] }
  0x87   :  { %2322 = vmatpush.bf16.msra.mxu3 %v2964_v49  ;;  %v2865_v49 = vld [vmem:[%s6510_s1 + $0x38] sm:$0xf0]  ;;  %v2860_v36 = vor.u32 %v4029_v4, %v2857_v7  ;;  %v2841_v7 = vld [vmem:[%s6510_s1 + $0x8] sm:$0xf0] }
  0x88   :  { %2266 = vmatpush.bf16.msra.mxu0 %v3912_v58  ;;  %v3887_v58 = vld [vmem:[%s6510_s1 + $0x830] sm:$0xf]  ;;  %v2868_v2 = vor.u32 %v4031_v47, %v2865_v49  ;;  %v4284_v49 = vld [vmem:[%s6510_s1 + $0x814] sm:$0xf0] }
  0x89   :  { %2285 = vmatpush.bf16.msra.mxu1 %v3976_v10  ;;  %v3888_v3 = vor.u32 %v4288_v59, %v3887_v58  ;;  %v2815_v10 = vld [vmem:[%s6511_s0 + $0xc0] sm:$0xf]  ;;  %v3871_v47 = vld [vmem:[%s6510_s1 + $0x810] sm:$0xf]  ;;  %v5543_v58 = vor.u32 %v4013_v12, %v2817_v15  ;;  %v4300_v59 = vld [vmem:[%s6510_s1 + $0x894] sm:$0xf0]  ;;  %v2916_v15 = vor.u32 %v4043_v60, %v2913_v61 }
  0x8a   :  { %2304 = vmatpush.bf16.msra.mxu2 %v2892_v55  ;;  %v2940_v55 = vor.u32 %v4049_v38, %v2937_v41  ;;  %v4027_v38 = vld [vmem:[%s6510_s1 + $0x14] sm:$0xf]  ;;  %v2849_v41 = vld [vmem:[%s6510_s1 + $0x18] sm:$0xf0]  ;;  %v3872_v4 = vor.u32 %v4284_v49, %v3871_v47  ;;  %v4101_v47 = vld [vmem:[%s6510_s1 + $0x264] sm:$0xf] }
  0x8b   :  { %2323 = vmatpush.bf16.msra.mxu3 %v2956_v11  ;;  %v4022_v11 = vld [vmem:[%s6511_s0 + $0x104] sm:$0xf0]  ;;  %v3145_v49 = vld [vmem:[%s6510_s1 + $0x268] sm:$0xf0]  ;;  %v4069_v60 = vld [vmem:[%s6510_s1 + $0x164] sm:$0xf] }
  0x8c   :  { %2267 = vmatpush.bf16.msra.mxu0 %v3904_v27  ;;  %v4302_v27 = vld [vmem:[%s6510_s1 + $0x8a4] sm:$0xf0]  ;;  %v3017_v61 = vld [vmem:[%s6510_s1 + $0x168] sm:$0xf0] }
  0x8d   :  { %2286 = vmatpush.bf16.msra.mxu1 %v3968_v32  ;;  %v2823_v32 = vld [vmem:[%s6511_s0 + $0xc8] sm:$0xf] }
  0x8e   :  { %2305 = vmatpush.bf16.msra.mxu2 %v2884_v26  ;;  %v3943_v26 = vld [vmem:[%s6510_s1 + $0x8a0] sm:$0xf] }
  0x8f   :  { %2324 = vmatpush.bf16.msra.mxu3 %v2948_v33  ;;  %v4023_v33 = vld [vmem:[%s6511_s0 + $0x10c] sm:$0xf0] }
  0x90   :  { %2268 = vmatpush.bf16.msra.mxu0 %v3896_v43  ;;  %v2924_v43 = vor.u32 %v4045_v30, %v2921_v31  ;;  %v5554_v62 = vor.u32 %v4023_v33, %v2823_v32  ;;  %v4071_v30 = vld [vmem:[%s6510_s1 + $0x174] sm:$0xf]  ;;  %v3025_v31 = vld [vmem:[%s6510_s1 + $0x178] sm:$0xf0] }
  0x91   :  { %2287 = vmatpush.bf16.msra.mxu1 %v3960_v52  ;;  %v3935_v52 = vld [vmem:[%s6510_s1 + $0x890] sm:$0xf]  ;;  %v4087_v32 = vld [vmem:[%s6510_s1 + $0x1f4] sm:$0xf] }
  0x92   :  { %2306 = vmatpush.bf16.msra.mxu2 %v2876_v42  ;;  %v3944_v42 = vor.u32 %v4302_v27, %v3943_v26  ;;  %v3936_v12 = vor.u32 %v4300_v59, %v3935_v52  ;;  %v4103_v26 = vld [vmem:[%s6510_s1 + $0x274] sm:$0xf]  ;;  %v3153_v27 = vld [vmem:[%s6510_s1 + $0x278] sm:$0xf0]  ;;  %v3092_v52 = vor.u32 %v4087_v32, %v3089_v35 }
  0x93   :  { %2325 = vmatpush.bf16.msra.mxu3 %v2940_v55  ;;  %v5541_v55 = vor.u32 %v4022_v11, %v2815_v10  ;;  %v3863_v10 = vld [vmem:[%s6510_s1 + $0x800] sm:$0xf]  ;;  %v4282_v11 = vld [vmem:[%s6510_s1 + $0x804] sm:$0xf0]  ;;  %v4083_v32 = vld [vmem:[%s6510_s1 + $0x1d4] sm:$0xf] }
  0x94   :  { %2269 = vmatpush.bf16.msra.mxu0 %v3888_v3  ;;  %v2852_v3 = vor.u32 %v4027_v38, %v2849_v41  ;;  %2221 = vmatmul.bf16.gmra.mxu1 %v5543_v58  ;;  %v3864_v34 = vor.u32 %v4282_v11, %v3863_v10  ;;  %v2908_v41 = vor.u32 %v4041_v20, %v2905_v21  ;;  %v2759_v10 = vld [vmem:[%s6511_s0 + $0x40] sm:$0xf] }
  0x95   :  { %2288 = vmatpush.bf16.msra.mxu1 %v3952_v16  ;;  %v3927_v16 = vld [vmem:[%s6510_s1 + $0x880] sm:$0xf]  ;;  %2202 = vmatmul.bf16.gmra.mxu0 %v5541_v55  ;;  %v3148_v11 = vor.u32 %v4101_v47, %v3145_v49  ;;  %v4097_v49 = vld [vmem:[%s6510_s1 + $0x244] sm:$0xf] }
  0x96   :  { %2307 = vmatpush.bf16.msra.mxu2 %v2868_v2  ;;  %v4025_v2 = vld [vmem:[%s6510_s1 + $0x4] sm:$0xf]  ;;  %2259 = vmatmul.bf16.gmra.mxu3 %v5556_v63 }
  0x97   :  { %2326 = vmatpush.bf16.msra.mxu3 %v2932_v19  ;;  %v4298_v19 = vld [vmem:[%s6510_s1 + $0x884] sm:$0xf0]  ;;  %2240 = vmatmul.bf16.gmra.mxu2 %v5554_v62  ;;  %v2844_v33 = vor.u32 %v4025_v2, %v2841_v7  ;;  %v4085_v2 = vld [vmem:[%s6510_s1 + $0x1e4] sm:$0xf]  ;;  %v3209_v7 = vld [vmem:[%s6510_s1 + $0x2e8] sm:$0xf0] }
  0x98   :  { %2270 = vmatpush.bf16.msra.mxu0 %v3880_v37  ;;  %v3217_v37 = vld [vmem:[%s6510_s1 + $0x2f8] sm:$0xf0]  ;;  %v3928_v38 = vor.u32 %v4298_v19, %v3927_v16  ;;  %v3997_v16 = vld [vmem:[%s6511_s0 + $0x44] sm:$0xf]  ;;  %v2761_v19 = vld [vmem:[%s6511_s0 + $0x88] sm:$0xf0] }
  0x99   :  { %2289 = vmatpush.bf16.msra.mxu1 %v3944_v42  ;;  %v3156_v42 = vor.u32 %v4103_v26, %v3153_v27  ;;  %v4099_v26 = vld [vmem:[%s6510_s1 + $0x254] sm:$0xf]  ;;  %v3137_v27 = vld [vmem:[%s6510_s1 + $0x258] sm:$0xf0]  ;;  %v5663_v35 = vor.u32 %v3997_v16, %v2761_v19 }
  0x9a   :  { %2308 = vmatpush.bf16.msra.mxu2 %v2860_v36  ;;  %v4119_v36 = vld [vmem:[%s6510_s1 + $0x2f4] sm:$0xf]  ;;  %v3121_v16 = vld [vmem:[%s6510_s1 + $0x238] sm:$0xf0] }
  0x9b   :  { %2327 = vmatpush.bf16.msra.mxu3 %v2924_v43  ;;  %v3028_v43 = vor.u32 %v4071_v30, %v3025_v31  ;;  %v3220_v59 = vor.u32 %v4119_v36, %v3217_v37  ;;  %v4067_v30 = vld [vmem:[%s6510_s1 + $0x154] sm:$0xf]  ;;  %v3009_v31 = vld [vmem:[%s6510_s1 + $0x158] sm:$0xf0] }
  0x9c   :  { %2271 = vmatpush.bf16.msra.mxu0 %v3872_v4  ;;  %v4117_v4 = vld [vmem:[%s6510_s1 + $0x2e4] sm:$0xf]  ;;  %v3073_v36 = vld [vmem:[%s6510_s1 + $0x1d8] sm:$0xf0]  ;;  %v4115_v37 = vld [vmem:[%s6510_s1 + $0x2d4] sm:$0xf]  ;;  %v3012_v47 = vor.u32 %v4067_v30, %v3009_v31 }
  0x9d   :  { %2290 = vmatpush.bf16.msra.mxu1 %v3936_v12  ;;  %v3020_v12 = vor.u32 %v4069_v60, %v3017_v61  ;;  %v3212_v21 = vor.u32 %v4117_v4, %v3209_v7  ;;  %v4065_v61 = vld [vmem:[%s6510_s1 + $0x144] sm:$0xf]  ;;  %v3065_v4 = vld [vmem:[%s6510_s1 + $0x1c8] sm:$0xf0] }
  0x9e   :  { %2309 = vmatpush.bf16.msra.mxu2 %v2852_v3  ;;  %v3081_v3 = vld [vmem:[%s6510_s1 + $0x1e8] sm:$0xf0]  ;;  %v4113_v7 = vld [vmem:[%s6510_s1 + $0x2c4] sm:$0xf] }
  0x9f   :  { %2328 = vmatpush.bf16.msra.mxu3 %v2916_v15  ;;  %v4006_v15 = vld [vmem:[%s6511_s0 + $0x84] sm:$0xf0]  ;;  %v3084_v20 = vor.u32 %v4085_v2, %v3081_v3  ;;  %v3001_v2 = vld [vmem:[%s6510_s1 + $0x148] sm:$0xf0]  ;;  %v4081_v3 = vld [vmem:[%s6510_s1 + $0x1c4] sm:$0xf] }
  0xa0   :  { %2272 = vmatpush.bf16.msra.mxu0 %v3864_v34  ;;  %v5661_v34 = vor.u32 %v4006_v15, %v2759_v10  ;;  %v3193_v10 = vld [vmem:[%s6510_s1 + $0x2c8] sm:$0xf0]  ;;  %v4095_v15 = vld [vmem:[%s6510_s1 + $0x234] sm:$0xf] }
  0xa1   :  { %2291 = vmatpush.bf16.msra.mxu1 %v3928_v38  ;;  %v3201_v38 = vld [vmem:[%s6510_s1 + $0x2d8] sm:$0xf0] }
  0xa2   :  { %2310 = vmatpush.bf16.msra.mxu2 %v2844_v33  ;;  %v1970_v33 = vpop.f32.mrf.mxu0  ;;  %v3204_v60 = vor.u32 %v4115_v37, %v3201_v38  ;;  %v3124_v38 = vor.u32 %v4095_v15, %v3121_v16  ;;  %v2833_v15 = vld [vmem:[%s6511_s0 + $0x118] sm:$0xf0] }
  0xa3   :  { %2329 = vmatpush.bf16.msra.mxu3 %v2908_v41  ;;  %v1989_v41 = vpop.f32.mrf.mxu1 }
  0xa4   :  { %2341 = vmatpush.bf16.msrb.mxu0 %v3028_v43  ;;  %v3140_v43 = vor.u32 %v4099_v26, %v3137_v27  ;;  %2292 = vmatmul.bf16.vlgmr.msra.gmra.mxu1 %v5663_v35  ;;  %v4079_v26 = vld [vmem:[%s6510_s1 + $0x1b4] sm:$0xf] }
  0xa5   :  { %2360 = vmatpush.bf16.msrb.mxu1 %v3092_v52  ;;  %v3129_v52 = vld [vmem:[%s6510_s1 + $0x248] sm:$0xf0]  ;;  %2273 = vmatmul.bf16.vlgmr.msra.gmra.mxu0 %v5661_v34 }
  0xa6   :  { %2379 = vmatpush.bf16.msrb.mxu2 %v3156_v42  ;;  %v1990_v42 = vadd.f32 %v1989_v41, %v1970_v33  ;;  %2330 = vmatmul.bf16.vlgmr.msra.gmra.mxu3 %v4586_v53  ;;  %v2993_v53 = vld [vmem:[%s6510_s1 + $0x138] sm:$0xf0]  ;;  %v4111_v33 = vld [vmem:[%s6510_s1 + $0x2b4] sm:$0xf] }
  0xa7   :  { %2398 = vmatpush.bf16.msrb.mxu3 %v3220_v59  ;;  %v3076_v59 = vor.u32 %v4083_v32, %v3073_v36  ;;  %2311 = vmatmul.bf16.vlgmr.msra.gmra.mxu2 %v4575_v48  ;;  %v4063_v48 = vld [vmem:[%s6510_s1 + $0x134] sm:$0xf]  ;;  %v3057_v32 = vld [vmem:[%s6510_s1 + $0x1b8] sm:$0xf0] }
  0xa8   :  { %2342 = vmatpush.bf16.msrb.mxu0 %v3020_v12  ;;  %v3004_v12 = vor.u32 %v4065_v61, %v3001_v2  ;;  %v2008_v19 = vpop.f32.mrf.mxu2  ;;  %v3185_v36 = vld [vmem:[%s6510_s1 + $0x2b8] sm:$0xf0]  ;;  %v4061_v61 = vld [vmem:[%s6510_s1 + $0x124] sm:$0xf]  ;;  %v2985_v2 = vld [vmem:[%s6510_s1 + $0x128] sm:$0xf0] }
  0xa9   :  { %2361 = vmatpush.bf16.msrb.mxu1 %v3084_v20  ;;  %v3068_v20 = vor.u32 %v4081_v3, %v3065_v4  ;;  %v2009_v27 = vadd.f32 %v2008_v19, %v1990_v42  ;;  %v2027_v30 = vpop.f32.mrf.mxu3  ;;  %v2996_v42 = vor.u32 %v4063_v48, %v2993_v53  ;;  %v4077_v3 = vld [vmem:[%s6510_s1 + $0x1a4] sm:$0xf]  ;;  %v3049_v4 = vld [vmem:[%s6510_s1 + $0x1a8] sm:$0xf0]  ;;  %v2988_v19 = vor.u32 %v4061_v61, %v2985_v2 }
  0xaa   :  { %2380 = vmatpush.bf16.msrb.mxu2 %v3148_v11  ;;  %v3132_v11 = vor.u32 %v4097_v49, %v3129_v52  ;;  %v1972_v31 = vpop.f32.mrf.mxu0  ;;  %v3113_v49 = vld [vmem:[%s6510_s1 + $0x228] sm:$0xf0]  ;;  %v2831_v52 = vld [vmem:[%s6511_s0 + $0xd0] sm:$0xf]  ;;  %v3052_v53 = vor.u32 %v4077_v3, %v3049_v4  ;;  %v4057_v4 = vld [vmem:[%s6510_s1 + $0x104] sm:$0xf] }
  0xab   :  { %2399 = vmatpush.bf16.msrb.mxu3 %v3212_v21  ;;  %v3196_v21 = vor.u32 %v4113_v7, %v3193_v10  ;;  %v1991_v37 = vpop.f32.mrf.mxu1  ;;  %v5726_v41 = vadd.f32 %v2027_v30, %v2009_v27  ;;  %v4109_v7 = vld [vmem:[%s6510_s1 + $0x2a4] sm:$0xf]  ;;  %v3177_v10 = vld [vmem:[%s6510_s1 + $0x2a8] sm:$0xf0]  ;;  %v4059_v27 = vld [vmem:[%s6510_s1 + $0x114] sm:$0xf] }
  0xac   :  { %2343 = vmatpush.bf16.msrb.mxu0 %v3012_v47  ;;  %v4093_v47 = vld [vmem:[%s6510_s1 + $0x224] sm:$0xf]  ;;  %v2977_v30 = vld [vmem:[%s6510_s1 + $0x118] sm:$0xf0]  ;;  %v3097_v3 = vld [vmem:[%s6510_s1 + $0x208] sm:$0xf0] }
  0xad   :  { %2362 = vmatpush.bf16.msrb.mxu1 %v3076_v59  ;;  %v3060_v59 = vor.u32 %v4079_v26, %v3057_v32  ;;  %v3116_v16 = vor.u32 %v4093_v47, %v3113_v49  ;;  %v3180_v26 = vor.u32 %v4109_v7, %v3177_v10  ;;  %v4107_v47 = vld [vmem:[%s6510_s1 + $0x294] sm:$0xf]  ;;  %v3169_v49 = vld [vmem:[%s6510_s1 + $0x298] sm:$0xf0]  ;;  %v2980_v2 = vor.u32 %v4059_v27, %v2977_v30  ;;  %v2969_v7 = vld [vmem:[%s6510_s1 + $0x108] sm:$0xf0] }
  0xae   :  { %2381 = vmatpush.bf16.msrb.mxu2 %v3140_v43  ;;  %v1992_v43 = vadd.f32 %v1991_v37, %v1972_v31  ;;  %v4075_v31 = vld [vmem:[%s6510_s1 + $0x194] sm:$0xf]  ;;  %v2972_v30 = vor.u32 %v4057_v4, %v2969_v7 }
  0xaf   :  { %2400 = vmatpush.bf16.msrb.mxu3 %v3204_v60  ;;  %v3188_v60 = vor.u32 %v4111_v33, %v3185_v36 }
  0xb0   :  { %2344 = vmatpush.bf16.msrb.mxu0 %v3004_v12  ;;  %v4015_v12 = vld [vmem:[%s6511_s0 + $0xd4] sm:$0xf]  ;;  %v2010_v48 = vpop.f32.mrf.mxu2 }
  0xb1   :  { %2363 = vmatpush.bf16.msrb.mxu1 %v3068_v20  ;;  %v4091_v20 = vld [vmem:[%s6510_s1 + $0x214] sm:$0xf]  ;;  %v2011_v32 = vadd.f32 %v2010_v48, %v1992_v43  ;;  %v2029_v33 = vpop.f32.mrf.mxu3 }
  0xb2   :  { %2382 = vmatpush.bf16.msrb.mxu2 %v3132_v11  ;;  %v4024_v11 = vld [vmem:[%s6511_s0 + $0x114] sm:$0xf0]  ;;  %v1975_v36 = vpop.f32.mrf.mxu0  ;;  %v4135_v48 = vld [vmem:[%s6510_s1 + $0x374] sm:$0xf] }
  0xb3   :  { %2401 = vmatpush.bf16.msrb.mxu3 %v3196_v21  ;;  %v3105_v21 = vld [vmem:[%s6510_s1 + $0x218] sm:$0xf0]  ;;  %v5779_v37 = vor.u32 %v4024_v11, %v2831_v52  ;;  %v4089_v52 = vld [vmem:[%s6510_s1 + $0x204] sm:$0xf]  ;;  %v3172_v11 = vor.u32 %v4107_v47, %v3169_v49 }
  0xb4   :  { %2345 = vmatpush.bf16.msrb.mxu0 %v2996_v42  ;;  %v3041_v42 = vld [vmem:[%s6510_s1 + $0x198] sm:$0xf0]  ;;  %v3108_v43 = vor.u32 %v4091_v20, %v3105_v21  ;;  %v4167_v20 = vld [vmem:[%s6510_s1 + $0x474] sm:$0xf]  ;;  %v3100_v27 = vor.u32 %v4089_v52, %v3097_v3  ;;  %v4165_v52 = vld [vmem:[%s6510_s1 + $0x464] sm:$0xf] }
  0xb5   :  { %2364 = vmatpush.bf16.msrb.mxu1 %v3060_v59  ;;  %v1994_v59 = vpop.f32.mrf.mxu1  ;;  %v3044_v10 = vor.u32 %v4075_v31, %v3041_v42  ;;  %2278 = vmatmul.bf16.gmra.mxu0 %v5779_v37  ;;  %v3409_v21 = vld [vmem:[%s6510_s1 + $0x478] sm:$0xf0] }
  0xb6   :  { %2383 = vmatpush.bf16.msrb.mxu2 %v3124_v38  ;;  %v5781_v38 = vor.u32 %v4015_v12, %v2833_v15  ;;  %v1995_v61 = vadd.f32 %v1994_v59, %v1975_v36  ;;  %v4073_v12 = vld [vmem:[%s6510_s1 + $0x184] sm:$0xf]  ;;  %v3033_v15 = vld [vmem:[%s6510_s1 + $0x188] sm:$0xf0]  ;;  %2335 = vmatmul.bf16.gmra.mxu3 %v4718_v50  ;;  %v4183_v50 = vld [vmem:[%s6510_s1 + $0x4f4] sm:$0xf]  ;;  %v3412_v59 = vor.u32 %v4167_v20, %v3409_v21 }
  0xb7   :  { %2402 = vmatpush.bf16.msrb.mxu3 %v3188_v60  ;;  %v5795_v60 = vadd.f32 %v2029_v33, %v2011_v32  ;;  %2316 = vmatmul.bf16.gmra.mxu2 %v4707_v44  ;;  %v3345_v44 = vld [vmem:[%s6510_s1 + $0x3f8] sm:$0xf0]  ;;  %v3036_v33 = vor.u32 %v4073_v12, %v3033_v15  ;;  %v3465_v20 = vld [vmem:[%s6510_s1 + $0x4e8] sm:$0xf0] }
  0xb8   :  { %2346 = vmatpush.bf16.msrb.mxu0 %v2988_v19  ;;  %2297 = vmatmul.bf16.gmra.mxu1 %v5781_v38  ;;  %v3161_v19 = vld [vmem:[%s6510_s1 + $0x288] sm:$0xf0]  ;;  %v3473_v31 = vld [vmem:[%s6510_s1 + $0x4f8] sm:$0xf0]  ;;  %v2013_v32 = vpop.f32.mrf.mxu2 }
  0xb9   :  { %2365 = vmatpush.bf16.msrb.mxu1 %v3052_v53  ;;  %v3281_v53 = vld [vmem:[%s6510_s1 + $0x378] sm:$0xf0]  ;;  %v2014_v42 = vadd.f32 %v2013_v32, %v1995_v61  ;;  %v2032_v47 = vpop.f32.mrf.mxu3  ;;  %v3476_v7 = vor.u32 %v4183_v50, %v3473_v31  ;;  %v3273_v61 = vld [vmem:[%s6510_s1 + $0x368] sm:$0xf0]  ;;  %v4131_v50 = vld [vmem:[%s6510_s1 + $0x354] sm:$0xf] }
  0xba   :  { %2384 = vmatpush.bf16.msrb.mxu2 %v3116_v16  ;;  %v4105_v16 = vld [vmem:[%s6510_s1 + $0x284] sm:$0xf]  ;;  %v1977_v49 = vpop.f32.mrf.mxu0  ;;  %v3265_v31 = vld [vmem:[%s6510_s1 + $0x358] sm:$0xf0]  ;;  %v4147_v32 = vld [vmem:[%s6510_s1 + $0x3d4] sm:$0xf] }
  0xbb   :  { %2403 = vmatpush.bf16.msrb.mxu3 %v3180_v26  ;;  %v4151_v26 = vld [vmem:[%s6510_s1 + $0x3f4] sm:$0xf]  ;;  %v3164_v36 = vor.u32 %v4105_v16, %v3161_v19  ;;  %v5861_v12 = vadd.f32 %v2032_v47, %v2014_v42  ;;  %v3337_v16 = vld [vmem:[%s6510_s1 + $0x3e8] sm:$0xf0]  ;;  %v4181_v19 = vld [vmem:[%s6510_s1 + $0x4e4] sm:$0xf] }
  0xbc   :  { %2347 = vmatpush.bf16.msrb.mxu0 %v2980_v2  ;;  %v3401_v2 = vld [vmem:[%s6510_s1 + $0x468] sm:$0xf0]  ;;  %v3348_v4 = vor.u32 %v4151_v26, %v3345_v44  ;;  %v3468_v26 = vor.u32 %v4181_v19, %v3465_v20  ;;  %v3329_v42 = vld [vmem:[%s6510_s1 + $0x3d8] sm:$0xf0]  ;;  %v4179_v47 = vld [vmem:[%s6510_s1 + $0x4d4] sm:$0xf] }
  0xbd   :  { %2366 = vmatpush.bf16.msrb.mxu1 %v3044_v10  ;;  %v1996_v3 = vpop.f32.mrf.mxu1  ;;  %v4133_v10 = vld [vmem:[%s6510_s1 + $0x364] sm:$0xf]  ;;  %v3404_v21 = vor.u32 %v4165_v52, %v3401_v2  ;;  %v3321_v20 = vld [vmem:[%s6510_s1 + $0x3c8] sm:$0xf0] }
  0xbe   :  { %2385 = vmatpush.bf16.msrb.mxu2 %v3108_v43  ;;  %v3284_v43 = vor.u32 %v4135_v48, %v3281_v53  ;;  %v1997_v15 = vadd.f32 %v1996_v3, %v1977_v49  ;;  %v3276_v48 = vor.u32 %v4133_v10, %v3273_v61  ;;  %v3457_v49 = vld [vmem:[%s6510_s1 + $0x4d8] sm:$0xf0]  ;;  %v3385_v10 = vld [vmem:[%s6510_s1 + $0x448] sm:$0xf0]  ;;  %v3332_v61 = vor.u32 %v4147_v32, %v3329_v42 }
  0xbf   :  { %2404 = vmatpush.bf16.msrb.mxu3 %v3172_v11  ;;  %v4149_v11 = vld [vmem:[%s6510_s1 + $0x3e4] sm:$0xf]  ;;  %v3313_v32 = vld [vmem:[%s6510_s1 + $0x3b8] sm:$0xf0] }
  0xc0   :  { %2348 = vmatpush.bf16.msrb.mxu0 %v2972_v30  ;;  %v3340_v53 = vor.u32 %v4149_v11, %v3337_v16  ;;  %v3393_v30 = vld [vmem:[%s6510_s1 + $0x458] sm:$0xf0]  ;;  %v2015_v44 = vpop.f32.mrf.mxu2  ;;  %v3460_v11 = vor.u32 %v4179_v47, %v3457_v49  ;;  %v4145_v16 = vld [vmem:[%s6510_s1 + $0x3c4] sm:$0xf] }
  0xc1   :  { %2367 = vmatpush.bf16.msrb.mxu1 %v3036_v33  ;;  %v2016_v33 = vadd.f32 %v2015_v44, %v1997_v15  ;;  %v4129_v15 = vld [vmem:[%s6510_s1 + $0x344] sm:$0xf]  ;;  %v4143_v44 = vld [vmem:[%s6510_s1 + $0x3b4] sm:$0xf] }
  0xc2   :  { %2386 = vmatpush.bf16.msrb.mxu2 %v3100_v27  ;;  %v4163_v27 = vld [vmem:[%s6510_s1 + $0x454] sm:$0xf] }
  0xc3   :  { %2405 = vmatpush.bf16.msrb.mxu3 %v3164_v36  ;;  %v2034_v36 = vpop.f32.mrf.mxu3  ;;  %v3396_v3 = vor.u32 %v4163_v27, %v3393_v30  ;;  %v3324_v27 = vor.u32 %v4145_v16, %v3321_v20  ;;  %v3305_v16 = vld [vmem:[%s6510_s1 + $0x3a8] sm:$0xf0] }
  0xc4   :  { %2417 = vmatpush.bf16.msra.mxu0 %v3284_v43  ;;  %v5896_v52 = vadd.f32 %v2034_v36, %v2016_v33  ;;  %v4175_v33 = vld [vmem:[%s6510_s1 + $0x4b4] sm:$0xf]  ;;  %v3441_v36 = vld [vmem:[%s6510_s1 + $0x4b8] sm:$0xf0]  ;;  %v3433_v20 = vld [vmem:[%s6510_s1 + $0x4a8] sm:$0xf0] }
  0xc5   :  { %2436 = vmatpush.bf16.msra.mxu1 %v3348_v4  ;;  %v2065_v43 = vpop.f32.mrf.mxu1  ;;  %v3268_v4 = vor.u32 %v4131_v50, %v3265_v31  ;;  %2349 = vmatmul.bf16.vlgmr.msrb.gmra.mxu0 %v4588_v54 }
  0xc6   :  { %2455 = vmatpush.bf16.msra.mxu2 %v3412_v59  ;;  %v2046_v59 = vpop.f32.mrf.mxu0  ;;  %2406 = vmatmul.bf16.vlgmr.msrb.gmra.mxu3 %v4865_v1  ;;  %v3249_v1 = vld [vmem:[%s6510_s1 + $0x338] sm:$0xf0] }
  0xc7   :  { %2474 = vmatpush.bf16.msra.mxu3 %v3476_v7  ;;  %v2047_v2 = vadd.f32 %v2046_v59, %v5726_v41  ;;  %v4161_v7 = vld [vmem:[%s6510_s1 + $0x444] sm:$0xf]  ;;  %v3257_v41 = vld [vmem:[%s6510_s1 + $0x348] sm:$0xf0]  ;;  %2387 = vmatmul.bf16.vlgmr.msrb.gmra.mxu2 %v4863_v0  ;;  %v4127_v0 = vld [vmem:[%s6510_s1 + $0x334] sm:$0xf] }
  0xc8   :  { %2418 = vmatpush.bf16.msra.mxu0 %v3276_v48  ;;  %2368 = vmatmul.bf16.vlgmr.msrb.gmra.mxu1 %v4596_v57  ;;  %v3449_v48 = vld [vmem:[%s6510_s1 + $0x4c8] sm:$0xf0]  ;;  %v3388_v54 = vor.u32 %v4161_v7, %v3385_v10  ;;  %v3260_v57 = vor.u32 %v4129_v15, %v3257_v41  ;;  %v2084_v50 = vpop.f32.mrf.mxu2  ;;  %v3316_v10 = vor.u32 %v4143_v44, %v3313_v32  ;;  %v4141_v15 = vld [vmem:[%s6510_s1 + $0x3a4] sm:$0xf]  ;;  %v3425_v32 = vld [vmem:[%s6510_s1 + $0x498] sm:$0xf0] }
  0xc9   :  { %2437 = vmatpush.bf16.msra.mxu1 %v3340_v53  ;;  %v2066_v19 = vadd.f32 %v2065_v43, %v2047_v2  ;;  %v4159_v53 = vld [vmem:[%s6510_s1 + $0x434] sm:$0xf]  ;;  %v3252_v2 = vor.u32 %v4127_v0, %v3249_v1 }
  0xca   :  { %2456 = vmatpush.bf16.msra.mxu2 %v3404_v21  ;;  %v4177_v21 = vld [vmem:[%s6510_s1 + $0x4c4] sm:$0xf]  ;;  %v4139_v0 = vld [vmem:[%s6510_s1 + $0x394] sm:$0xf] }
  0xcb   :  { %2475 = vmatpush.bf16.msra.mxu3 %v3468_v26  ;;  %v3377_v26 = vld [vmem:[%s6510_s1 + $0x438] sm:$0xf0]  ;;  %v3452_v30 = vor.u32 %v4177_v21, %v3449_v48  ;;  %v2103_v31 = vpop.f32.mrf.mxu3  ;;  %v2085_v42 = vadd.f32 %v2084_v50, %v2066_v19  ;;  %v4173_v19 = vld [vmem:[%s6510_s1 + $0x4a4] sm:$0xf] }
  0xcc   :  { %2419 = vmatpush.bf16.msra.mxu0 %v3268_v4  ;;  %v3380_v43 = vor.u32 %v4159_v53, %v3377_v26  ;;  %v3369_v4 = vld [vmem:[%s6510_s1 + $0x428] sm:$0xf0]  ;;  %v3308_v53 = vor.u32 %v4141_v15, %v3305_v16  ;;  %v3436_v26 = vor.u32 %v4173_v19, %v3433_v20  ;;  %v3297_v50 = vld [vmem:[%s6510_s1 + $0x398] sm:$0xf0]  ;;  %v4169_v15 = vld [vmem:[%s6510_s1 + $0x484] sm:$0xf] }
  0xcd   :  { %2438 = vmatpush.bf16.msra.mxu1 %v3332_v61  ;;  %v2067_v49 = vpop.f32.mrf.mxu1  ;;  %v5958_v7 = vadd.f32 %v2103_v31, %v2085_v42  ;;  %v3444_v61 = vor.u32 %v4175_v33, %v3441_v36  ;;  %v4171_v31 = vld [vmem:[%s6510_s1 + $0x494] sm:$0xf]  ;;  %v3417_v16 = vld [vmem:[%s6510_s1 + $0x488] sm:$0xf0]  ;;  %v3665_v20 = vld [vmem:[%s6510_s1 + $0x678] sm:$0xf0] }
  0xce   :  { %2457 = vmatpush.bf16.msra.mxu2 %v3396_v3  ;;  %v2048_v47 = vpop.f32.mrf.mxu0  ;;  %v4157_v3 = vld [vmem:[%s6510_s1 + $0x424] sm:$0xf]  ;;  %v4231_v19 = vld [vmem:[%s6510_s1 + $0x674] sm:$0xf] }
  0xcf   :  { %2476 = vmatpush.bf16.msra.mxu3 %v3460_v11  ;;  %v2049_v59 = vadd.f32 %v2048_v47, %v5795_v60  ;;  %v4125_v60 = vld [vmem:[%s6510_s1 + $0x324] sm:$0xf]  ;;  %v3241_v11 = vld [vmem:[%s6510_s1 + $0x328] sm:$0xf0]  ;;  %v3372_v21 = vor.u32 %v4157_v3, %v3369_v4 }
  0xd0   :  { %2420 = vmatpush.bf16.msra.mxu0 %v3260_v57  ;;  %v3244_v48 = vor.u32 %v4125_v60, %v3241_v11  ;;  %v3361_v57 = vld [vmem:[%s6510_s1 + $0x418] sm:$0xf0]  ;;  %v2086_v1 = vpop.f32.mrf.mxu2  ;;  %v4153_v47 = vld [vmem:[%s6510_s1 + $0x404] sm:$0xf]  ;;  %v3225_v4 = vld [vmem:[%s6510_s1 + $0x308] sm:$0xf0] }
  0xd1   :  { %2439 = vmatpush.bf16.msra.mxu1 %v3324_v27  ;;  %v2068_v41 = vadd.f32 %v2067_v49, %v2049_v59  ;;  %v4123_v27 = vld [vmem:[%s6510_s1 + $0x314] sm:$0xf]  ;;  %v4121_v3 = vld [vmem:[%s6510_s1 + $0x304] sm:$0xf]  ;;  %v3289_v11 = vld [vmem:[%s6510_s1 + $0x388] sm:$0xf0] }
  0xd2   :  { %2458 = vmatpush.bf16.msra.mxu2 %v3388_v54  ;;  %v4155_v54 = vld [vmem:[%s6510_s1 + $0x414] sm:$0xf]  ;;  %v4137_v60 = vld [vmem:[%s6510_s1 + $0x384] sm:$0xf] }
  0xd3   :  { %2477 = vmatpush.bf16.msra.mxu3 %v3452_v30  ;;  %v3233_v30 = vld [vmem:[%s6510_s1 + $0x318] sm:$0xf0]  ;;  %v2105_v44 = vpop.f32.mrf.mxu3  ;;  %v2087_v33 = vadd.f32 %v2086_v1, %v2068_v41  ;;  %v3364_v59 = vor.u32 %v4155_v54, %v3361_v57  ;;  %v3228_v54 = vor.u32 %v4121_v3, %v3225_v4  ;;  %v4245_v3 = vld [vmem:[%s6510_s1 + $0x6e4] sm:$0xf]  ;;  %v3721_v4 = vld [vmem:[%s6510_s1 + $0x6e8] sm:$0xf0] }
  0xd4   :  { %2421 = vmatpush.bf16.msra.mxu0 %v3252_v2  ;;  %v3353_v2 = vld [vmem:[%s6510_s1 + $0x408] sm:$0xf0]  ;;  %v3729_v57 = vld [vmem:[%s6510_s1 + $0x6f8] sm:$0xf0] }
  0xd5   :  { %2440 = vmatpush.bf16.msra.mxu1 %v3316_v10  ;;  %v2070_v42 = vpop.f32.mrf.mxu1  ;;  %v6015_v10 = vadd.f32 %v2105_v44, %v2087_v33  ;;  %2354 = vmatmul.bf16.gmra.mxu0 %v4720_v51  ;;  %v4199_v51 = vld [vmem:[%s6510_s1 + $0x574] sm:$0xf]  ;;  %v4229_v44 = vld [vmem:[%s6510_s1 + $0x664] sm:$0xf] }
  0xd6   :  { %2459 = vmatpush.bf16.msra.mxu2 %v3380_v43  ;;  %v2051_v36 = vpop.f32.mrf.mxu0  ;;  %v3236_v43 = vor.u32 %v4123_v27, %v3233_v30  ;;  %2411 = vmatmul.bf16.gmra.mxu3 %v4997_v9  ;;  %v4247_v9 = vld [vmem:[%s6510_s1 + $0x6f4] sm:$0xf] }
  0xd7   :  { %2478 = vmatpush.bf16.msra.mxu3 %v3444_v61  ;;  %v2052_v49 = vadd.f32 %v2051_v36, %v5861_v12  ;;  %v3300_v12 = vor.u32 %v4139_v0, %v3297_v50  ;;  %v3428_v61 = vor.u32 %v4171_v31, %v3425_v32  ;;  %2392 = vmatmul.bf16.gmra.mxu2 %v4995_v8  ;;  %v3601_v8 = vld [vmem:[%s6510_s1 + $0x5f8] sm:$0xf0]  ;;  %v3657_v50 = vld [vmem:[%s6510_s1 + $0x668] sm:$0xf0] }
  0xd8   :  { %2422 = vmatpush.bf16.msra.mxu0 %v3244_v48  ;;  %2373 = vmatmul.bf16.gmra.mxu1 %v4728_v56  ;;  %v3537_v56 = vld [vmem:[%s6510_s1 + $0x578] sm:$0xf0]  ;;  %v3356_v48 = vor.u32 %v4153_v47, %v3353_v2  ;;  %v2089_v27 = vpop.f32.mrf.mxu2  ;;  %v3668_v0 = vor.u32 %v4231_v19, %v3665_v20  ;;  %v4197_v47 = vld [vmem:[%s6510_s1 + $0x564] sm:$0xf]  ;;  %v3593_v2 = vld [vmem:[%s6510_s1 + $0x5e8] sm:$0xf0] }
  0xd9   :  { %2441 = vmatpush.bf16.msra.mxu1 %v3308_v53  ;;  %v2071_v41 = vadd.f32 %v2070_v42, %v2052_v49  ;;  %v3292_v53 = vor.u32 %v4137_v60, %v3289_v11  ;;  %v3540_v1 = vor.u32 %v4199_v51, %v3537_v56  ;;  %v3732_v42 = vor.u32 %v4247_v9, %v3729_v57  ;;  %v3529_v49 = vld [vmem:[%s6510_s1 + $0x568] sm:$0xf0]  ;;  %v4195_v19 = vld [vmem:[%s6510_s1 + $0x554] sm:$0xf]  ;;  %v3521_v20 = vld [vmem:[%s6510_s1 + $0x558] sm:$0xf0] }
  0xda   :  { %2460 = vmatpush.bf16.msra.mxu2 %v3372_v21  ;;  %v4215_v21 = vld [vmem:[%s6510_s1 + $0x5f4] sm:$0xf]  ;;  %v3532_v60 = vor.u32 %v4197_v47, %v3529_v49  ;;  %v4241_v47 = vld [vmem:[%s6510_s1 + $0x6c4] sm:$0xf]  ;;  %v3705_v49 = vld [vmem:[%s6510_s1 + $0x6c8] sm:$0xf0] }
  0xdb   :  { %2479 = vmatpush.bf16.msra.mxu3 %v3436_v26  ;;  %v3420_v26 = vor.u32 %v4169_v15, %v3417_v16  ;;  %v2108_v30 = vpop.f32.mrf.mxu3  ;;  %v2090_v31 = vadd.f32 %v2089_v27, %v2071_v41  ;;  %v3604_v36 = vor.u32 %v4215_v21, %v3601_v8  ;;  %v3724_v15 = vor.u32 %v4245_v3, %v3721_v4  ;;  %v4227_v41 = vld [vmem:[%s6510_s1 + $0x654] sm:$0xf]  ;;  %v3649_v16 = vld [vmem:[%s6510_s1 + $0x658] sm:$0xf0] }
  0xdc   :  { %2423 = vmatpush.bf16.msra.mxu0 %v3236_v43  ;;  %v4211_v51 = vld [vmem:[%s6510_s1 + $0x5d4] sm:$0xf]  ;;  %v3713_v8 = vld [vmem:[%s6510_s1 + $0x6d8] sm:$0xf0]  ;;  %v3652_v27 = vor.u32 %v4227_v41, %v3649_v16  ;;  %v3708_v3 = vor.u32 %v4241_v47, %v3705_v49 }
  0xdd   :  { %2442 = vmatpush.bf16.msra.mxu1 %v3300_v12  ;;  %v2072_v33 = vpop.f32.mrf.mxu1  ;;  %v6082_v12 = vadd.f32 %v2108_v30, %v2090_v31  ;;  %v3524_v30 = vor.u32 %v4195_v19, %v3521_v20  ;;  %v4207_v4 = vld [vmem:[%s6510_s1 + $0x5b4] sm:$0xf] }
  0xde   :  { %2461 = vmatpush.bf16.msra.mxu2 %v3364_v59  ;;  %v2053_v32 = vpop.f32.mrf.mxu0  ;;  %v4213_v59 = vld [vmem:[%s6510_s1 + $0x5e4] sm:$0xf]  ;;  %v4203_v47 = vld [vmem:[%s6510_s1 + $0x594] sm:$0xf] }
  0xdf   :  { %2480 = vmatpush.bf16.msra.mxu3 %v3428_v61  ;;  %v2054_v43 = vadd.f32 %v2053_v32, %v5896_v52  ;;  %v3660_v52 = vor.u32 %v4229_v44, %v3657_v50  ;;  %v3596_v11 = vor.u32 %v4213_v59, %v3593_v2  ;;  %v4193_v32 = vld [vmem:[%s6510_s1 + $0x544] sm:$0xf]  ;;  %v4223_v59 = vld [vmem:[%s6510_s1 + $0x634] sm:$0xf] }
  0xe0   :  { %2424 = vmatpush.bf16.msra.mxu0 %v3228_v54  ;;  %v2091_v56 = vpop.f32.mrf.mxu2  ;;  %v4243_v54 = vld [vmem:[%s6510_s1 + $0x6d4] sm:$0xf] }
  0xe1   :  { %2443 = vmatpush.bf16.msra.mxu1 %v3292_v53  ;;  %v2073_v61 = vadd.f32 %v2072_v33, %v2054_v43  ;;  %v3716_v31 = vor.u32 %v4243_v54, %v3713_v8  ;;  %v4209_v33 = vld [vmem:[%s6510_s1 + $0x5c4] sm:$0xf]  ;;  %v3633_v43 = vld [vmem:[%s6510_s1 + $0x638] sm:$0xf0] }
  0xe2   :  { %2462 = vmatpush.bf16.msra.mxu2 %v3356_v48  ;;  %v3585_v48 = vld [vmem:[%s6510_s1 + $0x5d8] sm:$0xf0] }
  0xe3   :  { %2481 = vmatpush.bf16.msra.mxu3 %v3420_v26  ;;  %v2110_v21 = vpop.f32.mrf.mxu3  ;;  %v2092_v9 = vadd.f32 %v2091_v56, %v2073_v61  ;;  %v3588_v50 = vor.u32 %v4211_v51, %v3585_v48  ;;  %v3636_v51 = vor.u32 %v4223_v59, %v3633_v43  ;;  %v3625_v48 = vld [vmem:[%s6510_s1 + $0x628] sm:$0xf0]  ;;  %v4235_v59 = vld [vmem:[%s6510_s1 + $0x694] sm:$0xf]  ;;  %v3681_v43 = vld [vmem:[%s6510_s1 + $0x698] sm:$0xf0] }
  0xe4   :  { %2493 = vmatpush.bf16.msrb.mxu0 %v3540_v1  ;;  %v3641_v1 = vld [vmem:[%s6510_s1 + $0x648] sm:$0xf0] }
  0xe5   :  { %2512 = vmatpush.bf16.msrb.mxu1 %v3604_v36  ;;  %v2141_v53 = vpop.f32.mrf.mxu1  ;;  %v6115_v44 = vadd.f32 %v2110_v21, %v2092_v9  ;;  %2425 = vmatmul.bf16.vlgmr.msra.gmra.mxu0 %v4876_v5  ;;  %v4221_v21 = vld [vmem:[%s6510_s1 + $0x624] sm:$0xf] }
  0xe6   :  { %2531 = vmatpush.bf16.msrb.mxu2 %v3668_v0  ;;  %v2122_v57 = vpop.f32.mrf.mxu0  ;;  %v4225_v0 = vld [vmem:[%s6510_s1 + $0x644] sm:$0xf]  ;;  %2482 = vmatmul.bf16.vlgmr.msra.gmra.mxu3 %v5135_v24  ;;  %v3505_v24 = vld [vmem:[%s6510_s1 + $0x538] sm:$0xf0] }
  0xe7   :  { %2550 = vmatpush.bf16.msrb.mxu3 %v3732_v42  ;;  %v2123_v26 = vadd.f32 %v2122_v57, %v5958_v7  ;;  %v3513_v7 = vld [vmem:[%s6510_s1 + $0x548] sm:$0xf0]  ;;  %2463 = vmatmul.bf16.vlgmr.msra.gmra.mxu2 %v5133_v23  ;;  %v3644_v5 = vor.u32 %v4225_v0, %v3641_v1  ;;  %v4191_v23 = vld [vmem:[%s6510_s1 + $0x534] sm:$0xf]  ;;  %v3628_v1 = vor.u32 %v4221_v21, %v3625_v48 }
  0xe8   :  { %2494 = vmatpush.bf16.msrb.mxu0 %v3532_v60  ;;  %2444 = vmatmul.bf16.vlgmr.msra.gmra.mxu1 %v4878_v6  ;;  %v3577_v42 = vld [vmem:[%s6510_s1 + $0x5c8] sm:$0xf0]  ;;  %v3516_v6 = vor.u32 %v4193_v32, %v3513_v7  ;;  %v2160_v61 = vpop.f32.mrf.mxu2  ;;  %v3569_v60 = vld [vmem:[%s6510_s1 + $0x5b8] sm:$0xf0]  ;;  %v3508_v56 = vor.u32 %v4191_v23, %v3505_v24  ;;  %v4217_v24 = vld [vmem:[%s6510_s1 + $0x604] sm:$0xf] }
  0xe9   :  { %2513 = vmatpush.bf16.msrb.mxu1 %v3596_v11  ;;  %v2142_v36 = vadd.f32 %v2141_v53, %v2123_v26  ;;  %v3580_v2 = vor.u32 %v4209_v33, %v3577_v42  ;;  %v4239_v11 = vld [vmem:[%s6510_s1 + $0x6b4] sm:$0xf]  ;;  %v3572_v8 = vor.u32 %v4207_v4, %v3569_v60  ;;  %v3497_v57 = vld [vmem:[%s6510_s1 + $0x528] sm:$0xf0]  ;;  %v4205_v53 = vld [vmem:[%s6510_s1 + $0x5a4] sm:$0xf] }
  0xea   :  { %2532 = vmatpush.bf16.msrb.mxu2 %v3660_v52  ;;  %v3689_v0 = vld [vmem:[%s6510_s1 + $0x6a8] sm:$0xf0]  ;;  %v3617_v32 = vld [vmem:[%s6510_s1 + $0x618] sm:$0xf0]  ;;  %v4295_v48 = vld [vmem:[%s6510_s1 + $0x874] sm:$0xf] }
  0xeb   :  { %2551 = vmatpush.bf16.msrb.mxu3 %v3724_v15  ;;  %v2179_v52 = vpop.f32.mrf.mxu3  ;;  %v3697_v15 = vld [vmem:[%s6510_s1 + $0x6b8] sm:$0xf0]  ;;  %v2161_v41 = vadd.f32 %v2160_v61, %v2142_v36  ;;  %v4187_v36 = vld [vmem:[%s6510_s1 + $0x514] sm:$0xf]  ;;  %v3609_v60 = vld [vmem:[%s6510_s1 + $0x608] sm:$0xf0] }
  0xec   :  { %2495 = vmatpush.bf16.msrb.mxu0 %v3524_v30  ;;  %v3700_v9 = vor.u32 %v4239_v11, %v3697_v15  ;;  %v4237_v30 = vld [vmem:[%s6510_s1 + $0x6a4] sm:$0xf]  ;;  %v3489_v42 = vld [vmem:[%s6510_s1 + $0x518] sm:$0xf0]  ;;  %v3481_v15 = vld [vmem:[%s6510_s1 + $0x508] sm:$0xf0] }
  0xed   :  { %2514 = vmatpush.bf16.msrb.mxu1 %v3588_v50  ;;  %v2143_v19 = vpop.f32.mrf.mxu1  ;;  %v6170_v54 = vadd.f32 %v2179_v52, %v2161_v41  ;;  %v3692_v33 = vor.u32 %v4237_v30, %v3689_v0  ;;  %v3492_v52 = vor.u32 %v4187_v36, %v3489_v42  ;;  %v4185_v11 = vld [vmem:[%s6510_s1 + $0x504] sm:$0xf]  ;;  %v3673_v21 = vld [vmem:[%s6510_s1 + $0x688] sm:$0xf0] }
  0xee   :  { %2533 = vmatpush.bf16.msrb.mxu2 %v3652_v27  ;;  %v2124_v16 = vpop.f32.mrf.mxu0  ;;  %v3561_v27 = vld [vmem:[%s6510_s1 + $0x5a8] sm:$0xf0] }
  0xef   :  { %2552 = vmatpush.bf16.msrb.mxu3 %v3716_v31  ;;  %v2125_v20 = vadd.f32 %v2124_v16, %v6015_v10  ;;  %v4189_v10 = vld [vmem:[%s6510_s1 + $0x524] sm:$0xf]  ;;  %v4219_v31 = vld [vmem:[%s6510_s1 + $0x614] sm:$0xf]  ;;  %v3564_v7 = vor.u32 %v4205_v53, %v3561_v27  ;;  %v3684_v16 = vor.u32 %v4235_v59, %v3681_v43  ;;  %v3985_v53 = vld [vmem:[%s6510_s1 + $0x8f8] sm:$0xf0] }
  0xf0   :  { %2496 = vmatpush.bf16.msrb.mxu0 %v3516_v6  ;;  %v3500_v50 = vor.u32 %v4189_v10, %v3497_v57  ;;  %v2162_v49 = vpop.f32.mrf.mxu2  ;;  %v3553_v6 = vld [vmem:[%s6510_s1 + $0x598] sm:$0xf0]  ;;  %v3620_v61 = vor.u32 %v4219_v31, %v3617_v32  ;;  %v3612_v10 = vor.u32 %v4217_v24, %v3609_v60  ;;  %v3484_v57 = vor.u32 %v4185_v11, %v3481_v15  ;;  %v4293_v31 = vld [vmem:[%s6510_s1 + $0x864] sm:$0xf]  ;;  %v3913_v32 = vld [vmem:[%s6510_s1 + $0x868] sm:$0xf0] }
  0xf1   :  { %2515 = vmatpush.bf16.msrb.mxu1 %v3580_v2  ;;  %v2144_v26 = vadd.f32 %v2143_v19, %v2125_v20  ;;  %v4201_v19 = vld [vmem:[%s6510_s1 + $0x584] sm:$0xf]  ;;  %v3545_v20 = vld [vmem:[%s6510_s1 + $0x588] sm:$0xf0]  ;;  %v4291_v60 = vld [vmem:[%s6510_s1 + $0x854] sm:$0xf] }
  0xf2   :  { %2534 = vmatpush.bf16.msrb.mxu2 %v3644_v5  ;;  %v3849_v43 = vld [vmem:[%s6510_s1 + $0x7e8] sm:$0xf0]  ;;  %v3905_v11 = vld [vmem:[%s6510_s1 + $0x858] sm:$0xf0]  ;;  %v4259_v15 = vld [vmem:[%s6510_s1 + $0x754] sm:$0xf] }
  0xf3   :  { %2553 = vmatpush.bf16.msrb.mxu3 %v3708_v3  ;;  %v2181_v5 = vpop.f32.mrf.mxu3  ;;  %v2163_v2 = vadd.f32 %v2162_v49, %v2144_v26  ;;  %v3548_v26 = vor.u32 %v4201_v19, %v3545_v20  ;;  %v4261_v49 = vld [vmem:[%s6510_s1 + $0x764] sm:$0xf] }
  0xf4   :  { %2497 = vmatpush.bf16.msrb.mxu0 %v3508_v56 }
  0xf5   :  { %2516 = vmatpush.bf16.msrb.mxu1 %v3572_v8  ;;  %v2146_v23 = vpop.f32.mrf.mxu1  ;;  %v6227_v41 = vadd.f32 %v2181_v5, %v2163_v2  ;;  %2430 = vmatmul.bf16.gmra.mxu0 %v5008_v13  ;;  %v3921_v8 = vld [vmem:[%s6510_s1 + $0x878] sm:$0xf0]  ;;  %v4263_v13 = vld [vmem:[%s6510_s1 + $0x774] sm:$0xf]  ;;  %v3785_v5 = vld [vmem:[%s6510_s1 + $0x768] sm:$0xf0] }
  0xf6   :  { %2535 = vmatpush.bf16.msrb.mxu2 %v3636_v51  ;;  %v2127_v3 = vpop.f32.mrf.mxu0  ;;  %v4233_v51 = vld [vmem:[%s6510_s1 + $0x684] sm:$0xf]  ;;  %2487 = vmatmul.bf16.gmra.mxu3 %v5267_v40  ;;  %v4311_v40 = vld [vmem:[%s6510_s1 + $0x8f4] sm:$0xf] }
  0xf7   :  { %2554 = vmatpush.bf16.msrb.mxu3 %v3700_v9  ;;  %v2128_v4 = vadd.f32 %v2127_v3, %v6082_v12  ;;  %v3556_v12 = vor.u32 %v4203_v47, %v3553_v6  ;;  %2468 = vmatmul.bf16.gmra.mxu2 %v5265_v39  ;;  %v4279_v9 = vld [vmem:[%s6510_s1 + $0x7f4] sm:$0xf]  ;;  %v3857_v39 = vld [vmem:[%s6510_s1 + $0x7f8] sm:$0xf0]  ;;  %v3676_v27 = vor.u32 %v4233_v51, %v3673_v21  ;;  %v4277_v6 = vld [vmem:[%s6510_s1 + $0x7e4] sm:$0xf] }
  0xf8   :  { %2498 = vmatpush.bf16.msrb.mxu0 %v3500_v50  ;;  %2449 = vmatmul.bf16.gmra.mxu1 %v5010_v14  ;;  %v3793_v14 = vld [vmem:[%s6510_s1 + $0x778] sm:$0xf0]  ;;  %v2165_v30 = vpop.f32.mrf.mxu2  ;;  %v3860_v42 = vor.u32 %v4279_v9, %v3857_v39  ;;  %v3988_v47 = vor.u32 %v4311_v40, %v3985_v53  ;;  %v4309_v2 = vld [vmem:[%s6510_s1 + $0x8e4] sm:$0xf]  ;;  %v3977_v3 = vld [vmem:[%s6510_s1 + $0x8e8] sm:$0xf0]  ;;  %v3908_v9 = vor.u32 %v4291_v60, %v3905_v11 }
  0xf9   :  { %2517 = vmatpush.bf16.msrb.mxu1 %v3564_v7  ;;  %v2147_v56 = vadd.f32 %v2146_v23, %v2128_v4  ;;  %v3796_v50 = vor.u32 %v4263_v13, %v3793_v14  ;;  %v3788_v4 = vor.u32 %v4261_v49, %v3785_v5  ;;  %v3841_v51 = vld [vmem:[%s6510_s1 + $0x7d8] sm:$0xf0]  ;;  %v3897_v39 = vld [vmem:[%s6510_s1 + $0x848] sm:$0xf0] }
  0xfa   :  { %2536 = vmatpush.bf16.msrb.mxu2 %v3628_v1  ;;  %v3924_v1 = vor.u32 %v4295_v48, %v3921_v8  ;;  %v3969_v21 = vld [vmem:[%s6510_s1 + $0x8d8] sm:$0xf0] }
  0xfb   :  { %2555 = vmatpush.bf16.msrb.mxu3 %v3692_v33  ;;  %v2184_v0 = vpop.f32.mrf.mxu3  ;;  %v2166_v7 = vadd.f32 %v2165_v30, %v2147_v56  ;;  %v4307_v56 = vld [vmem:[%s6510_s1 + $0x8d4] sm:$0xf]  ;;  %v4273_v30 = vld [vmem:[%s6510_s1 + $0x7c4] sm:$0xf]  ;;  %v3825_v5 = vld [vmem:[%s6510_s1 + $0x7b8] sm:$0xf0] }
  0xfc   :  { %2499 = vmatpush.bf16.msrb.mxu0 %v3492_v52  ;;  %v3980_v52 = vor.u32 %v4309_v2, %v3977_v3 }
  0xfd   :  { %2518 = vmatpush.bf16.msrb.mxu1 %v3556_v12  ;;  %v2148_v36 = vpop.f32.mrf.mxu1  ;;  %v6294_v23 = vadd.f32 %v2184_v0, %v2166_v7  ;;  %v3777_v12 = vld [vmem:[%s6510_s1 + $0x758] sm:$0xf0] }
  0xfe   :  { %2537 = vmatpush.bf16.msrb.mxu2 %v3620_v61  ;;  %v2129_v33 = vpop.f32.mrf.mxu0  ;;  %v3852_v61 = vor.u32 %v4277_v6, %v3849_v43  ;;  %v3889_v7 = vld [vmem:[%s6510_s1 + $0x838] sm:$0xf0]  ;;  %v4303_v6 = vld [vmem:[%s6510_s1 + $0x8b4] sm:$0xf] }
  0xff   :  { %2556 = vmatpush.bf16.msrb.mxu3 %v3684_v16  ;;  %v2130_v59 = vadd.f32 %v2129_v33, %v6115_v44  ;;  %v3916_v44 = vor.u32 %v4293_v31, %v3913_v32  ;;  %v4275_v16 = vld [vmem:[%s6510_s1 + $0x7d4] sm:$0xf]  ;;  %v3961_v31 = vld [vmem:[%s6510_s1 + $0x8c8] sm:$0xf0] }
 0x100   :  { %2500 = vmatpush.bf16.msrb.mxu0 %v3484_v57  ;;  %v2167_v19 = vpop.f32.mrf.mxu2  ;;  %v4289_v57 = vld [vmem:[%s6510_s1 + $0x844] sm:$0xf]  ;;  %v3844_v53 = vor.u32 %v4275_v16, %v3841_v51  ;;  %v4287_v32 = vld [vmem:[%s6510_s1 + $0x834] sm:$0xf] }
 0x101   :  { %2519 = vmatpush.bf16.msrb.mxu1 %v3548_v26  ;;  %v2149_v24 = vadd.f32 %v2148_v36, %v2130_v59  ;;  %v3972_v26 = vor.u32 %v4307_v56, %v3969_v21  ;;  %v3953_v59 = vld [vmem:[%s6510_s1 + $0x8b8] sm:$0xf0]  ;;  %v4269_v16 = vld [vmem:[%s6510_s1 + $0x7a4] sm:$0xf]  ;;  %v3945_v56 = vld [vmem:[%s6510_s1 + $0x8a8] sm:$0xf0] }
 0x102   :  { %2538 = vmatpush.bf16.msrb.mxu2 %v3612_v10  ;;  %v3780_v10 = vor.u32 %v4259_v15, %v3777_v12  ;;  %v3956_v15 = vor.u32 %v4303_v6, %v3953_v59  ;;  %v3753_v12 = vld [vmem:[%s6510_s1 + $0x728] sm:$0xf0]  ;;  %v4301_v51 = vld [vmem:[%s6510_s1 + $0x8a4] sm:$0xf] }
 0x103   :  { %2557 = vmatpush.bf16.msrb.mxu3 %v3676_v27  ;;  %v2186_v20 = vpop.f32.mrf.mxu3  ;;  %v2168_v48 = vadd.f32 %v2167_v19, %v2149_v24  ;;  %v4257_v27 = vld [vmem:[%s6510_s1 + $0x744] sm:$0xf]  ;;  %v3929_v6 = vld [vmem:[%s6510_s1 + $0x888] sm:$0xf0] }
 0x104   :  { %2569 = vmatpush.bf16.msra.mxu0 %v3796_v50  ;;  %v4305_v50 = vld [vmem:[%s6510_s1 + $0x8c4] sm:$0xf] }
 0x105   :  { %2588 = vmatpush.bf16.msra.mxu1 %v3860_v42  ;;  %v2217_v13 = vpop.f32.mrf.mxu1  ;;  %v6327_v40 = vadd.f32 %v2186_v20, %v2168_v48  ;;  %2501 = vmatmul.bf16.vlgmr.msrb.gmra.mxu0 %v5146_v28  ;;  %v3900_v28 = vor.u32 %v4289_v57, %v3897_v39  ;;  %v3964_v36 = vor.u32 %v4305_v50, %v3961_v31  ;;  %v4271_v42 = vld [vmem:[%s6510_s1 + $0x7b4] sm:$0xf]  ;;  %v3817_v20 = vld [vmem:[%s6510_s1 + $0x7a8] sm:$0xf0]  ;;  %v3745_v57 = vld [vmem:[%s6510_s1 + $0x718] sm:$0xf0] }
 0x106   :  { %2607 = vmatpush.bf16.msra.mxu2 %v3924_v1  ;;  %v2198_v8 = vpop.f32.mrf.mxu0  ;;  %v3833_v1 = vld [vmem:[%s6510_s1 + $0x7c8] sm:$0xf0]  ;;  %2558 = vmatmul.bf16.vlgmr.msrb.gmra.mxu3 %v5411_v18  ;;  %v3761_v18 = vld [vmem:[%s6510_s1 + $0x738] sm:$0xf0]  ;;  %v3828_v11 = vor.u32 %v4271_v42, %v3825_v5  ;;  %v4267_v39 = vld [vmem:[%s6510_s1 + $0x794] sm:$0xf] }
 0x107   :  { %2626 = vmatpush.bf16.msra.mxu3 %v3988_v47  ;;  %v2199_v14 = vadd.f32 %v2198_v8, %v6170_v54  ;;  %v3769_v54 = vld [vmem:[%s6510_s1 + $0x748] sm:$0xf0]  ;;  %2539 = vmatmul.bf16.vlgmr.msrb.gmra.mxu2 %v5409_v17  ;;  %v3836_v33 = vor.u32 %v4273_v30, %v3833_v1  ;;  %v4255_v17 = vld [vmem:[%s6510_s1 + $0x734] sm:$0xf]  ;;  %v3937_v30 = vld [vmem:[%s6510_s1 + $0x898] sm:$0xf0] }
 0x108   :  { %2570 = vmatpush.bf16.msra.mxu0 %v3788_v4  ;;  %2520 = vmatmul.bf16.vlgmr.msrb.gmra.mxu1 %v5148_v29  ;;  %v3772_v29 = vor.u32 %v4257_v27, %v3769_v54  ;;  %v2236_v47 = vpop.f32.mrf.mxu2  ;;  %v3764_v4 = vor.u32 %v4255_v17, %v3761_v18  ;;  %v4283_v8 = vld [vmem:[%s6510_s1 + $0x814] sm:$0xf]  ;;  %v3809_v27 = vld [vmem:[%s6510_s1 + $0x798] sm:$0xf0]  ;;  %v3737_v18 = vld [vmem:[%s6510_s1 + $0x708] sm:$0xf0] }
 0x109   :  { %2589 = vmatpush.bf16.msra.mxu1 %v3852_v61  ;;  %v2218_v0 = vadd.f32 %v2217_v13, %v2199_v14  ;;  %v4285_v61 = vld [vmem:[%s6510_s1 + $0x824] sm:$0xf]  ;;  %v3873_v13 = vld [vmem:[%s6510_s1 + $0x818] sm:$0xf0]  ;;  %v3820_v14 = vor.u32 %v4269_v16, %v3817_v20  ;;  %v4299_v54 = vld [vmem:[%s6510_s1 + $0x894] sm:$0xf] }
 0x10a   :  { %2608 = vmatpush.bf16.msra.mxu2 %v3916_v44  ;;  %v3892_v44 = vor.u32 %v4287_v32, %v3889_v7  ;;  %v4281_v32 = vld [vmem:[%s6510_s1 + $0x804] sm:$0xf]  ;;  %v3865_v7 = vld [vmem:[%s6510_s1 + $0x808] sm:$0xf0]  ;;  %v3940_v17 = vor.u32 %v4299_v54, %v3937_v30 }
 0x10b   :  { %2627 = vmatpush.bf16.msra.mxu3 %v3980_v52  ;;  %v2255_v49 = vpop.f32.mrf.mxu3  ;;  %v2237_v43 = vadd.f32 %v2236_v47, %v2218_v0  ;;  %v3881_v52 = vld [vmem:[%s6510_s1 + $0x828] sm:$0xf0]  ;;  %v4265_v42 = vld [vmem:[%s6510_s1 + $0x784] sm:$0xf] }
 0x10c   :  { %2571 = vmatpush.bf16.msra.mxu0 %v3780_v10  ;;  %v3884_v21 = vor.u32 %v4285_v61, %v3881_v52  ;;  %v4251_v10 = vld [vmem:[%s6510_s1 + $0x714] sm:$0xf]  ;;  %v4297_v5 = vld [vmem:[%s6510_s1 + $0x884] sm:$0xf] }
 0x10d   :  { %2590 = vmatpush.bf16.msra.mxu1 %v3844_v53  ;;  %v2219_v3 = vpop.f32.mrf.mxu1  ;;  %v6382_v60 = vadd.f32 %v2255_v49, %v2237_v43  ;;  %v3801_v49 = vld [vmem:[%s6510_s1 + $0x788] sm:$0xf0]  ;;  %v3932_v43 = vor.u32 %v4297_v5, %v3929_v6 }
 0x10e   :  { %2609 = vmatpush.bf16.msra.mxu2 %v3908_v9  ;;  %v2200_v2 = vpop.f32.mrf.mxu0  ;;  %v3948_v9 = vor.u32 %v4301_v51, %v3945_v56  ;;  %v3804_v59 = vor.u32 %v4265_v42, %v3801_v49 }
 0x10f   :  { %2628 = vmatpush.bf16.msra.mxu3 %v3972_v26  ;;  %v2201_v24 = vadd.f32 %v2200_v2, %v6227_v41  ;;  %v4253_v41 = vld [vmem:[%s6510_s1 + $0x724] sm:$0xf] }
 0x110   :  { %2572 = vmatpush.bf16.msra.mxu0 %v3772_v29  ;;  %v3756_v48 = vor.u32 %v4253_v41, %v3753_v12  ;;  %v2238_v53 = vpop.f32.mrf.mxu2  ;;  %v3748_v29 = vor.u32 %v4251_v10, %v3745_v57 }
 0x111   :  { %2591 = vmatpush.bf16.msra.mxu1 %v3836_v33  ;;  %v2220_v19 = vadd.f32 %v2219_v3, %v2201_v24 }
 0x112   :  { %2610 = vmatpush.bf16.msra.mxu2 %v3900_v28  ;;  %v3876_v28 = vor.u32 %v4283_v8, %v3873_v13 }
 0x113   :  { %2629 = vmatpush.bf16.msra.mxu3 %v3964_v36  ;;  %v2257_v26 = vpop.f32.mrf.mxu3  ;;  %v2239_v0 = vadd.f32 %v2238_v53, %v2220_v19  ;;  %v3812_v36 = vor.u32 %v4267_v39, %v3809_v27 }
 0x114   :  { %2573 = vmatpush.bf16.msra.mxu0 %v3764_v4 }
 0x115   :  { %2592 = vmatpush.bf16.msra.mxu1 %v3828_v11  ;;  %v2222_v50 = vpop.f32.mrf.mxu1  ;;  %v2258_v33 = vadd.f32 %v2257_v26, %v2239_v0  ;;  %2506 = vmatmul.bf16.gmra.mxu0 %v5278_v45  ;;  %v3868_v45 = vor.u32 %v4281_v32, %v3865_v7 }
 0x116   :  { %2611 = vmatpush.bf16.msra.mxu2 %v3892_v44  ;;  %v2203_v1 = vpop.f32.mrf.mxu0  ;;  %2563 = vmatmul.bf16.gmra.mxu3 %v5543_v58 }
 0x117   :  { %2630 = vmatpush.bf16.msra.mxu3 %v3956_v15  ;;  %v2204_v31 = vadd.f32 %v2203_v1, %v6294_v23  ;;  %v4249_v23 = vld [vmem:[%s6510_s1 + $0x704] sm:$0xf]  ;;  %2544 = vmatmul.bf16.gmra.mxu2 %v5541_v55 }
 0x118   :  { %2574 = vmatpush.bf16.msra.mxu0 %v3756_v48  ;;  %2525 = vmatmul.bf16.gmra.mxu1 %v5280_v46  ;;  %v3740_v46 = vor.u32 %v4249_v23, %v3737_v18 }
 0x119   :  { %2593 = vmatpush.bf16.msra.mxu1 %v3820_v14  ;;  %v2223_v47 = vadd.f32 %v2222_v50, %v2204_v31 }
 0x11a   :  { %2612 = vmatpush.bf16.msra.mxu2 %v3884_v21  ;;  %v2241_v2 = vpop.f32.mrf.mxu2 }
 0x11b   :  { %2631 = vmatpush.bf16.msra.mxu3 %v3948_v9  ;;  %v2260_v3 = vpop.f32.mrf.mxu3  ;;  %v2242_v24 = vadd.f32 %v2241_v2, %v2223_v47 }
 0x11c   :  { %2575 = vmatpush.bf16.msra.mxu0 %v3748_v29 }
 0x11d   :  { %2594 = vmatpush.bf16.msra.mxu1 %v3812_v36  ;;  %v2224_v4 = vpop.f32.mrf.mxu1  ;;  %v2261_v55 = vadd.f32 %v2260_v3, %v2242_v24 }
 0x11e   :  { %2613 = vmatpush.bf16.msra.mxu2 %v3876_v28  ;;  %v2205_v44 = vpop.f32.mrf.mxu0 }
 0x11f   :  { %2632 = vmatpush.bf16.msra.mxu3 %v3940_v17  ;;  %v2206_v61 = vadd.f32 %v2205_v44, %v6327_v40 }
 0x120   :  { %2576 = vmatpush.bf16.msra.mxu0 %v3740_v46 }
 0x121   :  { %2595 = vmatpush.bf16.msra.mxu1 %v3804_v59  ;;  %v2225_v58 = vadd.f32 %v2224_v4, %v2206_v61 }
 0x122   :  { %2614 = vmatpush.bf16.msra.mxu2 %v3868_v45  ;;  %v2243_v52 = vpop.f32.mrf.mxu2 }
 0x123   :  { %2633 = vmatpush.bf16.msra.mxu3 %v3932_v43  ;;  %v2262_v11 = vpop.f32.mrf.mxu3  ;;  %v2244_v15 = vadd.f32 %v2243_v52, %v2225_v58 }
 0x125   :  { %v2293_v12 = vpop.f32.mrf.mxu1  ;;  %v2263_v19 = vadd.f32 %v2262_v11, %v2244_v15  ;;  %2577 = vmatmul.bf16.vlgmr.msra.gmra.mxu0 %v5422_v22 }
 0x126   :  { %v2274_v41 = vpop.f32.mrf.mxu0  ;;  %2634 = vmatmul.bf16.vlgmr.msra.gmra.mxu3 %v5663_v35 }
 0x127   :  { %v2275_v16 = vadd.f32 %v2274_v41, %v6382_v60  ;;  %2615 = vmatmul.bf16.vlgmr.msra.gmra.mxu2 %v5661_v34 }
 0x128   :  { %2596 = vmatmul.bf16.vlgmr.msra.gmra.mxu1 %v5424_v25 }
 0x129   :  { %v6457_v20 = vadd.f32 %v2293_v12, %v2275_v16 }
 0x12a   :  { %v2312_v40 = vpop.f32.mrf.mxu2 }
 0x12b   :  { %v2331_v51 = vpop.f32.mrf.mxu3 }
 0x12c   :  { %v2332_v56 = vadd.f32 %v2331_v51, %v2312_v40 }
 0x12d   :  { %v2295_v48 = vpop.f32.mrf.mxu1 }
 0x12e   :  { %v2276_v21 = vpop.f32.mrf.mxu0 }
 0x12f   :  { %v2277_v8 = vadd.f32 %v2276_v21, %v2258_v33 }
 0x131   :  { %v6463_v13 = vadd.f32 %v2295_v48, %v2277_v8 }
 0x132   :  { %v2314_v60 = vpop.f32.mrf.mxu2 }
 0x133   :  { %v2333_v14 = vpop.f32.mrf.mxu3 }
 0x134   :  { %v2334_v9 = vadd.f32 %v2333_v14, %v2314_v60 }
 0x135   :  { %v2298_v57 = vpop.f32.mrf.mxu1  ;;  %2582 = vmatmul.bf16.gmra.mxu0 %v5554_v62 }
 0x136   :  { %v2279_v10 = vpop.f32.mrf.mxu0  ;;  %2639 = vmatmul.bf16.gmra.mxu3 %v5781_v38 }
 0x137   :  { %v2280_v22 = vadd.f32 %v2279_v10, %v2261_v55  ;;  %2620 = vmatmul.bf16.gmra.mxu2 %v5779_v37 }
 0x138   :  { %2601 = vmatmul.bf16.gmra.mxu1 %v5556_v63 }
 0x139   :  { %v6465_v39 = vadd.f32 %v2298_v57, %v2280_v22 }
 0x13a   :  { %v2317_v25 = vpop.f32.mrf.mxu2 }
 0x13b   :  { %v2336_v34 = vpop.f32.mrf.mxu3 }
 0x13c   :  { %v2337_v35 = vadd.f32 %v2336_v34, %v2317_v25 }
 0x13d   :  { %v2300_v26 = vpop.f32.mrf.mxu1 }
 0x13e   :  { %v2281_v53 = vpop.f32.mrf.mxu0 }
 0x13f   :  { %v2282_v27 = vadd.f32 %v2281_v53, %v2263_v19 }
 0x141   :  { %v6471_v54 = vadd.f32 %v2300_v26, %v2282_v27 }
 0x142   :  { %v2319_v30 = vpop.f32.mrf.mxu2 }
 0x143   :  { %v2338_v0 = vpop.f32.mrf.mxu3 }
 0x144   :  { %v2339_v1 = vadd.f32 %v2338_v0, %v2319_v30 }
 0x145   :  { %v2369_v31 = vpop.f32.mrf.mxu1 }
 0x146   :  { %v2350_v50 = vpop.f32.mrf.mxu0 }
 0x147   :  { %v2351_v62 = vadd.f32 %v2350_v50, %v2332_v56 }
 0x149   :  { %v2370_v28 = vadd.f32 %v2369_v31, %v2351_v62 }
 0x14a   :  { %v2388_v63 = vpop.f32.mrf.mxu2 }
 0x14b   :  { %v2407_v29 = vpop.f32.mrf.mxu3  ;;  %v2389_v37 = vadd.f32 %v2388_v63, %v2370_v28 }
 0x14d   :  { %v2371_v38 = vpop.f32.mrf.mxu1  ;;  %v2408_v33 = vadd.f32 %v2407_v29, %v2389_v37 }
 0x14e   :  { %v2352_v32 = vpop.f32.mrf.mxu0 }
 0x14f   :  { %v2353_v7 = vadd.f32 %v2352_v32, %v2334_v9 }
 0x151   :  { %v2372_v36 = vadd.f32 %v2371_v38, %v2353_v7 }
 0x152   :  { %v2390_v17 = vpop.f32.mrf.mxu2 }
 0x153   :  { %v2409_v23 = vpop.f32.mrf.mxu3  ;;  %v2391_v18 = vadd.f32 %v2390_v17, %v2372_v36 }
 0x155   :  { %v2374_v47 = vpop.f32.mrf.mxu1  ;;  %v2410_v5 = vadd.f32 %v2409_v23, %v2391_v18 }
 0x156   :  { %v2355_v42 = vpop.f32.mrf.mxu0 }
 0x157   :  { %v2356_v49 = vadd.f32 %v2355_v42, %v2337_v35 }
 0x159   :  { %v2375_v6 = vadd.f32 %v2374_v47, %v2356_v49 }
 0x15a   :  { %v2393_v45 = vpop.f32.mrf.mxu2 }
 0x15b   :  { %v2412_v46 = vpop.f32.mrf.mxu3  ;;  %v2394_v59 = vadd.f32 %v2393_v45, %v2375_v6 }
 0x15d   :  { %v2376_v2 = vpop.f32.mrf.mxu1  ;;  %v2413_v24 = vadd.f32 %v2412_v46, %v2394_v59 }
 0x15e   :  { %v2357_v43 = vpop.f32.mrf.mxu0 }
 0x15f   :  { %v2358_v3 = vadd.f32 %v2357_v43, %v2339_v1 }
 0x161   :  { %v2377_v44 = vadd.f32 %v2376_v2, %v2358_v3 }
 0x162   :  { %v2395_v4 = vpop.f32.mrf.mxu2 }
 0x163   :  { %v2414_v61 = vpop.f32.mrf.mxu3  ;;  %v2396_v55 = vadd.f32 %v2395_v4, %v2377_v44 }
 0x165   :  { %v2445_v52 = vpop.f32.mrf.mxu1  ;;  %v2415_v11 = vadd.f32 %v2414_v61, %v2396_v55 }
 0x166   :  { %v2426_v58 = vpop.f32.mrf.mxu0 }
 0x167   :  { %v2427_v53 = vadd.f32 %v2426_v58, %v2408_v33 }
 0x169   :  { %v2446_v26 = vadd.f32 %v2445_v52, %v2427_v53 }
 0x16a   :  { %v2464_v15 = vpop.f32.mrf.mxu2 }
 0x16b   :  { %v2483_v41 = vpop.f32.mrf.mxu3  ;;  %v2465_v0 = vadd.f32 %v2464_v15, %v2446_v26 }
 0x16d   :  { %v2447_v16 = vpop.f32.mrf.mxu1  ;;  %v2484_v62 = vadd.f32 %v2483_v41, %v2465_v0 }
 0x16e   :  { %v2428_v12 = vpop.f32.mrf.mxu0 }
 0x16f   :  { %v2429_v31 = vadd.f32 %v2428_v12, %v2410_v5  ;;  %v2645_v5 = vld [vmem:[%s6512_s2] sm:$0x3] }
 0x170   :  { %v6478_v44 = vperm.slane %v2645_v5, 0 }
 0x171   :  { %v2448_v28 = vadd.f32 %v2447_v16, %v2429_v31 }
 0x172   :  { %v2466_v19 = vpop.f32.mrf.mxu2  ;;  %v2651_v15 = vmul.f32 %v6478_v44, %v6457_v20 }
 0x173   :  { %v2485_v40 = vpop.f32.mrf.mxu3  ;;  %v2467_v32 = vadd.f32 %v2466_v19, %v2448_v28 }
 0x175   :  { %v2450_v56 = vpop.f32.mrf.mxu1  ;;  %v2486_v23 = vadd.f32 %v2485_v40, %v2467_v32 }
 0x176   :  { %v2431_v51 = vpop.f32.mrf.mxu0 }
 0x177   :  { %v2432_v36 = vadd.f32 %v2431_v51, %v2413_v24  ;;  %v2659_v24 = vld [vmem:[%s6513_s3] sm:$0x3]  ;;  %v2648_v51 = vperm.slane %v2645_v5, 1 }
 0x178   :  { %v6485_v41 = vperm.slane %v2659_v24, 0 }
 0x179   :  { %v2451_v33 = vadd.f32 %v2450_v56, %v2432_v36 }
 0x17a   :  { %v2469_v21 = vpop.f32.mrf.mxu2 }
 0x17b   :  { %v2488_v48 = vpop.f32.mrf.mxu3  ;;  %v2470_v6 = vadd.f32 %v2469_v21, %v2451_v33 }
 0x17d   :  { %v2452_v60 = vpop.f32.mrf.mxu1  ;;  %v2489_v4 = vadd.f32 %v2488_v48, %v2470_v6  ;;  %v2662_v48 = vperm.slane %v2659_v24, 1 }
 0x17e   :  { %v2433_v8 = vpop.f32.mrf.mxu0 }
 0x17f   :  { %v2434_v43 = vadd.f32 %v2433_v8, %v2415_v11 }
 0x181   :  { %v2453_v55 = vadd.f32 %v2452_v60, %v2434_v43  ;;  %v2665_v60 = vadd.f32 %v6485_v41, %v2651_v15 }
 0x182   :  { %v2471_v14 = vpop.f32.mrf.mxu2 }
 0x183   :  { %v6473_v9 = vpop.f32.mrf.mxu3  ;;  %v2472_v16 = vadd.f32 %v2471_v14, %v2453_v55  ;;  %v2653_v14 = vmul.f32 %v6478_v44, %v6463_v13 }
 0x185   :  { %v2521_v57 = vpop.f32.mrf.mxu1 }
 0x186   :  { %v2502_v10 = vpop.f32.mrf.mxu0 }
 0x187   :  { %v2503_v63 = vadd.f32 %v2502_v10, %v2484_v62 }
 0x189   :  { %v2522_v17 = vadd.f32 %v2521_v57, %v2503_v63 }
 0x18a   :  { %v2540_v22 = vpop.f32.mrf.mxu2 }
 0x18b   :  { %v2559_v25 = vpop.f32.mrf.mxu3  ;;  %v2541_v18 = vadd.f32 %v2540_v22, %v2522_v17  ;;  %v2491_v22 = vadd.f32 %v6473_v9, %v2472_v16  ;;  %v2667_v9 = vadd.f32 %v6485_v41, %v2653_v14 }
 0x18d   :  { %v2523_v35 = vpop.f32.mrf.mxu1  ;;  %v2560_v45 = vadd.f32 %v2559_v25, %v2541_v18 }
 0x18e   :  { %v2504_v34 = vpop.f32.mrf.mxu0 }
 0x18f   :  { %v2505_v42 = vadd.f32 %v2504_v34, %v2486_v23  ;;  %v2675_v23 = vmax.f32 %v2667_v9, 0.0 }
 0x191   :  { %v2524_v2 = vadd.f32 %v2523_v35, %v2505_v42 }
 0x192   :  { %v2542_v27 = vpop.f32.mrf.mxu2 }
 0x193   :  { %v2561_v30 = vpop.f32.mrf.mxu3  ;;  %v2543_v61 = vadd.f32 %v2542_v27, %v2524_v2 }
 0x195   :  { %v2526_v50 = vpop.f32.mrf.mxu1  ;;  %v2562_v19 = vadd.f32 %v2561_v30, %v2543_v61  ;;  %v2673_v30 = vmax.f32 %v2665_v60, 0.0 }
 0x196   :  { %v2507_v1 = vpop.f32.mrf.mxu0 }
 0x197   :  { %v2508_v58 = vadd.f32 %v2507_v1, %v2489_v4 }
 0x199   :  { %v2527_v8 = vadd.f32 %v2526_v50, %v2508_v58 }
 0x19a   :  { %v2545_v29 = vpop.f32.mrf.mxu2 }
 0x19b   :  { %v2564_v37 = vpop.f32.mrf.mxu3  ;;  %v2546_v25 = vadd.f32 %v2545_v29, %v2527_v8 }
 0x19d   :  { %v2528_v7 = vpop.f32.mrf.mxu1  ;;  %v2565_v0 = vadd.f32 %v2564_v37, %v2546_v25 }
 0x19e   :  { %v2509_v38 = vpop.f32.mrf.mxu0 }
 0x19f   :  { %v2510_v34 = vadd.f32 %v2509_v38, %v2491_v22 }
 0x1a1   :  { %v2529_v62 = vadd.f32 %v2528_v7, %v2510_v34  ;;  %v2655_v7 = vmul.f32 %v6478_v44, %v6465_v39  ;;  %v2657_v39 = vmul.f32 %v6478_v44, %v6471_v54 }
 0x1a2   :  { %v2547_v47 = vpop.f32.mrf.mxu2 }
 0x1a3   :  { %v2566_v49 = vpop.f32.mrf.mxu3  ;;  %v2548_v38 = vadd.f32 %v2547_v47, %v2529_v62 }
 0x1a5   :  { %v2597_v59 = vpop.f32.mrf.mxu1  ;;  %v2567_v33 = vadd.f32 %v2566_v49, %v2548_v38 }
 0x1a6   :  { %v2578_v46 = vpop.f32.mrf.mxu0 }
 0x1a7   :  { %v2579_v3 = vadd.f32 %v2578_v46, %v2560_v45 }
 0x1a9   :  { %v2598_v52 = vadd.f32 %v2597_v59, %v2579_v3  ;;  %v2669_v59 = vadd.f32 %v6485_v41, %v2655_v7 }
 0x1aa   :  { %v2616_v12 = vpop.f32.mrf.mxu2 }
 0x1ab   :  { %v2635_v11 = vpop.f32.mrf.mxu3  ;;  %v2617_v40 = vadd.f32 %v2616_v12, %v2598_v52  ;;  %v2677_v61 = vmax.f32 %v2669_v59, 0.0  ;;  %v2671_v12 = vadd.f32 %v6485_v41, %v2657_v39 }
 0x1ad   :  { %v2599_v21 = vpop.f32.mrf.mxu1  ;;  %v2636_v10 = vadd.f32 %v2635_v11, %v2617_v40 }
 0x1ae   :  { %v2580_v56 = vpop.f32.mrf.mxu0 }
 0x1af   :  { %v2581_v57 = vadd.f32 %v2580_v56, %v2562_v19  ;;  %v2652_v20 = vmul.f32 %v2648_v51, %v2636_v10  ;;  %v2679_v19 = vmax.f32 %v2671_v12, 0.0 }
 0x1b1   :  { %v2666_v35 = vadd.f32 %v2662_v48, %v2652_v20  ;;  %v2600_v53 = vadd.f32 %v2599_v21, %v2581_v57 }
 0x1b2   :  { %v2618_v26 = vpop.f32.mrf.mxu2 }
 0x1b3   :  { %v2637_v27 = vpop.f32.mrf.mxu3  ;;  %v2674_v1 = vmax.f32 %v2666_v35, 0.0  ;;  %v2619_v50 = vadd.f32 %v2618_v26, %v2600_v53 }
 0x1b5   :  { %v2681_v28 = vpack.c.bf16 %v2674_v1, %v2673_v30  ;;  %v2638_v63 = vadd.f32 %v2637_v27, %v2619_v50  ;;  %v2602_v29 = vpop.f32.mrf.mxu1 }
 0x1b6   :  { %v2583_v31 = vpop.f32.mrf.mxu0 }
 0x1b7   :  { %v2584_v32 = vadd.f32 %v2583_v31, %v2565_v0  ;;  %2685 = vst [vmem:[%s6514_s4] sm:$0xff] %v2681_v28  ;;  %v2654_v13 = vmul.f32 %v2648_v51, %v2638_v63 }
 0x1b9   :  { %v2668_v36 = vadd.f32 %v2662_v48, %v2654_v13  ;;  %v2603_v17 = vadd.f32 %v2602_v29, %v2584_v32 }
 0x1ba   :  { %v2621_v37 = vpop.f32.mrf.mxu2 }
 0x1bb   :  { %v2640_v18 = vpop.f32.mrf.mxu3  ;;  %v2676_v42 = vmax.f32 %v2668_v36, 0.0  ;;  %v2622_v5 = vadd.f32 %v2621_v37, %v2603_v17 }
 0x1bd   :  { %v2682_v45 = vpack.c.bf16 %v2676_v42, %v2675_v23  ;;  %v2641_v46 = vadd.f32 %v2640_v18, %v2622_v5  ;;  %v2604_v2 = vpop.f32.mrf.mxu1 }
 0x1be   :  { %v2585_v6 = vpop.f32.mrf.mxu0 }
 0x1bf   :  { %v2586_v47 = vadd.f32 %v2585_v6, %v2567_v33  ;;  %2686 = vst [vmem:[%s6514_s4 + $0x8] sm:$0xff] %v2682_v45  ;;  %v2656_v43 = vmul.f32 %v2648_v51, %v2641_v46 }
 0x1c1   :  { %v2670_v3 = vadd.f32 %v2662_v48, %v2656_v43  ;;  %v2605_v24 = vadd.f32 %v2604_v2, %v2586_v47 }
 0x1c2   :  { %v2623_v4 = vpop.f32.mrf.mxu2 }
 0x1c3   :  { %v2678_v49 = vmax.f32 %v2670_v3, 0.0  ;;  %v2624_v55 = vadd.f32 %v2623_v4, %v2605_v24  ;;  %v2642_v58 = vpop.f32.mrf.mxu3 }
 0x1c5   :  { %v2683_v52 = vpack.c.bf16 %v2678_v49, %v2677_v61  ;;  %v2643_v15 = vadd.f32 %v2642_v58, %v2624_v55 }
 0x1c7   :  { %2687 = vst [vmem:[%s6514_s4 + $0x10] sm:$0xff] %v2683_v52  ;;  %v2658_v11 = vmul.f32 %v2648_v51, %v2643_v15 }
 0x1c9   :  { %v2672_v16 = vadd.f32 %v2662_v48, %v2658_v11 }
 0x1cb   :  { %v2680_v40 = vmax.f32 %v2672_v16, 0.0 }
 0x1cd   :  { %v2684_v56 = vpack.c.bf16 %v2680_v40, %v2679_v19 }
 0x1cf   :  { %2688 = vst [vmem:[%s6514_s4 + $0x18] sm:$0xff] %v2684_v56 }

</bundles_post_ra>
